<compile_context>
chip_gen: v7x
topology: tpu7x:2x2x1
jax: 0.10.0
libtpu: 0.0.40
codegen_flags: <defaults>
</compile_context>

<pallas_src>
import functools

import numpy as np

import jax
import jax.numpy as jnp
from jax.experimental import pallas as pl
from jax.experimental.pallas import tpu as pltpu


# ----------------------------------------------------------------------------
# The single fused kernel.  Everything is VMEM-resident for the whole body
# (total weights ~4.7 MB bf16, activations at B=2 < 1 MB).
# ----------------------------------------------------------------------------
def _disc_fused_kernel(p1_ref, w1_ref, b1_ref, s2_ref, w2_ref, b2_ref,
                       g2_ref, bb2_ref, wf1_hbm, bf1_ref, gf_ref, bbf_ref,
                       wf2_ref, bf2_ref, o_ref, wf1_vmem, wf1_sem,
                       *, batch, npos2, eps, slope):
    # Kick off the big fc1-weight DMA first so it overlaps conv1/conv2.
    wf1_copy = pltpu.make_async_copy(wf1_hbm, wf1_vmem, wf1_sem)
    wf1_copy.start()

    def lrelu(v):
        return jnp.where(v > 0, v, slope * v)

    # ---- conv1 (input pre-im2col'ed) + bias + LeakyReLU(0.2) ---------------
    y1 = jnp.dot(p1_ref[...], w1_ref[...], preferred_element_type=jnp.float32)
    y1 = lrelu(y1 + b1_ref[...]).astype(jnp.bfloat16)            # (B*npos1, 64)

    # ---- conv2: 16 taps, each a one-hot gather matmul + weight matmul ------
    m2 = batch * npos2
    acc2 = jnp.zeros((m2, 128), jnp.float32)
    for t in range(16):
        tap = jnp.dot(s2_ref[t], y1,                             # (B*npos2, 64)
                      preferred_element_type=jnp.float32)
        acc2 = acc2 + jnp.dot(tap.astype(jnp.bfloat16), w2_ref[t],
                              preferred_element_type=jnp.float32)
    acc2 = acc2 + b2_ref[...]

    # ---- BatchNorm2d (batch stats over all B*H*W rows) + LeakyReLU ---------
    mu = jnp.mean(acc2, axis=0, keepdims=True)
    var = jnp.mean((acc2 - mu) ** 2, axis=0, keepdims=True)      # biased (train BN)
    y2 = g2_ref[...] * ((acc2 - mu) * jax.lax.rsqrt(var + eps)) + bb2_ref[...]
    y2 = lrelu(y2)                                               # (B*npos2, 128) f32

    # ---- fc1, blocked over spatial positions (needs wf1 resident) ----------
    wf1_copy.wait()
    n_hidden = wf1_vmem.shape[2]
    h = jnp.zeros((batch, n_hidden), jnp.float32)
    for p in range(npos2):
        xb = y2[p * batch:(p + 1) * batch, :].astype(jnp.bfloat16)
        h = h + jnp.dot(xb, wf1_vmem[p], preferred_element_type=jnp.float32)
    h = h + bf1_ref[...]

    # ---- BatchNorm1d + LeakyReLU + fc2 + Sigmoid ---------------------------
    mu = jnp.mean(h, axis=0, keepdims=True)
    var = jnp.mean((h - mu) ** 2, axis=0, keepdims=True)
    h = gf_ref[...] * ((h - mu) * jax.lax.rsqrt(var + eps)) + bbf_ref[...]
    h = lrelu(h).astype(jnp.bfloat16)
    out = jnp.dot(h, wf2_ref[...], preferred_element_type=jnp.float32)
    out = out + bf2_ref[...]
    o_ref[...] = jax.nn.sigmoid(out).astype(o_ref.dtype)


def _fused_forward(p1, sel2, params, *, batch, npos2, eps=1e-5, slope=0.2):
    vmem = pl.BlockSpec(memory_space=pltpu.MemorySpace.VMEM)
    in_specs = [vmem] * 14
    in_specs[8] = pl.BlockSpec(memory_space=pl.ANY)   # wf1 stays in HBM; manual DMA
    kernel = functools.partial(_disc_fused_kernel, batch=batch, npos2=npos2,
                               eps=eps, slope=slope)
    n_out = params["wf2"].shape[1]
    return pl.pallas_call(
        kernel,
        out_shape=jax.ShapeDtypeStruct((batch, n_out), jnp.float32),
        in_specs=in_specs,
        out_specs=vmem,
        scratch_shapes=[
            pltpu.VMEM(params["wf1"].shape, params["wf1"].dtype),  # wf1 landing buf
            pltpu.SemaphoreType.DMA,
        ],
        compiler_params=pltpu.CompilerParams(vmem_limit_bytes=32 * 1024 * 1024),
    )(p1, params["w1"], params["b1"], sel2, params["w2"], params["b2"],
      params["bn2_g"], params["bn2_b"], params["wf1"], params["bf1"],
      params["bnf_g"], params["bnf_b"], params["wf2"], params["bf2"])


# ----------------------------------------------------------------------------
# Host-side helpers (run at trace time / fused by XLA under jit).
# ----------------------------------------------------------------------------
def im2col_nhwc(x, k, stride, pad):
    # Column order is (kh, kw, c), matching the w1 re-layout in init_params.
    B, H, W, C = x.shape
    xp = jnp.pad(x, ((0, 0), (pad, pad), (pad, pad), (0, 0)))
    OH = (H + 2 * pad - k) // stride + 1
    OW = (W + 2 * pad - k) // stride + 1
    taps = []
    for i in range(k):
        for j in range(k):
            taps.append(xp[:, i:i + stride * OH:stride, j:j + stride * OW:stride, :])
    p = jnp.stack(taps, axis=3)                       # [B, OH, OW, k*k, C]
    return p.reshape(B * OH * OW, k * k * C), OH, OW


def _conv2_selection(batch, oh1, ow1, oh2, ow2, dtype=jnp.bfloat16):
    # S[t, r2, r1] = 1 iff y2 row r2 (spatial-major, batch-minor) takes tap
    # t=(i,j) from y1 row r1 (batch-major); 0 where the tap hits zero padding.
    npos1 = oh1 * ow1
    npos2 = oh2 * ow2
    sel = np.zeros((16, npos2 * batch, npos1 * batch), np.float32)
    for oh in range(oh2):
        for ow in range(ow2):
            p2 = oh * ow2 + ow
            for i in range(4):
                for j in range(4):
                    ih = 2 * oh - 1 + i
                    iw = 2 * ow - 1 + j
                    if 0 <= ih < oh1 and 0 <= iw < ow1:
                        t = i * 4 + j
                        p1 = ih * ow1 + iw
                        for b in range(batch):
                            sel[t, p2 * batch + b, b * npos1 + p1] = 1.0
    return jnp.asarray(sel, dtype=dtype)


# ----------------------------------------------------------------------------
# Parameter init (matches utils.initialize_weights: conv/linear ~ N(0, 0.02),
# BN gamma ~ N(1, 0.02), biases 0), re-laid-out for the fused kernel.
# ----------------------------------------------------------------------------
def init_params(key, input_dim, class_num, input_size, output_dim,
                mxu_dtype=jnp.bfloat16):
    cin = input_dim + class_num
    cin_pad = ((cin + 7) // 8) * 8
    s4 = input_size // 4
    npos2 = s4 * s4
    ks = jax.random.split(key, 6)

    # PyTorch-shaped parameters
    w1 = 0.02 * jax.random.normal(ks[0], (64, cin, 4, 4), jnp.float32)
    w2 = 0.02 * jax.random.normal(ks[1], (128, 64, 4, 4), jnp.float32)
    wf1 = 0.02 * jax.random.normal(ks[2], (1024, 128 * npos2), jnp.float32)
    wf2 = 0.02 * jax.random.normal(ks[3], (output_dim, 1024), jnp.float32)
    bn2_g = 1.0 + 0.02 * jax.random.normal(ks[4], (128,), jnp.float32)
    bnf_g = 1.0 + 0.02 * jax.random.normal(ks[5], (1024,), jnp.float32)

    # conv1: pad Cin -> cin_pad (zero cols), rows ordered (kh, kw, c); Cout=64.
    w1p = jnp.pad(w1, ((0, 0), (0, cin_pad - cin), (0, 0), (0, 0)))
    w1p = w1p.transpose(2, 3, 1, 0).reshape(16 * cin_pad, 64).astype(mxu_dtype)
    b1p = jnp.zeros((1, 64), jnp.float32)

    # conv2: per-tap weight blocks (t=(kh,kw), cin, cout).
    w2p = w2.transpose(2, 3, 1, 0).reshape(16, 64, 128).astype(mxu_dtype)
    b2p = jnp.zeros((1, 128), jnp.float32)

    # fc1: wf1p[p, c, d] = wf1_torch[d, c*npos2 + p]  (PyTorch NCHW flatten).
    wf1p = wf1.reshape(1024, 128, npos2).transpose(2, 1, 0).astype(mxu_dtype)
    bf1 = jnp.zeros((1, 1024), jnp.float32)

    # fc2: pad the single output column to 128 for a lane-dense store.
    n_pad = 128
    wf2p = jnp.zeros((1024, n_pad), jnp.float32).at[:, :output_dim].set(wf2.T)
    wf2p = wf2p.astype(mxu_dtype)
    bf2 = jnp.zeros((1, n_pad), jnp.float32)

    return {
        "w1": w1p, "b1": b1p,
        "w2": w2p, "b2": b2p,
        "bn2_g": bn2_g.reshape(1, 128), "bn2_b": jnp.zeros((1, 128), jnp.float32),
        "wf1": wf1p, "bf1": bf1,
        "bnf_g": bnf_g.reshape(1, 1024), "bnf_b": jnp.zeros((1, 1024), jnp.float32),
        "wf2": wf2p, "bf2": bf2,
    }


# ----------------------------------------------------------------------------
# Forward (mirrors discriminator.forward), fully jitted, ONE pallas_call.
# ----------------------------------------------------------------------------
@functools.partial(jax.jit, static_argnames=("output_dim",))
def discriminator_forward(params, z, label, *, output_dim=1):
    B = z.shape[0]
    input_size = z.shape[2]
    # torch.cat([z, label], 1) in NCHW, then channels-last + bf16 + pad Cin.
    x = jnp.concatenate([z, label], axis=1)
    x = x.transpose(0, 2, 3, 1).astype(jnp.bfloat16)            # NHWC
    cin_pad = params["w1"].shape[0] // 16
    x = jnp.pad(x, ((0, 0), (0, 0), (0, 0), (0, cin_pad - x.shape[-1])))

    # conv1 im2col (4,2,1) — cheap XLA glue fused under jit.
    p1, oh1, ow1 = im2col_nhwc(x, 4, 2, 1)                       # (B*oh1*ow1, 16*cin_pad)

    s4 = input_size // 4
    sel2 = _conv2_selection(B, oh1, ow1, s4, s4)                 # trace-time constant

    out = _fused_forward(p1, sel2, params, batch=B, npos2=s4 * s4)  # (B, 128) f32
    return out[:, :output_dim]


if __name__ == "__main__":
    input_dim, output_dim, input_size, class_num = 1, 1, 16, 10
    B = 2

    key = jax.random.PRNGKey(0)
    kp, kz, kl = jax.random.split(key, 3)
    params = init_params(kp, input_dim, class_num, input_size, output_dim)

    z = jax.random.normal(kz, (B, input_dim, input_size, input_size), jnp.float32)
    # one-hot class labels broadcast over the spatial map (CGAN convention)
    cls = jax.random.randint(kl, (B,), 0, class_num)
    label = jnp.broadcast_to(
        jax.nn.one_hot(cls, class_num, dtype=jnp.float32)[:, :, None, None],
        (B, class_num, input_size, input_size))

    out = discriminator_forward(params, z, label, output_dim=output_dim)
    out = jax.block_until_ready(out)
    assert out.shape == (B, output_dim), out.shape
    assert bool(jnp.all(jnp.isfinite(out)))
    assert bool(jnp.all((out >= 0.0) & (out <= 1.0)))
    print("KERNEL_OK")
</pallas_src>

<mosaic_0001>
module attributes {stable_mosaic.version = 11 : i64} {
  func.func @_disc_fused_kernel(%arg0: memref<128x256xbf16, #tpu.memory_space<vmem>>, %arg1: memref<256x64xbf16, #tpu.memory_space<vmem>>, %arg2: memref<1x64xf32, #tpu.memory_space<vmem>>, %arg3: memref<16x32x128xbf16, #tpu.memory_space<vmem>>, %arg4: memref<16x64x128xbf16, #tpu.memory_space<vmem>>, %arg5: memref<1x128xf32, #tpu.memory_space<vmem>>, %arg6: memref<1x128xf32, #tpu.memory_space<vmem>>, %arg7: memref<1x128xf32, #tpu.memory_space<vmem>>, %arg8: memref<16x128x1024xbf16, #tpu.memory_space<any>>, %arg9: memref<1x1024xf32, #tpu.memory_space<vmem>>, %arg10: memref<1x1024xf32, #tpu.memory_space<vmem>>, %arg11: memref<1x1024xf32, #tpu.memory_space<vmem>>, %arg12: memref<1024x128xbf16, #tpu.memory_space<vmem>>, %arg13: memref<1x128xf32, #tpu.memory_space<vmem>>, %arg14: memref<2x128xf32, #tpu.memory_space<vmem>>, %arg15: memref<16x128x1024xbf16, #tpu.memory_space<vmem>>, %arg16: memref<!tpu.dma_semaphore, #tpu.memory_space<semaphore_mem>>) attributes {dimension_semantics = [], scalar_prefetch = 0 : i64, scratch_operands = 2 : i64, tpu.core_type = #tpu.core_type<tc>} {
    tpu.enqueue_dma source(%arg8 : memref<16x128x1024xbf16, #tpu.memory_space<any>>) target(%arg15 : memref<16x128x1024xbf16, #tpu.memory_space<vmem>>) target_semaphore(%arg16 : memref<!tpu.dma_semaphore, #tpu.memory_space<semaphore_mem>>)
    %c0 = arith.constant 0 : index
    %c0_0 = arith.constant 0 : index
    %0 = vector.load %arg0[%c0, %c0_0] : memref<128x256xbf16, #tpu.memory_space<vmem>>, vector<128x256xbf16>
    %c0_1 = arith.constant 0 : index
    %c0_2 = arith.constant 0 : index
    %1 = vector.load %arg1[%c0_1, %c0_2] : memref<256x64xbf16, #tpu.memory_space<vmem>>, vector<256x64xbf16>
    %cst = arith.constant dense<0.000000e+00> : vector<128x64xf32>
    %2 = tpu.matmul %0, %1, %cst {dimension_numbers = #tpu.dot_dimension_numbers<[1], [0], [0], [1], [0, 0, 1, 1], [], []>} : vector<128x256xbf16>, vector<256x64xbf16>, vector<128x64xf32> -> vector<128x64xf32>
    %c0_3 = arith.constant 0 : index
    %c0_4 = arith.constant 0 : index
    %3 = vector.load %arg2[%c0_3, %c0_4] : memref<1x64xf32, #tpu.memory_space<vmem>>, vector<1x64xf32>
    %4 = vector.broadcast %3 : vector<1x64xf32> to vector<128x64xf32>
    %5 = arith.addf %2, %4 : vector<128x64xf32>
    %cst_5 = arith.constant 0.000000e+00 : f32
    %6 = vector.broadcast %cst_5 : f32 to vector<128x64xf32>
    %7 = arith.cmpf ogt, %5, %6 : vector<128x64xf32>
    %cst_6 = arith.constant 2.000000e-01 : f32
    %8 = vector.broadcast %cst_6 : f32 to vector<128x64xf32>
    %9 = arith.mulf %8, %5 : vector<128x64xf32>
    %10 = arith.select %7, %5, %9 : vector<128x64xi1>, vector<128x64xf32>
    %11 = arith.truncf %10 : vector<128x64xf32> to vector<128x64xbf16>
    %cst_7 = arith.constant 0.000000e+00 : f32
    %12 = vector.broadcast %cst_7 : f32 to vector<32x128xf32>
    %c0_8 = arith.constant 0 : index
    %c0_9 = arith.constant 0 : index
    %c0_10 = arith.constant 0 : index
    %13 = vector.load %arg3[%c0_8, %c0_9, %c0_10] : memref<16x32x128xbf16, #tpu.memory_space<vmem>>, vector<1x32x128xbf16>
    %14 = vector.shape_cast %13 : vector<1x32x128xbf16> to vector<32x128xbf16>
    %cst_11 = arith.constant dense<0.000000e+00> : vector<32x64xf32>
    %15 = tpu.matmul %14, %11, %cst_11 {dimension_numbers = #tpu.dot_dimension_numbers<[1], [0], [0], [1], [0, 0, 1, 1], [], []>} : vector<32x128xbf16>, vector<128x64xbf16>, vector<32x64xf32> -> vector<32x64xf32>
    %16 = arith.truncf %15 : vector<32x64xf32> to vector<32x64xbf16>
    %c0_12 = arith.constant 0 : index
    %c0_13 = arith.constant 0 : index
    %c0_14 = arith.constant 0 : index
    %17 = vector.load %arg4[%c0_12, %c0_13, %c0_14] : memref<16x64x128xbf16, #tpu.memory_space<vmem>>, vector<1x64x128xbf16>
    %18 = vector.shape_cast %17 : vector<1x64x128xbf16> to vector<64x128xbf16>
    %cst_15 = arith.constant dense<0.000000e+00> : vector<32x128xf32>
    %19 = tpu.matmul %16, %18, %cst_15 {dimension_numbers = #tpu.dot_dimension_numbers<[1], [0], [0], [1], [0, 0, 1, 1], [], []>} : vector<32x64xbf16>, vector<64x128xbf16>, vector<32x128xf32> -> vector<32x128xf32>
    %20 = arith.addf %12, %19 : vector<32x128xf32>
    %c1 = arith.constant 1 : index
    %c0_16 = arith.constant 0 : index
    %c0_17 = arith.constant 0 : index
    %21 = vector.load %arg3[%c1, %c0_16, %c0_17] : memref<16x32x128xbf16, #tpu.memory_space<vmem>>, vector<1x32x128xbf16>
    %22 = vector.shape_cast %21 : vector<1x32x128xbf16> to vector<32x128xbf16>
    %cst_18 = arith.constant dense<0.000000e+00> : vector<32x64xf32>
    %23 = tpu.matmul %22, %11, %cst_18 {dimension_numbers = #tpu.dot_dimension_numbers<[1], [0], [0], [1], [0, 0, 1, 1], [], []>} : vector<32x128xbf16>, vector<128x64xbf16>, vector<32x64xf32> -> vector<32x64xf32>
    %24 = arith.truncf %23 : vector<32x64xf32> to vector<32x64xbf16>
    %c1_19 = arith.constant 1 : index
    %c0_20 = arith.constant 0 : index
    %c0_21 = arith.constant 0 : index
    %25 = vector.load %arg4[%c1_19, %c0_20, %c0_21] : memref<16x64x128xbf16, #tpu.memory_space<vmem>>, vector<1x64x128xbf16>
    %26 = vector.shape_cast %25 : vector<1x64x128xbf16> to vector<64x128xbf16>
    %cst_22 = arith.constant dense<0.000000e+00> : vector<32x128xf32>
    %27 = tpu.matmul %24, %26, %cst_22 {dimension_numbers = #tpu.dot_dimension_numbers<[1], [0], [0], [1], [0, 0, 1, 1], [], []>} : vector<32x64xbf16>, vector<64x128xbf16>, vector<32x128xf32> -> vector<32x128xf32>
    %28 = arith.addf %20, %27 : vector<32x128xf32>
    %c2 = arith.constant 2 : index
    %c0_23 = arith.constant 0 : index
    %c0_24 = arith.constant 0 : index
    %29 = vector.load %arg3[%c2, %c0_23, %c0_24] : memref<16x32x128xbf16, #tpu.memory_space<vmem>>, vector<1x32x128xbf16>
    %30 = vector.shape_cast %29 : vector<1x32x128xbf16> to vector<32x128xbf16>
    %cst_25 = arith.constant dense<0.000000e+00> : vector<32x64xf32>
    %31 = tpu.matmul %30, %11, %cst_25 {dimension_numbers = #tpu.dot_dimension_numbers<[1], [0], [0], [1], [0, 0, 1, 1], [], []>} : vector<32x128xbf16>, vector<128x64xbf16>, vector<32x64xf32> -> vector<32x64xf32>
    %32 = arith.truncf %31 : vector<32x64xf32> to vector<32x64xbf16>
    %c2_26 = arith.constant 2 : index
    %c0_27 = arith.constant 0 : index
    %c0_28 = arith.constant 0 : index
    %33 = vector.load %arg4[%c2_26, %c0_27, %c0_28] : memref<16x64x128xbf16, #tpu.memory_space<vmem>>, vector<1x64x128xbf16>
    %34 = vector.shape_cast %33 : vector<1x64x128xbf16> to vector<64x128xbf16>
    %cst_29 = arith.constant dense<0.000000e+00> : vector<32x128xf32>
    %35 = tpu.matmul %32, %34, %cst_29 {dimension_numbers = #tpu.dot_dimension_numbers<[1], [0], [0], [1], [0, 0, 1, 1], [], []>} : vector<32x64xbf16>, vector<64x128xbf16>, vector<32x128xf32> -> vector<32x128xf32>
    %36 = arith.addf %28, %35 : vector<32x128xf32>
    %c3 = arith.constant 3 : index
    %c0_30 = arith.constant 0 : index
    %c0_31 = arith.constant 0 : index
    %37 = vector.load %arg3[%c3, %c0_30, %c0_31] : memref<16x32x128xbf16, #tpu.memory_space<vmem>>, vector<1x32x128xbf16>
    %38 = vector.shape_cast %37 : vector<1x32x128xbf16> to vector<32x128xbf16>
    %cst_32 = arith.constant dense<0.000000e+00> : vector<32x64xf32>
    %39 = tpu.matmul %38, %11, %cst_32 {dimension_numbers = #tpu.dot_dimension_numbers<[1], [0], [0], [1], [0, 0, 1, 1], [], []>} : vector<32x128xbf16>, vector<128x64xbf16>, vector<32x64xf32> -> vector<32x64xf32>
    %40 = arith.truncf %39 : vector<32x64xf32> to vector<32x64xbf16>
    %c3_33 = arith.constant 3 : index
    %c0_34 = arith.constant 0 : index
    %c0_35 = arith.constant 0 : index
    %41 = vector.load %arg4[%c3_33, %c0_34, %c0_35] : memref<16x64x128xbf16, #tpu.memory_space<vmem>>, vector<1x64x128xbf16>
    %42 = vector.shape_cast %41 : vector<1x64x128xbf16> to vector<64x128xbf16>
    %cst_36 = arith.constant dense<0.000000e+00> : vector<32x128xf32>
    %43 = tpu.matmul %40, %42, %cst_36 {dimension_numbers = #tpu.dot_dimension_numbers<[1], [0], [0], [1], [0, 0, 1, 1], [], []>} : vector<32x64xbf16>, vector<64x128xbf16>, vector<32x128xf32> -> vector<32x128xf32>
    %44 = arith.addf %36, %43 : vector<32x128xf32>
    %c4 = arith.constant 4 : index
    %c0_37 = arith.constant 0 : index
    %c0_38 = arith.constant 0 : index
    %45 = vector.load %arg3[%c4, %c0_37, %c0_38] : memref<16x32x128xbf16, #tpu.memory_space<vmem>>, vector<1x32x128xbf16>
    %46 = vector.shape_cast %45 : vector<1x32x128xbf16> to vector<32x128xbf16>
    %cst_39 = arith.constant dense<0.000000e+00> : vector<32x64xf32>
    %47 = tpu.matmul %46, %11, %cst_39 {dimension_numbers = #tpu.dot_dimension_numbers<[1], [0], [0], [1], [0, 0, 1, 1], [], []>} : vector<32x128xbf16>, vector<128x64xbf16>, vector<32x64xf32> -> vector<32x64xf32>
    %48 = arith.truncf %47 : vector<32x64xf32> to vector<32x64xbf16>
    %c4_40 = arith.constant 4 : index
    %c0_41 = arith.constant 0 : index
    %c0_42 = arith.constant 0 : index
    %49 = vector.load %arg4[%c4_40, %c0_41, %c0_42] : memref<16x64x128xbf16, #tpu.memory_space<vmem>>, vector<1x64x128xbf16>
    %50 = vector.shape_cast %49 : vector<1x64x128xbf16> to vector<64x128xbf16>
    %cst_43 = arith.constant dense<0.000000e+00> : vector<32x128xf32>
    %51 = tpu.matmul %48, %50, %cst_43 {dimension_numbers = #tpu.dot_dimension_numbers<[1], [0], [0], [1], [0, 0, 1, 1], [], []>} : vector<32x64xbf16>, vector<64x128xbf16>, vector<32x128xf32> -> vector<32x128xf32>
    %52 = arith.addf %44, %51 : vector<32x128xf32>
    %c5 = arith.constant 5 : index
    %c0_44 = arith.constant 0 : index
    %c0_45 = arith.constant 0 : index
    %53 = vector.load %arg3[%c5, %c0_44, %c0_45] : memref<16x32x128xbf16, #tpu.memory_space<vmem>>, vector<1x32x128xbf16>
    %54 = vector.shape_cast %53 : vector<1x32x128xbf16> to vector<32x128xbf16>
    %cst_46 = arith.constant dense<0.000000e+00> : vector<32x64xf32>
    %55 = tpu.matmul %54, %11, %cst_46 {dimension_numbers = #tpu.dot_dimension_numbers<[1], [0], [0], [1], [0, 0, 1, 1], [], []>} : vector<32x128xbf16>, vector<128x64xbf16>, vector<32x64xf32> -> vector<32x64xf32>
    %56 = arith.truncf %55 : vector<32x64xf32> to vector<32x64xbf16>
    %c5_47 = arith.constant 5 : index
    %c0_48 = arith.constant 0 : index
    %c0_49 = arith.constant 0 : index
    %57 = vector.load %arg4[%c5_47, %c0_48, %c0_49] : memref<16x64x128xbf16, #tpu.memory_space<vmem>>, vector<1x64x128xbf16>
    %58 = vector.shape_cast %57 : vector<1x64x128xbf16> to vector<64x128xbf16>
    %cst_50 = arith.constant dense<0.000000e+00> : vector<32x128xf32>
    %59 = tpu.matmul %56, %58, %cst_50 {dimension_numbers = #tpu.dot_dimension_numbers<[1], [0], [0], [1], [0, 0, 1, 1], [], []>} : vector<32x64xbf16>, vector<64x128xbf16>, vector<32x128xf32> -> vector<32x128xf32>
    %60 = arith.addf %52, %59 : vector<32x128xf32>
    %c6 = arith.constant 6 : index
    %c0_51 = arith.constant 0 : index
    %c0_52 = arith.constant 0 : index
    %61 = vector.load %arg3[%c6, %c0_51, %c0_52] : memref<16x32x128xbf16, #tpu.memory_space<vmem>>, vector<1x32x128xbf16>
    %62 = vector.shape_cast %61 : vector<1x32x128xbf16> to vector<32x128xbf16>
    %cst_53 = arith.constant dense<0.000000e+00> : vector<32x64xf32>
    %63 = tpu.matmul %62, %11, %cst_53 {dimension_numbers = #tpu.dot_dimension_numbers<[1], [0], [0], [1], [0, 0, 1, 1], [], []>} : vector<32x128xbf16>, vector<128x64xbf16>, vector<32x64xf32> -> vector<32x64xf32>
    %64 = arith.truncf %63 : vector<32x64xf32> to vector<32x64xbf16>
    %c6_54 = arith.constant 6 : index
    %c0_55 = arith.constant 0 : index
    %c0_56 = arith.constant 0 : index
    %65 = vector.load %arg4[%c6_54, %c0_55, %c0_56] : memref<16x64x128xbf16, #tpu.memory_space<vmem>>, vector<1x64x128xbf16>
    %66 = vector.shape_cast %65 : vector<1x64x128xbf16> to vector<64x128xbf16>
    %cst_57 = arith.constant dense<0.000000e+00> : vector<32x128xf32>
    %67 = tpu.matmul %64, %66, %cst_57 {dimension_numbers = #tpu.dot_dimension_numbers<[1], [0], [0], [1], [0, 0, 1, 1], [], []>} : vector<32x64xbf16>, vector<64x128xbf16>, vector<32x128xf32> -> vector<32x128xf32>
    %68 = arith.addf %60, %67 : vector<32x128xf32>
    %c7 = arith.constant 7 : index
    %c0_58 = arith.constant 0 : index
    %c0_59 = arith.constant 0 : index
    %69 = vector.load %arg3[%c7, %c0_58, %c0_59] : memref<16x32x128xbf16, #tpu.memory_space<vmem>>, vector<1x32x128xbf16>
    %70 = vector.shape_cast %69 : vector<1x32x128xbf16> to vector<32x128xbf16>
    %cst_60 = arith.constant dense<0.000000e+00> : vector<32x64xf32>
    %71 = tpu.matmul %70, %11, %cst_60 {dimension_numbers = #tpu.dot_dimension_numbers<[1], [0], [0], [1], [0, 0, 1, 1], [], []>} : vector<32x128xbf16>, vector<128x64xbf16>, vector<32x64xf32> -> vector<32x64xf32>
    %72 = arith.truncf %71 : vector<32x64xf32> to vector<32x64xbf16>
    %c7_61 = arith.constant 7 : index
    %c0_62 = arith.constant 0 : index
    %c0_63 = arith.constant 0 : index
    %73 = vector.load %arg4[%c7_61, %c0_62, %c0_63] : memref<16x64x128xbf16, #tpu.memory_space<vmem>>, vector<1x64x128xbf16>
    %74 = vector.shape_cast %73 : vector<1x64x128xbf16> to vector<64x128xbf16>
    %cst_64 = arith.constant dense<0.000000e+00> : vector<32x128xf32>
    %75 = tpu.matmul %72, %74, %cst_64 {dimension_numbers = #tpu.dot_dimension_numbers<[1], [0], [0], [1], [0, 0, 1, 1], [], []>} : vector<32x64xbf16>, vector<64x128xbf16>, vector<32x128xf32> -> vector<32x128xf32>
    %76 = arith.addf %68, %75 : vector<32x128xf32>
    %c8 = arith.constant 8 : index
    %c0_65 = arith.constant 0 : index
    %c0_66 = arith.constant 0 : index
    %77 = vector.load %arg3[%c8, %c0_65, %c0_66] : memref<16x32x128xbf16, #tpu.memory_space<vmem>>, vector<1x32x128xbf16>
    %78 = vector.shape_cast %77 : vector<1x32x128xbf16> to vector<32x128xbf16>
    %cst_67 = arith.constant dense<0.000000e+00> : vector<32x64xf32>
    %79 = tpu.matmul %78, %11, %cst_67 {dimension_numbers = #tpu.dot_dimension_numbers<[1], [0], [0], [1], [0, 0, 1, 1], [], []>} : vector<32x128xbf16>, vector<128x64xbf16>, vector<32x64xf32> -> vector<32x64xf32>
    %80 = arith.truncf %79 : vector<32x64xf32> to vector<32x64xbf16>
    %c8_68 = arith.constant 8 : index
    %c0_69 = arith.constant 0 : index
    %c0_70 = arith.constant 0 : index
    %81 = vector.load %arg4[%c8_68, %c0_69, %c0_70] : memref<16x64x128xbf16, #tpu.memory_space<vmem>>, vector<1x64x128xbf16>
    %82 = vector.shape_cast %81 : vector<1x64x128xbf16> to vector<64x128xbf16>
    %cst_71 = arith.constant dense<0.000000e+00> : vector<32x128xf32>
    %83 = tpu.matmul %80, %82, %cst_71 {dimension_numbers = #tpu.dot_dimension_numbers<[1], [0], [0], [1], [0, 0, 1, 1], [], []>} : vector<32x64xbf16>, vector<64x128xbf16>, vector<32x128xf32> -> vector<32x128xf32>
    %84 = arith.addf %76, %83 : vector<32x128xf32>
    %c9 = arith.constant 9 : index
    %c0_72 = arith.constant 0 : index
    %c0_73 = arith.constant 0 : index
    %85 = vector.load %arg3[%c9, %c0_72, %c0_73] : memref<16x32x128xbf16, #tpu.memory_space<vmem>>, vector<1x32x128xbf16>
    %86 = vector.shape_cast %85 : vector<1x32x128xbf16> to vector<32x128xbf16>
    %cst_74 = arith.constant dense<0.000000e+00> : vector<32x64xf32>
    %87 = tpu.matmul %86, %11, %cst_74 {dimension_numbers = #tpu.dot_dimension_numbers<[1], [0], [0], [1], [0, 0, 1, 1], [], []>} : vector<32x128xbf16>, vector<128x64xbf16>, vector<32x64xf32> -> vector<32x64xf32>
    %88 = arith.truncf %87 : vector<32x64xf32> to vector<32x64xbf16>
    %c9_75 = arith.constant 9 : index
    %c0_76 = arith.constant 0 : index
    %c0_77 = arith.constant 0 : index
    %89 = vector.load %arg4[%c9_75, %c0_76, %c0_77] : memref<16x64x128xbf16, #tpu.memory_space<vmem>>, vector<1x64x128xbf16>
    %90 = vector.shape_cast %89 : vector<1x64x128xbf16> to vector<64x128xbf16>
    %cst_78 = arith.constant dense<0.000000e+00> : vector<32x128xf32>
    %91 = tpu.matmul %88, %90, %cst_78 {dimension_numbers = #tpu.dot_dimension_numbers<[1], [0], [0], [1], [0, 0, 1, 1], [], []>} : vector<32x64xbf16>, vector<64x128xbf16>, vector<32x128xf32> -> vector<32x128xf32>
    %92 = arith.addf %84, %91 : vector<32x128xf32>
    %c10 = arith.constant 10 : index
    %c0_79 = arith.constant 0 : index
    %c0_80 = arith.constant 0 : index
    %93 = vector.load %arg3[%c10, %c0_79, %c0_80] : memref<16x32x128xbf16, #tpu.memory_space<vmem>>, vector<1x32x128xbf16>
    %94 = vector.shape_cast %93 : vector<1x32x128xbf16> to vector<32x128xbf16>
    %cst_81 = arith.constant dense<0.000000e+00> : vector<32x64xf32>
    %95 = tpu.matmul %94, %11, %cst_81 {dimension_numbers = #tpu.dot_dimension_numbers<[1], [0], [0], [1], [0, 0, 1, 1], [], []>} : vector<32x128xbf16>, vector<128x64xbf16>, vector<32x64xf32> -> vector<32x64xf32>
    %96 = arith.truncf %95 : vector<32x64xf32> to vector<32x64xbf16>
    %c10_82 = arith.constant 10 : index
    %c0_83 = arith.constant 0 : index
    %c0_84 = arith.constant 0 : index
    %97 = vector.load %arg4[%c10_82, %c0_83, %c0_84] : memref<16x64x128xbf16, #tpu.memory_space<vmem>>, vector<1x64x128xbf16>
    %98 = vector.shape_cast %97 : vector<1x64x128xbf16> to vector<64x128xbf16>
    %cst_85 = arith.constant dense<0.000000e+00> : vector<32x128xf32>
    %99 = tpu.matmul %96, %98, %cst_85 {dimension_numbers = #tpu.dot_dimension_numbers<[1], [0], [0], [1], [0, 0, 1, 1], [], []>} : vector<32x64xbf16>, vector<64x128xbf16>, vector<32x128xf32> -> vector<32x128xf32>
    %100 = arith.addf %92, %99 : vector<32x128xf32>
    %c11 = arith.constant 11 : index
    %c0_86 = arith.constant 0 : index
    %c0_87 = arith.constant 0 : index
    %101 = vector.load %arg3[%c11, %c0_86, %c0_87] : memref<16x32x128xbf16, #tpu.memory_space<vmem>>, vector<1x32x128xbf16>
    %102 = vector.shape_cast %101 : vector<1x32x128xbf16> to vector<32x128xbf16>
    %cst_88 = arith.constant dense<0.000000e+00> : vector<32x64xf32>
    %103 = tpu.matmul %102, %11, %cst_88 {dimension_numbers = #tpu.dot_dimension_numbers<[1], [0], [0], [1], [0, 0, 1, 1], [], []>} : vector<32x128xbf16>, vector<128x64xbf16>, vector<32x64xf32> -> vector<32x64xf32>
    %104 = arith.truncf %103 : vector<32x64xf32> to vector<32x64xbf16>
    %c11_89 = arith.constant 11 : index
    %c0_90 = arith.constant 0 : index
    %c0_91 = arith.constant 0 : index
    %105 = vector.load %arg4[%c11_89, %c0_90, %c0_91] : memref<16x64x128xbf16, #tpu.memory_space<vmem>>, vector<1x64x128xbf16>
    %106 = vector.shape_cast %105 : vector<1x64x128xbf16> to vector<64x128xbf16>
    %cst_92 = arith.constant dense<0.000000e+00> : vector<32x128xf32>
    %107 = tpu.matmul %104, %106, %cst_92 {dimension_numbers = #tpu.dot_dimension_numbers<[1], [0], [0], [1], [0, 0, 1, 1], [], []>} : vector<32x64xbf16>, vector<64x128xbf16>, vector<32x128xf32> -> vector<32x128xf32>
    %108 = arith.addf %100, %107 : vector<32x128xf32>
    %c12 = arith.constant 12 : index
    %c0_93 = arith.constant 0 : index
    %c0_94 = arith.constant 0 : index
    %109 = vector.load %arg3[%c12, %c0_93, %c0_94] : memref<16x32x128xbf16, #tpu.memory_space<vmem>>, vector<1x32x128xbf16>
    %110 = vector.shape_cast %109 : vector<1x32x128xbf16> to vector<32x128xbf16>
    %cst_95 = arith.constant dense<0.000000e+00> : vector<32x64xf32>
    %111 = tpu.matmul %110, %11, %cst_95 {dimension_numbers = #tpu.dot_dimension_numbers<[1], [0], [0], [1], [0, 0, 1, 1], [], []>} : vector<32x128xbf16>, vector<128x64xbf16>, vector<32x64xf32> -> vector<32x64xf32>
    %112 = arith.truncf %111 : vector<32x64xf32> to vector<32x64xbf16>
    %c12_96 = arith.constant 12 : index
    %c0_97 = arith.constant 0 : index
    %c0_98 = arith.constant 0 : index
    %113 = vector.load %arg4[%c12_96, %c0_97, %c0_98] : memref<16x64x128xbf16, #tpu.memory_space<vmem>>, vector<1x64x128xbf16>
    %114 = vector.shape_cast %113 : vector<1x64x128xbf16> to vector<64x128xbf16>
    %cst_99 = arith.constant dense<0.000000e+00> : vector<32x128xf32>
    %115 = tpu.matmul %112, %114, %cst_99 {dimension_numbers = #tpu.dot_dimension_numbers<[1], [0], [0], [1], [0, 0, 1, 1], [], []>} : vector<32x64xbf16>, vector<64x128xbf16>, vector<32x128xf32> -> vector<32x128xf32>
    %116 = arith.addf %108, %115 : vector<32x128xf32>
    %c13 = arith.constant 13 : index
    %c0_100 = arith.constant 0 : index
    %c0_101 = arith.constant 0 : index
    %117 = vector.load %arg3[%c13, %c0_100, %c0_101] : memref<16x32x128xbf16, #tpu.memory_space<vmem>>, vector<1x32x128xbf16>
    %118 = vector.shape_cast %117 : vector<1x32x128xbf16> to vector<32x128xbf16>
    %cst_102 = arith.constant dense<0.000000e+00> : vector<32x64xf32>
    %119 = tpu.matmul %118, %11, %cst_102 {dimension_numbers = #tpu.dot_dimension_numbers<[1], [0], [0], [1], [0, 0, 1, 1], [], []>} : vector<32x128xbf16>, vector<128x64xbf16>, vector<32x64xf32> -> vector<32x64xf32>
    %120 = arith.truncf %119 : vector<32x64xf32> to vector<32x64xbf16>
    %c13_103 = arith.constant 13 : index
    %c0_104 = arith.constant 0 : index
    %c0_105 = arith.constant 0 : index
    %121 = vector.load %arg4[%c13_103, %c0_104, %c0_105] : memref<16x64x128xbf16, #tpu.memory_space<vmem>>, vector<1x64x128xbf16>
    %122 = vector.shape_cast %121 : vector<1x64x128xbf16> to vector<64x128xbf16>
    %cst_106 = arith.constant dense<0.000000e+00> : vector<32x128xf32>
    %123 = tpu.matmul %120, %122, %cst_106 {dimension_numbers = #tpu.dot_dimension_numbers<[1], [0], [0], [1], [0, 0, 1, 1], [], []>} : vector<32x64xbf16>, vector<64x128xbf16>, vector<32x128xf32> -> vector<32x128xf32>
    %124 = arith.addf %116, %123 : vector<32x128xf32>
    %c14 = arith.constant 14 : index
    %c0_107 = arith.constant 0 : index
    %c0_108 = arith.constant 0 : index
    %125 = vector.load %arg3[%c14, %c0_107, %c0_108] : memref<16x32x128xbf16, #tpu.memory_space<vmem>>, vector<1x32x128xbf16>
    %126 = vector.shape_cast %125 : vector<1x32x128xbf16> to vector<32x128xbf16>
    %cst_109 = arith.constant dense<0.000000e+00> : vector<32x64xf32>
    %127 = tpu.matmul %126, %11, %cst_109 {dimension_numbers = #tpu.dot_dimension_numbers<[1], [0], [0], [1], [0, 0, 1, 1], [], []>} : vector<32x128xbf16>, vector<128x64xbf16>, vector<32x64xf32> -> vector<32x64xf32>
    %128 = arith.truncf %127 : vector<32x64xf32> to vector<32x64xbf16>
    %c14_110 = arith.constant 14 : index
    %c0_111 = arith.constant 0 : index
    %c0_112 = arith.constant 0 : index
    %129 = vector.load %arg4[%c14_110, %c0_111, %c0_112] : memref<16x64x128xbf16, #tpu.memory_space<vmem>>, vector<1x64x128xbf16>
    %130 = vector.shape_cast %129 : vector<1x64x128xbf16> to vector<64x128xbf16>
    %cst_113 = arith.constant dense<0.000000e+00> : vector<32x128xf32>
    %131 = tpu.matmul %128, %130, %cst_113 {dimension_numbers = #tpu.dot_dimension_numbers<[1], [0], [0], [1], [0, 0, 1, 1], [], []>} : vector<32x64xbf16>, vector<64x128xbf16>, vector<32x128xf32> -> vector<32x128xf32>
    %132 = arith.addf %124, %131 : vector<32x128xf32>
    %c15 = arith.constant 15 : index
    %c0_114 = arith.constant 0 : index
    %c0_115 = arith.constant 0 : index
    %133 = vector.load %arg3[%c15, %c0_114, %c0_115] : memref<16x32x128xbf16, #tpu.memory_space<vmem>>, vector<1x32x128xbf16>
    %134 = vector.shape_cast %133 : vector<1x32x128xbf16> to vector<32x128xbf16>
    %cst_116 = arith.constant dense<0.000000e+00> : vector<32x64xf32>
    %135 = tpu.matmul %134, %11, %cst_116 {dimension_numbers = #tpu.dot_dimension_numbers<[1], [0], [0], [1], [0, 0, 1, 1], [], []>} : vector<32x128xbf16>, vector<128x64xbf16>, vector<32x64xf32> -> vector<32x64xf32>
    %136 = arith.truncf %135 : vector<32x64xf32> to vector<32x64xbf16>
    %c15_117 = arith.constant 15 : index
    %c0_118 = arith.constant 0 : index
    %c0_119 = arith.constant 0 : index
    %137 = vector.load %arg4[%c15_117, %c0_118, %c0_119] : memref<16x64x128xbf16, #tpu.memory_space<vmem>>, vector<1x64x128xbf16>
    %138 = vector.shape_cast %137 : vector<1x64x128xbf16> to vector<64x128xbf16>
    %cst_120 = arith.constant dense<0.000000e+00> : vector<32x128xf32>
    %139 = tpu.matmul %136, %138, %cst_120 {dimension_numbers = #tpu.dot_dimension_numbers<[1], [0], [0], [1], [0, 0, 1, 1], [], []>} : vector<32x64xbf16>, vector<64x128xbf16>, vector<32x128xf32> -> vector<32x128xf32>
    %140 = arith.addf %132, %139 : vector<32x128xf32>
    %c0_121 = arith.constant 0 : index
    %c0_122 = arith.constant 0 : index
    %141 = vector.load %arg5[%c0_121, %c0_122] : memref<1x128xf32, #tpu.memory_space<vmem>>, vector<1x128xf32>
    %142 = vector.broadcast %141 : vector<1x128xf32> to vector<32x128xf32>
    %143 = arith.addf %140, %142 : vector<32x128xf32>
    %cst_123 = arith.constant dense<0.000000e+00> : vector<128xf32>
    %144 = vector.multi_reduction <add>, %143, %cst_123 [0] : vector<32x128xf32> to vector<128xf32>
    %145 = vector.shape_cast %144 : vector<128xf32> to vector<1x128xf32>
    %cst_124 = arith.constant 3.200000e+01 : f32
    %146 = vector.broadcast %cst_124 : f32 to vector<1x128xf32>
    %147 = arith.divf %145, %146 : vector<1x128xf32>
    %148 = vector.broadcast %147 : vector<1x128xf32> to vector<32x128xf32>
    %149 = arith.subf %143, %148 : vector<32x128xf32>
    %150 = arith.mulf %149, %149 : vector<32x128xf32>
    %cst_125 = arith.constant dense<0.000000e+00> : vector<128xf32>
    %151 = vector.multi_reduction <add>, %150, %cst_125 [0] : vector<32x128xf32> to vector<128xf32>
    %152 = vector.shape_cast %151 : vector<128xf32> to vector<1x128xf32>
    %cst_126 = arith.constant 3.200000e+01 : f32
    %153 = vector.broadcast %cst_126 : f32 to vector<1x128xf32>
    %154 = arith.divf %152, %153 : vector<1x128xf32>
    %c0_127 = arith.constant 0 : index
    %c0_128 = arith.constant 0 : index
    %155 = vector.load %arg6[%c0_127, %c0_128] : memref<1x128xf32, #tpu.memory_space<vmem>>, vector<1x128xf32>
    %156 = vector.broadcast %147 : vector<1x128xf32> to vector<32x128xf32>
    %157 = arith.subf %143, %156 : vector<32x128xf32>
    %cst_129 = arith.constant 9.99999974E-6 : f32
    %158 = vector.broadcast %cst_129 : f32 to vector<1x128xf32>
    %159 = arith.addf %154, %158 : vector<1x128xf32>
    %160 = math.rsqrt %159 : vector<1x128xf32>
    %161 = vector.broadcast %160 : vector<1x128xf32> to vector<32x128xf32>
    %162 = arith.mulf %157, %161 : vector<32x128xf32>
    %163 = vector.broadcast %155 : vector<1x128xf32> to vector<32x128xf32>
    %164 = arith.mulf %163, %162 : vector<32x128xf32>
    %c0_130 = arith.constant 0 : index
    %c0_131 = arith.constant 0 : index
    %165 = vector.load %arg7[%c0_130, %c0_131] : memref<1x128xf32, #tpu.memory_space<vmem>>, vector<1x128xf32>
    %166 = vector.broadcast %165 : vector<1x128xf32> to vector<32x128xf32>
    %167 = arith.addf %164, %166 : vector<32x128xf32>
    %cst_132 = arith.constant 0.000000e+00 : f32
    %168 = vector.broadcast %cst_132 : f32 to vector<32x128xf32>
    %169 = arith.cmpf ogt, %167, %168 : vector<32x128xf32>
    %cst_133 = arith.constant 2.000000e-01 : f32
    %170 = vector.broadcast %cst_133 : f32 to vector<32x128xf32>
    %171 = arith.mulf %170, %167 : vector<32x128xf32>
    %172 = arith.select %169, %167, %171 : vector<32x128xi1>, vector<32x128xf32>
    tpu.wait_dma2 semaphore(%arg16 : memref<!tpu.dma_semaphore, #tpu.memory_space<semaphore_mem>>) src(%arg8 : memref<16x128x1024xbf16, #tpu.memory_space<any>>) dst(%arg15 : memref<16x128x1024xbf16, #tpu.memory_space<vmem>>)
    %cst_134 = arith.constant 0.000000e+00 : f32
    %173 = vector.broadcast %cst_134 : f32 to vector<2x1024xf32>
    %174 = vector.extract_strided_slice %172 {offsets = [0, 0], sizes = [2, 128], strides = [1, 1]} : vector<32x128xf32> to vector<2x128xf32>
    %175 = arith.truncf %174 : vector<2x128xf32> to vector<2x128xbf16>
    %c0_135 = arith.constant 0 : index
    %c0_136 = arith.constant 0 : index
    %c0_137 = arith.constant 0 : index
    %176 = vector.load %arg15[%c0_135, %c0_136, %c0_137] : memref<16x128x1024xbf16, #tpu.memory_space<vmem>>, vector<1x128x1024xbf16>
    %177 = vector.shape_cast %176 : vector<1x128x1024xbf16> to vector<128x1024xbf16>
    %cst_138 = arith.constant dense<0.000000e+00> : vector<2x1024xf32>
    %178 = tpu.matmul %175, %177, %cst_138 {dimension_numbers = #tpu.dot_dimension_numbers<[1], [0], [0], [1], [0, 0, 1, 1], [], []>} : vector<2x128xbf16>, vector<128x1024xbf16>, vector<2x1024xf32> -> vector<2x1024xf32>
    %179 = arith.addf %173, %178 : vector<2x1024xf32>
    %180 = vector.extract_strided_slice %172 {offsets = [2, 0], sizes = [2, 128], strides = [1, 1]} : vector<32x128xf32> to vector<2x128xf32>
    %181 = arith.truncf %180 : vector<2x128xf32> to vector<2x128xbf16>
    %c1_139 = arith.constant 1 : index
    %c0_140 = arith.constant 0 : index
    %c0_141 = arith.constant 0 : index
    %182 = vector.load %arg15[%c1_139, %c0_140, %c0_141] : memref<16x128x1024xbf16, #tpu.memory_space<vmem>>, vector<1x128x1024xbf16>
    %183 = vector.shape_cast %182 : vector<1x128x1024xbf16> to vector<128x1024xbf16>
    %cst_142 = arith.constant dense<0.000000e+00> : vector<2x1024xf32>
    %184 = tpu.matmul %181, %183, %cst_142 {dimension_numbers = #tpu.dot_dimension_numbers<[1], [0], [0], [1], [0, 0, 1, 1], [], []>} : vector<2x128xbf16>, vector<128x1024xbf16>, vector<2x1024xf32> -> vector<2x1024xf32>
    %185 = arith.addf %179, %184 : vector<2x1024xf32>
    %186 = vector.extract_strided_slice %172 {offsets = [4, 0], sizes = [2, 128], strides = [1, 1]} : vector<32x128xf32> to vector<2x128xf32>
    %187 = arith.truncf %186 : vector<2x128xf32> to vector<2x128xbf16>
    %c2_143 = arith.constant 2 : index
    %c0_144 = arith.constant 0 : index
    %c0_145 = arith.constant 0 : index
    %188 = vector.load %arg15[%c2_143, %c0_144, %c0_145] : memref<16x128x1024xbf16, #tpu.memory_space<vmem>>, vector<1x128x1024xbf16>
    %189 = vector.shape_cast %188 : vector<1x128x1024xbf16> to vector<128x1024xbf16>
    %cst_146 = arith.constant dense<0.000000e+00> : vector<2x1024xf32>
    %190 = tpu.matmul %187, %189, %cst_146 {dimension_numbers = #tpu.dot_dimension_numbers<[1], [0], [0], [1], [0, 0, 1, 1], [], []>} : vector<2x128xbf16>, vector<128x1024xbf16>, vector<2x1024xf32> -> vector<2x1024xf32>
    %191 = arith.addf %185, %190 : vector<2x1024xf32>
    %192 = vector.extract_strided_slice %172 {offsets = [6, 0], sizes = [2, 128], strides = [1, 1]} : vector<32x128xf32> to vector<2x128xf32>
    %193 = arith.truncf %192 : vector<2x128xf32> to vector<2x128xbf16>
    %c3_147 = arith.constant 3 : index
    %c0_148 = arith.constant 0 : index
    %c0_149 = arith.constant 0 : index
    %194 = vector.load %arg15[%c3_147, %c0_148, %c0_149] : memref<16x128x1024xbf16, #tpu.memory_space<vmem>>, vector<1x128x1024xbf16>
    %195 = vector.shape_cast %194 : vector<1x128x1024xbf16> to vector<128x1024xbf16>
    %cst_150 = arith.constant dense<0.000000e+00> : vector<2x1024xf32>
    %196 = tpu.matmul %193, %195, %cst_150 {dimension_numbers = #tpu.dot_dimension_numbers<[1], [0], [0], [1], [0, 0, 1, 1], [], []>} : vector<2x128xbf16>, vector<128x1024xbf16>, vector<2x1024xf32> -> vector<2x1024xf32>
    %197 = arith.addf %191, %196 : vector<2x1024xf32>
    %198 = vector.extract_strided_slice %172 {offsets = [8, 0], sizes = [2, 128], strides = [1, 1]} : vector<32x128xf32> to vector<2x128xf32>
    %199 = arith.truncf %198 : vector<2x128xf32> to vector<2x128xbf16>
    %c4_151 = arith.constant 4 : index
    %c0_152 = arith.constant 0 : index
    %c0_153 = arith.constant 0 : index
    %200 = vector.load %arg15[%c4_151, %c0_152, %c0_153] : memref<16x128x1024xbf16, #tpu.memory_space<vmem>>, vector<1x128x1024xbf16>
    %201 = vector.shape_cast %200 : vector<1x128x1024xbf16> to vector<128x1024xbf16>
    %cst_154 = arith.constant dense<0.000000e+00> : vector<2x1024xf32>
    %202 = tpu.matmul %199, %201, %cst_154 {dimension_numbers = #tpu.dot_dimension_numbers<[1], [0], [0], [1], [0, 0, 1, 1], [], []>} : vector<2x128xbf16>, vector<128x1024xbf16>, vector<2x1024xf32> -> vector<2x1024xf32>
    %203 = arith.addf %197, %202 : vector<2x1024xf32>
    %204 = vector.extract_strided_slice %172 {offsets = [10, 0], sizes = [2, 128], strides = [1, 1]} : vector<32x128xf32> to vector<2x128xf32>
    %205 = arith.truncf %204 : vector<2x128xf32> to vector<2x128xbf16>
    %c5_155 = arith.constant 5 : index
    %c0_156 = arith.constant 0 : index
    %c0_157 = arith.constant 0 : index
    %206 = vector.load %arg15[%c5_155, %c0_156, %c0_157] : memref<16x128x1024xbf16, #tpu.memory_space<vmem>>, vector<1x128x1024xbf16>
    %207 = vector.shape_cast %206 : vector<1x128x1024xbf16> to vector<128x1024xbf16>
    %cst_158 = arith.constant dense<0.000000e+00> : vector<2x1024xf32>
    %208 = tpu.matmul %205, %207, %cst_158 {dimension_numbers = #tpu.dot_dimension_numbers<[1], [0], [0], [1], [0, 0, 1, 1], [], []>} : vector<2x128xbf16>, vector<128x1024xbf16>, vector<2x1024xf32> -> vector<2x1024xf32>
    %209 = arith.addf %203, %208 : vector<2x1024xf32>
    %210 = vector.extract_strided_slice %172 {offsets = [12, 0], sizes = [2, 128], strides = [1, 1]} : vector<32x128xf32> to vector<2x128xf32>
    %211 = arith.truncf %210 : vector<2x128xf32> to vector<2x128xbf16>
    %c6_159 = arith.constant 6 : index
    %c0_160 = arith.constant 0 : index
    %c0_161 = arith.constant 0 : index
    %212 = vector.load %arg15[%c6_159, %c0_160, %c0_161] : memref<16x128x1024xbf16, #tpu.memory_space<vmem>>, vector<1x128x1024xbf16>
    %213 = vector.shape_cast %212 : vector<1x128x1024xbf16> to vector<128x1024xbf16>
    %cst_162 = arith.constant dense<0.000000e+00> : vector<2x1024xf32>
    %214 = tpu.matmul %211, %213, %cst_162 {dimension_numbers = #tpu.dot_dimension_numbers<[1], [0], [0], [1], [0, 0, 1, 1], [], []>} : vector<2x128xbf16>, vector<128x1024xbf16>, vector<2x1024xf32> -> vector<2x1024xf32>
    %215 = arith.addf %209, %214 : vector<2x1024xf32>
    %216 = vector.extract_strided_slice %172 {offsets = [14, 0], sizes = [2, 128], strides = [1, 1]} : vector<32x128xf32> to vector<2x128xf32>
    %217 = arith.truncf %216 : vector<2x128xf32> to vector<2x128xbf16>
    %c7_163 = arith.constant 7 : index
    %c0_164 = arith.constant 0 : index
    %c0_165 = arith.constant 0 : index
    %218 = vector.load %arg15[%c7_163, %c0_164, %c0_165] : memref<16x128x1024xbf16, #tpu.memory_space<vmem>>, vector<1x128x1024xbf16>
    %219 = vector.shape_cast %218 : vector<1x128x1024xbf16> to vector<128x1024xbf16>
    %cst_166 = arith.constant dense<0.000000e+00> : vector<2x1024xf32>
    %220 = tpu.matmul %217, %219, %cst_166 {dimension_numbers = #tpu.dot_dimension_numbers<[1], [0], [0], [1], [0, 0, 1, 1], [], []>} : vector<2x128xbf16>, vector<128x1024xbf16>, vector<2x1024xf32> -> vector<2x1024xf32>
    %221 = arith.addf %215, %220 : vector<2x1024xf32>
    %222 = vector.extract_strided_slice %172 {offsets = [16, 0], sizes = [2, 128], strides = [1, 1]} : vector<32x128xf32> to vector<2x128xf32>
    %223 = arith.truncf %222 : vector<2x128xf32> to vector<2x128xbf16>
    %c8_167 = arith.constant 8 : index
    %c0_168 = arith.constant 0 : index
    %c0_169 = arith.constant 0 : index
    %224 = vector.load %arg15[%c8_167, %c0_168, %c0_169] : memref<16x128x1024xbf16, #tpu.memory_space<vmem>>, vector<1x128x1024xbf16>
    %225 = vector.shape_cast %224 : vector<1x128x1024xbf16> to vector<128x1024xbf16>
    %cst_170 = arith.constant dense<0.000000e+00> : vector<2x1024xf32>
    %226 = tpu.matmul %223, %225, %cst_170 {dimension_numbers = #tpu.dot_dimension_numbers<[1], [0], [0], [1], [0, 0, 1, 1], [], []>} : vector<2x128xbf16>, vector<128x1024xbf16>, vector<2x1024xf32> -> vector<2x1024xf32>
    %227 = arith.addf %221, %226 : vector<2x1024xf32>
    %228 = vector.extract_strided_slice %172 {offsets = [18, 0], sizes = [2, 128], strides = [1, 1]} : vector<32x128xf32> to vector<2x128xf32>
    %229 = arith.truncf %228 : vector<2x128xf32> to vector<2x128xbf16>
    %c9_171 = arith.constant 9 : index
    %c0_172 = arith.constant 0 : index
    %c0_173 = arith.constant 0 : index
    %230 = vector.load %arg15[%c9_171, %c0_172, %c0_173] : memref<16x128x1024xbf16, #tpu.memory_space<vmem>>, vector<1x128x1024xbf16>
    %231 = vector.shape_cast %230 : vector<1x128x1024xbf16> to vector<128x1024xbf16>
    %cst_174 = arith.constant dense<0.000000e+00> : vector<2x1024xf32>
    %232 = tpu.matmul %229, %231, %cst_174 {dimension_numbers = #tpu.dot_dimension_numbers<[1], [0], [0], [1], [0, 0, 1, 1], [], []>} : vector<2x128xbf16>, vector<128x1024xbf16>, vector<2x1024xf32> -> vector<2x1024xf32>
    %233 = arith.addf %227, %232 : vector<2x1024xf32>
    %234 = vector.extract_strided_slice %172 {offsets = [20, 0], sizes = [2, 128], strides = [1, 1]} : vector<32x128xf32> to vector<2x128xf32>
    %235 = arith.truncf %234 : vector<2x128xf32> to vector<2x128xbf16>
    %c10_175 = arith.constant 10 : index
    %c0_176 = arith.constant 0 : index
    %c0_177 = arith.constant 0 : index
    %236 = vector.load %arg15[%c10_175, %c0_176, %c0_177] : memref<16x128x1024xbf16, #tpu.memory_space<vmem>>, vector<1x128x1024xbf16>
    %237 = vector.shape_cast %236 : vector<1x128x1024xbf16> to vector<128x1024xbf16>
    %cst_178 = arith.constant dense<0.000000e+00> : vector<2x1024xf32>
    %238 = tpu.matmul %235, %237, %cst_178 {dimension_numbers = #tpu.dot_dimension_numbers<[1], [0], [0], [1], [0, 0, 1, 1], [], []>} : vector<2x128xbf16>, vector<128x1024xbf16>, vector<2x1024xf32> -> vector<2x1024xf32>
    %239 = arith.addf %233, %238 : vector<2x1024xf32>
    %240 = vector.extract_strided_slice %172 {offsets = [22, 0], sizes = [2, 128], strides = [1, 1]} : vector<32x128xf32> to vector<2x128xf32>
    %241 = arith.truncf %240 : vector<2x128xf32> to vector<2x128xbf16>
    %c11_179 = arith.constant 11 : index
    %c0_180 = arith.constant 0 : index
    %c0_181 = arith.constant 0 : index
    %242 = vector.load %arg15[%c11_179, %c0_180, %c0_181] : memref<16x128x1024xbf16, #tpu.memory_space<vmem>>, vector<1x128x1024xbf16>
    %243 = vector.shape_cast %242 : vector<1x128x1024xbf16> to vector<128x1024xbf16>
    %cst_182 = arith.constant dense<0.000000e+00> : vector<2x1024xf32>
    %244 = tpu.matmul %241, %243, %cst_182 {dimension_numbers = #tpu.dot_dimension_numbers<[1], [0], [0], [1], [0, 0, 1, 1], [], []>} : vector<2x128xbf16>, vector<128x1024xbf16>, vector<2x1024xf32> -> vector<2x1024xf32>
    %245 = arith.addf %239, %244 : vector<2x1024xf32>
    %246 = vector.extract_strided_slice %172 {offsets = [24, 0], sizes = [2, 128], strides = [1, 1]} : vector<32x128xf32> to vector<2x128xf32>
    %247 = arith.truncf %246 : vector<2x128xf32> to vector<2x128xbf16>
    %c12_183 = arith.constant 12 : index
    %c0_184 = arith.constant 0 : index
    %c0_185 = arith.constant 0 : index
    %248 = vector.load %arg15[%c12_183, %c0_184, %c0_185] : memref<16x128x1024xbf16, #tpu.memory_space<vmem>>, vector<1x128x1024xbf16>
    %249 = vector.shape_cast %248 : vector<1x128x1024xbf16> to vector<128x1024xbf16>
    %cst_186 = arith.constant dense<0.000000e+00> : vector<2x1024xf32>
    %250 = tpu.matmul %247, %249, %cst_186 {dimension_numbers = #tpu.dot_dimension_numbers<[1], [0], [0], [1], [0, 0, 1, 1], [], []>} : vector<2x128xbf16>, vector<128x1024xbf16>, vector<2x1024xf32> -> vector<2x1024xf32>
    %251 = arith.addf %245, %250 : vector<2x1024xf32>
    %252 = vector.extract_strided_slice %172 {offsets = [26, 0], sizes = [2, 128], strides = [1, 1]} : vector<32x128xf32> to vector<2x128xf32>
    %253 = arith.truncf %252 : vector<2x128xf32> to vector<2x128xbf16>
    %c13_187 = arith.constant 13 : index
    %c0_188 = arith.constant 0 : index
    %c0_189 = arith.constant 0 : index
    %254 = vector.load %arg15[%c13_187, %c0_188, %c0_189] : memref<16x128x1024xbf16, #tpu.memory_space<vmem>>, vector<1x128x1024xbf16>
    %255 = vector.shape_cast %254 : vector<1x128x1024xbf16> to vector<128x1024xbf16>
    %cst_190 = arith.constant dense<0.000000e+00> : vector<2x1024xf32>
    %256 = tpu.matmul %253, %255, %cst_190 {dimension_numbers = #tpu.dot_dimension_numbers<[1], [0], [0], [1], [0, 0, 1, 1], [], []>} : vector<2x128xbf16>, vector<128x1024xbf16>, vector<2x1024xf32> -> vector<2x1024xf32>
    %257 = arith.addf %251, %256 : vector<2x1024xf32>
    %258 = vector.extract_strided_slice %172 {offsets = [28, 0], sizes = [2, 128], strides = [1, 1]} : vector<32x128xf32> to vector<2x128xf32>
    %259 = arith.truncf %258 : vector<2x128xf32> to vector<2x128xbf16>
    %c14_191 = arith.constant 14 : index
    %c0_192 = arith.constant 0 : index
    %c0_193 = arith.constant 0 : index
    %260 = vector.load %arg15[%c14_191, %c0_192, %c0_193] : memref<16x128x1024xbf16, #tpu.memory_space<vmem>>, vector<1x128x1024xbf16>
    %261 = vector.shape_cast %260 : vector<1x128x1024xbf16> to vector<128x1024xbf16>
    %cst_194 = arith.constant dense<0.000000e+00> : vector<2x1024xf32>
    %262 = tpu.matmul %259, %261, %cst_194 {dimension_numbers = #tpu.dot_dimension_numbers<[1], [0], [0], [1], [0, 0, 1, 1], [], []>} : vector<2x128xbf16>, vector<128x1024xbf16>, vector<2x1024xf32> -> vector<2x1024xf32>
    %263 = arith.addf %257, %262 : vector<2x1024xf32>
    %264 = vector.extract_strided_slice %172 {offsets = [30, 0], sizes = [2, 128], strides = [1, 1]} : vector<32x128xf32> to vector<2x128xf32>
    %265 = arith.truncf %264 : vector<2x128xf32> to vector<2x128xbf16>
    %c15_195 = arith.constant 15 : index
    %c0_196 = arith.constant 0 : index
    %c0_197 = arith.constant 0 : index
    %266 = vector.load %arg15[%c15_195, %c0_196, %c0_197] : memref<16x128x1024xbf16, #tpu.memory_space<vmem>>, vector<1x128x1024xbf16>
    %267 = vector.shape_cast %266 : vector<1x128x1024xbf16> to vector<128x1024xbf16>
    %cst_198 = arith.constant dense<0.000000e+00> : vector<2x1024xf32>
    %268 = tpu.matmul %265, %267, %cst_198 {dimension_numbers = #tpu.dot_dimension_numbers<[1], [0], [0], [1], [0, 0, 1, 1], [], []>} : vector<2x128xbf16>, vector<128x1024xbf16>, vector<2x1024xf32> -> vector<2x1024xf32>
    %269 = arith.addf %263, %268 : vector<2x1024xf32>
    %c0_199 = arith.constant 0 : index
    %c0_200 = arith.constant 0 : index
    %270 = vector.load %arg9[%c0_199, %c0_200] : memref<1x1024xf32, #tpu.memory_space<vmem>>, vector<1x1024xf32>
    %271 = vector.broadcast %270 : vector<1x1024xf32> to vector<2x1024xf32>
    %272 = arith.addf %269, %271 : vector<2x1024xf32>
    %cst_201 = arith.constant dense<0.000000e+00> : vector<1024xf32>
    %273 = vector.multi_reduction <add>, %272, %cst_201 [0] : vector<2x1024xf32> to vector<1024xf32>
    %274 = vector.shape_cast %273 : vector<1024xf32> to vector<1x1024xf32>
    %cst_202 = arith.constant 2.000000e+00 : f32
    %275 = vector.broadcast %cst_202 : f32 to vector<1x1024xf32>
    %276 = arith.divf %274, %275 : vector<1x1024xf32>
    %277 = vector.broadcast %276 : vector<1x1024xf32> to vector<2x1024xf32>
    %278 = arith.subf %272, %277 : vector<2x1024xf32>
    %279 = arith.mulf %278, %278 : vector<2x1024xf32>
    %cst_203 = arith.constant dense<0.000000e+00> : vector<1024xf32>
    %280 = vector.multi_reduction <add>, %279, %cst_203 [0] : vector<2x1024xf32> to vector<1024xf32>
    %281 = vector.shape_cast %280 : vector<1024xf32> to vector<1x1024xf32>
    %cst_204 = arith.constant 2.000000e+00 : f32
    %282 = vector.broadcast %cst_204 : f32 to vector<1x1024xf32>
    %283 = arith.divf %281, %282 : vector<1x1024xf32>
    %c0_205 = arith.constant 0 : index
    %c0_206 = arith.constant 0 : index
    %284 = vector.load %arg10[%c0_205, %c0_206] : memref<1x1024xf32, #tpu.memory_space<vmem>>, vector<1x1024xf32>
    %285 = vector.broadcast %276 : vector<1x1024xf32> to vector<2x1024xf32>
    %286 = arith.subf %272, %285 : vector<2x1024xf32>
    %cst_207 = arith.constant 9.99999974E-6 : f32
    %287 = vector.broadcast %cst_207 : f32 to vector<1x1024xf32>
    %288 = arith.addf %283, %287 : vector<1x1024xf32>
    %289 = math.rsqrt %288 : vector<1x1024xf32>
    %290 = vector.broadcast %289 : vector<1x1024xf32> to vector<2x1024xf32>
    %291 = arith.mulf %286, %290 : vector<2x1024xf32>
    %292 = vector.broadcast %284 : vector<1x1024xf32> to vector<2x1024xf32>
    %293 = arith.mulf %292, %291 : vector<2x1024xf32>
    %c0_208 = arith.constant 0 : index
    %c0_209 = arith.constant 0 : index
    %294 = vector.load %arg11[%c0_208, %c0_209] : memref<1x1024xf32, #tpu.memory_space<vmem>>, vector<1x1024xf32>
    %295 = vector.broadcast %294 : vector<1x1024xf32> to vector<2x1024xf32>
    %296 = arith.addf %293, %295 : vector<2x1024xf32>
    %cst_210 = arith.constant 0.000000e+00 : f32
    %297 = vector.broadcast %cst_210 : f32 to vector<2x1024xf32>
    %298 = arith.cmpf ogt, %296, %297 : vector<2x1024xf32>
    %cst_211 = arith.constant 2.000000e-01 : f32
    %299 = vector.broadcast %cst_211 : f32 to vector<2x1024xf32>
    %300 = arith.mulf %299, %296 : vector<2x1024xf32>
    %301 = arith.select %298, %296, %300 : vector<2x1024xi1>, vector<2x1024xf32>
    %302 = arith.truncf %301 : vector<2x1024xf32> to vector<2x1024xbf16>
    %c0_212 = arith.constant 0 : index
    %c0_213 = arith.constant 0 : index
    %303 = vector.load %arg12[%c0_212, %c0_213] : memref<1024x128xbf16, #tpu.memory_space<vmem>>, vector<1024x128xbf16>
    %cst_214 = arith.constant dense<0.000000e+00> : vector<2x128xf32>
    %304 = tpu.matmul %302, %303, %cst_214 {dimension_numbers = #tpu.dot_dimension_numbers<[1], [0], [0], [1], [0, 0, 1, 1], [], []>} : vector<2x1024xbf16>, vector<1024x128xbf16>, vector<2x128xf32> -> vector<2x128xf32>
    %c0_215 = arith.constant 0 : index
    %c0_216 = arith.constant 0 : index
    %305 = vector.load %arg13[%c0_215, %c0_216] : memref<1x128xf32, #tpu.memory_space<vmem>>, vector<1x128xf32>
    %306 = vector.broadcast %305 : vector<1x128xf32> to vector<2x128xf32>
    %307 = arith.addf %304, %306 : vector<2x128xf32>
    %308 = arith.negf %307 : vector<2x128xf32>
    %309 = math.exp %308 : vector<2x128xf32>
    %cst_217 = arith.constant 1.000000e+00 : f32
    %310 = vector.broadcast %cst_217 : f32 to vector<2x128xf32>
    %311 = arith.addf %310, %309 : vector<2x128xf32>
    %312 = arith.divf %310, %311 : vector<2x128xf32>
    %c0_218 = arith.constant 0 : index
    %c0_219 = arith.constant 0 : index
    %313 = vector.load %arg14[%c0_218, %c0_219] : memref<2x128xf32, #tpu.memory_space<vmem>>, vector<2x128xf32>
    tpu.vector_store %arg14[%c0_218, %c0_219], %312 {strides = array<i32>} : memref<2x128xf32, #tpu.memory_space<vmem>>, vector<2x128xf32>,
    return
  }
}

</mosaic_0001>

<bundles_post_ra>
// kernel: discriminator_forward.1
= control target key start
LH: loop header
LB: loop body
LE: loop exit
PB: predicated region body
PF: predicated region fallthrough
CT: control target
= control target key end

     0   :  { %s18094_s29 = smov [#allocation2]   ;;  %s18101_s17 = smov 0   ;;  %s21861_s0 = inlined_call_operand.vmem [shape: bf16[128,256], index: 0, kind: input, shape index: {}]   ;;  %s21862_s1 = inlined_call_operand.vmem [shape: bf16[256,64], index: 1, kind: input, shape index: {}]   ;;  %s21863_s2 = inlined_call_operand.vmem [shape: f32[1,64], index: 2, kind: input, shape index: {}]   ;;  %s21864_s3 = inlined_call_operand.vmem [shape: bf16[16,32,128], index: 3, kind: input, shape index: {}]   ;;  %s21865_s4 = inlined_call_operand.vmem [shape: bf16[16,64,128], index: 4, kind: input, shape index: {}]   ;;  %s21866_s5 = inlined_call_operand.vmem [shape: f32[1,128], index: 5, kind: input, shape index: {}]   ;;  %s21867_s6 = inlined_call_operand.vmem [shape: f32[1,128], index: 6, kind: input, shape index: {}]   ;;  %s21868_s7 = inlined_call_operand.vmem [shape: f32[1,128], index: 7, kind: input, shape index: {}]   ;;  %s21869_s8 = inlined_call_operand.vmem [shape: bf16[16,128,1024], index: 8, kind: input, shape index: {}]   ;;  %s21870_s9 = inlined_call_operand.vmem [shape: f32[1,1024], index: 9, kind: input, shape index: {}]   ;;  %s21871_s10 = inlined_call_operand.vmem [shape: f32[1,1024], index: 10, kind: input, shape index: {}]   ;;  %s21872_s11 = inlined_call_operand.vmem [shape: f32[1,1024], index: 11, kind: input, shape index: {}]   ;;  %s21873_s12 = inlined_call_operand.vmem [shape: bf16[1024,128], index: 12, kind: input, shape index: {}]   ;;  %s21874_s13 = inlined_call_operand.vmem [shape: f32[1,128], index: 13, kind: input, shape index: {}]   ;;  %s21875_s14 = inlined_call_operand.vmem [shape: f32[2,128], index: 14, kind: output, shape index: {}]  }
   0x1   :  { %s21876_s16 = smov %s21869_s8  ;;  %s18103_s18 = smov 0  }
   0x2 LB: > { %v66_v0 = vld [vmem:[%s18008_s16] sm:$0xf]  ;;  %v68_v1 = vld [vmem:[%s18008_s16 + $0x4] sm:$0xf]  ;;  %v70_v2 = vld [vmem:[%s18008_s16 + $0x8] sm:$0xf]  ;;  %s18016_s18 = sphi %s18103_s18, %s62_s18   ;;  %s18012_s17 = sphi %s18101_s17, %s21877_s17   ;;  %s18008_s16 = sphi %s21876_s16, %s2119_s16   ;;  %s18004_s29 = sphi %s18094_s29, %s2120_s29  }
   0x3   : > { %67 = vst [vmem:[%s18004_s29] sm:$0xf] %v66_v0  ;;  %69 = vst [vmem:[%s18004_s29 + $0x8] sm:$0xf] %v68_v1  ;;  %v72_v3 = vld [vmem:[%s18008_s16 + $0xc] sm:$0xf]  ;;  %s2114_s19 = sadd.s32 1, %s18012_s17 }
   0x4   : > { %71 = vst [vmem:[%s18004_s29 + $0x10] sm:$0xf] %v70_v2  ;;  %v74_v4 = vld [vmem:[%s18008_s16 + $0x10] sm:$0xf]  ;;  %v76_v5 = vld [vmem:[%s18008_s16 + $0x14] sm:$0xf] }
   0x5   : > { %73 = vst [vmem:[%s18004_s29 + $0x18] sm:$0xf] %v72_v3  ;;  %75 = vst [vmem:[%s18004_s29 + $0x20] sm:$0xf] %v74_v4  ;;  %v78_v6 = vld [vmem:[%s18008_s16 + $0x18] sm:$0xf] }
   0x6   : > { %77 = vst [vmem:[%s18004_s29 + $0x28] sm:$0xf] %v76_v5  ;;  %v80_v7 = vld [vmem:[%s18008_s16 + $0x1c] sm:$0xf]  ;;  %v82_v8 = vld [vmem:[%s18008_s16 + $0x40] sm:$0xf] }
   0x7   : > { %79 = vst [vmem:[%s18004_s29 + $0x30] sm:$0xf] %v78_v6  ;;  %81 = vst [vmem:[%s18004_s29 + $0x38] sm:$0xf] %v80_v7  ;;  %v84_v9 = vld [vmem:[%s18008_s16 + $0x44] sm:$0xf] }
   0x8   : > { %83 = vst [vmem:[%s18004_s29 + $0x40] sm:$0xf] %v82_v8  ;;  %v86_v10 = vld [vmem:[%s18008_s16 + $0x48] sm:$0xf]  ;;  %v88_v11 = vld [vmem:[%s18008_s16 + $0x4c] sm:$0xf] }
   0x9   : > { %85 = vst [vmem:[%s18004_s29 + $0x48] sm:$0xf] %v84_v9  ;;  %87 = vst [vmem:[%s18004_s29 + $0x50] sm:$0xf] %v86_v10  ;;  %v90_v12 = vld [vmem:[%s18008_s16 + $0x50] sm:$0xf] }
   0xa   : > { %89 = vst [vmem:[%s18004_s29 + $0x58] sm:$0xf] %v88_v11  ;;  %v92_v13 = vld [vmem:[%s18008_s16 + $0x54] sm:$0xf]  ;;  %v94_v14 = vld [vmem:[%s18008_s16 + $0x58] sm:$0xf] }
   0xb   : > { %91 = vst [vmem:[%s18004_s29 + $0x60] sm:$0xf] %v90_v12  ;;  %93 = vst [vmem:[%s18004_s29 + $0x68] sm:$0xf] %v92_v13  ;;  %v96_v15 = vld [vmem:[%s18008_s16 + $0x5c] sm:$0xf] }
   0xc   : > { %95 = vst [vmem:[%s18004_s29 + $0x70] sm:$0xf] %v94_v14  ;;  %v98_v16 = vld [vmem:[%s18008_s16 + $0x80] sm:$0xf]  ;;  %v100_v17 = vld [vmem:[%s18008_s16 + $0x84] sm:$0xf] }
   0xd   : > { %97 = vst [vmem:[%s18004_s29 + $0x78] sm:$0xf] %v96_v15  ;;  %99 = vst [vmem:[%s18004_s29 + $0x80] sm:$0xf] %v98_v16  ;;  %v102_v18 = vld [vmem:[%s18008_s16 + $0x88] sm:$0xf] }
   0xe   : > { %101 = vst [vmem:[%s18004_s29 + $0x88] sm:$0xf] %v100_v17  ;;  %v104_v19 = vld [vmem:[%s18008_s16 + $0x8c] sm:$0xf]  ;;  %v106_v20 = vld [vmem:[%s18008_s16 + $0x90] sm:$0xf] }
   0xf   : > { %103 = vst [vmem:[%s18004_s29 + $0x90] sm:$0xf] %v102_v18  ;;  %105 = vst [vmem:[%s18004_s29 + $0x98] sm:$0xf] %v104_v19  ;;  %v108_v21 = vld [vmem:[%s18008_s16 + $0x94] sm:$0xf] }
  0x10   : > { %107 = vst [vmem:[%s18004_s29 + $0xa0] sm:$0xf] %v106_v20  ;;  %v110_v22 = vld [vmem:[%s18008_s16 + $0x98] sm:$0xf]  ;;  %v112_v23 = vld [vmem:[%s18008_s16 + $0x9c] sm:$0xf] }
  0x11   : > { %109 = vst [vmem:[%s18004_s29 + $0xa8] sm:$0xf] %v108_v21  ;;  %111 = vst [vmem:[%s18004_s29 + $0xb0] sm:$0xf] %v110_v22  ;;  %v114_v24 = vld [vmem:[%s18008_s16 + $0xc0] sm:$0xf] }
  0x12   : > { %113 = vst [vmem:[%s18004_s29 + $0xb8] sm:$0xf] %v112_v23  ;;  %v116_v25 = vld [vmem:[%s18008_s16 + $0xc4] sm:$0xf]  ;;  %v118_v26 = vld [vmem:[%s18008_s16 + $0xc8] sm:$0xf] }
  0x13   : > { %115 = vst [vmem:[%s18004_s29 + $0xc0] sm:$0xf] %v114_v24  ;;  %117 = vst [vmem:[%s18004_s29 + $0xc8] sm:$0xf] %v116_v25  ;;  %v120_v27 = vld [vmem:[%s18008_s16 + $0xcc] sm:$0xf] }
  0x14   : > { %119 = vst [vmem:[%s18004_s29 + $0xd0] sm:$0xf] %v118_v26  ;;  %v122_v28 = vld [vmem:[%s18008_s16 + $0xd0] sm:$0xf]  ;;  %v124_v29 = vld [vmem:[%s18008_s16 + $0xd4] sm:$0xf] }
  0x15   : > { %121 = vst [vmem:[%s18004_s29 + $0xd8] sm:$0xf] %v120_v27  ;;  %123 = vst [vmem:[%s18004_s29 + $0xe0] sm:$0xf] %v122_v28  ;;  %v126_v30 = vld [vmem:[%s18008_s16 + $0xd8] sm:$0xf] }
  0x16   : > { %125 = vst [vmem:[%s18004_s29 + $0xe8] sm:$0xf] %v124_v29  ;;  %v128_v31 = vld [vmem:[%s18008_s16 + $0xdc] sm:$0xf]  ;;  %v130_v32 = vld [vmem:[%s18008_s16 + $0x100] sm:$0xf] }
  0x17   : > { %127 = vst [vmem:[%s18004_s29 + $0xf0] sm:$0xf] %v126_v30  ;;  %129 = vst [vmem:[%s18004_s29 + $0xf8] sm:$0xf] %v128_v31  ;;  %v132_v33 = vld [vmem:[%s18008_s16 + $0x104] sm:$0xf] }
  0x18   : > { %131 = vst [vmem:[%s18004_s29 + $0x100] sm:$0xf] %v130_v32  ;;  %v134_v34 = vld [vmem:[%s18008_s16 + $0x108] sm:$0xf]  ;;  %v136_v35 = vld [vmem:[%s18008_s16 + $0x10c] sm:$0xf] }
  0x19   : > { %133 = vst [vmem:[%s18004_s29 + $0x108] sm:$0xf] %v132_v33  ;;  %135 = vst [vmem:[%s18004_s29 + $0x110] sm:$0xf] %v134_v34  ;;  %v138_v36 = vld [vmem:[%s18008_s16 + $0x110] sm:$0xf] }
  0x1a   : > { %137 = vst [vmem:[%s18004_s29 + $0x118] sm:$0xf] %v136_v35  ;;  %v140_v37 = vld [vmem:[%s18008_s16 + $0x114] sm:$0xf]  ;;  %v142_v38 = vld [vmem:[%s18008_s16 + $0x118] sm:$0xf] }
  0x1b   : > { %139 = vst [vmem:[%s18004_s29 + $0x120] sm:$0xf] %v138_v36  ;;  %141 = vst [vmem:[%s18004_s29 + $0x128] sm:$0xf] %v140_v37  ;;  %v144_v39 = vld [vmem:[%s18008_s16 + $0x11c] sm:$0xf] }
  0x1c   : > { %143 = vst [vmem:[%s18004_s29 + $0x130] sm:$0xf] %v142_v38  ;;  %v146_v40 = vld [vmem:[%s18008_s16 + $0x140] sm:$0xf]  ;;  %v148_v41 = vld [vmem:[%s18008_s16 + $0x144] sm:$0xf] }
  0x1d   : > { %145 = vst [vmem:[%s18004_s29 + $0x138] sm:$0xf] %v144_v39  ;;  %147 = vst [vmem:[%s18004_s29 + $0x140] sm:$0xf] %v146_v40  ;;  %v150_v42 = vld [vmem:[%s18008_s16 + $0x148] sm:$0xf] }
  0x1e   : > { %149 = vst [vmem:[%s18004_s29 + $0x148] sm:$0xf] %v148_v41  ;;  %v152_v43 = vld [vmem:[%s18008_s16 + $0x14c] sm:$0xf]  ;;  %v154_v44 = vld [vmem:[%s18008_s16 + $0x150] sm:$0xf] }
  0x1f   : > { %151 = vst [vmem:[%s18004_s29 + $0x150] sm:$0xf] %v150_v42  ;;  %153 = vst [vmem:[%s18004_s29 + $0x158] sm:$0xf] %v152_v43  ;;  %v156_v45 = vld [vmem:[%s18008_s16 + $0x154] sm:$0xf] }
  0x20   : > { %155 = vst [vmem:[%s18004_s29 + $0x160] sm:$0xf] %v154_v44  ;;  %v158_v46 = vld [vmem:[%s18008_s16 + $0x158] sm:$0xf]  ;;  %v160_v47 = vld [vmem:[%s18008_s16 + $0x15c] sm:$0xf] }
  0x21   : > { %157 = vst [vmem:[%s18004_s29 + $0x168] sm:$0xf] %v156_v45  ;;  %159 = vst [vmem:[%s18004_s29 + $0x170] sm:$0xf] %v158_v46  ;;  %v162_v48 = vld [vmem:[%s18008_s16 + $0x180] sm:$0xf] }
  0x22   : > { %161 = vst [vmem:[%s18004_s29 + $0x178] sm:$0xf] %v160_v47  ;;  %v164_v49 = vld [vmem:[%s18008_s16 + $0x184] sm:$0xf]  ;;  %v166_v50 = vld [vmem:[%s18008_s16 + $0x188] sm:$0xf] }
  0x23   : > { %163 = vst [vmem:[%s18004_s29 + $0x180] sm:$0xf] %v162_v48  ;;  %165 = vst [vmem:[%s18004_s29 + $0x188] sm:$0xf] %v164_v49  ;;  %v168_v51 = vld [vmem:[%s18008_s16 + $0x18c] sm:$0xf] }
  0x24   : > { %167 = vst [vmem:[%s18004_s29 + $0x190] sm:$0xf] %v166_v50  ;;  %v170_v52 = vld [vmem:[%s18008_s16 + $0x190] sm:$0xf]  ;;  %v172_v53 = vld [vmem:[%s18008_s16 + $0x194] sm:$0xf] }
  0x25   : > { %169 = vst [vmem:[%s18004_s29 + $0x198] sm:$0xf] %v168_v51  ;;  %171 = vst [vmem:[%s18004_s29 + $0x1a0] sm:$0xf] %v170_v52  ;;  %v174_v54 = vld [vmem:[%s18008_s16 + $0x198] sm:$0xf] }
  0x26   : > { %173 = vst [vmem:[%s18004_s29 + $0x1a8] sm:$0xf] %v172_v53  ;;  %v176_v55 = vld [vmem:[%s18008_s16 + $0x19c] sm:$0xf]  ;;  %v178_v56 = vld [vmem:[%s18008_s16 + $0x1c0] sm:$0xf] }
  0x27   : > { %175 = vst [vmem:[%s18004_s29 + $0x1b0] sm:$0xf] %v174_v54  ;;  %177 = vst [vmem:[%s18004_s29 + $0x1b8] sm:$0xf] %v176_v55  ;;  %v180_v57 = vld [vmem:[%s18008_s16 + $0x1c4] sm:$0xf] }
  0x28   : > { %179 = vst [vmem:[%s18004_s29 + $0x1c0] sm:$0xf] %v178_v56  ;;  %v182_v58 = vld [vmem:[%s18008_s16 + $0x1c8] sm:$0xf]  ;;  %v184_v59 = vld [vmem:[%s18008_s16 + $0x1cc] sm:$0xf] }
  0x29   : > { %181 = vst [vmem:[%s18004_s29 + $0x1c8] sm:$0xf] %v180_v57  ;;  %183 = vst [vmem:[%s18004_s29 + $0x1d0] sm:$0xf] %v182_v58  ;;  %v186_v60 = vld [vmem:[%s18008_s16 + $0x1d0] sm:$0xf] }
  0x2a   : > { %185 = vst [vmem:[%s18004_s29 + $0x1d8] sm:$0xf] %v184_v59  ;;  %v188_v61 = vld [vmem:[%s18008_s16 + $0x1d4] sm:$0xf]  ;;  %v190_v62 = vld [vmem:[%s18008_s16 + $0x1d8] sm:$0xf] }
  0x2b   : > { %187 = vst [vmem:[%s18004_s29 + $0x1e0] sm:$0xf] %v186_v60  ;;  %189 = vst [vmem:[%s18004_s29 + $0x1e8] sm:$0xf] %v188_v61  ;;  %v192_v63 = vld [vmem:[%s18008_s16 + $0x1dc] sm:$0xf] }
  0x2c   : > { %191 = vst [vmem:[%s18004_s29 + $0x1f0] sm:$0xf] %v190_v62  ;;  %v194_v0 = vld [vmem:[%s18008_s16 + $0x200] sm:$0xf]  ;;  %v196_v1 = vld [vmem:[%s18008_s16 + $0x204] sm:$0xf] }
  0x2d   : > { %193 = vst [vmem:[%s18004_s29 + $0x1f8] sm:$0xf] %v192_v63  ;;  %195 = vst [vmem:[%s18004_s29 + $0x200] sm:$0xf] %v194_v0  ;;  %v198_v2 = vld [vmem:[%s18008_s16 + $0x208] sm:$0xf] }
  0x2e   : > { %197 = vst [vmem:[%s18004_s29 + $0x208] sm:$0xf] %v196_v1  ;;  %v200_v3 = vld [vmem:[%s18008_s16 + $0x20c] sm:$0xf]  ;;  %v202_v4 = vld [vmem:[%s18008_s16 + $0x210] sm:$0xf] }
  0x2f   : > { %199 = vst [vmem:[%s18004_s29 + $0x210] sm:$0xf] %v198_v2  ;;  %201 = vst [vmem:[%s18004_s29 + $0x218] sm:$0xf] %v200_v3  ;;  %v204_v5 = vld [vmem:[%s18008_s16 + $0x214] sm:$0xf] }
  0x30   : > { %203 = vst [vmem:[%s18004_s29 + $0x220] sm:$0xf] %v202_v4  ;;  %v206_v6 = vld [vmem:[%s18008_s16 + $0x218] sm:$0xf]  ;;  %v208_v7 = vld [vmem:[%s18008_s16 + $0x21c] sm:$0xf] }
  0x31   : > { %205 = vst [vmem:[%s18004_s29 + $0x228] sm:$0xf] %v204_v5  ;;  %207 = vst [vmem:[%s18004_s29 + $0x230] sm:$0xf] %v206_v6  ;;  %v210_v8 = vld [vmem:[%s18008_s16 + $0x240] sm:$0xf] }
  0x32   : > { %209 = vst [vmem:[%s18004_s29 + $0x238] sm:$0xf] %v208_v7  ;;  %v212_v9 = vld [vmem:[%s18008_s16 + $0x244] sm:$0xf]  ;;  %v214_v10 = vld [vmem:[%s18008_s16 + $0x248] sm:$0xf] }
  0x33   : > { %211 = vst [vmem:[%s18004_s29 + $0x240] sm:$0xf] %v210_v8  ;;  %213 = vst [vmem:[%s18004_s29 + $0x248] sm:$0xf] %v212_v9  ;;  %v216_v11 = vld [vmem:[%s18008_s16 + $0x24c] sm:$0xf] }
  0x34   : > { %215 = vst [vmem:[%s18004_s29 + $0x250] sm:$0xf] %v214_v10  ;;  %v218_v12 = vld [vmem:[%s18008_s16 + $0x250] sm:$0xf]  ;;  %v220_v13 = vld [vmem:[%s18008_s16 + $0x254] sm:$0xf] }
  0x35   : > { %217 = vst [vmem:[%s18004_s29 + $0x258] sm:$0xf] %v216_v11  ;;  %219 = vst [vmem:[%s18004_s29 + $0x260] sm:$0xf] %v218_v12  ;;  %v222_v14 = vld [vmem:[%s18008_s16 + $0x258] sm:$0xf] }
  0x36   : > { %221 = vst [vmem:[%s18004_s29 + $0x268] sm:$0xf] %v220_v13  ;;  %v224_v15 = vld [vmem:[%s18008_s16 + $0x25c] sm:$0xf]  ;;  %v226_v16 = vld [vmem:[%s18008_s16 + $0x280] sm:$0xf] }
  0x37   : > { %223 = vst [vmem:[%s18004_s29 + $0x270] sm:$0xf] %v222_v14  ;;  %225 = vst [vmem:[%s18004_s29 + $0x278] sm:$0xf] %v224_v15  ;;  %v228_v17 = vld [vmem:[%s18008_s16 + $0x284] sm:$0xf] }
  0x38   : > { %227 = vst [vmem:[%s18004_s29 + $0x280] sm:$0xf] %v226_v16  ;;  %v230_v18 = vld [vmem:[%s18008_s16 + $0x288] sm:$0xf]  ;;  %v232_v19 = vld [vmem:[%s18008_s16 + $0x28c] sm:$0xf] }
  0x39   : > { %229 = vst [vmem:[%s18004_s29 + $0x288] sm:$0xf] %v228_v17  ;;  %231 = vst [vmem:[%s18004_s29 + $0x290] sm:$0xf] %v230_v18  ;;  %v234_v20 = vld [vmem:[%s18008_s16 + $0x290] sm:$0xf] }
  0x3a   : > { %233 = vst [vmem:[%s18004_s29 + $0x298] sm:$0xf] %v232_v19  ;;  %v236_v21 = vld [vmem:[%s18008_s16 + $0x294] sm:$0xf]  ;;  %v238_v22 = vld [vmem:[%s18008_s16 + $0x298] sm:$0xf] }
  0x3b   : > { %235 = vst [vmem:[%s18004_s29 + $0x2a0] sm:$0xf] %v234_v20  ;;  %237 = vst [vmem:[%s18004_s29 + $0x2a8] sm:$0xf] %v236_v21  ;;  %v240_v23 = vld [vmem:[%s18008_s16 + $0x29c] sm:$0xf] }
  0x3c   : > { %239 = vst [vmem:[%s18004_s29 + $0x2b0] sm:$0xf] %v238_v22  ;;  %v242_v24 = vld [vmem:[%s18008_s16 + $0x2c0] sm:$0xf]  ;;  %v244_v25 = vld [vmem:[%s18008_s16 + $0x2c4] sm:$0xf] }
  0x3d   : > { %241 = vst [vmem:[%s18004_s29 + $0x2b8] sm:$0xf] %v240_v23  ;;  %243 = vst [vmem:[%s18004_s29 + $0x2c0] sm:$0xf] %v242_v24  ;;  %v246_v26 = vld [vmem:[%s18008_s16 + $0x2c8] sm:$0xf] }
  0x3e   : > { %245 = vst [vmem:[%s18004_s29 + $0x2c8] sm:$0xf] %v244_v25  ;;  %v248_v27 = vld [vmem:[%s18008_s16 + $0x2cc] sm:$0xf]  ;;  %v250_v28 = vld [vmem:[%s18008_s16 + $0x2d0] sm:$0xf] }
  0x3f   : > { %247 = vst [vmem:[%s18004_s29 + $0x2d0] sm:$0xf] %v246_v26  ;;  %249 = vst [vmem:[%s18004_s29 + $0x2d8] sm:$0xf] %v248_v27  ;;  %v252_v29 = vld [vmem:[%s18008_s16 + $0x2d4] sm:$0xf] }
  0x40   : > { %251 = vst [vmem:[%s18004_s29 + $0x2e0] sm:$0xf] %v250_v28  ;;  %v254_v30 = vld [vmem:[%s18008_s16 + $0x2d8] sm:$0xf]  ;;  %v256_v31 = vld [vmem:[%s18008_s16 + $0x2dc] sm:$0xf] }
  0x41   : > { %253 = vst [vmem:[%s18004_s29 + $0x2e8] sm:$0xf] %v252_v29  ;;  %255 = vst [vmem:[%s18004_s29 + $0x2f0] sm:$0xf] %v254_v30  ;;  %v258_v32 = vld [vmem:[%s18008_s16 + $0x300] sm:$0xf] }
  0x42   : > { %257 = vst [vmem:[%s18004_s29 + $0x2f8] sm:$0xf] %v256_v31  ;;  %v260_v33 = vld [vmem:[%s18008_s16 + $0x304] sm:$0xf]  ;;  %v262_v34 = vld [vmem:[%s18008_s16 + $0x308] sm:$0xf] }
  0x43   : > { %259 = vst [vmem:[%s18004_s29 + $0x300] sm:$0xf] %v258_v32  ;;  %261 = vst [vmem:[%s18004_s29 + $0x308] sm:$0xf] %v260_v33  ;;  %v264_v35 = vld [vmem:[%s18008_s16 + $0x30c] sm:$0xf] }
  0x44   : > { %263 = vst [vmem:[%s18004_s29 + $0x310] sm:$0xf] %v262_v34  ;;  %v266_v36 = vld [vmem:[%s18008_s16 + $0x310] sm:$0xf]  ;;  %v268_v37 = vld [vmem:[%s18008_s16 + $0x314] sm:$0xf] }
  0x45   : > { %265 = vst [vmem:[%s18004_s29 + $0x318] sm:$0xf] %v264_v35  ;;  %267 = vst [vmem:[%s18004_s29 + $0x320] sm:$0xf] %v266_v36  ;;  %v270_v38 = vld [vmem:[%s18008_s16 + $0x318] sm:$0xf] }
  0x46   : > { %269 = vst [vmem:[%s18004_s29 + $0x328] sm:$0xf] %v268_v37  ;;  %v272_v39 = vld [vmem:[%s18008_s16 + $0x31c] sm:$0xf]  ;;  %v274_v40 = vld [vmem:[%s18008_s16 + $0x340] sm:$0xf] }
  0x47   : > { %271 = vst [vmem:[%s18004_s29 + $0x330] sm:$0xf] %v270_v38  ;;  %273 = vst [vmem:[%s18004_s29 + $0x338] sm:$0xf] %v272_v39  ;;  %v276_v41 = vld [vmem:[%s18008_s16 + $0x344] sm:$0xf] }
  0x48   : > { %275 = vst [vmem:[%s18004_s29 + $0x340] sm:$0xf] %v274_v40  ;;  %v278_v42 = vld [vmem:[%s18008_s16 + $0x348] sm:$0xf]  ;;  %v280_v43 = vld [vmem:[%s18008_s16 + $0x34c] sm:$0xf] }
  0x49   : > { %277 = vst [vmem:[%s18004_s29 + $0x348] sm:$0xf] %v276_v41  ;;  %279 = vst [vmem:[%s18004_s29 + $0x350] sm:$0xf] %v278_v42  ;;  %v282_v44 = vld [vmem:[%s18008_s16 + $0x350] sm:$0xf] }
  0x4a   : > { %281 = vst [vmem:[%s18004_s29 + $0x358] sm:$0xf] %v280_v43  ;;  %v284_v45 = vld [vmem:[%s18008_s16 + $0x354] sm:$0xf]  ;;  %v286_v46 = vld [vmem:[%s18008_s16 + $0x358] sm:$0xf] }
  0x4b   : > { %283 = vst [vmem:[%s18004_s29 + $0x360] sm:$0xf] %v282_v44  ;;  %285 = vst [vmem:[%s18004_s29 + $0x368] sm:$0xf] %v284_v45  ;;  %v288_v47 = vld [vmem:[%s18008_s16 + $0x35c] sm:$0xf] }
  0x4c   : > { %287 = vst [vmem:[%s18004_s29 + $0x370] sm:$0xf] %v286_v46  ;;  %v290_v48 = vld [vmem:[%s18008_s16 + $0x380] sm:$0xf]  ;;  %v292_v49 = vld [vmem:[%s18008_s16 + $0x384] sm:$0xf] }
  0x4d   : > { %289 = vst [vmem:[%s18004_s29 + $0x378] sm:$0xf] %v288_v47  ;;  %291 = vst [vmem:[%s18004_s29 + $0x380] sm:$0xf] %v290_v48  ;;  %v294_v50 = vld [vmem:[%s18008_s16 + $0x388] sm:$0xf] }
  0x4e   : > { %293 = vst [vmem:[%s18004_s29 + $0x388] sm:$0xf] %v292_v49  ;;  %v296_v51 = vld [vmem:[%s18008_s16 + $0x38c] sm:$0xf]  ;;  %v298_v52 = vld [vmem:[%s18008_s16 + $0x390] sm:$0xf] }
  0x4f   : > { %295 = vst [vmem:[%s18004_s29 + $0x390] sm:$0xf] %v294_v50  ;;  %297 = vst [vmem:[%s18004_s29 + $0x398] sm:$0xf] %v296_v51  ;;  %v300_v53 = vld [vmem:[%s18008_s16 + $0x394] sm:$0xf] }
  0x50   : > { %299 = vst [vmem:[%s18004_s29 + $0x3a0] sm:$0xf] %v298_v52  ;;  %v302_v54 = vld [vmem:[%s18008_s16 + $0x398] sm:$0xf]  ;;  %v304_v55 = vld [vmem:[%s18008_s16 + $0x39c] sm:$0xf] }
  0x51   : > { %301 = vst [vmem:[%s18004_s29 + $0x3a8] sm:$0xf] %v300_v53  ;;  %303 = vst [vmem:[%s18004_s29 + $0x3b0] sm:$0xf] %v302_v54  ;;  %v306_v56 = vld [vmem:[%s18008_s16 + $0x3c0] sm:$0xf] }
  0x52   : > { %305 = vst [vmem:[%s18004_s29 + $0x3b8] sm:$0xf] %v304_v55  ;;  %v308_v57 = vld [vmem:[%s18008_s16 + $0x3c4] sm:$0xf]  ;;  %v310_v58 = vld [vmem:[%s18008_s16 + $0x3c8] sm:$0xf] }
  0x53   : > { %307 = vst [vmem:[%s18004_s29 + $0x3c0] sm:$0xf] %v306_v56  ;;  %309 = vst [vmem:[%s18004_s29 + $0x3c8] sm:$0xf] %v308_v57  ;;  %v312_v59 = vld [vmem:[%s18008_s16 + $0x3cc] sm:$0xf] }
  0x54   : > { %311 = vst [vmem:[%s18004_s29 + $0x3d0] sm:$0xf] %v310_v58  ;;  %v314_v60 = vld [vmem:[%s18008_s16 + $0x3d0] sm:$0xf]  ;;  %v316_v61 = vld [vmem:[%s18008_s16 + $0x3d4] sm:$0xf] }
  0x55   : > { %313 = vst [vmem:[%s18004_s29 + $0x3d8] sm:$0xf] %v312_v59  ;;  %315 = vst [vmem:[%s18004_s29 + $0x3e0] sm:$0xf] %v314_v60  ;;  %v318_v62 = vld [vmem:[%s18008_s16 + $0x3d8] sm:$0xf] }
  0x56   : > { %317 = vst [vmem:[%s18004_s29 + $0x3e8] sm:$0xf] %v316_v61  ;;  %v320_v63 = vld [vmem:[%s18008_s16 + $0x3dc] sm:$0xf]  ;;  %v322_v0 = vld [vmem:[%s18008_s16 + $0x400] sm:$0xf] }
  0x57   : > { %319 = vst [vmem:[%s18004_s29 + $0x3f0] sm:$0xf] %v318_v62  ;;  %321 = vst [vmem:[%s18004_s29 + $0x3f8] sm:$0xf] %v320_v63  ;;  %v324_v1 = vld [vmem:[%s18008_s16 + $0x404] sm:$0xf] }
  0x58   : > { %323 = vst [vmem:[%s18004_s29 + $0x400] sm:$0xf] %v322_v0  ;;  %v326_v2 = vld [vmem:[%s18008_s16 + $0x408] sm:$0xf]  ;;  %v328_v3 = vld [vmem:[%s18008_s16 + $0x40c] sm:$0xf] }
  0x59   : > { %325 = vst [vmem:[%s18004_s29 + $0x408] sm:$0xf] %v324_v1  ;;  %327 = vst [vmem:[%s18004_s29 + $0x410] sm:$0xf] %v326_v2  ;;  %v330_v4 = vld [vmem:[%s18008_s16 + $0x410] sm:$0xf] }
  0x5a   : > { %329 = vst [vmem:[%s18004_s29 + $0x418] sm:$0xf] %v328_v3  ;;  %v332_v5 = vld [vmem:[%s18008_s16 + $0x414] sm:$0xf]  ;;  %v334_v6 = vld [vmem:[%s18008_s16 + $0x418] sm:$0xf] }
  0x5b   : > { %331 = vst [vmem:[%s18004_s29 + $0x420] sm:$0xf] %v330_v4  ;;  %333 = vst [vmem:[%s18004_s29 + $0x428] sm:$0xf] %v332_v5  ;;  %v336_v7 = vld [vmem:[%s18008_s16 + $0x41c] sm:$0xf] }
  0x5c   : > { %335 = vst [vmem:[%s18004_s29 + $0x430] sm:$0xf] %v334_v6  ;;  %v338_v8 = vld [vmem:[%s18008_s16 + $0x440] sm:$0xf]  ;;  %v340_v9 = vld [vmem:[%s18008_s16 + $0x444] sm:$0xf] }
  0x5d   : > { %337 = vst [vmem:[%s18004_s29 + $0x438] sm:$0xf] %v336_v7  ;;  %339 = vst [vmem:[%s18004_s29 + $0x440] sm:$0xf] %v338_v8  ;;  %v342_v10 = vld [vmem:[%s18008_s16 + $0x448] sm:$0xf] }
  0x5e   : > { %341 = vst [vmem:[%s18004_s29 + $0x448] sm:$0xf] %v340_v9  ;;  %v344_v11 = vld [vmem:[%s18008_s16 + $0x44c] sm:$0xf]  ;;  %v346_v12 = vld [vmem:[%s18008_s16 + $0x450] sm:$0xf] }
  0x5f   : > { %343 = vst [vmem:[%s18004_s29 + $0x450] sm:$0xf] %v342_v10  ;;  %345 = vst [vmem:[%s18004_s29 + $0x458] sm:$0xf] %v344_v11  ;;  %v348_v13 = vld [vmem:[%s18008_s16 + $0x454] sm:$0xf] }
  0x60   : > { %347 = vst [vmem:[%s18004_s29 + $0x460] sm:$0xf] %v346_v12  ;;  %v350_v14 = vld [vmem:[%s18008_s16 + $0x458] sm:$0xf]  ;;  %v352_v15 = vld [vmem:[%s18008_s16 + $0x45c] sm:$0xf] }
  0x61   : > { %349 = vst [vmem:[%s18004_s29 + $0x468] sm:$0xf] %v348_v13  ;;  %351 = vst [vmem:[%s18004_s29 + $0x470] sm:$0xf] %v350_v14  ;;  %v354_v16 = vld [vmem:[%s18008_s16 + $0x480] sm:$0xf] }
  0x62   : > { %353 = vst [vmem:[%s18004_s29 + $0x478] sm:$0xf] %v352_v15  ;;  %v356_v17 = vld [vmem:[%s18008_s16 + $0x484] sm:$0xf]  ;;  %v358_v18 = vld [vmem:[%s18008_s16 + $0x488] sm:$0xf] }
  0x63   : > { %355 = vst [vmem:[%s18004_s29 + $0x480] sm:$0xf] %v354_v16  ;;  %357 = vst [vmem:[%s18004_s29 + $0x488] sm:$0xf] %v356_v17  ;;  %v360_v19 = vld [vmem:[%s18008_s16 + $0x48c] sm:$0xf] }
  0x64   : > { %359 = vst [vmem:[%s18004_s29 + $0x490] sm:$0xf] %v358_v18  ;;  %v362_v20 = vld [vmem:[%s18008_s16 + $0x490] sm:$0xf]  ;;  %v364_v21 = vld [vmem:[%s18008_s16 + $0x494] sm:$0xf] }
  0x65   : > { %361 = vst [vmem:[%s18004_s29 + $0x498] sm:$0xf] %v360_v19  ;;  %363 = vst [vmem:[%s18004_s29 + $0x4a0] sm:$0xf] %v362_v20  ;;  %v366_v22 = vld [vmem:[%s18008_s16 + $0x498] sm:$0xf] }
  0x66   : > { %365 = vst [vmem:[%s18004_s29 + $0x4a8] sm:$0xf] %v364_v21  ;;  %v368_v23 = vld [vmem:[%s18008_s16 + $0x49c] sm:$0xf]  ;;  %v370_v24 = vld [vmem:[%s18008_s16 + $0x4c0] sm:$0xf] }
  0x67   : > { %367 = vst [vmem:[%s18004_s29 + $0x4b0] sm:$0xf] %v366_v22  ;;  %369 = vst [vmem:[%s18004_s29 + $0x4b8] sm:$0xf] %v368_v23  ;;  %v372_v25 = vld [vmem:[%s18008_s16 + $0x4c4] sm:$0xf] }
  0x68   : > { %371 = vst [vmem:[%s18004_s29 + $0x4c0] sm:$0xf] %v370_v24  ;;  %v374_v26 = vld [vmem:[%s18008_s16 + $0x4c8] sm:$0xf]  ;;  %v376_v27 = vld [vmem:[%s18008_s16 + $0x4cc] sm:$0xf] }
  0x69   : > { %373 = vst [vmem:[%s18004_s29 + $0x4c8] sm:$0xf] %v372_v25  ;;  %375 = vst [vmem:[%s18004_s29 + $0x4d0] sm:$0xf] %v374_v26  ;;  %v378_v28 = vld [vmem:[%s18008_s16 + $0x4d0] sm:$0xf] }
  0x6a   : > { %377 = vst [vmem:[%s18004_s29 + $0x4d8] sm:$0xf] %v376_v27  ;;  %v380_v29 = vld [vmem:[%s18008_s16 + $0x4d4] sm:$0xf]  ;;  %v382_v30 = vld [vmem:[%s18008_s16 + $0x4d8] sm:$0xf] }
  0x6b   : > { %379 = vst [vmem:[%s18004_s29 + $0x4e0] sm:$0xf] %v378_v28  ;;  %381 = vst [vmem:[%s18004_s29 + $0x4e8] sm:$0xf] %v380_v29  ;;  %v384_v31 = vld [vmem:[%s18008_s16 + $0x4dc] sm:$0xf] }
  0x6c   : > { %383 = vst [vmem:[%s18004_s29 + $0x4f0] sm:$0xf] %v382_v30  ;;  %v386_v32 = vld [vmem:[%s18008_s16 + $0x500] sm:$0xf]  ;;  %v388_v33 = vld [vmem:[%s18008_s16 + $0x504] sm:$0xf] }
  0x6d   : > { %385 = vst [vmem:[%s18004_s29 + $0x4f8] sm:$0xf] %v384_v31  ;;  %387 = vst [vmem:[%s18004_s29 + $0x500] sm:$0xf] %v386_v32  ;;  %v390_v34 = vld [vmem:[%s18008_s16 + $0x508] sm:$0xf] }
  0x6e   : > { %389 = vst [vmem:[%s18004_s29 + $0x508] sm:$0xf] %v388_v33  ;;  %v392_v35 = vld [vmem:[%s18008_s16 + $0x50c] sm:$0xf]  ;;  %v394_v36 = vld [vmem:[%s18008_s16 + $0x510] sm:$0xf] }
  0x6f   : > { %391 = vst [vmem:[%s18004_s29 + $0x510] sm:$0xf] %v390_v34  ;;  %393 = vst [vmem:[%s18004_s29 + $0x518] sm:$0xf] %v392_v35  ;;  %v396_v37 = vld [vmem:[%s18008_s16 + $0x514] sm:$0xf] }
  0x70   : > { %395 = vst [vmem:[%s18004_s29 + $0x520] sm:$0xf] %v394_v36  ;;  %v398_v38 = vld [vmem:[%s18008_s16 + $0x518] sm:$0xf]  ;;  %v400_v39 = vld [vmem:[%s18008_s16 + $0x51c] sm:$0xf] }
  0x71   : > { %397 = vst [vmem:[%s18004_s29 + $0x528] sm:$0xf] %v396_v37  ;;  %399 = vst [vmem:[%s18004_s29 + $0x530] sm:$0xf] %v398_v38  ;;  %v402_v40 = vld [vmem:[%s18008_s16 + $0x540] sm:$0xf] }
  0x72   : > { %401 = vst [vmem:[%s18004_s29 + $0x538] sm:$0xf] %v400_v39  ;;  %v404_v41 = vld [vmem:[%s18008_s16 + $0x544] sm:$0xf]  ;;  %v406_v42 = vld [vmem:[%s18008_s16 + $0x548] sm:$0xf] }
  0x73   : > { %403 = vst [vmem:[%s18004_s29 + $0x540] sm:$0xf] %v402_v40  ;;  %405 = vst [vmem:[%s18004_s29 + $0x548] sm:$0xf] %v404_v41  ;;  %v408_v43 = vld [vmem:[%s18008_s16 + $0x54c] sm:$0xf] }
  0x74   : > { %407 = vst [vmem:[%s18004_s29 + $0x550] sm:$0xf] %v406_v42  ;;  %v410_v44 = vld [vmem:[%s18008_s16 + $0x550] sm:$0xf]  ;;  %v412_v45 = vld [vmem:[%s18008_s16 + $0x554] sm:$0xf] }
  0x75   : > { %409 = vst [vmem:[%s18004_s29 + $0x558] sm:$0xf] %v408_v43  ;;  %411 = vst [vmem:[%s18004_s29 + $0x560] sm:$0xf] %v410_v44  ;;  %v414_v46 = vld [vmem:[%s18008_s16 + $0x558] sm:$0xf] }
  0x76   : > { %413 = vst [vmem:[%s18004_s29 + $0x568] sm:$0xf] %v412_v45  ;;  %v416_v47 = vld [vmem:[%s18008_s16 + $0x55c] sm:$0xf]  ;;  %v418_v48 = vld [vmem:[%s18008_s16 + $0x580] sm:$0xf] }
  0x77   : > { %415 = vst [vmem:[%s18004_s29 + $0x570] sm:$0xf] %v414_v46  ;;  %417 = vst [vmem:[%s18004_s29 + $0x578] sm:$0xf] %v416_v47  ;;  %v420_v49 = vld [vmem:[%s18008_s16 + $0x584] sm:$0xf] }
  0x78   : > { %419 = vst [vmem:[%s18004_s29 + $0x580] sm:$0xf] %v418_v48  ;;  %v422_v50 = vld [vmem:[%s18008_s16 + $0x588] sm:$0xf]  ;;  %v424_v51 = vld [vmem:[%s18008_s16 + $0x58c] sm:$0xf] }
  0x79   : > { %421 = vst [vmem:[%s18004_s29 + $0x588] sm:$0xf] %v420_v49  ;;  %423 = vst [vmem:[%s18004_s29 + $0x590] sm:$0xf] %v422_v50  ;;  %v426_v52 = vld [vmem:[%s18008_s16 + $0x590] sm:$0xf] }
  0x7a   : > { %425 = vst [vmem:[%s18004_s29 + $0x598] sm:$0xf] %v424_v51  ;;  %v428_v53 = vld [vmem:[%s18008_s16 + $0x594] sm:$0xf]  ;;  %v430_v54 = vld [vmem:[%s18008_s16 + $0x598] sm:$0xf] }
  0x7b   : > { %427 = vst [vmem:[%s18004_s29 + $0x5a0] sm:$0xf] %v426_v52  ;;  %429 = vst [vmem:[%s18004_s29 + $0x5a8] sm:$0xf] %v428_v53  ;;  %v432_v55 = vld [vmem:[%s18008_s16 + $0x59c] sm:$0xf] }
  0x7c   : > { %431 = vst [vmem:[%s18004_s29 + $0x5b0] sm:$0xf] %v430_v54  ;;  %v434_v56 = vld [vmem:[%s18008_s16 + $0x5c0] sm:$0xf]  ;;  %v436_v57 = vld [vmem:[%s18008_s16 + $0x5c4] sm:$0xf] }
  0x7d   : > { %433 = vst [vmem:[%s18004_s29 + $0x5b8] sm:$0xf] %v432_v55  ;;  %435 = vst [vmem:[%s18004_s29 + $0x5c0] sm:$0xf] %v434_v56  ;;  %v438_v58 = vld [vmem:[%s18008_s16 + $0x5c8] sm:$0xf] }
  0x7e   : > { %437 = vst [vmem:[%s18004_s29 + $0x5c8] sm:$0xf] %v436_v57  ;;  %v440_v59 = vld [vmem:[%s18008_s16 + $0x5cc] sm:$0xf]  ;;  %v442_v60 = vld [vmem:[%s18008_s16 + $0x5d0] sm:$0xf] }
  0x7f   : > { %439 = vst [vmem:[%s18004_s29 + $0x5d0] sm:$0xf] %v438_v58  ;;  %441 = vst [vmem:[%s18004_s29 + $0x5d8] sm:$0xf] %v440_v59  ;;  %v444_v61 = vld [vmem:[%s18008_s16 + $0x5d4] sm:$0xf] }
  0x80   : > { %443 = vst [vmem:[%s18004_s29 + $0x5e0] sm:$0xf] %v442_v60  ;;  %v446_v62 = vld [vmem:[%s18008_s16 + $0x5d8] sm:$0xf]  ;;  %v448_v63 = vld [vmem:[%s18008_s16 + $0x5dc] sm:$0xf] }
  0x81   : > { %445 = vst [vmem:[%s18004_s29 + $0x5e8] sm:$0xf] %v444_v61  ;;  %447 = vst [vmem:[%s18004_s29 + $0x5f0] sm:$0xf] %v446_v62  ;;  %v450_v0 = vld [vmem:[%s18008_s16 + $0x600] sm:$0xf] }
  0x82   : > { %449 = vst [vmem:[%s18004_s29 + $0x5f8] sm:$0xf] %v448_v63  ;;  %v452_v1 = vld [vmem:[%s18008_s16 + $0x604] sm:$0xf]  ;;  %v454_v2 = vld [vmem:[%s18008_s16 + $0x608] sm:$0xf] }
  0x83   : > { %451 = vst [vmem:[%s18004_s29 + $0x600] sm:$0xf] %v450_v0  ;;  %453 = vst [vmem:[%s18004_s29 + $0x608] sm:$0xf] %v452_v1  ;;  %v456_v3 = vld [vmem:[%s18008_s16 + $0x60c] sm:$0xf] }
  0x84   : > { %455 = vst [vmem:[%s18004_s29 + $0x610] sm:$0xf] %v454_v2  ;;  %v458_v4 = vld [vmem:[%s18008_s16 + $0x610] sm:$0xf]  ;;  %v460_v5 = vld [vmem:[%s18008_s16 + $0x614] sm:$0xf] }
  0x85   : > { %457 = vst [vmem:[%s18004_s29 + $0x618] sm:$0xf] %v456_v3  ;;  %459 = vst [vmem:[%s18004_s29 + $0x620] sm:$0xf] %v458_v4  ;;  %v462_v6 = vld [vmem:[%s18008_s16 + $0x618] sm:$0xf] }
  0x86   : > { %461 = vst [vmem:[%s18004_s29 + $0x628] sm:$0xf] %v460_v5  ;;  %v464_v7 = vld [vmem:[%s18008_s16 + $0x61c] sm:$0xf]  ;;  %v466_v8 = vld [vmem:[%s18008_s16 + $0x640] sm:$0xf] }
  0x87   : > { %463 = vst [vmem:[%s18004_s29 + $0x630] sm:$0xf] %v462_v6  ;;  %465 = vst [vmem:[%s18004_s29 + $0x638] sm:$0xf] %v464_v7  ;;  %v468_v9 = vld [vmem:[%s18008_s16 + $0x644] sm:$0xf] }
  0x88   : > { %467 = vst [vmem:[%s18004_s29 + $0x640] sm:$0xf] %v466_v8  ;;  %v470_v10 = vld [vmem:[%s18008_s16 + $0x648] sm:$0xf]  ;;  %v472_v11 = vld [vmem:[%s18008_s16 + $0x64c] sm:$0xf] }
  0x89   : > { %469 = vst [vmem:[%s18004_s29 + $0x648] sm:$0xf] %v468_v9  ;;  %471 = vst [vmem:[%s18004_s29 + $0x650] sm:$0xf] %v470_v10  ;;  %v474_v12 = vld [vmem:[%s18008_s16 + $0x650] sm:$0xf] }
  0x8a   : > { %473 = vst [vmem:[%s18004_s29 + $0x658] sm:$0xf] %v472_v11  ;;  %v476_v13 = vld [vmem:[%s18008_s16 + $0x654] sm:$0xf]  ;;  %v478_v14 = vld [vmem:[%s18008_s16 + $0x658] sm:$0xf] }
  0x8b   : > { %475 = vst [vmem:[%s18004_s29 + $0x660] sm:$0xf] %v474_v12  ;;  %477 = vst [vmem:[%s18004_s29 + $0x668] sm:$0xf] %v476_v13  ;;  %v480_v15 = vld [vmem:[%s18008_s16 + $0x65c] sm:$0xf] }
  0x8c   : > { %479 = vst [vmem:[%s18004_s29 + $0x670] sm:$0xf] %v478_v14  ;;  %v482_v16 = vld [vmem:[%s18008_s16 + $0x680] sm:$0xf]  ;;  %v484_v17 = vld [vmem:[%s18008_s16 + $0x684] sm:$0xf] }
  0x8d   : > { %481 = vst [vmem:[%s18004_s29 + $0x678] sm:$0xf] %v480_v15  ;;  %483 = vst [vmem:[%s18004_s29 + $0x680] sm:$0xf] %v482_v16  ;;  %v486_v18 = vld [vmem:[%s18008_s16 + $0x688] sm:$0xf] }
  0x8e   : > { %485 = vst [vmem:[%s18004_s29 + $0x688] sm:$0xf] %v484_v17  ;;  %v488_v19 = vld [vmem:[%s18008_s16 + $0x68c] sm:$0xf]  ;;  %v490_v20 = vld [vmem:[%s18008_s16 + $0x690] sm:$0xf] }
  0x8f   : > { %487 = vst [vmem:[%s18004_s29 + $0x690] sm:$0xf] %v486_v18  ;;  %489 = vst [vmem:[%s18004_s29 + $0x698] sm:$0xf] %v488_v19  ;;  %v492_v21 = vld [vmem:[%s18008_s16 + $0x694] sm:$0xf] }
  0x90   : > { %491 = vst [vmem:[%s18004_s29 + $0x6a0] sm:$0xf] %v490_v20  ;;  %v494_v22 = vld [vmem:[%s18008_s16 + $0x698] sm:$0xf]  ;;  %v496_v23 = vld [vmem:[%s18008_s16 + $0x69c] sm:$0xf] }
  0x91   : > { %493 = vst [vmem:[%s18004_s29 + $0x6a8] sm:$0xf] %v492_v21  ;;  %495 = vst [vmem:[%s18004_s29 + $0x6b0] sm:$0xf] %v494_v22  ;;  %v498_v24 = vld [vmem:[%s18008_s16 + $0x6c0] sm:$0xf] }
  0x92   : > { %497 = vst [vmem:[%s18004_s29 + $0x6b8] sm:$0xf] %v496_v23  ;;  %v500_v25 = vld [vmem:[%s18008_s16 + $0x6c4] sm:$0xf]  ;;  %v502_v26 = vld [vmem:[%s18008_s16 + $0x6c8] sm:$0xf] }
  0x93   : > { %499 = vst [vmem:[%s18004_s29 + $0x6c0] sm:$0xf] %v498_v24  ;;  %501 = vst [vmem:[%s18004_s29 + $0x6c8] sm:$0xf] %v500_v25  ;;  %v504_v27 = vld [vmem:[%s18008_s16 + $0x6cc] sm:$0xf] }
  0x94   : > { %503 = vst [vmem:[%s18004_s29 + $0x6d0] sm:$0xf] %v502_v26  ;;  %v506_v28 = vld [vmem:[%s18008_s16 + $0x6d0] sm:$0xf]  ;;  %v508_v29 = vld [vmem:[%s18008_s16 + $0x6d4] sm:$0xf] }
  0x95   : > { %505 = vst [vmem:[%s18004_s29 + $0x6d8] sm:$0xf] %v504_v27  ;;  %507 = vst [vmem:[%s18004_s29 + $0x6e0] sm:$0xf] %v506_v28  ;;  %v510_v30 = vld [vmem:[%s18008_s16 + $0x6d8] sm:$0xf] }
  0x96   : > { %509 = vst [vmem:[%s18004_s29 + $0x6e8] sm:$0xf] %v508_v29  ;;  %v512_v31 = vld [vmem:[%s18008_s16 + $0x6dc] sm:$0xf]  ;;  %v514_v32 = vld [vmem:[%s18008_s16 + $0x700] sm:$0xf] }
  0x97   : > { %511 = vst [vmem:[%s18004_s29 + $0x6f0] sm:$0xf] %v510_v30  ;;  %513 = vst [vmem:[%s18004_s29 + $0x6f8] sm:$0xf] %v512_v31  ;;  %v516_v33 = vld [vmem:[%s18008_s16 + $0x704] sm:$0xf] }
  0x98   : > { %515 = vst [vmem:[%s18004_s29 + $0x700] sm:$0xf] %v514_v32  ;;  %v518_v34 = vld [vmem:[%s18008_s16 + $0x708] sm:$0xf]  ;;  %v520_v35 = vld [vmem:[%s18008_s16 + $0x70c] sm:$0xf] }
  0x99   : > { %517 = vst [vmem:[%s18004_s29 + $0x708] sm:$0xf] %v516_v33  ;;  %519 = vst [vmem:[%s18004_s29 + $0x710] sm:$0xf] %v518_v34  ;;  %v522_v36 = vld [vmem:[%s18008_s16 + $0x710] sm:$0xf] }
  0x9a   : > { %521 = vst [vmem:[%s18004_s29 + $0x718] sm:$0xf] %v520_v35  ;;  %v524_v37 = vld [vmem:[%s18008_s16 + $0x714] sm:$0xf]  ;;  %v526_v38 = vld [vmem:[%s18008_s16 + $0x718] sm:$0xf] }
  0x9b   : > { %523 = vst [vmem:[%s18004_s29 + $0x720] sm:$0xf] %v522_v36  ;;  %525 = vst [vmem:[%s18004_s29 + $0x728] sm:$0xf] %v524_v37  ;;  %v528_v39 = vld [vmem:[%s18008_s16 + $0x71c] sm:$0xf] }
  0x9c   : > { %527 = vst [vmem:[%s18004_s29 + $0x730] sm:$0xf] %v526_v38  ;;  %v530_v40 = vld [vmem:[%s18008_s16 + $0x740] sm:$0xf]  ;;  %v532_v41 = vld [vmem:[%s18008_s16 + $0x744] sm:$0xf] }
  0x9d   : > { %529 = vst [vmem:[%s18004_s29 + $0x738] sm:$0xf] %v528_v39  ;;  %531 = vst [vmem:[%s18004_s29 + $0x740] sm:$0xf] %v530_v40  ;;  %v534_v42 = vld [vmem:[%s18008_s16 + $0x748] sm:$0xf] }
  0x9e   : > { %533 = vst [vmem:[%s18004_s29 + $0x748] sm:$0xf] %v532_v41  ;;  %v536_v43 = vld [vmem:[%s18008_s16 + $0x74c] sm:$0xf]  ;;  %v538_v44 = vld [vmem:[%s18008_s16 + $0x750] sm:$0xf] }
  0x9f   : > { %535 = vst [vmem:[%s18004_s29 + $0x750] sm:$0xf] %v534_v42  ;;  %537 = vst [vmem:[%s18004_s29 + $0x758] sm:$0xf] %v536_v43  ;;  %v540_v45 = vld [vmem:[%s18008_s16 + $0x754] sm:$0xf] }
  0xa0   : > { %539 = vst [vmem:[%s18004_s29 + $0x760] sm:$0xf] %v538_v44  ;;  %v542_v46 = vld [vmem:[%s18008_s16 + $0x758] sm:$0xf]  ;;  %v544_v47 = vld [vmem:[%s18008_s16 + $0x75c] sm:$0xf] }
  0xa1   : > { %541 = vst [vmem:[%s18004_s29 + $0x768] sm:$0xf] %v540_v45  ;;  %543 = vst [vmem:[%s18004_s29 + $0x770] sm:$0xf] %v542_v46  ;;  %v546_v48 = vld [vmem:[%s18008_s16 + $0x780] sm:$0xf] }
  0xa2   : > { %545 = vst [vmem:[%s18004_s29 + $0x778] sm:$0xf] %v544_v47  ;;  %v548_v49 = vld [vmem:[%s18008_s16 + $0x784] sm:$0xf]  ;;  %v550_v50 = vld [vmem:[%s18008_s16 + $0x788] sm:$0xf] }
  0xa3   : > { %547 = vst [vmem:[%s18004_s29 + $0x780] sm:$0xf] %v546_v48  ;;  %549 = vst [vmem:[%s18004_s29 + $0x788] sm:$0xf] %v548_v49  ;;  %v552_v51 = vld [vmem:[%s18008_s16 + $0x78c] sm:$0xf] }
  0xa4   : > { %551 = vst [vmem:[%s18004_s29 + $0x790] sm:$0xf] %v550_v50  ;;  %v554_v52 = vld [vmem:[%s18008_s16 + $0x790] sm:$0xf]  ;;  %v556_v53 = vld [vmem:[%s18008_s16 + $0x794] sm:$0xf] }
  0xa5   : > { %553 = vst [vmem:[%s18004_s29 + $0x798] sm:$0xf] %v552_v51  ;;  %555 = vst [vmem:[%s18004_s29 + $0x7a0] sm:$0xf] %v554_v52  ;;  %v558_v54 = vld [vmem:[%s18008_s16 + $0x798] sm:$0xf] }
  0xa6   : > { %557 = vst [vmem:[%s18004_s29 + $0x7a8] sm:$0xf] %v556_v53  ;;  %v560_v55 = vld [vmem:[%s18008_s16 + $0x79c] sm:$0xf]  ;;  %v562_v56 = vld [vmem:[%s18008_s16 + $0x7c0] sm:$0xf] }
  0xa7   : > { %559 = vst [vmem:[%s18004_s29 + $0x7b0] sm:$0xf] %v558_v54  ;;  %561 = vst [vmem:[%s18004_s29 + $0x7b8] sm:$0xf] %v560_v55  ;;  %v564_v57 = vld [vmem:[%s18008_s16 + $0x7c4] sm:$0xf] }
  0xa8   : > { %563 = vst [vmem:[%s18004_s29 + $0x7c0] sm:$0xf] %v562_v56  ;;  %v566_v58 = vld [vmem:[%s18008_s16 + $0x7c8] sm:$0xf]  ;;  %v568_v59 = vld [vmem:[%s18008_s16 + $0x7cc] sm:$0xf] }
  0xa9   : > { %565 = vst [vmem:[%s18004_s29 + $0x7c8] sm:$0xf] %v564_v57  ;;  %567 = vst [vmem:[%s18004_s29 + $0x7d0] sm:$0xf] %v566_v58  ;;  %v570_v60 = vld [vmem:[%s18008_s16 + $0x7d0] sm:$0xf] }
  0xaa   : > { %569 = vst [vmem:[%s18004_s29 + $0x7d8] sm:$0xf] %v568_v59  ;;  %v572_v61 = vld [vmem:[%s18008_s16 + $0x7d4] sm:$0xf]  ;;  %v574_v62 = vld [vmem:[%s18008_s16 + $0x7d8] sm:$0xf] }
  0xab   : > { %571 = vst [vmem:[%s18004_s29 + $0x7e0] sm:$0xf] %v570_v60  ;;  %573 = vst [vmem:[%s18004_s29 + $0x7e8] sm:$0xf] %v572_v61  ;;  %v576_v63 = vld [vmem:[%s18008_s16 + $0x7dc] sm:$0xf] }
  0xac   : > { %575 = vst [vmem:[%s18004_s29 + $0x7f0] sm:$0xf] %v574_v62  ;;  %v578_v0 = vld [vmem:[%s18008_s16 + $0x800] sm:$0xf]  ;;  %v580_v1 = vld [vmem:[%s18008_s16 + $0x804] sm:$0xf] }
  0xad   : > { %577 = vst [vmem:[%s18004_s29 + $0x7f8] sm:$0xf] %v576_v63  ;;  %579 = vst [vmem:[%s18004_s29 + $0x800] sm:$0xf] %v578_v0  ;;  %v582_v2 = vld [vmem:[%s18008_s16 + $0x808] sm:$0xf] }
  0xae   : > { %581 = vst [vmem:[%s18004_s29 + $0x808] sm:$0xf] %v580_v1  ;;  %v584_v3 = vld [vmem:[%s18008_s16 + $0x80c] sm:$0xf]  ;;  %v586_v4 = vld [vmem:[%s18008_s16 + $0x810] sm:$0xf] }
  0xaf   : > { %583 = vst [vmem:[%s18004_s29 + $0x810] sm:$0xf] %v582_v2  ;;  %585 = vst [vmem:[%s18004_s29 + $0x818] sm:$0xf] %v584_v3  ;;  %v588_v5 = vld [vmem:[%s18008_s16 + $0x814] sm:$0xf] }
  0xb0   : > { %587 = vst [vmem:[%s18004_s29 + $0x820] sm:$0xf] %v586_v4  ;;  %v590_v6 = vld [vmem:[%s18008_s16 + $0x818] sm:$0xf]  ;;  %v592_v7 = vld [vmem:[%s18008_s16 + $0x81c] sm:$0xf] }
  0xb1   : > { %589 = vst [vmem:[%s18004_s29 + $0x828] sm:$0xf] %v588_v5  ;;  %591 = vst [vmem:[%s18004_s29 + $0x830] sm:$0xf] %v590_v6  ;;  %v594_v8 = vld [vmem:[%s18008_s16 + $0x840] sm:$0xf] }
  0xb2   : > { %593 = vst [vmem:[%s18004_s29 + $0x838] sm:$0xf] %v592_v7  ;;  %v596_v9 = vld [vmem:[%s18008_s16 + $0x844] sm:$0xf]  ;;  %v598_v10 = vld [vmem:[%s18008_s16 + $0x848] sm:$0xf] }
  0xb3   : > { %595 = vst [vmem:[%s18004_s29 + $0x840] sm:$0xf] %v594_v8  ;;  %597 = vst [vmem:[%s18004_s29 + $0x848] sm:$0xf] %v596_v9  ;;  %v600_v11 = vld [vmem:[%s18008_s16 + $0x84c] sm:$0xf] }
  0xb4   : > { %599 = vst [vmem:[%s18004_s29 + $0x850] sm:$0xf] %v598_v10  ;;  %v602_v12 = vld [vmem:[%s18008_s16 + $0x850] sm:$0xf]  ;;  %v604_v13 = vld [vmem:[%s18008_s16 + $0x854] sm:$0xf] }
  0xb5   : > { %601 = vst [vmem:[%s18004_s29 + $0x858] sm:$0xf] %v600_v11  ;;  %603 = vst [vmem:[%s18004_s29 + $0x860] sm:$0xf] %v602_v12  ;;  %v606_v14 = vld [vmem:[%s18008_s16 + $0x858] sm:$0xf] }
  0xb6   : > { %605 = vst [vmem:[%s18004_s29 + $0x868] sm:$0xf] %v604_v13  ;;  %v608_v15 = vld [vmem:[%s18008_s16 + $0x85c] sm:$0xf]  ;;  %v610_v16 = vld [vmem:[%s18008_s16 + $0x880] sm:$0xf] }
  0xb7   : > { %607 = vst [vmem:[%s18004_s29 + $0x870] sm:$0xf] %v606_v14  ;;  %609 = vst [vmem:[%s18004_s29 + $0x878] sm:$0xf] %v608_v15  ;;  %v612_v17 = vld [vmem:[%s18008_s16 + $0x884] sm:$0xf] }
  0xb8   : > { %611 = vst [vmem:[%s18004_s29 + $0x880] sm:$0xf] %v610_v16  ;;  %v614_v18 = vld [vmem:[%s18008_s16 + $0x888] sm:$0xf]  ;;  %v616_v19 = vld [vmem:[%s18008_s16 + $0x88c] sm:$0xf] }
  0xb9   : > { %613 = vst [vmem:[%s18004_s29 + $0x888] sm:$0xf] %v612_v17  ;;  %615 = vst [vmem:[%s18004_s29 + $0x890] sm:$0xf] %v614_v18  ;;  %v618_v20 = vld [vmem:[%s18008_s16 + $0x890] sm:$0xf] }
  0xba   : > { %617 = vst [vmem:[%s18004_s29 + $0x898] sm:$0xf] %v616_v19  ;;  %v620_v21 = vld [vmem:[%s18008_s16 + $0x894] sm:$0xf]  ;;  %v622_v22 = vld [vmem:[%s18008_s16 + $0x898] sm:$0xf] }
  0xbb   : > { %619 = vst [vmem:[%s18004_s29 + $0x8a0] sm:$0xf] %v618_v20  ;;  %621 = vst [vmem:[%s18004_s29 + $0x8a8] sm:$0xf] %v620_v21  ;;  %v624_v23 = vld [vmem:[%s18008_s16 + $0x89c] sm:$0xf] }
  0xbc   : > { %623 = vst [vmem:[%s18004_s29 + $0x8b0] sm:$0xf] %v622_v22  ;;  %v626_v24 = vld [vmem:[%s18008_s16 + $0x8c0] sm:$0xf]  ;;  %v628_v25 = vld [vmem:[%s18008_s16 + $0x8c4] sm:$0xf] }
  0xbd   : > { %625 = vst [vmem:[%s18004_s29 + $0x8b8] sm:$0xf] %v624_v23  ;;  %627 = vst [vmem:[%s18004_s29 + $0x8c0] sm:$0xf] %v626_v24  ;;  %v630_v26 = vld [vmem:[%s18008_s16 + $0x8c8] sm:$0xf] }
  0xbe   : > { %629 = vst [vmem:[%s18004_s29 + $0x8c8] sm:$0xf] %v628_v25  ;;  %v632_v27 = vld [vmem:[%s18008_s16 + $0x8cc] sm:$0xf]  ;;  %v634_v28 = vld [vmem:[%s18008_s16 + $0x8d0] sm:$0xf] }
  0xbf   : > { %631 = vst [vmem:[%s18004_s29 + $0x8d0] sm:$0xf] %v630_v26  ;;  %633 = vst [vmem:[%s18004_s29 + $0x8d8] sm:$0xf] %v632_v27  ;;  %v636_v29 = vld [vmem:[%s18008_s16 + $0x8d4] sm:$0xf] }
  0xc0   : > { %635 = vst [vmem:[%s18004_s29 + $0x8e0] sm:$0xf] %v634_v28  ;;  %v638_v30 = vld [vmem:[%s18008_s16 + $0x8d8] sm:$0xf]  ;;  %v640_v31 = vld [vmem:[%s18008_s16 + $0x8dc] sm:$0xf] }
  0xc1   : > { %637 = vst [vmem:[%s18004_s29 + $0x8e8] sm:$0xf] %v636_v29  ;;  %639 = vst [vmem:[%s18004_s29 + $0x8f0] sm:$0xf] %v638_v30  ;;  %v642_v32 = vld [vmem:[%s18008_s16 + $0x900] sm:$0xf] }
  0xc2   : > { %641 = vst [vmem:[%s18004_s29 + $0x8f8] sm:$0xf] %v640_v31  ;;  %v644_v33 = vld [vmem:[%s18008_s16 + $0x904] sm:$0xf]  ;;  %v646_v34 = vld [vmem:[%s18008_s16 + $0x908] sm:$0xf] }
  0xc3   : > { %643 = vst [vmem:[%s18004_s29 + $0x900] sm:$0xf] %v642_v32  ;;  %645 = vst [vmem:[%s18004_s29 + $0x908] sm:$0xf] %v644_v33  ;;  %v648_v35 = vld [vmem:[%s18008_s16 + $0x90c] sm:$0xf] }
  0xc4   : > { %647 = vst [vmem:[%s18004_s29 + $0x910] sm:$0xf] %v646_v34  ;;  %v650_v36 = vld [vmem:[%s18008_s16 + $0x910] sm:$0xf]  ;;  %v652_v37 = vld [vmem:[%s18008_s16 + $0x914] sm:$0xf] }
  0xc5   : > { %649 = vst [vmem:[%s18004_s29 + $0x918] sm:$0xf] %v648_v35  ;;  %651 = vst [vmem:[%s18004_s29 + $0x920] sm:$0xf] %v650_v36  ;;  %v654_v38 = vld [vmem:[%s18008_s16 + $0x918] sm:$0xf] }
  0xc6   : > { %653 = vst [vmem:[%s18004_s29 + $0x928] sm:$0xf] %v652_v37  ;;  %v656_v39 = vld [vmem:[%s18008_s16 + $0x91c] sm:$0xf]  ;;  %v658_v40 = vld [vmem:[%s18008_s16 + $0x940] sm:$0xf] }
  0xc7   : > { %655 = vst [vmem:[%s18004_s29 + $0x930] sm:$0xf] %v654_v38  ;;  %657 = vst [vmem:[%s18004_s29 + $0x938] sm:$0xf] %v656_v39  ;;  %v660_v41 = vld [vmem:[%s18008_s16 + $0x944] sm:$0xf] }
  0xc8   : > { %659 = vst [vmem:[%s18004_s29 + $0x940] sm:$0xf] %v658_v40  ;;  %v662_v42 = vld [vmem:[%s18008_s16 + $0x948] sm:$0xf]  ;;  %v664_v43 = vld [vmem:[%s18008_s16 + $0x94c] sm:$0xf] }
  0xc9   : > { %661 = vst [vmem:[%s18004_s29 + $0x948] sm:$0xf] %v660_v41  ;;  %663 = vst [vmem:[%s18004_s29 + $0x950] sm:$0xf] %v662_v42  ;;  %v666_v44 = vld [vmem:[%s18008_s16 + $0x950] sm:$0xf] }
  0xca   : > { %665 = vst [vmem:[%s18004_s29 + $0x958] sm:$0xf] %v664_v43  ;;  %v668_v45 = vld [vmem:[%s18008_s16 + $0x954] sm:$0xf]  ;;  %v670_v46 = vld [vmem:[%s18008_s16 + $0x958] sm:$0xf] }
  0xcb   : > { %667 = vst [vmem:[%s18004_s29 + $0x960] sm:$0xf] %v666_v44  ;;  %669 = vst [vmem:[%s18004_s29 + $0x968] sm:$0xf] %v668_v45  ;;  %v672_v47 = vld [vmem:[%s18008_s16 + $0x95c] sm:$0xf] }
  0xcc   : > { %671 = vst [vmem:[%s18004_s29 + $0x970] sm:$0xf] %v670_v46  ;;  %v674_v48 = vld [vmem:[%s18008_s16 + $0x980] sm:$0xf]  ;;  %v676_v49 = vld [vmem:[%s18008_s16 + $0x984] sm:$0xf] }
  0xcd   : > { %673 = vst [vmem:[%s18004_s29 + $0x978] sm:$0xf] %v672_v47  ;;  %675 = vst [vmem:[%s18004_s29 + $0x980] sm:$0xf] %v674_v48  ;;  %v678_v50 = vld [vmem:[%s18008_s16 + $0x988] sm:$0xf] }
  0xce   : > { %677 = vst [vmem:[%s18004_s29 + $0x988] sm:$0xf] %v676_v49  ;;  %v680_v51 = vld [vmem:[%s18008_s16 + $0x98c] sm:$0xf]  ;;  %v682_v52 = vld [vmem:[%s18008_s16 + $0x990] sm:$0xf] }
  0xcf   : > { %679 = vst [vmem:[%s18004_s29 + $0x990] sm:$0xf] %v678_v50  ;;  %681 = vst [vmem:[%s18004_s29 + $0x998] sm:$0xf] %v680_v51  ;;  %v684_v53 = vld [vmem:[%s18008_s16 + $0x994] sm:$0xf] }
  0xd0   : > { %683 = vst [vmem:[%s18004_s29 + $0x9a0] sm:$0xf] %v682_v52  ;;  %v686_v54 = vld [vmem:[%s18008_s16 + $0x998] sm:$0xf]  ;;  %v688_v55 = vld [vmem:[%s18008_s16 + $0x99c] sm:$0xf] }
  0xd1   : > { %685 = vst [vmem:[%s18004_s29 + $0x9a8] sm:$0xf] %v684_v53  ;;  %687 = vst [vmem:[%s18004_s29 + $0x9b0] sm:$0xf] %v686_v54  ;;  %v690_v56 = vld [vmem:[%s18008_s16 + $0x9c0] sm:$0xf] }
  0xd2   : > { %689 = vst [vmem:[%s18004_s29 + $0x9b8] sm:$0xf] %v688_v55  ;;  %v692_v57 = vld [vmem:[%s18008_s16 + $0x9c4] sm:$0xf]  ;;  %v694_v58 = vld [vmem:[%s18008_s16 + $0x9c8] sm:$0xf] }
  0xd3   : > { %691 = vst [vmem:[%s18004_s29 + $0x9c0] sm:$0xf] %v690_v56  ;;  %693 = vst [vmem:[%s18004_s29 + $0x9c8] sm:$0xf] %v692_v57  ;;  %v696_v59 = vld [vmem:[%s18008_s16 + $0x9cc] sm:$0xf] }
  0xd4   : > { %695 = vst [vmem:[%s18004_s29 + $0x9d0] sm:$0xf] %v694_v58  ;;  %v698_v60 = vld [vmem:[%s18008_s16 + $0x9d0] sm:$0xf]  ;;  %v700_v61 = vld [vmem:[%s18008_s16 + $0x9d4] sm:$0xf] }
  0xd5   : > { %697 = vst [vmem:[%s18004_s29 + $0x9d8] sm:$0xf] %v696_v59  ;;  %699 = vst [vmem:[%s18004_s29 + $0x9e0] sm:$0xf] %v698_v60  ;;  %v702_v62 = vld [vmem:[%s18008_s16 + $0x9d8] sm:$0xf] }
  0xd6   : > { %701 = vst [vmem:[%s18004_s29 + $0x9e8] sm:$0xf] %v700_v61  ;;  %v704_v63 = vld [vmem:[%s18008_s16 + $0x9dc] sm:$0xf]  ;;  %v706_v0 = vld [vmem:[%s18008_s16 + $0xa00] sm:$0xf] }
  0xd7   : > { %703 = vst [vmem:[%s18004_s29 + $0x9f0] sm:$0xf] %v702_v62  ;;  %705 = vst [vmem:[%s18004_s29 + $0x9f8] sm:$0xf] %v704_v63  ;;  %v708_v1 = vld [vmem:[%s18008_s16 + $0xa04] sm:$0xf] }
  0xd8   : > { %707 = vst [vmem:[%s18004_s29 + $0xa00] sm:$0xf] %v706_v0  ;;  %v710_v2 = vld [vmem:[%s18008_s16 + $0xa08] sm:$0xf]  ;;  %v712_v3 = vld [vmem:[%s18008_s16 + $0xa0c] sm:$0xf] }
  0xd9   : > { %709 = vst [vmem:[%s18004_s29 + $0xa08] sm:$0xf] %v708_v1  ;;  %711 = vst [vmem:[%s18004_s29 + $0xa10] sm:$0xf] %v710_v2  ;;  %v714_v4 = vld [vmem:[%s18008_s16 + $0xa10] sm:$0xf] }
  0xda   : > { %713 = vst [vmem:[%s18004_s29 + $0xa18] sm:$0xf] %v712_v3  ;;  %v716_v5 = vld [vmem:[%s18008_s16 + $0xa14] sm:$0xf]  ;;  %v718_v6 = vld [vmem:[%s18008_s16 + $0xa18] sm:$0xf] }
  0xdb   : > { %715 = vst [vmem:[%s18004_s29 + $0xa20] sm:$0xf] %v714_v4  ;;  %717 = vst [vmem:[%s18004_s29 + $0xa28] sm:$0xf] %v716_v5  ;;  %v720_v7 = vld [vmem:[%s18008_s16 + $0xa1c] sm:$0xf] }
  0xdc   : > { %719 = vst [vmem:[%s18004_s29 + $0xa30] sm:$0xf] %v718_v6  ;;  %v722_v8 = vld [vmem:[%s18008_s16 + $0xa40] sm:$0xf]  ;;  %v724_v9 = vld [vmem:[%s18008_s16 + $0xa44] sm:$0xf] }
  0xdd   : > { %721 = vst [vmem:[%s18004_s29 + $0xa38] sm:$0xf] %v720_v7  ;;  %723 = vst [vmem:[%s18004_s29 + $0xa40] sm:$0xf] %v722_v8  ;;  %v726_v10 = vld [vmem:[%s18008_s16 + $0xa48] sm:$0xf] }
  0xde   : > { %725 = vst [vmem:[%s18004_s29 + $0xa48] sm:$0xf] %v724_v9  ;;  %v728_v11 = vld [vmem:[%s18008_s16 + $0xa4c] sm:$0xf]  ;;  %v730_v12 = vld [vmem:[%s18008_s16 + $0xa50] sm:$0xf] }
  0xdf   : > { %727 = vst [vmem:[%s18004_s29 + $0xa50] sm:$0xf] %v726_v10  ;;  %729 = vst [vmem:[%s18004_s29 + $0xa58] sm:$0xf] %v728_v11  ;;  %v732_v13 = vld [vmem:[%s18008_s16 + $0xa54] sm:$0xf] }
  0xe0   : > { %731 = vst [vmem:[%s18004_s29 + $0xa60] sm:$0xf] %v730_v12  ;;  %v734_v14 = vld [vmem:[%s18008_s16 + $0xa58] sm:$0xf]  ;;  %v736_v15 = vld [vmem:[%s18008_s16 + $0xa5c] sm:$0xf] }
  0xe1   : > { %733 = vst [vmem:[%s18004_s29 + $0xa68] sm:$0xf] %v732_v13  ;;  %735 = vst [vmem:[%s18004_s29 + $0xa70] sm:$0xf] %v734_v14  ;;  %v738_v16 = vld [vmem:[%s18008_s16 + $0xa80] sm:$0xf] }
  0xe2   : > { %737 = vst [vmem:[%s18004_s29 + $0xa78] sm:$0xf] %v736_v15  ;;  %v740_v17 = vld [vmem:[%s18008_s16 + $0xa84] sm:$0xf]  ;;  %v742_v18 = vld [vmem:[%s18008_s16 + $0xa88] sm:$0xf] }
  0xe3   : > { %739 = vst [vmem:[%s18004_s29 + $0xa80] sm:$0xf] %v738_v16  ;;  %741 = vst [vmem:[%s18004_s29 + $0xa88] sm:$0xf] %v740_v17  ;;  %v744_v19 = vld [vmem:[%s18008_s16 + $0xa8c] sm:$0xf] }
  0xe4   : > { %743 = vst [vmem:[%s18004_s29 + $0xa90] sm:$0xf] %v742_v18  ;;  %v746_v20 = vld [vmem:[%s18008_s16 + $0xa90] sm:$0xf]  ;;  %v748_v21 = vld [vmem:[%s18008_s16 + $0xa94] sm:$0xf] }
  0xe5   : > { %745 = vst [vmem:[%s18004_s29 + $0xa98] sm:$0xf] %v744_v19  ;;  %747 = vst [vmem:[%s18004_s29 + $0xaa0] sm:$0xf] %v746_v20  ;;  %v750_v22 = vld [vmem:[%s18008_s16 + $0xa98] sm:$0xf] }
  0xe6   : > { %749 = vst [vmem:[%s18004_s29 + $0xaa8] sm:$0xf] %v748_v21  ;;  %v752_v23 = vld [vmem:[%s18008_s16 + $0xa9c] sm:$0xf]  ;;  %v754_v24 = vld [vmem:[%s18008_s16 + $0xac0] sm:$0xf] }
  0xe7   : > { %751 = vst [vmem:[%s18004_s29 + $0xab0] sm:$0xf] %v750_v22  ;;  %753 = vst [vmem:[%s18004_s29 + $0xab8] sm:$0xf] %v752_v23  ;;  %v756_v25 = vld [vmem:[%s18008_s16 + $0xac4] sm:$0xf] }
  0xe8   : > { %755 = vst [vmem:[%s18004_s29 + $0xac0] sm:$0xf] %v754_v24  ;;  %v758_v26 = vld [vmem:[%s18008_s16 + $0xac8] sm:$0xf]  ;;  %v760_v27 = vld [vmem:[%s18008_s16 + $0xacc] sm:$0xf] }
  0xe9   : > { %757 = vst [vmem:[%s18004_s29 + $0xac8] sm:$0xf] %v756_v25  ;;  %759 = vst [vmem:[%s18004_s29 + $0xad0] sm:$0xf] %v758_v26  ;;  %v762_v28 = vld [vmem:[%s18008_s16 + $0xad0] sm:$0xf] }
  0xea   : > { %761 = vst [vmem:[%s18004_s29 + $0xad8] sm:$0xf] %v760_v27  ;;  %v764_v29 = vld [vmem:[%s18008_s16 + $0xad4] sm:$0xf]  ;;  %v766_v30 = vld [vmem:[%s18008_s16 + $0xad8] sm:$0xf] }
  0xeb   : > { %763 = vst [vmem:[%s18004_s29 + $0xae0] sm:$0xf] %v762_v28  ;;  %765 = vst [vmem:[%s18004_s29 + $0xae8] sm:$0xf] %v764_v29  ;;  %v768_v31 = vld [vmem:[%s18008_s16 + $0xadc] sm:$0xf] }
  0xec   : > { %767 = vst [vmem:[%s18004_s29 + $0xaf0] sm:$0xf] %v766_v30  ;;  %v770_v32 = vld [vmem:[%s18008_s16 + $0xb00] sm:$0xf]  ;;  %v772_v33 = vld [vmem:[%s18008_s16 + $0xb04] sm:$0xf] }
  0xed   : > { %769 = vst [vmem:[%s18004_s29 + $0xaf8] sm:$0xf] %v768_v31  ;;  %771 = vst [vmem:[%s18004_s29 + $0xb00] sm:$0xf] %v770_v32  ;;  %v774_v34 = vld [vmem:[%s18008_s16 + $0xb08] sm:$0xf] }
  0xee   : > { %773 = vst [vmem:[%s18004_s29 + $0xb08] sm:$0xf] %v772_v33  ;;  %v776_v35 = vld [vmem:[%s18008_s16 + $0xb0c] sm:$0xf]  ;;  %v778_v36 = vld [vmem:[%s18008_s16 + $0xb10] sm:$0xf] }
  0xef   : > { %775 = vst [vmem:[%s18004_s29 + $0xb10] sm:$0xf] %v774_v34  ;;  %777 = vst [vmem:[%s18004_s29 + $0xb18] sm:$0xf] %v776_v35  ;;  %v780_v37 = vld [vmem:[%s18008_s16 + $0xb14] sm:$0xf] }
  0xf0   : > { %779 = vst [vmem:[%s18004_s29 + $0xb20] sm:$0xf] %v778_v36  ;;  %v782_v38 = vld [vmem:[%s18008_s16 + $0xb18] sm:$0xf]  ;;  %v784_v39 = vld [vmem:[%s18008_s16 + $0xb1c] sm:$0xf] }
  0xf1   : > { %781 = vst [vmem:[%s18004_s29 + $0xb28] sm:$0xf] %v780_v37  ;;  %783 = vst [vmem:[%s18004_s29 + $0xb30] sm:$0xf] %v782_v38  ;;  %v786_v40 = vld [vmem:[%s18008_s16 + $0xb40] sm:$0xf] }
  0xf2   : > { %785 = vst [vmem:[%s18004_s29 + $0xb38] sm:$0xf] %v784_v39  ;;  %v788_v41 = vld [vmem:[%s18008_s16 + $0xb44] sm:$0xf]  ;;  %v790_v42 = vld [vmem:[%s18008_s16 + $0xb48] sm:$0xf] }
  0xf3   : > { %787 = vst [vmem:[%s18004_s29 + $0xb40] sm:$0xf] %v786_v40  ;;  %789 = vst [vmem:[%s18004_s29 + $0xb48] sm:$0xf] %v788_v41  ;;  %v792_v43 = vld [vmem:[%s18008_s16 + $0xb4c] sm:$0xf] }
  0xf4   : > { %791 = vst [vmem:[%s18004_s29 + $0xb50] sm:$0xf] %v790_v42  ;;  %v794_v44 = vld [vmem:[%s18008_s16 + $0xb50] sm:$0xf]  ;;  %v796_v45 = vld [vmem:[%s18008_s16 + $0xb54] sm:$0xf] }
  0xf5   : > { %793 = vst [vmem:[%s18004_s29 + $0xb58] sm:$0xf] %v792_v43  ;;  %795 = vst [vmem:[%s18004_s29 + $0xb60] sm:$0xf] %v794_v44  ;;  %v798_v46 = vld [vmem:[%s18008_s16 + $0xb58] sm:$0xf] }
  0xf6   : > { %797 = vst [vmem:[%s18004_s29 + $0xb68] sm:$0xf] %v796_v45  ;;  %v800_v47 = vld [vmem:[%s18008_s16 + $0xb5c] sm:$0xf]  ;;  %v802_v48 = vld [vmem:[%s18008_s16 + $0xb80] sm:$0xf] }
  0xf7   : > { %799 = vst [vmem:[%s18004_s29 + $0xb70] sm:$0xf] %v798_v46  ;;  %801 = vst [vmem:[%s18004_s29 + $0xb78] sm:$0xf] %v800_v47  ;;  %v804_v49 = vld [vmem:[%s18008_s16 + $0xb84] sm:$0xf] }
  0xf8   : > { %803 = vst [vmem:[%s18004_s29 + $0xb80] sm:$0xf] %v802_v48  ;;  %v806_v50 = vld [vmem:[%s18008_s16 + $0xb88] sm:$0xf]  ;;  %v808_v51 = vld [vmem:[%s18008_s16 + $0xb8c] sm:$0xf] }
  0xf9   : > { %805 = vst [vmem:[%s18004_s29 + $0xb88] sm:$0xf] %v804_v49  ;;  %807 = vst [vmem:[%s18004_s29 + $0xb90] sm:$0xf] %v806_v50  ;;  %v810_v52 = vld [vmem:[%s18008_s16 + $0xb90] sm:$0xf] }
  0xfa   : > { %809 = vst [vmem:[%s18004_s29 + $0xb98] sm:$0xf] %v808_v51  ;;  %v812_v53 = vld [vmem:[%s18008_s16 + $0xb94] sm:$0xf]  ;;  %v814_v54 = vld [vmem:[%s18008_s16 + $0xb98] sm:$0xf] }
  0xfb   : > { %811 = vst [vmem:[%s18004_s29 + $0xba0] sm:$0xf] %v810_v52  ;;  %813 = vst [vmem:[%s18004_s29 + $0xba8] sm:$0xf] %v812_v53  ;;  %v816_v55 = vld [vmem:[%s18008_s16 + $0xb9c] sm:$0xf] }
  0xfc   : > { %815 = vst [vmem:[%s18004_s29 + $0xbb0] sm:$0xf] %v814_v54  ;;  %v818_v56 = vld [vmem:[%s18008_s16 + $0xbc0] sm:$0xf]  ;;  %v820_v57 = vld [vmem:[%s18008_s16 + $0xbc4] sm:$0xf] }
  0xfd   : > { %817 = vst [vmem:[%s18004_s29 + $0xbb8] sm:$0xf] %v816_v55  ;;  %819 = vst [vmem:[%s18004_s29 + $0xbc0] sm:$0xf] %v818_v56  ;;  %v822_v58 = vld [vmem:[%s18008_s16 + $0xbc8] sm:$0xf] }
  0xfe   : > { %821 = vst [vmem:[%s18004_s29 + $0xbc8] sm:$0xf] %v820_v57  ;;  %v824_v59 = vld [vmem:[%s18008_s16 + $0xbcc] sm:$0xf]  ;;  %v826_v60 = vld [vmem:[%s18008_s16 + $0xbd0] sm:$0xf] }
  0xff   : > { %823 = vst [vmem:[%s18004_s29 + $0xbd0] sm:$0xf] %v822_v58  ;;  %825 = vst [vmem:[%s18004_s29 + $0xbd8] sm:$0xf] %v824_v59  ;;  %v828_v61 = vld [vmem:[%s18008_s16 + $0xbd4] sm:$0xf] }
 0x100   : > { %827 = vst [vmem:[%s18004_s29 + $0xbe0] sm:$0xf] %v826_v60  ;;  %v830_v62 = vld [vmem:[%s18008_s16 + $0xbd8] sm:$0xf]  ;;  %v832_v63 = vld [vmem:[%s18008_s16 + $0xbdc] sm:$0xf] }
 0x101   : > { %829 = vst [vmem:[%s18004_s29 + $0xbe8] sm:$0xf] %v828_v61  ;;  %831 = vst [vmem:[%s18004_s29 + $0xbf0] sm:$0xf] %v830_v62  ;;  %v834_v0 = vld [vmem:[%s18008_s16 + $0xc00] sm:$0xf] }
 0x102   : > { %833 = vst [vmem:[%s18004_s29 + $0xbf8] sm:$0xf] %v832_v63  ;;  %v836_v1 = vld [vmem:[%s18008_s16 + $0xc04] sm:$0xf]  ;;  %v838_v2 = vld [vmem:[%s18008_s16 + $0xc08] sm:$0xf] }
 0x103   : > { %835 = vst [vmem:[%s18004_s29 + $0xc00] sm:$0xf] %v834_v0  ;;  %837 = vst [vmem:[%s18004_s29 + $0xc08] sm:$0xf] %v836_v1  ;;  %v840_v3 = vld [vmem:[%s18008_s16 + $0xc0c] sm:$0xf] }
 0x104   : > { %839 = vst [vmem:[%s18004_s29 + $0xc10] sm:$0xf] %v838_v2  ;;  %v842_v4 = vld [vmem:[%s18008_s16 + $0xc10] sm:$0xf]  ;;  %v844_v5 = vld [vmem:[%s18008_s16 + $0xc14] sm:$0xf] }
 0x105   : > { %841 = vst [vmem:[%s18004_s29 + $0xc18] sm:$0xf] %v840_v3  ;;  %843 = vst [vmem:[%s18004_s29 + $0xc20] sm:$0xf] %v842_v4  ;;  %v846_v6 = vld [vmem:[%s18008_s16 + $0xc18] sm:$0xf] }
 0x106   : > { %845 = vst [vmem:[%s18004_s29 + $0xc28] sm:$0xf] %v844_v5  ;;  %v848_v7 = vld [vmem:[%s18008_s16 + $0xc1c] sm:$0xf]  ;;  %v850_v8 = vld [vmem:[%s18008_s16 + $0xc40] sm:$0xf] }
 0x107   : > { %847 = vst [vmem:[%s18004_s29 + $0xc30] sm:$0xf] %v846_v6  ;;  %849 = vst [vmem:[%s18004_s29 + $0xc38] sm:$0xf] %v848_v7  ;;  %v852_v9 = vld [vmem:[%s18008_s16 + $0xc44] sm:$0xf] }
 0x108   : > { %851 = vst [vmem:[%s18004_s29 + $0xc40] sm:$0xf] %v850_v8  ;;  %v854_v10 = vld [vmem:[%s18008_s16 + $0xc48] sm:$0xf]  ;;  %v856_v11 = vld [vmem:[%s18008_s16 + $0xc4c] sm:$0xf] }
 0x109   : > { %853 = vst [vmem:[%s18004_s29 + $0xc48] sm:$0xf] %v852_v9  ;;  %855 = vst [vmem:[%s18004_s29 + $0xc50] sm:$0xf] %v854_v10  ;;  %v858_v12 = vld [vmem:[%s18008_s16 + $0xc50] sm:$0xf] }
 0x10a   : > { %857 = vst [vmem:[%s18004_s29 + $0xc58] sm:$0xf] %v856_v11  ;;  %v860_v13 = vld [vmem:[%s18008_s16 + $0xc54] sm:$0xf]  ;;  %v862_v14 = vld [vmem:[%s18008_s16 + $0xc58] sm:$0xf] }
 0x10b   : > { %859 = vst [vmem:[%s18004_s29 + $0xc60] sm:$0xf] %v858_v12  ;;  %861 = vst [vmem:[%s18004_s29 + $0xc68] sm:$0xf] %v860_v13  ;;  %v864_v15 = vld [vmem:[%s18008_s16 + $0xc5c] sm:$0xf] }
 0x10c   : > { %863 = vst [vmem:[%s18004_s29 + $0xc70] sm:$0xf] %v862_v14  ;;  %v866_v16 = vld [vmem:[%s18008_s16 + $0xc80] sm:$0xf]  ;;  %v868_v17 = vld [vmem:[%s18008_s16 + $0xc84] sm:$0xf] }
 0x10d   : > { %865 = vst [vmem:[%s18004_s29 + $0xc78] sm:$0xf] %v864_v15  ;;  %867 = vst [vmem:[%s18004_s29 + $0xc80] sm:$0xf] %v866_v16  ;;  %v870_v18 = vld [vmem:[%s18008_s16 + $0xc88] sm:$0xf] }
 0x10e   : > { %869 = vst [vmem:[%s18004_s29 + $0xc88] sm:$0xf] %v868_v17  ;;  %v872_v19 = vld [vmem:[%s18008_s16 + $0xc8c] sm:$0xf]  ;;  %v874_v20 = vld [vmem:[%s18008_s16 + $0xc90] sm:$0xf] }
 0x10f   : > { %871 = vst [vmem:[%s18004_s29 + $0xc90] sm:$0xf] %v870_v18  ;;  %873 = vst [vmem:[%s18004_s29 + $0xc98] sm:$0xf] %v872_v19  ;;  %v876_v21 = vld [vmem:[%s18008_s16 + $0xc94] sm:$0xf] }
 0x110   : > { %875 = vst [vmem:[%s18004_s29 + $0xca0] sm:$0xf] %v874_v20  ;;  %v878_v22 = vld [vmem:[%s18008_s16 + $0xc98] sm:$0xf]  ;;  %v880_v23 = vld [vmem:[%s18008_s16 + $0xc9c] sm:$0xf] }
 0x111   : > { %877 = vst [vmem:[%s18004_s29 + $0xca8] sm:$0xf] %v876_v21  ;;  %879 = vst [vmem:[%s18004_s29 + $0xcb0] sm:$0xf] %v878_v22  ;;  %v882_v24 = vld [vmem:[%s18008_s16 + $0xcc0] sm:$0xf] }
 0x112   : > { %881 = vst [vmem:[%s18004_s29 + $0xcb8] sm:$0xf] %v880_v23  ;;  %v884_v25 = vld [vmem:[%s18008_s16 + $0xcc4] sm:$0xf]  ;;  %v886_v26 = vld [vmem:[%s18008_s16 + $0xcc8] sm:$0xf] }
 0x113   : > { %883 = vst [vmem:[%s18004_s29 + $0xcc0] sm:$0xf] %v882_v24  ;;  %885 = vst [vmem:[%s18004_s29 + $0xcc8] sm:$0xf] %v884_v25  ;;  %v888_v27 = vld [vmem:[%s18008_s16 + $0xccc] sm:$0xf] }
 0x114   : > { %887 = vst [vmem:[%s18004_s29 + $0xcd0] sm:$0xf] %v886_v26  ;;  %v890_v28 = vld [vmem:[%s18008_s16 + $0xcd0] sm:$0xf]  ;;  %v892_v29 = vld [vmem:[%s18008_s16 + $0xcd4] sm:$0xf] }
 0x115   : > { %889 = vst [vmem:[%s18004_s29 + $0xcd8] sm:$0xf] %v888_v27  ;;  %891 = vst [vmem:[%s18004_s29 + $0xce0] sm:$0xf] %v890_v28  ;;  %v894_v30 = vld [vmem:[%s18008_s16 + $0xcd8] sm:$0xf] }
 0x116   : > { %893 = vst [vmem:[%s18004_s29 + $0xce8] sm:$0xf] %v892_v29  ;;  %v896_v31 = vld [vmem:[%s18008_s16 + $0xcdc] sm:$0xf]  ;;  %v898_v32 = vld [vmem:[%s18008_s16 + $0xd00] sm:$0xf] }
 0x117   : > { %895 = vst [vmem:[%s18004_s29 + $0xcf0] sm:$0xf] %v894_v30  ;;  %897 = vst [vmem:[%s18004_s29 + $0xcf8] sm:$0xf] %v896_v31  ;;  %v900_v33 = vld [vmem:[%s18008_s16 + $0xd04] sm:$0xf] }
 0x118   : > { %899 = vst [vmem:[%s18004_s29 + $0xd00] sm:$0xf] %v898_v32  ;;  %v902_v34 = vld [vmem:[%s18008_s16 + $0xd08] sm:$0xf]  ;;  %v904_v35 = vld [vmem:[%s18008_s16 + $0xd0c] sm:$0xf] }
 0x119   : > { %901 = vst [vmem:[%s18004_s29 + $0xd08] sm:$0xf] %v900_v33  ;;  %903 = vst [vmem:[%s18004_s29 + $0xd10] sm:$0xf] %v902_v34  ;;  %v906_v36 = vld [vmem:[%s18008_s16 + $0xd10] sm:$0xf] }
 0x11a   : > { %905 = vst [vmem:[%s18004_s29 + $0xd18] sm:$0xf] %v904_v35  ;;  %v908_v37 = vld [vmem:[%s18008_s16 + $0xd14] sm:$0xf]  ;;  %v910_v38 = vld [vmem:[%s18008_s16 + $0xd18] sm:$0xf] }
 0x11b   : > { %907 = vst [vmem:[%s18004_s29 + $0xd20] sm:$0xf] %v906_v36  ;;  %909 = vst [vmem:[%s18004_s29 + $0xd28] sm:$0xf] %v908_v37  ;;  %v912_v39 = vld [vmem:[%s18008_s16 + $0xd1c] sm:$0xf] }
 0x11c   : > { %911 = vst [vmem:[%s18004_s29 + $0xd30] sm:$0xf] %v910_v38  ;;  %v914_v40 = vld [vmem:[%s18008_s16 + $0xd40] sm:$0xf]  ;;  %v916_v41 = vld [vmem:[%s18008_s16 + $0xd44] sm:$0xf] }
 0x11d   : > { %913 = vst [vmem:[%s18004_s29 + $0xd38] sm:$0xf] %v912_v39  ;;  %915 = vst [vmem:[%s18004_s29 + $0xd40] sm:$0xf] %v914_v40  ;;  %v918_v42 = vld [vmem:[%s18008_s16 + $0xd48] sm:$0xf] }
 0x11e   : > { %917 = vst [vmem:[%s18004_s29 + $0xd48] sm:$0xf] %v916_v41  ;;  %v920_v43 = vld [vmem:[%s18008_s16 + $0xd4c] sm:$0xf]  ;;  %v922_v44 = vld [vmem:[%s18008_s16 + $0xd50] sm:$0xf] }
 0x11f   : > { %919 = vst [vmem:[%s18004_s29 + $0xd50] sm:$0xf] %v918_v42  ;;  %921 = vst [vmem:[%s18004_s29 + $0xd58] sm:$0xf] %v920_v43  ;;  %v924_v45 = vld [vmem:[%s18008_s16 + $0xd54] sm:$0xf] }
 0x120   : > { %923 = vst [vmem:[%s18004_s29 + $0xd60] sm:$0xf] %v922_v44  ;;  %v926_v46 = vld [vmem:[%s18008_s16 + $0xd58] sm:$0xf]  ;;  %v928_v47 = vld [vmem:[%s18008_s16 + $0xd5c] sm:$0xf] }
 0x121   : > { %925 = vst [vmem:[%s18004_s29 + $0xd68] sm:$0xf] %v924_v45  ;;  %927 = vst [vmem:[%s18004_s29 + $0xd70] sm:$0xf] %v926_v46  ;;  %v930_v48 = vld [vmem:[%s18008_s16 + $0xd80] sm:$0xf] }
 0x122   : > { %929 = vst [vmem:[%s18004_s29 + $0xd78] sm:$0xf] %v928_v47  ;;  %v932_v49 = vld [vmem:[%s18008_s16 + $0xd84] sm:$0xf]  ;;  %v934_v50 = vld [vmem:[%s18008_s16 + $0xd88] sm:$0xf] }
 0x123   : > { %931 = vst [vmem:[%s18004_s29 + $0xd80] sm:$0xf] %v930_v48  ;;  %933 = vst [vmem:[%s18004_s29 + $0xd88] sm:$0xf] %v932_v49  ;;  %v936_v51 = vld [vmem:[%s18008_s16 + $0xd8c] sm:$0xf] }
 0x124   : > { %935 = vst [vmem:[%s18004_s29 + $0xd90] sm:$0xf] %v934_v50  ;;  %v938_v52 = vld [vmem:[%s18008_s16 + $0xd90] sm:$0xf]  ;;  %v940_v53 = vld [vmem:[%s18008_s16 + $0xd94] sm:$0xf] }
 0x125   : > { %937 = vst [vmem:[%s18004_s29 + $0xd98] sm:$0xf] %v936_v51  ;;  %939 = vst [vmem:[%s18004_s29 + $0xda0] sm:$0xf] %v938_v52  ;;  %v942_v54 = vld [vmem:[%s18008_s16 + $0xd98] sm:$0xf] }
 0x126   : > { %941 = vst [vmem:[%s18004_s29 + $0xda8] sm:$0xf] %v940_v53  ;;  %v944_v55 = vld [vmem:[%s18008_s16 + $0xd9c] sm:$0xf]  ;;  %v946_v56 = vld [vmem:[%s18008_s16 + $0xdc0] sm:$0xf] }
 0x127   : > { %943 = vst [vmem:[%s18004_s29 + $0xdb0] sm:$0xf] %v942_v54  ;;  %945 = vst [vmem:[%s18004_s29 + $0xdb8] sm:$0xf] %v944_v55  ;;  %v948_v57 = vld [vmem:[%s18008_s16 + $0xdc4] sm:$0xf] }
 0x128   : > { %947 = vst [vmem:[%s18004_s29 + $0xdc0] sm:$0xf] %v946_v56  ;;  %v950_v58 = vld [vmem:[%s18008_s16 + $0xdc8] sm:$0xf]  ;;  %v952_v59 = vld [vmem:[%s18008_s16 + $0xdcc] sm:$0xf] }
 0x129   : > { %949 = vst [vmem:[%s18004_s29 + $0xdc8] sm:$0xf] %v948_v57  ;;  %951 = vst [vmem:[%s18004_s29 + $0xdd0] sm:$0xf] %v950_v58  ;;  %v954_v60 = vld [vmem:[%s18008_s16 + $0xdd0] sm:$0xf] }
 0x12a   : > { %953 = vst [vmem:[%s18004_s29 + $0xdd8] sm:$0xf] %v952_v59  ;;  %v956_v61 = vld [vmem:[%s18008_s16 + $0xdd4] sm:$0xf]  ;;  %v958_v62 = vld [vmem:[%s18008_s16 + $0xdd8] sm:$0xf] }
 0x12b   : > { %955 = vst [vmem:[%s18004_s29 + $0xde0] sm:$0xf] %v954_v60  ;;  %957 = vst [vmem:[%s18004_s29 + $0xde8] sm:$0xf] %v956_v61  ;;  %v960_v63 = vld [vmem:[%s18008_s16 + $0xddc] sm:$0xf] }
 0x12c   : > { %959 = vst [vmem:[%s18004_s29 + $0xdf0] sm:$0xf] %v958_v62  ;;  %v962_v0 = vld [vmem:[%s18008_s16 + $0xe00] sm:$0xf]  ;;  %v964_v1 = vld [vmem:[%s18008_s16 + $0xe04] sm:$0xf] }
 0x12d   : > { %961 = vst [vmem:[%s18004_s29 + $0xdf8] sm:$0xf] %v960_v63  ;;  %963 = vst [vmem:[%s18004_s29 + $0xe00] sm:$0xf] %v962_v0  ;;  %v966_v2 = vld [vmem:[%s18008_s16 + $0xe08] sm:$0xf] }
 0x12e   : > { %965 = vst [vmem:[%s18004_s29 + $0xe08] sm:$0xf] %v964_v1  ;;  %v968_v3 = vld [vmem:[%s18008_s16 + $0xe0c] sm:$0xf]  ;;  %v970_v4 = vld [vmem:[%s18008_s16 + $0xe10] sm:$0xf] }
 0x12f   : > { %967 = vst [vmem:[%s18004_s29 + $0xe10] sm:$0xf] %v966_v2  ;;  %969 = vst [vmem:[%s18004_s29 + $0xe18] sm:$0xf] %v968_v3  ;;  %v972_v5 = vld [vmem:[%s18008_s16 + $0xe14] sm:$0xf] }
 0x130   : > { %971 = vst [vmem:[%s18004_s29 + $0xe20] sm:$0xf] %v970_v4  ;;  %v974_v6 = vld [vmem:[%s18008_s16 + $0xe18] sm:$0xf]  ;;  %v976_v7 = vld [vmem:[%s18008_s16 + $0xe1c] sm:$0xf] }
 0x131   : > { %973 = vst [vmem:[%s18004_s29 + $0xe28] sm:$0xf] %v972_v5  ;;  %975 = vst [vmem:[%s18004_s29 + $0xe30] sm:$0xf] %v974_v6  ;;  %v978_v8 = vld [vmem:[%s18008_s16 + $0xe40] sm:$0xf] }
 0x132   : > { %977 = vst [vmem:[%s18004_s29 + $0xe38] sm:$0xf] %v976_v7  ;;  %v980_v9 = vld [vmem:[%s18008_s16 + $0xe44] sm:$0xf]  ;;  %v982_v10 = vld [vmem:[%s18008_s16 + $0xe48] sm:$0xf] }
 0x133   : > { %979 = vst [vmem:[%s18004_s29 + $0xe40] sm:$0xf] %v978_v8  ;;  %981 = vst [vmem:[%s18004_s29 + $0xe48] sm:$0xf] %v980_v9  ;;  %v984_v11 = vld [vmem:[%s18008_s16 + $0xe4c] sm:$0xf] }
 0x134   : > { %983 = vst [vmem:[%s18004_s29 + $0xe50] sm:$0xf] %v982_v10  ;;  %v986_v12 = vld [vmem:[%s18008_s16 + $0xe50] sm:$0xf]  ;;  %v988_v13 = vld [vmem:[%s18008_s16 + $0xe54] sm:$0xf] }
 0x135   : > { %985 = vst [vmem:[%s18004_s29 + $0xe58] sm:$0xf] %v984_v11  ;;  %987 = vst [vmem:[%s18004_s29 + $0xe60] sm:$0xf] %v986_v12  ;;  %v990_v14 = vld [vmem:[%s18008_s16 + $0xe58] sm:$0xf] }
 0x136   : > { %989 = vst [vmem:[%s18004_s29 + $0xe68] sm:$0xf] %v988_v13  ;;  %v992_v15 = vld [vmem:[%s18008_s16 + $0xe5c] sm:$0xf]  ;;  %v994_v16 = vld [vmem:[%s18008_s16 + $0xe80] sm:$0xf] }
 0x137   : > { %991 = vst [vmem:[%s18004_s29 + $0xe70] sm:$0xf] %v990_v14  ;;  %993 = vst [vmem:[%s18004_s29 + $0xe78] sm:$0xf] %v992_v15  ;;  %v996_v17 = vld [vmem:[%s18008_s16 + $0xe84] sm:$0xf] }
 0x138   : > { %995 = vst [vmem:[%s18004_s29 + $0xe80] sm:$0xf] %v994_v16  ;;  %v998_v18 = vld [vmem:[%s18008_s16 + $0xe88] sm:$0xf]  ;;  %v1000_v19 = vld [vmem:[%s18008_s16 + $0xe8c] sm:$0xf] }
 0x139   : > { %997 = vst [vmem:[%s18004_s29 + $0xe88] sm:$0xf] %v996_v17  ;;  %999 = vst [vmem:[%s18004_s29 + $0xe90] sm:$0xf] %v998_v18  ;;  %v1002_v20 = vld [vmem:[%s18008_s16 + $0xe90] sm:$0xf] }
 0x13a   : > { %1001 = vst [vmem:[%s18004_s29 + $0xe98] sm:$0xf] %v1000_v19  ;;  %v1004_v21 = vld [vmem:[%s18008_s16 + $0xe94] sm:$0xf]  ;;  %v1006_v22 = vld [vmem:[%s18008_s16 + $0xe98] sm:$0xf] }
 0x13b   : > { %1003 = vst [vmem:[%s18004_s29 + $0xea0] sm:$0xf] %v1002_v20  ;;  %1005 = vst [vmem:[%s18004_s29 + $0xea8] sm:$0xf] %v1004_v21  ;;  %v1008_v23 = vld [vmem:[%s18008_s16 + $0xe9c] sm:$0xf] }
 0x13c   : > { %1007 = vst [vmem:[%s18004_s29 + $0xeb0] sm:$0xf] %v1006_v22  ;;  %v1010_v24 = vld [vmem:[%s18008_s16 + $0xec0] sm:$0xf]  ;;  %v1012_v25 = vld [vmem:[%s18008_s16 + $0xec4] sm:$0xf] }
 0x13d   : > { %1009 = vst [vmem:[%s18004_s29 + $0xeb8] sm:$0xf] %v1008_v23  ;;  %1011 = vst [vmem:[%s18004_s29 + $0xec0] sm:$0xf] %v1010_v24  ;;  %v1014_v26 = vld [vmem:[%s18008_s16 + $0xec8] sm:$0xf] }
 0x13e   : > { %1013 = vst [vmem:[%s18004_s29 + $0xec8] sm:$0xf] %v1012_v25  ;;  %v1016_v27 = vld [vmem:[%s18008_s16 + $0xecc] sm:$0xf]  ;;  %v1018_v28 = vld [vmem:[%s18008_s16 + $0xed0] sm:$0xf] }
 0x13f   : > { %1015 = vst [vmem:[%s18004_s29 + $0xed0] sm:$0xf] %v1014_v26  ;;  %1017 = vst [vmem:[%s18004_s29 + $0xed8] sm:$0xf] %v1016_v27  ;;  %v1020_v29 = vld [vmem:[%s18008_s16 + $0xed4] sm:$0xf] }
 0x140   : > { %1019 = vst [vmem:[%s18004_s29 + $0xee0] sm:$0xf] %v1018_v28  ;;  %v1022_v30 = vld [vmem:[%s18008_s16 + $0xed8] sm:$0xf]  ;;  %v1024_v31 = vld [vmem:[%s18008_s16 + $0xedc] sm:$0xf] }
 0x141   : > { %1021 = vst [vmem:[%s18004_s29 + $0xee8] sm:$0xf] %v1020_v29  ;;  %1023 = vst [vmem:[%s18004_s29 + $0xef0] sm:$0xf] %v1022_v30  ;;  %v1026_v32 = vld [vmem:[%s18008_s16 + $0xf00] sm:$0xf] }
 0x142   : > { %1025 = vst [vmem:[%s18004_s29 + $0xef8] sm:$0xf] %v1024_v31  ;;  %v1028_v33 = vld [vmem:[%s18008_s16 + $0xf04] sm:$0xf]  ;;  %v1030_v34 = vld [vmem:[%s18008_s16 + $0xf08] sm:$0xf] }
 0x143   : > { %1027 = vst [vmem:[%s18004_s29 + $0xf00] sm:$0xf] %v1026_v32  ;;  %1029 = vst [vmem:[%s18004_s29 + $0xf08] sm:$0xf] %v1028_v33  ;;  %v1032_v35 = vld [vmem:[%s18008_s16 + $0xf0c] sm:$0xf] }
 0x144   : > { %1031 = vst [vmem:[%s18004_s29 + $0xf10] sm:$0xf] %v1030_v34  ;;  %v1034_v36 = vld [vmem:[%s18008_s16 + $0xf10] sm:$0xf]  ;;  %v1036_v37 = vld [vmem:[%s18008_s16 + $0xf14] sm:$0xf] }
 0x145   : > { %1033 = vst [vmem:[%s18004_s29 + $0xf18] sm:$0xf] %v1032_v35  ;;  %1035 = vst [vmem:[%s18004_s29 + $0xf20] sm:$0xf] %v1034_v36  ;;  %v1038_v38 = vld [vmem:[%s18008_s16 + $0xf18] sm:$0xf] }
 0x146   : > { %1037 = vst [vmem:[%s18004_s29 + $0xf28] sm:$0xf] %v1036_v37  ;;  %v1040_v39 = vld [vmem:[%s18008_s16 + $0xf1c] sm:$0xf]  ;;  %v1042_v40 = vld [vmem:[%s18008_s16 + $0xf40] sm:$0xf] }
 0x147   : > { %1039 = vst [vmem:[%s18004_s29 + $0xf30] sm:$0xf] %v1038_v38  ;;  %1041 = vst [vmem:[%s18004_s29 + $0xf38] sm:$0xf] %v1040_v39  ;;  %v1044_v41 = vld [vmem:[%s18008_s16 + $0xf44] sm:$0xf] }
 0x148   : > { %1043 = vst [vmem:[%s18004_s29 + $0xf40] sm:$0xf] %v1042_v40  ;;  %v1046_v42 = vld [vmem:[%s18008_s16 + $0xf48] sm:$0xf]  ;;  %v1048_v43 = vld [vmem:[%s18008_s16 + $0xf4c] sm:$0xf] }
 0x149   : > { %1045 = vst [vmem:[%s18004_s29 + $0xf48] sm:$0xf] %v1044_v41  ;;  %1047 = vst [vmem:[%s18004_s29 + $0xf50] sm:$0xf] %v1046_v42  ;;  %v1050_v44 = vld [vmem:[%s18008_s16 + $0xf50] sm:$0xf] }
 0x14a   : > { %1049 = vst [vmem:[%s18004_s29 + $0xf58] sm:$0xf] %v1048_v43  ;;  %v1052_v45 = vld [vmem:[%s18008_s16 + $0xf54] sm:$0xf]  ;;  %v1054_v46 = vld [vmem:[%s18008_s16 + $0xf58] sm:$0xf] }
 0x14b   : > { %1051 = vst [vmem:[%s18004_s29 + $0xf60] sm:$0xf] %v1050_v44  ;;  %1053 = vst [vmem:[%s18004_s29 + $0xf68] sm:$0xf] %v1052_v45  ;;  %v1056_v47 = vld [vmem:[%s18008_s16 + $0xf5c] sm:$0xf] }
 0x14c   : > { %1055 = vst [vmem:[%s18004_s29 + $0xf70] sm:$0xf] %v1054_v46  ;;  %v1058_v48 = vld [vmem:[%s18008_s16 + $0xf80] sm:$0xf]  ;;  %v1060_v49 = vld [vmem:[%s18008_s16 + $0xf84] sm:$0xf] }
 0x14d   : > { %1057 = vst [vmem:[%s18004_s29 + $0xf78] sm:$0xf] %v1056_v47  ;;  %1059 = vst [vmem:[%s18004_s29 + $0xf80] sm:$0xf] %v1058_v48  ;;  %v1062_v50 = vld [vmem:[%s18008_s16 + $0xf88] sm:$0xf] }
 0x14e   : > { %1061 = vst [vmem:[%s18004_s29 + $0xf88] sm:$0xf] %v1060_v49  ;;  %v1064_v51 = vld [vmem:[%s18008_s16 + $0xf8c] sm:$0xf]  ;;  %v1066_v52 = vld [vmem:[%s18008_s16 + $0xf90] sm:$0xf] }
 0x14f   : > { %1063 = vst [vmem:[%s18004_s29 + $0xf90] sm:$0xf] %v1062_v50  ;;  %1065 = vst [vmem:[%s18004_s29 + $0xf98] sm:$0xf] %v1064_v51  ;;  %v1068_v53 = vld [vmem:[%s18008_s16 + $0xf94] sm:$0xf] }
 0x150   : > { %1067 = vst [vmem:[%s18004_s29 + $0xfa0] sm:$0xf] %v1066_v52  ;;  %v1070_v54 = vld [vmem:[%s18008_s16 + $0xf98] sm:$0xf]  ;;  %v1072_v55 = vld [vmem:[%s18008_s16 + $0xf9c] sm:$0xf] }
 0x151   : > { %1069 = vst [vmem:[%s18004_s29 + $0xfa8] sm:$0xf] %v1068_v53  ;;  %1071 = vst [vmem:[%s18004_s29 + $0xfb0] sm:$0xf] %v1070_v54  ;;  %v1074_v56 = vld [vmem:[%s18008_s16 + $0xfc0] sm:$0xf] }
 0x152   : > { %1073 = vst [vmem:[%s18004_s29 + $0xfb8] sm:$0xf] %v1072_v55  ;;  %v1076_v57 = vld [vmem:[%s18008_s16 + $0xfc4] sm:$0xf]  ;;  %v1078_v58 = vld [vmem:[%s18008_s16 + $0xfc8] sm:$0xf] }
 0x153   : > { %1075 = vst [vmem:[%s18004_s29 + $0xfc0] sm:$0xf] %v1074_v56  ;;  %1077 = vst [vmem:[%s18004_s29 + $0xfc8] sm:$0xf] %v1076_v57  ;;  %v1080_v59 = vld [vmem:[%s18008_s16 + $0xfcc] sm:$0xf] }
 0x154   : > { %1079 = vst [vmem:[%s18004_s29 + $0xfd0] sm:$0xf] %v1078_v58  ;;  %v1082_v60 = vld [vmem:[%s18008_s16 + $0xfd0] sm:$0xf]  ;;  %v1084_v61 = vld [vmem:[%s18008_s16 + $0xfd4] sm:$0xf] }
 0x155   : > { %1081 = vst [vmem:[%s18004_s29 + $0xfd8] sm:$0xf] %v1080_v59  ;;  %1083 = vst [vmem:[%s18004_s29 + $0xfe0] sm:$0xf] %v1082_v60  ;;  %v1086_v62 = vld [vmem:[%s18008_s16 + $0xfd8] sm:$0xf] }
 0x156   : > { %1085 = vst [vmem:[%s18004_s29 + $0xfe8] sm:$0xf] %v1084_v61  ;;  %v1088_v63 = vld [vmem:[%s18008_s16 + $0xfdc] sm:$0xf]  ;;  %v1090_v0 = vld [vmem:[%s18008_s16 + $0x1000] sm:$0xf] }
 0x157   : > { %1087 = vst [vmem:[%s18004_s29 + $0xff0] sm:$0xf] %v1086_v62  ;;  %1089 = vst [vmem:[%s18004_s29 + $0xff8] sm:$0xf] %v1088_v63  ;;  %v1092_v1 = vld [vmem:[%s18008_s16 + $0x1004] sm:$0xf] }
 0x158   : > { %1091 = vst [vmem:[%s18004_s29 + $0x1000] sm:$0xf] %v1090_v0  ;;  %v1094_v2 = vld [vmem:[%s18008_s16 + $0x1008] sm:$0xf]  ;;  %v1096_v3 = vld [vmem:[%s18008_s16 + $0x100c] sm:$0xf] }
 0x159   : > { %1093 = vst [vmem:[%s18004_s29 + $0x1008] sm:$0xf] %v1092_v1  ;;  %1095 = vst [vmem:[%s18004_s29 + $0x1010] sm:$0xf] %v1094_v2  ;;  %v1098_v4 = vld [vmem:[%s18008_s16 + $0x1010] sm:$0xf] }
 0x15a   : > { %1097 = vst [vmem:[%s18004_s29 + $0x1018] sm:$0xf] %v1096_v3  ;;  %v1100_v5 = vld [vmem:[%s18008_s16 + $0x1014] sm:$0xf]  ;;  %v1102_v6 = vld [vmem:[%s18008_s16 + $0x1018] sm:$0xf] }
 0x15b   : > { %1099 = vst [vmem:[%s18004_s29 + $0x1020] sm:$0xf] %v1098_v4  ;;  %1101 = vst [vmem:[%s18004_s29 + $0x1028] sm:$0xf] %v1100_v5  ;;  %v1104_v7 = vld [vmem:[%s18008_s16 + $0x101c] sm:$0xf] }
 0x15c   : > { %1103 = vst [vmem:[%s18004_s29 + $0x1030] sm:$0xf] %v1102_v6  ;;  %v1106_v8 = vld [vmem:[%s18008_s16 + $0x1040] sm:$0xf]  ;;  %v1108_v9 = vld [vmem:[%s18008_s16 + $0x1044] sm:$0xf] }
 0x15d   : > { %1105 = vst [vmem:[%s18004_s29 + $0x1038] sm:$0xf] %v1104_v7  ;;  %1107 = vst [vmem:[%s18004_s29 + $0x1040] sm:$0xf] %v1106_v8  ;;  %v1110_v10 = vld [vmem:[%s18008_s16 + $0x1048] sm:$0xf] }
 0x15e   : > { %1109 = vst [vmem:[%s18004_s29 + $0x1048] sm:$0xf] %v1108_v9  ;;  %v1112_v11 = vld [vmem:[%s18008_s16 + $0x104c] sm:$0xf]  ;;  %v1114_v12 = vld [vmem:[%s18008_s16 + $0x1050] sm:$0xf] }
 0x15f   : > { %1111 = vst [vmem:[%s18004_s29 + $0x1050] sm:$0xf] %v1110_v10  ;;  %1113 = vst [vmem:[%s18004_s29 + $0x1058] sm:$0xf] %v1112_v11  ;;  %v1116_v13 = vld [vmem:[%s18008_s16 + $0x1054] sm:$0xf] }
 0x160   : > { %1115 = vst [vmem:[%s18004_s29 + $0x1060] sm:$0xf] %v1114_v12  ;;  %v1118_v14 = vld [vmem:[%s18008_s16 + $0x1058] sm:$0xf]  ;;  %v1120_v15 = vld [vmem:[%s18008_s16 + $0x105c] sm:$0xf] }
 0x161   : > { %1117 = vst [vmem:[%s18004_s29 + $0x1068] sm:$0xf] %v1116_v13  ;;  %1119 = vst [vmem:[%s18004_s29 + $0x1070] sm:$0xf] %v1118_v14  ;;  %v1122_v16 = vld [vmem:[%s18008_s16 + $0x1080] sm:$0xf] }
 0x162   : > { %1121 = vst [vmem:[%s18004_s29 + $0x1078] sm:$0xf] %v1120_v15  ;;  %v1124_v17 = vld [vmem:[%s18008_s16 + $0x1084] sm:$0xf]  ;;  %v1126_v18 = vld [vmem:[%s18008_s16 + $0x1088] sm:$0xf] }
 0x163   : > { %1123 = vst [vmem:[%s18004_s29 + $0x1080] sm:$0xf] %v1122_v16  ;;  %1125 = vst [vmem:[%s18004_s29 + $0x1088] sm:$0xf] %v1124_v17  ;;  %v1128_v19 = vld [vmem:[%s18008_s16 + $0x108c] sm:$0xf] }
 0x164   : > { %1127 = vst [vmem:[%s18004_s29 + $0x1090] sm:$0xf] %v1126_v18  ;;  %v1130_v20 = vld [vmem:[%s18008_s16 + $0x1090] sm:$0xf]  ;;  %v1132_v21 = vld [vmem:[%s18008_s16 + $0x1094] sm:$0xf] }
 0x165   : > { %1129 = vst [vmem:[%s18004_s29 + $0x1098] sm:$0xf] %v1128_v19  ;;  %1131 = vst [vmem:[%s18004_s29 + $0x10a0] sm:$0xf] %v1130_v20  ;;  %v1134_v22 = vld [vmem:[%s18008_s16 + $0x1098] sm:$0xf] }
 0x166   : > { %1133 = vst [vmem:[%s18004_s29 + $0x10a8] sm:$0xf] %v1132_v21  ;;  %v1136_v23 = vld [vmem:[%s18008_s16 + $0x109c] sm:$0xf]  ;;  %v1138_v24 = vld [vmem:[%s18008_s16 + $0x10c0] sm:$0xf] }
 0x167   : > { %1135 = vst [vmem:[%s18004_s29 + $0x10b0] sm:$0xf] %v1134_v22  ;;  %1137 = vst [vmem:[%s18004_s29 + $0x10b8] sm:$0xf] %v1136_v23  ;;  %v1140_v25 = vld [vmem:[%s18008_s16 + $0x10c4] sm:$0xf] }
 0x168   : > { %1139 = vst [vmem:[%s18004_s29 + $0x10c0] sm:$0xf] %v1138_v24  ;;  %v1142_v26 = vld [vmem:[%s18008_s16 + $0x10c8] sm:$0xf]  ;;  %v1144_v27 = vld [vmem:[%s18008_s16 + $0x10cc] sm:$0xf] }
 0x169   : > { %1141 = vst [vmem:[%s18004_s29 + $0x10c8] sm:$0xf] %v1140_v25  ;;  %1143 = vst [vmem:[%s18004_s29 + $0x10d0] sm:$0xf] %v1142_v26  ;;  %v1146_v28 = vld [vmem:[%s18008_s16 + $0x10d0] sm:$0xf] }
 0x16a   : > { %1145 = vst [vmem:[%s18004_s29 + $0x10d8] sm:$0xf] %v1144_v27  ;;  %v1148_v29 = vld [vmem:[%s18008_s16 + $0x10d4] sm:$0xf]  ;;  %v1150_v30 = vld [vmem:[%s18008_s16 + $0x10d8] sm:$0xf] }
 0x16b   : > { %1147 = vst [vmem:[%s18004_s29 + $0x10e0] sm:$0xf] %v1146_v28  ;;  %1149 = vst [vmem:[%s18004_s29 + $0x10e8] sm:$0xf] %v1148_v29  ;;  %v1152_v31 = vld [vmem:[%s18008_s16 + $0x10dc] sm:$0xf] }
 0x16c   : > { %1151 = vst [vmem:[%s18004_s29 + $0x10f0] sm:$0xf] %v1150_v30  ;;  %v1154_v32 = vld [vmem:[%s18008_s16 + $0x1100] sm:$0xf]  ;;  %v1156_v33 = vld [vmem:[%s18008_s16 + $0x1104] sm:$0xf] }
 0x16d   : > { %1153 = vst [vmem:[%s18004_s29 + $0x10f8] sm:$0xf] %v1152_v31  ;;  %1155 = vst [vmem:[%s18004_s29 + $0x1100] sm:$0xf] %v1154_v32  ;;  %v1158_v34 = vld [vmem:[%s18008_s16 + $0x1108] sm:$0xf] }
 0x16e   : > { %1157 = vst [vmem:[%s18004_s29 + $0x1108] sm:$0xf] %v1156_v33  ;;  %v1160_v35 = vld [vmem:[%s18008_s16 + $0x110c] sm:$0xf]  ;;  %v1162_v36 = vld [vmem:[%s18008_s16 + $0x1110] sm:$0xf] }
 0x16f   : > { %1159 = vst [vmem:[%s18004_s29 + $0x1110] sm:$0xf] %v1158_v34  ;;  %1161 = vst [vmem:[%s18004_s29 + $0x1118] sm:$0xf] %v1160_v35  ;;  %v1164_v37 = vld [vmem:[%s18008_s16 + $0x1114] sm:$0xf] }
 0x170   : > { %1163 = vst [vmem:[%s18004_s29 + $0x1120] sm:$0xf] %v1162_v36  ;;  %v1166_v38 = vld [vmem:[%s18008_s16 + $0x1118] sm:$0xf]  ;;  %v1168_v39 = vld [vmem:[%s18008_s16 + $0x111c] sm:$0xf] }
 0x171   : > { %1165 = vst [vmem:[%s18004_s29 + $0x1128] sm:$0xf] %v1164_v37  ;;  %1167 = vst [vmem:[%s18004_s29 + $0x1130] sm:$0xf] %v1166_v38  ;;  %v1170_v40 = vld [vmem:[%s18008_s16 + $0x1140] sm:$0xf] }
 0x172   : > { %1169 = vst [vmem:[%s18004_s29 + $0x1138] sm:$0xf] %v1168_v39  ;;  %v1172_v41 = vld [vmem:[%s18008_s16 + $0x1144] sm:$0xf]  ;;  %v1174_v42 = vld [vmem:[%s18008_s16 + $0x1148] sm:$0xf] }
 0x173   : > { %1171 = vst [vmem:[%s18004_s29 + $0x1140] sm:$0xf] %v1170_v40  ;;  %1173 = vst [vmem:[%s18004_s29 + $0x1148] sm:$0xf] %v1172_v41  ;;  %v1176_v43 = vld [vmem:[%s18008_s16 + $0x114c] sm:$0xf] }
 0x174   : > { %1175 = vst [vmem:[%s18004_s29 + $0x1150] sm:$0xf] %v1174_v42  ;;  %v1178_v44 = vld [vmem:[%s18008_s16 + $0x1150] sm:$0xf]  ;;  %v1180_v45 = vld [vmem:[%s18008_s16 + $0x1154] sm:$0xf] }
 0x175   : > { %1177 = vst [vmem:[%s18004_s29 + $0x1158] sm:$0xf] %v1176_v43  ;;  %1179 = vst [vmem:[%s18004_s29 + $0x1160] sm:$0xf] %v1178_v44  ;;  %v1182_v46 = vld [vmem:[%s18008_s16 + $0x1158] sm:$0xf] }
 0x176   : > { %1181 = vst [vmem:[%s18004_s29 + $0x1168] sm:$0xf] %v1180_v45  ;;  %v1184_v47 = vld [vmem:[%s18008_s16 + $0x115c] sm:$0xf]  ;;  %v1186_v48 = vld [vmem:[%s18008_s16 + $0x1180] sm:$0xf] }
 0x177   : > { %1183 = vst [vmem:[%s18004_s29 + $0x1170] sm:$0xf] %v1182_v46  ;;  %1185 = vst [vmem:[%s18004_s29 + $0x1178] sm:$0xf] %v1184_v47  ;;  %v1188_v49 = vld [vmem:[%s18008_s16 + $0x1184] sm:$0xf] }
 0x178   : > { %1187 = vst [vmem:[%s18004_s29 + $0x1180] sm:$0xf] %v1186_v48  ;;  %v1190_v50 = vld [vmem:[%s18008_s16 + $0x1188] sm:$0xf]  ;;  %v1192_v51 = vld [vmem:[%s18008_s16 + $0x118c] sm:$0xf] }
 0x179   : > { %1189 = vst [vmem:[%s18004_s29 + $0x1188] sm:$0xf] %v1188_v49  ;;  %1191 = vst [vmem:[%s18004_s29 + $0x1190] sm:$0xf] %v1190_v50  ;;  %v1194_v52 = vld [vmem:[%s18008_s16 + $0x1190] sm:$0xf] }
 0x17a   : > { %1193 = vst [vmem:[%s18004_s29 + $0x1198] sm:$0xf] %v1192_v51  ;;  %v1196_v53 = vld [vmem:[%s18008_s16 + $0x1194] sm:$0xf]  ;;  %v1198_v54 = vld [vmem:[%s18008_s16 + $0x1198] sm:$0xf] }
 0x17b   : > { %1195 = vst [vmem:[%s18004_s29 + $0x11a0] sm:$0xf] %v1194_v52  ;;  %1197 = vst [vmem:[%s18004_s29 + $0x11a8] sm:$0xf] %v1196_v53  ;;  %v1200_v55 = vld [vmem:[%s18008_s16 + $0x119c] sm:$0xf] }
 0x17c   : > { %1199 = vst [vmem:[%s18004_s29 + $0x11b0] sm:$0xf] %v1198_v54  ;;  %v1202_v56 = vld [vmem:[%s18008_s16 + $0x11c0] sm:$0xf]  ;;  %v1204_v57 = vld [vmem:[%s18008_s16 + $0x11c4] sm:$0xf] }
 0x17d   : > { %1201 = vst [vmem:[%s18004_s29 + $0x11b8] sm:$0xf] %v1200_v55  ;;  %1203 = vst [vmem:[%s18004_s29 + $0x11c0] sm:$0xf] %v1202_v56  ;;  %v1206_v58 = vld [vmem:[%s18008_s16 + $0x11c8] sm:$0xf] }
 0x17e   : > { %1205 = vst [vmem:[%s18004_s29 + $0x11c8] sm:$0xf] %v1204_v57  ;;  %v1208_v59 = vld [vmem:[%s18008_s16 + $0x11cc] sm:$0xf]  ;;  %v1210_v60 = vld [vmem:[%s18008_s16 + $0x11d0] sm:$0xf] }
 0x17f   : > { %1207 = vst [vmem:[%s18004_s29 + $0x11d0] sm:$0xf] %v1206_v58  ;;  %1209 = vst [vmem:[%s18004_s29 + $0x11d8] sm:$0xf] %v1208_v59  ;;  %v1212_v61 = vld [vmem:[%s18008_s16 + $0x11d4] sm:$0xf] }
 0x180   : > { %1211 = vst [vmem:[%s18004_s29 + $0x11e0] sm:$0xf] %v1210_v60  ;;  %v1214_v62 = vld [vmem:[%s18008_s16 + $0x11d8] sm:$0xf]  ;;  %v1216_v63 = vld [vmem:[%s18008_s16 + $0x11dc] sm:$0xf] }
 0x181   : > { %1213 = vst [vmem:[%s18004_s29 + $0x11e8] sm:$0xf] %v1212_v61  ;;  %1215 = vst [vmem:[%s18004_s29 + $0x11f0] sm:$0xf] %v1214_v62  ;;  %v1218_v0 = vld [vmem:[%s18008_s16 + $0x1200] sm:$0xf] }
 0x182   : > { %1217 = vst [vmem:[%s18004_s29 + $0x11f8] sm:$0xf] %v1216_v63  ;;  %v1220_v1 = vld [vmem:[%s18008_s16 + $0x1204] sm:$0xf]  ;;  %v1222_v2 = vld [vmem:[%s18008_s16 + $0x1208] sm:$0xf] }
 0x183   : > { %1219 = vst [vmem:[%s18004_s29 + $0x1200] sm:$0xf] %v1218_v0  ;;  %1221 = vst [vmem:[%s18004_s29 + $0x1208] sm:$0xf] %v1220_v1  ;;  %v1224_v3 = vld [vmem:[%s18008_s16 + $0x120c] sm:$0xf] }
 0x184   : > { %1223 = vst [vmem:[%s18004_s29 + $0x1210] sm:$0xf] %v1222_v2  ;;  %v1226_v4 = vld [vmem:[%s18008_s16 + $0x1210] sm:$0xf]  ;;  %v1228_v5 = vld [vmem:[%s18008_s16 + $0x1214] sm:$0xf] }
 0x185   : > { %1225 = vst [vmem:[%s18004_s29 + $0x1218] sm:$0xf] %v1224_v3  ;;  %1227 = vst [vmem:[%s18004_s29 + $0x1220] sm:$0xf] %v1226_v4  ;;  %v1230_v6 = vld [vmem:[%s18008_s16 + $0x1218] sm:$0xf] }
 0x186   : > { %1229 = vst [vmem:[%s18004_s29 + $0x1228] sm:$0xf] %v1228_v5  ;;  %v1232_v7 = vld [vmem:[%s18008_s16 + $0x121c] sm:$0xf]  ;;  %v1234_v8 = vld [vmem:[%s18008_s16 + $0x1240] sm:$0xf] }
 0x187   : > { %1231 = vst [vmem:[%s18004_s29 + $0x1230] sm:$0xf] %v1230_v6  ;;  %1233 = vst [vmem:[%s18004_s29 + $0x1238] sm:$0xf] %v1232_v7  ;;  %v1236_v9 = vld [vmem:[%s18008_s16 + $0x1244] sm:$0xf] }
 0x188   : > { %1235 = vst [vmem:[%s18004_s29 + $0x1240] sm:$0xf] %v1234_v8  ;;  %v1238_v10 = vld [vmem:[%s18008_s16 + $0x1248] sm:$0xf]  ;;  %v1240_v11 = vld [vmem:[%s18008_s16 + $0x124c] sm:$0xf] }
 0x189   : > { %1237 = vst [vmem:[%s18004_s29 + $0x1248] sm:$0xf] %v1236_v9  ;;  %1239 = vst [vmem:[%s18004_s29 + $0x1250] sm:$0xf] %v1238_v10  ;;  %v1242_v12 = vld [vmem:[%s18008_s16 + $0x1250] sm:$0xf] }
 0x18a   : > { %1241 = vst [vmem:[%s18004_s29 + $0x1258] sm:$0xf] %v1240_v11  ;;  %v1244_v13 = vld [vmem:[%s18008_s16 + $0x1254] sm:$0xf]  ;;  %v1246_v14 = vld [vmem:[%s18008_s16 + $0x1258] sm:$0xf] }
 0x18b   : > { %1243 = vst [vmem:[%s18004_s29 + $0x1260] sm:$0xf] %v1242_v12  ;;  %1245 = vst [vmem:[%s18004_s29 + $0x1268] sm:$0xf] %v1244_v13  ;;  %v1248_v15 = vld [vmem:[%s18008_s16 + $0x125c] sm:$0xf] }
 0x18c   : > { %1247 = vst [vmem:[%s18004_s29 + $0x1270] sm:$0xf] %v1246_v14  ;;  %v1250_v16 = vld [vmem:[%s18008_s16 + $0x1280] sm:$0xf]  ;;  %v1252_v17 = vld [vmem:[%s18008_s16 + $0x1284] sm:$0xf] }
 0x18d   : > { %1249 = vst [vmem:[%s18004_s29 + $0x1278] sm:$0xf] %v1248_v15  ;;  %1251 = vst [vmem:[%s18004_s29 + $0x1280] sm:$0xf] %v1250_v16  ;;  %v1254_v18 = vld [vmem:[%s18008_s16 + $0x1288] sm:$0xf] }
 0x18e   : > { %1253 = vst [vmem:[%s18004_s29 + $0x1288] sm:$0xf] %v1252_v17  ;;  %v1256_v19 = vld [vmem:[%s18008_s16 + $0x128c] sm:$0xf]  ;;  %v1258_v20 = vld [vmem:[%s18008_s16 + $0x1290] sm:$0xf] }
 0x18f   : > { %1255 = vst [vmem:[%s18004_s29 + $0x1290] sm:$0xf] %v1254_v18  ;;  %1257 = vst [vmem:[%s18004_s29 + $0x1298] sm:$0xf] %v1256_v19  ;;  %v1260_v21 = vld [vmem:[%s18008_s16 + $0x1294] sm:$0xf] }
 0x190   : > { %1259 = vst [vmem:[%s18004_s29 + $0x12a0] sm:$0xf] %v1258_v20  ;;  %v1262_v22 = vld [vmem:[%s18008_s16 + $0x1298] sm:$0xf]  ;;  %v1264_v23 = vld [vmem:[%s18008_s16 + $0x129c] sm:$0xf] }
 0x191   : > { %1261 = vst [vmem:[%s18004_s29 + $0x12a8] sm:$0xf] %v1260_v21  ;;  %1263 = vst [vmem:[%s18004_s29 + $0x12b0] sm:$0xf] %v1262_v22  ;;  %v1266_v24 = vld [vmem:[%s18008_s16 + $0x12c0] sm:$0xf] }
 0x192   : > { %1265 = vst [vmem:[%s18004_s29 + $0x12b8] sm:$0xf] %v1264_v23  ;;  %v1268_v25 = vld [vmem:[%s18008_s16 + $0x12c4] sm:$0xf]  ;;  %v1270_v26 = vld [vmem:[%s18008_s16 + $0x12c8] sm:$0xf] }
 0x193   : > { %1267 = vst [vmem:[%s18004_s29 + $0x12c0] sm:$0xf] %v1266_v24  ;;  %1269 = vst [vmem:[%s18004_s29 + $0x12c8] sm:$0xf] %v1268_v25  ;;  %v1272_v27 = vld [vmem:[%s18008_s16 + $0x12cc] sm:$0xf] }
 0x194   : > { %1271 = vst [vmem:[%s18004_s29 + $0x12d0] sm:$0xf] %v1270_v26  ;;  %v1274_v28 = vld [vmem:[%s18008_s16 + $0x12d0] sm:$0xf]  ;;  %v1276_v29 = vld [vmem:[%s18008_s16 + $0x12d4] sm:$0xf] }
 0x195   : > { %1273 = vst [vmem:[%s18004_s29 + $0x12d8] sm:$0xf] %v1272_v27  ;;  %1275 = vst [vmem:[%s18004_s29 + $0x12e0] sm:$0xf] %v1274_v28  ;;  %v1278_v30 = vld [vmem:[%s18008_s16 + $0x12d8] sm:$0xf] }
 0x196   : > { %1277 = vst [vmem:[%s18004_s29 + $0x12e8] sm:$0xf] %v1276_v29  ;;  %v1280_v31 = vld [vmem:[%s18008_s16 + $0x12dc] sm:$0xf]  ;;  %v1282_v32 = vld [vmem:[%s18008_s16 + $0x1300] sm:$0xf] }
 0x197   : > { %1279 = vst [vmem:[%s18004_s29 + $0x12f0] sm:$0xf] %v1278_v30  ;;  %1281 = vst [vmem:[%s18004_s29 + $0x12f8] sm:$0xf] %v1280_v31  ;;  %v1284_v33 = vld [vmem:[%s18008_s16 + $0x1304] sm:$0xf] }
 0x198   : > { %1283 = vst [vmem:[%s18004_s29 + $0x1300] sm:$0xf] %v1282_v32  ;;  %v1286_v34 = vld [vmem:[%s18008_s16 + $0x1308] sm:$0xf]  ;;  %v1288_v35 = vld [vmem:[%s18008_s16 + $0x130c] sm:$0xf] }
 0x199   : > { %1285 = vst [vmem:[%s18004_s29 + $0x1308] sm:$0xf] %v1284_v33  ;;  %1287 = vst [vmem:[%s18004_s29 + $0x1310] sm:$0xf] %v1286_v34  ;;  %v1290_v36 = vld [vmem:[%s18008_s16 + $0x1310] sm:$0xf] }
 0x19a   : > { %1289 = vst [vmem:[%s18004_s29 + $0x1318] sm:$0xf] %v1288_v35  ;;  %v1292_v37 = vld [vmem:[%s18008_s16 + $0x1314] sm:$0xf]  ;;  %v1294_v38 = vld [vmem:[%s18008_s16 + $0x1318] sm:$0xf] }
 0x19b   : > { %1291 = vst [vmem:[%s18004_s29 + $0x1320] sm:$0xf] %v1290_v36  ;;  %1293 = vst [vmem:[%s18004_s29 + $0x1328] sm:$0xf] %v1292_v37  ;;  %v1296_v39 = vld [vmem:[%s18008_s16 + $0x131c] sm:$0xf] }
 0x19c   : > { %1295 = vst [vmem:[%s18004_s29 + $0x1330] sm:$0xf] %v1294_v38  ;;  %v1298_v40 = vld [vmem:[%s18008_s16 + $0x1340] sm:$0xf]  ;;  %v1300_v41 = vld [vmem:[%s18008_s16 + $0x1344] sm:$0xf] }
 0x19d   : > { %1297 = vst [vmem:[%s18004_s29 + $0x1338] sm:$0xf] %v1296_v39  ;;  %1299 = vst [vmem:[%s18004_s29 + $0x1340] sm:$0xf] %v1298_v40  ;;  %v1302_v42 = vld [vmem:[%s18008_s16 + $0x1348] sm:$0xf] }
 0x19e   : > { %1301 = vst [vmem:[%s18004_s29 + $0x1348] sm:$0xf] %v1300_v41  ;;  %v1304_v43 = vld [vmem:[%s18008_s16 + $0x134c] sm:$0xf]  ;;  %v1306_v44 = vld [vmem:[%s18008_s16 + $0x1350] sm:$0xf] }
 0x19f   : > { %1303 = vst [vmem:[%s18004_s29 + $0x1350] sm:$0xf] %v1302_v42  ;;  %1305 = vst [vmem:[%s18004_s29 + $0x1358] sm:$0xf] %v1304_v43  ;;  %v1308_v45 = vld [vmem:[%s18008_s16 + $0x1354] sm:$0xf] }
 0x1a0   : > { %1307 = vst [vmem:[%s18004_s29 + $0x1360] sm:$0xf] %v1306_v44  ;;  %v1310_v46 = vld [vmem:[%s18008_s16 + $0x1358] sm:$0xf]  ;;  %v1312_v47 = vld [vmem:[%s18008_s16 + $0x135c] sm:$0xf] }
 0x1a1   : > { %1309 = vst [vmem:[%s18004_s29 + $0x1368] sm:$0xf] %v1308_v45  ;;  %1311 = vst [vmem:[%s18004_s29 + $0x1370] sm:$0xf] %v1310_v46  ;;  %v1314_v48 = vld [vmem:[%s18008_s16 + $0x1380] sm:$0xf] }
 0x1a2   : > { %1313 = vst [vmem:[%s18004_s29 + $0x1378] sm:$0xf] %v1312_v47  ;;  %v1316_v49 = vld [vmem:[%s18008_s16 + $0x1384] sm:$0xf]  ;;  %v1318_v50 = vld [vmem:[%s18008_s16 + $0x1388] sm:$0xf] }
 0x1a3   : > { %1315 = vst [vmem:[%s18004_s29 + $0x1380] sm:$0xf] %v1314_v48  ;;  %1317 = vst [vmem:[%s18004_s29 + $0x1388] sm:$0xf] %v1316_v49  ;;  %v1320_v51 = vld [vmem:[%s18008_s16 + $0x138c] sm:$0xf] }
 0x1a4   : > { %1319 = vst [vmem:[%s18004_s29 + $0x1390] sm:$0xf] %v1318_v50  ;;  %v1322_v52 = vld [vmem:[%s18008_s16 + $0x1390] sm:$0xf]  ;;  %v1324_v53 = vld [vmem:[%s18008_s16 + $0x1394] sm:$0xf] }
 0x1a5   : > { %1321 = vst [vmem:[%s18004_s29 + $0x1398] sm:$0xf] %v1320_v51  ;;  %1323 = vst [vmem:[%s18004_s29 + $0x13a0] sm:$0xf] %v1322_v52  ;;  %v1326_v54 = vld [vmem:[%s18008_s16 + $0x1398] sm:$0xf] }
 0x1a6   : > { %1325 = vst [vmem:[%s18004_s29 + $0x13a8] sm:$0xf] %v1324_v53  ;;  %v1328_v55 = vld [vmem:[%s18008_s16 + $0x139c] sm:$0xf]  ;;  %v1330_v56 = vld [vmem:[%s18008_s16 + $0x13c0] sm:$0xf] }
 0x1a7   : > { %1327 = vst [vmem:[%s18004_s29 + $0x13b0] sm:$0xf] %v1326_v54  ;;  %1329 = vst [vmem:[%s18004_s29 + $0x13b8] sm:$0xf] %v1328_v55  ;;  %v1332_v57 = vld [vmem:[%s18008_s16 + $0x13c4] sm:$0xf] }
 0x1a8   : > { %1331 = vst [vmem:[%s18004_s29 + $0x13c0] sm:$0xf] %v1330_v56  ;;  %v1334_v58 = vld [vmem:[%s18008_s16 + $0x13c8] sm:$0xf]  ;;  %v1336_v59 = vld [vmem:[%s18008_s16 + $0x13cc] sm:$0xf] }
 0x1a9   : > { %1333 = vst [vmem:[%s18004_s29 + $0x13c8] sm:$0xf] %v1332_v57  ;;  %1335 = vst [vmem:[%s18004_s29 + $0x13d0] sm:$0xf] %v1334_v58  ;;  %v1338_v60 = vld [vmem:[%s18008_s16 + $0x13d0] sm:$0xf] }
 0x1aa   : > { %1337 = vst [vmem:[%s18004_s29 + $0x13d8] sm:$0xf] %v1336_v59  ;;  %v1340_v61 = vld [vmem:[%s18008_s16 + $0x13d4] sm:$0xf]  ;;  %v1342_v62 = vld [vmem:[%s18008_s16 + $0x13d8] sm:$0xf] }
 0x1ab   : > { %1339 = vst [vmem:[%s18004_s29 + $0x13e0] sm:$0xf] %v1338_v60  ;;  %1341 = vst [vmem:[%s18004_s29 + $0x13e8] sm:$0xf] %v1340_v61  ;;  %v1344_v63 = vld [vmem:[%s18008_s16 + $0x13dc] sm:$0xf] }
 0x1ac   : > { %1343 = vst [vmem:[%s18004_s29 + $0x13f0] sm:$0xf] %v1342_v62  ;;  %v1346_v0 = vld [vmem:[%s18008_s16 + $0x1400] sm:$0xf]  ;;  %v1348_v1 = vld [vmem:[%s18008_s16 + $0x1404] sm:$0xf] }
 0x1ad   : > { %1345 = vst [vmem:[%s18004_s29 + $0x13f8] sm:$0xf] %v1344_v63  ;;  %1347 = vst [vmem:[%s18004_s29 + $0x1400] sm:$0xf] %v1346_v0  ;;  %v1350_v2 = vld [vmem:[%s18008_s16 + $0x1408] sm:$0xf] }
 0x1ae   : > { %1349 = vst [vmem:[%s18004_s29 + $0x1408] sm:$0xf] %v1348_v1  ;;  %v1352_v3 = vld [vmem:[%s18008_s16 + $0x140c] sm:$0xf]  ;;  %v1354_v4 = vld [vmem:[%s18008_s16 + $0x1410] sm:$0xf] }
 0x1af   : > { %1351 = vst [vmem:[%s18004_s29 + $0x1410] sm:$0xf] %v1350_v2  ;;  %1353 = vst [vmem:[%s18004_s29 + $0x1418] sm:$0xf] %v1352_v3  ;;  %v1356_v5 = vld [vmem:[%s18008_s16 + $0x1414] sm:$0xf] }
 0x1b0   : > { %1355 = vst [vmem:[%s18004_s29 + $0x1420] sm:$0xf] %v1354_v4  ;;  %v1358_v6 = vld [vmem:[%s18008_s16 + $0x1418] sm:$0xf]  ;;  %v1360_v7 = vld [vmem:[%s18008_s16 + $0x141c] sm:$0xf] }
 0x1b1   : > { %1357 = vst [vmem:[%s18004_s29 + $0x1428] sm:$0xf] %v1356_v5  ;;  %1359 = vst [vmem:[%s18004_s29 + $0x1430] sm:$0xf] %v1358_v6  ;;  %v1362_v8 = vld [vmem:[%s18008_s16 + $0x1440] sm:$0xf] }
 0x1b2   : > { %1361 = vst [vmem:[%s18004_s29 + $0x1438] sm:$0xf] %v1360_v7  ;;  %v1364_v9 = vld [vmem:[%s18008_s16 + $0x1444] sm:$0xf]  ;;  %v1366_v10 = vld [vmem:[%s18008_s16 + $0x1448] sm:$0xf] }
 0x1b3   : > { %1363 = vst [vmem:[%s18004_s29 + $0x1440] sm:$0xf] %v1362_v8  ;;  %1365 = vst [vmem:[%s18004_s29 + $0x1448] sm:$0xf] %v1364_v9  ;;  %v1368_v11 = vld [vmem:[%s18008_s16 + $0x144c] sm:$0xf] }
 0x1b4   : > { %1367 = vst [vmem:[%s18004_s29 + $0x1450] sm:$0xf] %v1366_v10  ;;  %v1370_v12 = vld [vmem:[%s18008_s16 + $0x1450] sm:$0xf]  ;;  %v1372_v13 = vld [vmem:[%s18008_s16 + $0x1454] sm:$0xf] }
 0x1b5   : > { %1369 = vst [vmem:[%s18004_s29 + $0x1458] sm:$0xf] %v1368_v11  ;;  %1371 = vst [vmem:[%s18004_s29 + $0x1460] sm:$0xf] %v1370_v12  ;;  %v1374_v14 = vld [vmem:[%s18008_s16 + $0x1458] sm:$0xf] }
 0x1b6   : > { %1373 = vst [vmem:[%s18004_s29 + $0x1468] sm:$0xf] %v1372_v13  ;;  %v1376_v15 = vld [vmem:[%s18008_s16 + $0x145c] sm:$0xf]  ;;  %v1378_v16 = vld [vmem:[%s18008_s16 + $0x1480] sm:$0xf] }
 0x1b7   : > { %1375 = vst [vmem:[%s18004_s29 + $0x1470] sm:$0xf] %v1374_v14  ;;  %1377 = vst [vmem:[%s18004_s29 + $0x1478] sm:$0xf] %v1376_v15  ;;  %v1380_v17 = vld [vmem:[%s18008_s16 + $0x1484] sm:$0xf] }
 0x1b8   : > { %1379 = vst [vmem:[%s18004_s29 + $0x1480] sm:$0xf] %v1378_v16  ;;  %v1382_v18 = vld [vmem:[%s18008_s16 + $0x1488] sm:$0xf]  ;;  %v1384_v19 = vld [vmem:[%s18008_s16 + $0x148c] sm:$0xf] }
 0x1b9   : > { %1381 = vst [vmem:[%s18004_s29 + $0x1488] sm:$0xf] %v1380_v17  ;;  %1383 = vst [vmem:[%s18004_s29 + $0x1490] sm:$0xf] %v1382_v18  ;;  %v1386_v20 = vld [vmem:[%s18008_s16 + $0x1490] sm:$0xf] }
 0x1ba   : > { %1385 = vst [vmem:[%s18004_s29 + $0x1498] sm:$0xf] %v1384_v19  ;;  %v1388_v21 = vld [vmem:[%s18008_s16 + $0x1494] sm:$0xf]  ;;  %v1390_v22 = vld [vmem:[%s18008_s16 + $0x1498] sm:$0xf] }
 0x1bb   : > { %1387 = vst [vmem:[%s18004_s29 + $0x14a0] sm:$0xf] %v1386_v20  ;;  %1389 = vst [vmem:[%s18004_s29 + $0x14a8] sm:$0xf] %v1388_v21  ;;  %v1392_v23 = vld [vmem:[%s18008_s16 + $0x149c] sm:$0xf] }
 0x1bc   : > { %1391 = vst [vmem:[%s18004_s29 + $0x14b0] sm:$0xf] %v1390_v22  ;;  %v1394_v24 = vld [vmem:[%s18008_s16 + $0x14c0] sm:$0xf]  ;;  %v1396_v25 = vld [vmem:[%s18008_s16 + $0x14c4] sm:$0xf] }
 0x1bd   : > { %1393 = vst [vmem:[%s18004_s29 + $0x14b8] sm:$0xf] %v1392_v23  ;;  %1395 = vst [vmem:[%s18004_s29 + $0x14c0] sm:$0xf] %v1394_v24  ;;  %v1398_v26 = vld [vmem:[%s18008_s16 + $0x14c8] sm:$0xf] }
 0x1be   : > { %1397 = vst [vmem:[%s18004_s29 + $0x14c8] sm:$0xf] %v1396_v25  ;;  %v1400_v27 = vld [vmem:[%s18008_s16 + $0x14cc] sm:$0xf]  ;;  %v1402_v28 = vld [vmem:[%s18008_s16 + $0x14d0] sm:$0xf] }
 0x1bf   : > { %1399 = vst [vmem:[%s18004_s29 + $0x14d0] sm:$0xf] %v1398_v26  ;;  %1401 = vst [vmem:[%s18004_s29 + $0x14d8] sm:$0xf] %v1400_v27  ;;  %v1404_v29 = vld [vmem:[%s18008_s16 + $0x14d4] sm:$0xf] }
 0x1c0   : > { %1403 = vst [vmem:[%s18004_s29 + $0x14e0] sm:$0xf] %v1402_v28  ;;  %v1406_v30 = vld [vmem:[%s18008_s16 + $0x14d8] sm:$0xf]  ;;  %v1408_v31 = vld [vmem:[%s18008_s16 + $0x14dc] sm:$0xf] }
 0x1c1   : > { %1405 = vst [vmem:[%s18004_s29 + $0x14e8] sm:$0xf] %v1404_v29  ;;  %1407 = vst [vmem:[%s18004_s29 + $0x14f0] sm:$0xf] %v1406_v30  ;;  %v1410_v32 = vld [vmem:[%s18008_s16 + $0x1500] sm:$0xf] }
 0x1c2   : > { %1409 = vst [vmem:[%s18004_s29 + $0x14f8] sm:$0xf] %v1408_v31  ;;  %v1412_v33 = vld [vmem:[%s18008_s16 + $0x1504] sm:$0xf]  ;;  %v1414_v34 = vld [vmem:[%s18008_s16 + $0x1508] sm:$0xf] }
 0x1c3   : > { %1411 = vst [vmem:[%s18004_s29 + $0x1500] sm:$0xf] %v1410_v32  ;;  %1413 = vst [vmem:[%s18004_s29 + $0x1508] sm:$0xf] %v1412_v33  ;;  %v1416_v35 = vld [vmem:[%s18008_s16 + $0x150c] sm:$0xf] }
 0x1c4   : > { %1415 = vst [vmem:[%s18004_s29 + $0x1510] sm:$0xf] %v1414_v34  ;;  %v1418_v36 = vld [vmem:[%s18008_s16 + $0x1510] sm:$0xf]  ;;  %v1420_v37 = vld [vmem:[%s18008_s16 + $0x1514] sm:$0xf] }
 0x1c5   : > { %1417 = vst [vmem:[%s18004_s29 + $0x1518] sm:$0xf] %v1416_v35  ;;  %1419 = vst [vmem:[%s18004_s29 + $0x1520] sm:$0xf] %v1418_v36  ;;  %v1422_v38 = vld [vmem:[%s18008_s16 + $0x1518] sm:$0xf] }
 0x1c6   : > { %1421 = vst [vmem:[%s18004_s29 + $0x1528] sm:$0xf] %v1420_v37  ;;  %v1424_v39 = vld [vmem:[%s18008_s16 + $0x151c] sm:$0xf]  ;;  %v1426_v40 = vld [vmem:[%s18008_s16 + $0x1540] sm:$0xf] }
 0x1c7   : > { %1423 = vst [vmem:[%s18004_s29 + $0x1530] sm:$0xf] %v1422_v38  ;;  %1425 = vst [vmem:[%s18004_s29 + $0x1538] sm:$0xf] %v1424_v39  ;;  %v1428_v41 = vld [vmem:[%s18008_s16 + $0x1544] sm:$0xf] }
 0x1c8   : > { %1427 = vst [vmem:[%s18004_s29 + $0x1540] sm:$0xf] %v1426_v40  ;;  %v1430_v42 = vld [vmem:[%s18008_s16 + $0x1548] sm:$0xf]  ;;  %v1432_v43 = vld [vmem:[%s18008_s16 + $0x154c] sm:$0xf] }
 0x1c9   : > { %1429 = vst [vmem:[%s18004_s29 + $0x1548] sm:$0xf] %v1428_v41  ;;  %1431 = vst [vmem:[%s18004_s29 + $0x1550] sm:$0xf] %v1430_v42  ;;  %v1434_v44 = vld [vmem:[%s18008_s16 + $0x1550] sm:$0xf] }
 0x1ca   : > { %1433 = vst [vmem:[%s18004_s29 + $0x1558] sm:$0xf] %v1432_v43  ;;  %v1436_v45 = vld [vmem:[%s18008_s16 + $0x1554] sm:$0xf]  ;;  %v1438_v46 = vld [vmem:[%s18008_s16 + $0x1558] sm:$0xf] }
 0x1cb   : > { %1435 = vst [vmem:[%s18004_s29 + $0x1560] sm:$0xf] %v1434_v44  ;;  %1437 = vst [vmem:[%s18004_s29 + $0x1568] sm:$0xf] %v1436_v45  ;;  %v1440_v47 = vld [vmem:[%s18008_s16 + $0x155c] sm:$0xf] }
 0x1cc   : > { %1439 = vst [vmem:[%s18004_s29 + $0x1570] sm:$0xf] %v1438_v46  ;;  %v1442_v48 = vld [vmem:[%s18008_s16 + $0x1580] sm:$0xf]  ;;  %v1444_v49 = vld [vmem:[%s18008_s16 + $0x1584] sm:$0xf] }
 0x1cd   : > { %1441 = vst [vmem:[%s18004_s29 + $0x1578] sm:$0xf] %v1440_v47  ;;  %1443 = vst [vmem:[%s18004_s29 + $0x1580] sm:$0xf] %v1442_v48  ;;  %v1446_v50 = vld [vmem:[%s18008_s16 + $0x1588] sm:$0xf] }
 0x1ce   : > { %1445 = vst [vmem:[%s18004_s29 + $0x1588] sm:$0xf] %v1444_v49  ;;  %v1448_v51 = vld [vmem:[%s18008_s16 + $0x158c] sm:$0xf]  ;;  %v1450_v52 = vld [vmem:[%s18008_s16 + $0x1590] sm:$0xf] }
 0x1cf   : > { %1447 = vst [vmem:[%s18004_s29 + $0x1590] sm:$0xf] %v1446_v50  ;;  %1449 = vst [vmem:[%s18004_s29 + $0x1598] sm:$0xf] %v1448_v51  ;;  %v1452_v53 = vld [vmem:[%s18008_s16 + $0x1594] sm:$0xf] }
 0x1d0   : > { %1451 = vst [vmem:[%s18004_s29 + $0x15a0] sm:$0xf] %v1450_v52  ;;  %v1454_v54 = vld [vmem:[%s18008_s16 + $0x1598] sm:$0xf]  ;;  %v1456_v55 = vld [vmem:[%s18008_s16 + $0x159c] sm:$0xf] }
 0x1d1   : > { %1453 = vst [vmem:[%s18004_s29 + $0x15a8] sm:$0xf] %v1452_v53  ;;  %1455 = vst [vmem:[%s18004_s29 + $0x15b0] sm:$0xf] %v1454_v54  ;;  %v1458_v56 = vld [vmem:[%s18008_s16 + $0x15c0] sm:$0xf] }
 0x1d2   : > { %1457 = vst [vmem:[%s18004_s29 + $0x15b8] sm:$0xf] %v1456_v55  ;;  %v1460_v57 = vld [vmem:[%s18008_s16 + $0x15c4] sm:$0xf]  ;;  %v1462_v58 = vld [vmem:[%s18008_s16 + $0x15c8] sm:$0xf] }
 0x1d3   : > { %1459 = vst [vmem:[%s18004_s29 + $0x15c0] sm:$0xf] %v1458_v56  ;;  %1461 = vst [vmem:[%s18004_s29 + $0x15c8] sm:$0xf] %v1460_v57  ;;  %v1464_v59 = vld [vmem:[%s18008_s16 + $0x15cc] sm:$0xf] }
 0x1d4   : > { %1463 = vst [vmem:[%s18004_s29 + $0x15d0] sm:$0xf] %v1462_v58  ;;  %v1466_v60 = vld [vmem:[%s18008_s16 + $0x15d0] sm:$0xf]  ;;  %v1468_v61 = vld [vmem:[%s18008_s16 + $0x15d4] sm:$0xf] }
 0x1d5   : > { %1465 = vst [vmem:[%s18004_s29 + $0x15d8] sm:$0xf] %v1464_v59  ;;  %1467 = vst [vmem:[%s18004_s29 + $0x15e0] sm:$0xf] %v1466_v60  ;;  %v1470_v62 = vld [vmem:[%s18008_s16 + $0x15d8] sm:$0xf] }
 0x1d6   : > { %1469 = vst [vmem:[%s18004_s29 + $0x15e8] sm:$0xf] %v1468_v61  ;;  %v1472_v63 = vld [vmem:[%s18008_s16 + $0x15dc] sm:$0xf]  ;;  %v1474_v0 = vld [vmem:[%s18008_s16 + $0x1600] sm:$0xf] }
 0x1d7   : > { %1471 = vst [vmem:[%s18004_s29 + $0x15f0] sm:$0xf] %v1470_v62  ;;  %1473 = vst [vmem:[%s18004_s29 + $0x15f8] sm:$0xf] %v1472_v63  ;;  %v1476_v1 = vld [vmem:[%s18008_s16 + $0x1604] sm:$0xf] }
 0x1d8   : > { %1475 = vst [vmem:[%s18004_s29 + $0x1600] sm:$0xf] %v1474_v0  ;;  %v1478_v2 = vld [vmem:[%s18008_s16 + $0x1608] sm:$0xf]  ;;  %v1480_v3 = vld [vmem:[%s18008_s16 + $0x160c] sm:$0xf] }
 0x1d9   : > { %1477 = vst [vmem:[%s18004_s29 + $0x1608] sm:$0xf] %v1476_v1  ;;  %1479 = vst [vmem:[%s18004_s29 + $0x1610] sm:$0xf] %v1478_v2  ;;  %v1482_v4 = vld [vmem:[%s18008_s16 + $0x1610] sm:$0xf] }
 0x1da   : > { %1481 = vst [vmem:[%s18004_s29 + $0x1618] sm:$0xf] %v1480_v3  ;;  %v1484_v5 = vld [vmem:[%s18008_s16 + $0x1614] sm:$0xf]  ;;  %v1486_v6 = vld [vmem:[%s18008_s16 + $0x1618] sm:$0xf] }
 0x1db   : > { %1483 = vst [vmem:[%s18004_s29 + $0x1620] sm:$0xf] %v1482_v4  ;;  %1485 = vst [vmem:[%s18004_s29 + $0x1628] sm:$0xf] %v1484_v5  ;;  %v1488_v7 = vld [vmem:[%s18008_s16 + $0x161c] sm:$0xf] }
 0x1dc   : > { %1487 = vst [vmem:[%s18004_s29 + $0x1630] sm:$0xf] %v1486_v6  ;;  %v1490_v8 = vld [vmem:[%s18008_s16 + $0x1640] sm:$0xf]  ;;  %v1492_v9 = vld [vmem:[%s18008_s16 + $0x1644] sm:$0xf] }
 0x1dd   : > { %1489 = vst [vmem:[%s18004_s29 + $0x1638] sm:$0xf] %v1488_v7  ;;  %1491 = vst [vmem:[%s18004_s29 + $0x1640] sm:$0xf] %v1490_v8  ;;  %v1494_v10 = vld [vmem:[%s18008_s16 + $0x1648] sm:$0xf] }
 0x1de   : > { %1493 = vst [vmem:[%s18004_s29 + $0x1648] sm:$0xf] %v1492_v9  ;;  %v1496_v11 = vld [vmem:[%s18008_s16 + $0x164c] sm:$0xf]  ;;  %v1498_v12 = vld [vmem:[%s18008_s16 + $0x1650] sm:$0xf] }
 0x1df   : > { %1495 = vst [vmem:[%s18004_s29 + $0x1650] sm:$0xf] %v1494_v10  ;;  %1497 = vst [vmem:[%s18004_s29 + $0x1658] sm:$0xf] %v1496_v11  ;;  %v1500_v13 = vld [vmem:[%s18008_s16 + $0x1654] sm:$0xf] }
 0x1e0   : > { %1499 = vst [vmem:[%s18004_s29 + $0x1660] sm:$0xf] %v1498_v12  ;;  %v1502_v14 = vld [vmem:[%s18008_s16 + $0x1658] sm:$0xf]  ;;  %v1504_v15 = vld [vmem:[%s18008_s16 + $0x165c] sm:$0xf] }
 0x1e1   : > { %1501 = vst [vmem:[%s18004_s29 + $0x1668] sm:$0xf] %v1500_v13  ;;  %1503 = vst [vmem:[%s18004_s29 + $0x1670] sm:$0xf] %v1502_v14  ;;  %v1506_v16 = vld [vmem:[%s18008_s16 + $0x1680] sm:$0xf] }
 0x1e2   : > { %1505 = vst [vmem:[%s18004_s29 + $0x1678] sm:$0xf] %v1504_v15  ;;  %v1508_v17 = vld [vmem:[%s18008_s16 + $0x1684] sm:$0xf]  ;;  %v1510_v18 = vld [vmem:[%s18008_s16 + $0x1688] sm:$0xf] }
 0x1e3   : > { %1507 = vst [vmem:[%s18004_s29 + $0x1680] sm:$0xf] %v1506_v16  ;;  %1509 = vst [vmem:[%s18004_s29 + $0x1688] sm:$0xf] %v1508_v17  ;;  %v1512_v19 = vld [vmem:[%s18008_s16 + $0x168c] sm:$0xf] }
 0x1e4   : > { %1511 = vst [vmem:[%s18004_s29 + $0x1690] sm:$0xf] %v1510_v18  ;;  %v1514_v20 = vld [vmem:[%s18008_s16 + $0x1690] sm:$0xf]  ;;  %v1516_v21 = vld [vmem:[%s18008_s16 + $0x1694] sm:$0xf] }
 0x1e5   : > { %1513 = vst [vmem:[%s18004_s29 + $0x1698] sm:$0xf] %v1512_v19  ;;  %1515 = vst [vmem:[%s18004_s29 + $0x16a0] sm:$0xf] %v1514_v20  ;;  %v1518_v22 = vld [vmem:[%s18008_s16 + $0x1698] sm:$0xf] }
 0x1e6   : > { %1517 = vst [vmem:[%s18004_s29 + $0x16a8] sm:$0xf] %v1516_v21  ;;  %v1520_v23 = vld [vmem:[%s18008_s16 + $0x169c] sm:$0xf]  ;;  %v1522_v24 = vld [vmem:[%s18008_s16 + $0x16c0] sm:$0xf] }
 0x1e7   : > { %1519 = vst [vmem:[%s18004_s29 + $0x16b0] sm:$0xf] %v1518_v22  ;;  %1521 = vst [vmem:[%s18004_s29 + $0x16b8] sm:$0xf] %v1520_v23  ;;  %v1524_v25 = vld [vmem:[%s18008_s16 + $0x16c4] sm:$0xf] }
 0x1e8   : > { %1523 = vst [vmem:[%s18004_s29 + $0x16c0] sm:$0xf] %v1522_v24  ;;  %v1526_v26 = vld [vmem:[%s18008_s16 + $0x16c8] sm:$0xf]  ;;  %v1528_v27 = vld [vmem:[%s18008_s16 + $0x16cc] sm:$0xf] }
 0x1e9   : > { %1525 = vst [vmem:[%s18004_s29 + $0x16c8] sm:$0xf] %v1524_v25  ;;  %1527 = vst [vmem:[%s18004_s29 + $0x16d0] sm:$0xf] %v1526_v26  ;;  %v1530_v28 = vld [vmem:[%s18008_s16 + $0x16d0] sm:$0xf] }
 0x1ea   : > { %1529 = vst [vmem:[%s18004_s29 + $0x16d8] sm:$0xf] %v1528_v27  ;;  %v1532_v29 = vld [vmem:[%s18008_s16 + $0x16d4] sm:$0xf]  ;;  %v1534_v30 = vld [vmem:[%s18008_s16 + $0x16d8] sm:$0xf] }
 0x1eb   : > { %1531 = vst [vmem:[%s18004_s29 + $0x16e0] sm:$0xf] %v1530_v28  ;;  %1533 = vst [vmem:[%s18004_s29 + $0x16e8] sm:$0xf] %v1532_v29  ;;  %v1536_v31 = vld [vmem:[%s18008_s16 + $0x16dc] sm:$0xf] }
 0x1ec   : > { %1535 = vst [vmem:[%s18004_s29 + $0x16f0] sm:$0xf] %v1534_v30  ;;  %v1538_v32 = vld [vmem:[%s18008_s16 + $0x1700] sm:$0xf]  ;;  %v1540_v33 = vld [vmem:[%s18008_s16 + $0x1704] sm:$0xf] }
 0x1ed   : > { %1537 = vst [vmem:[%s18004_s29 + $0x16f8] sm:$0xf] %v1536_v31  ;;  %1539 = vst [vmem:[%s18004_s29 + $0x1700] sm:$0xf] %v1538_v32  ;;  %v1542_v34 = vld [vmem:[%s18008_s16 + $0x1708] sm:$0xf] }
 0x1ee   : > { %1541 = vst [vmem:[%s18004_s29 + $0x1708] sm:$0xf] %v1540_v33  ;;  %v1544_v35 = vld [vmem:[%s18008_s16 + $0x170c] sm:$0xf]  ;;  %v1546_v36 = vld [vmem:[%s18008_s16 + $0x1710] sm:$0xf] }
 0x1ef   : > { %1543 = vst [vmem:[%s18004_s29 + $0x1710] sm:$0xf] %v1542_v34  ;;  %1545 = vst [vmem:[%s18004_s29 + $0x1718] sm:$0xf] %v1544_v35  ;;  %v1548_v37 = vld [vmem:[%s18008_s16 + $0x1714] sm:$0xf] }
 0x1f0   : > { %1547 = vst [vmem:[%s18004_s29 + $0x1720] sm:$0xf] %v1546_v36  ;;  %v1550_v38 = vld [vmem:[%s18008_s16 + $0x1718] sm:$0xf]  ;;  %v1552_v39 = vld [vmem:[%s18008_s16 + $0x171c] sm:$0xf] }
 0x1f1   : > { %1549 = vst [vmem:[%s18004_s29 + $0x1728] sm:$0xf] %v1548_v37  ;;  %1551 = vst [vmem:[%s18004_s29 + $0x1730] sm:$0xf] %v1550_v38  ;;  %v1554_v40 = vld [vmem:[%s18008_s16 + $0x1740] sm:$0xf] }
 0x1f2   : > { %1553 = vst [vmem:[%s18004_s29 + $0x1738] sm:$0xf] %v1552_v39  ;;  %v1556_v41 = vld [vmem:[%s18008_s16 + $0x1744] sm:$0xf]  ;;  %v1558_v42 = vld [vmem:[%s18008_s16 + $0x1748] sm:$0xf] }
 0x1f3   : > { %1555 = vst [vmem:[%s18004_s29 + $0x1740] sm:$0xf] %v1554_v40  ;;  %1557 = vst [vmem:[%s18004_s29 + $0x1748] sm:$0xf] %v1556_v41  ;;  %v1560_v43 = vld [vmem:[%s18008_s16 + $0x174c] sm:$0xf] }
 0x1f4   : > { %1559 = vst [vmem:[%s18004_s29 + $0x1750] sm:$0xf] %v1558_v42  ;;  %v1562_v44 = vld [vmem:[%s18008_s16 + $0x1750] sm:$0xf]  ;;  %v1564_v45 = vld [vmem:[%s18008_s16 + $0x1754] sm:$0xf] }
 0x1f5   : > { %1561 = vst [vmem:[%s18004_s29 + $0x1758] sm:$0xf] %v1560_v43  ;;  %1563 = vst [vmem:[%s18004_s29 + $0x1760] sm:$0xf] %v1562_v44  ;;  %v1566_v46 = vld [vmem:[%s18008_s16 + $0x1758] sm:$0xf] }
 0x1f6   : > { %1565 = vst [vmem:[%s18004_s29 + $0x1768] sm:$0xf] %v1564_v45  ;;  %v1568_v47 = vld [vmem:[%s18008_s16 + $0x175c] sm:$0xf]  ;;  %v1570_v48 = vld [vmem:[%s18008_s16 + $0x1780] sm:$0xf] }
 0x1f7   : > { %1567 = vst [vmem:[%s18004_s29 + $0x1770] sm:$0xf] %v1566_v46  ;;  %1569 = vst [vmem:[%s18004_s29 + $0x1778] sm:$0xf] %v1568_v47  ;;  %v1572_v49 = vld [vmem:[%s18008_s16 + $0x1784] sm:$0xf] }
 0x1f8   : > { %1571 = vst [vmem:[%s18004_s29 + $0x1780] sm:$0xf] %v1570_v48  ;;  %v1574_v50 = vld [vmem:[%s18008_s16 + $0x1788] sm:$0xf]  ;;  %v1576_v51 = vld [vmem:[%s18008_s16 + $0x178c] sm:$0xf] }
 0x1f9   : > { %1573 = vst [vmem:[%s18004_s29 + $0x1788] sm:$0xf] %v1572_v49  ;;  %1575 = vst [vmem:[%s18004_s29 + $0x1790] sm:$0xf] %v1574_v50  ;;  %v1578_v52 = vld [vmem:[%s18008_s16 + $0x1790] sm:$0xf] }
 0x1fa   : > { %1577 = vst [vmem:[%s18004_s29 + $0x1798] sm:$0xf] %v1576_v51  ;;  %v1580_v53 = vld [vmem:[%s18008_s16 + $0x1794] sm:$0xf]  ;;  %v1582_v54 = vld [vmem:[%s18008_s16 + $0x1798] sm:$0xf] }
 0x1fb   : > { %1579 = vst [vmem:[%s18004_s29 + $0x17a0] sm:$0xf] %v1578_v52  ;;  %1581 = vst [vmem:[%s18004_s29 + $0x17a8] sm:$0xf] %v1580_v53  ;;  %v1584_v55 = vld [vmem:[%s18008_s16 + $0x179c] sm:$0xf] }
 0x1fc   : > { %1583 = vst [vmem:[%s18004_s29 + $0x17b0] sm:$0xf] %v1582_v54  ;;  %v1586_v56 = vld [vmem:[%s18008_s16 + $0x17c0] sm:$0xf]  ;;  %v1588_v57 = vld [vmem:[%s18008_s16 + $0x17c4] sm:$0xf] }
 0x1fd   : > { %1585 = vst [vmem:[%s18004_s29 + $0x17b8] sm:$0xf] %v1584_v55  ;;  %1587 = vst [vmem:[%s18004_s29 + $0x17c0] sm:$0xf] %v1586_v56  ;;  %v1590_v58 = vld [vmem:[%s18008_s16 + $0x17c8] sm:$0xf] }
 0x1fe   : > { %1589 = vst [vmem:[%s18004_s29 + $0x17c8] sm:$0xf] %v1588_v57  ;;  %v1592_v59 = vld [vmem:[%s18008_s16 + $0x17cc] sm:$0xf]  ;;  %v1594_v60 = vld [vmem:[%s18008_s16 + $0x17d0] sm:$0xf] }
 0x1ff   : > { %1591 = vst [vmem:[%s18004_s29 + $0x17d0] sm:$0xf] %v1590_v58  ;;  %1593 = vst [vmem:[%s18004_s29 + $0x17d8] sm:$0xf] %v1592_v59  ;;  %v1596_v61 = vld [vmem:[%s18008_s16 + $0x17d4] sm:$0xf] }
 0x200   : > { %1595 = vst [vmem:[%s18004_s29 + $0x17e0] sm:$0xf] %v1594_v60  ;;  %v1598_v62 = vld [vmem:[%s18008_s16 + $0x17d8] sm:$0xf]  ;;  %v1600_v63 = vld [vmem:[%s18008_s16 + $0x17dc] sm:$0xf] }
 0x201   : > { %1597 = vst [vmem:[%s18004_s29 + $0x17e8] sm:$0xf] %v1596_v61  ;;  %1599 = vst [vmem:[%s18004_s29 + $0x17f0] sm:$0xf] %v1598_v62  ;;  %v1602_v0 = vld [vmem:[%s18008_s16 + $0x1800] sm:$0xf] }
 0x202   : > { %1601 = vst [vmem:[%s18004_s29 + $0x17f8] sm:$0xf] %v1600_v63  ;;  %v1604_v1 = vld [vmem:[%s18008_s16 + $0x1804] sm:$0xf]  ;;  %v1606_v2 = vld [vmem:[%s18008_s16 + $0x1808] sm:$0xf] }
 0x203   : > { %1603 = vst [vmem:[%s18004_s29 + $0x1800] sm:$0xf] %v1602_v0  ;;  %1605 = vst [vmem:[%s18004_s29 + $0x1808] sm:$0xf] %v1604_v1  ;;  %v1608_v3 = vld [vmem:[%s18008_s16 + $0x180c] sm:$0xf] }
 0x204   : > { %1607 = vst [vmem:[%s18004_s29 + $0x1810] sm:$0xf] %v1606_v2  ;;  %v1610_v4 = vld [vmem:[%s18008_s16 + $0x1810] sm:$0xf]  ;;  %v1612_v5 = vld [vmem:[%s18008_s16 + $0x1814] sm:$0xf] }
 0x205   : > { %1609 = vst [vmem:[%s18004_s29 + $0x1818] sm:$0xf] %v1608_v3  ;;  %1611 = vst [vmem:[%s18004_s29 + $0x1820] sm:$0xf] %v1610_v4  ;;  %v1614_v6 = vld [vmem:[%s18008_s16 + $0x1818] sm:$0xf] }
 0x206   : > { %1613 = vst [vmem:[%s18004_s29 + $0x1828] sm:$0xf] %v1612_v5  ;;  %v1616_v7 = vld [vmem:[%s18008_s16 + $0x181c] sm:$0xf]  ;;  %v1618_v8 = vld [vmem:[%s18008_s16 + $0x1840] sm:$0xf] }
 0x207   : > { %1615 = vst [vmem:[%s18004_s29 + $0x1830] sm:$0xf] %v1614_v6  ;;  %1617 = vst [vmem:[%s18004_s29 + $0x1838] sm:$0xf] %v1616_v7  ;;  %v1620_v9 = vld [vmem:[%s18008_s16 + $0x1844] sm:$0xf] }
 0x208   : > { %1619 = vst [vmem:[%s18004_s29 + $0x1840] sm:$0xf] %v1618_v8  ;;  %v1622_v10 = vld [vmem:[%s18008_s16 + $0x1848] sm:$0xf]  ;;  %v1624_v11 = vld [vmem:[%s18008_s16 + $0x184c] sm:$0xf] }
 0x209   : > { %1621 = vst [vmem:[%s18004_s29 + $0x1848] sm:$0xf] %v1620_v9  ;;  %1623 = vst [vmem:[%s18004_s29 + $0x1850] sm:$0xf] %v1622_v10  ;;  %v1626_v12 = vld [vmem:[%s18008_s16 + $0x1850] sm:$0xf] }
 0x20a   : > { %1625 = vst [vmem:[%s18004_s29 + $0x1858] sm:$0xf] %v1624_v11  ;;  %v1628_v13 = vld [vmem:[%s18008_s16 + $0x1854] sm:$0xf]  ;;  %v1630_v14 = vld [vmem:[%s18008_s16 + $0x1858] sm:$0xf] }
 0x20b   : > { %1627 = vst [vmem:[%s18004_s29 + $0x1860] sm:$0xf] %v1626_v12  ;;  %1629 = vst [vmem:[%s18004_s29 + $0x1868] sm:$0xf] %v1628_v13  ;;  %v1632_v15 = vld [vmem:[%s18008_s16 + $0x185c] sm:$0xf] }
 0x20c   : > { %1631 = vst [vmem:[%s18004_s29 + $0x1870] sm:$0xf] %v1630_v14  ;;  %v1634_v16 = vld [vmem:[%s18008_s16 + $0x1880] sm:$0xf]  ;;  %v1636_v17 = vld [vmem:[%s18008_s16 + $0x1884] sm:$0xf] }
 0x20d   : > { %1633 = vst [vmem:[%s18004_s29 + $0x1878] sm:$0xf] %v1632_v15  ;;  %1635 = vst [vmem:[%s18004_s29 + $0x1880] sm:$0xf] %v1634_v16  ;;  %v1638_v18 = vld [vmem:[%s18008_s16 + $0x1888] sm:$0xf] }
 0x20e   : > { %1637 = vst [vmem:[%s18004_s29 + $0x1888] sm:$0xf] %v1636_v17  ;;  %v1640_v19 = vld [vmem:[%s18008_s16 + $0x188c] sm:$0xf]  ;;  %v1642_v20 = vld [vmem:[%s18008_s16 + $0x1890] sm:$0xf] }
 0x20f   : > { %1639 = vst [vmem:[%s18004_s29 + $0x1890] sm:$0xf] %v1638_v18  ;;  %1641 = vst [vmem:[%s18004_s29 + $0x1898] sm:$0xf] %v1640_v19  ;;  %v1644_v21 = vld [vmem:[%s18008_s16 + $0x1894] sm:$0xf] }
 0x210   : > { %1643 = vst [vmem:[%s18004_s29 + $0x18a0] sm:$0xf] %v1642_v20  ;;  %v1646_v22 = vld [vmem:[%s18008_s16 + $0x1898] sm:$0xf]  ;;  %v1648_v23 = vld [vmem:[%s18008_s16 + $0x189c] sm:$0xf] }
 0x211   : > { %1645 = vst [vmem:[%s18004_s29 + $0x18a8] sm:$0xf] %v1644_v21  ;;  %1647 = vst [vmem:[%s18004_s29 + $0x18b0] sm:$0xf] %v1646_v22  ;;  %v1650_v24 = vld [vmem:[%s18008_s16 + $0x18c0] sm:$0xf] }
 0x212   : > { %1649 = vst [vmem:[%s18004_s29 + $0x18b8] sm:$0xf] %v1648_v23  ;;  %v1652_v25 = vld [vmem:[%s18008_s16 + $0x18c4] sm:$0xf]  ;;  %v1654_v26 = vld [vmem:[%s18008_s16 + $0x18c8] sm:$0xf] }
 0x213   : > { %1651 = vst [vmem:[%s18004_s29 + $0x18c0] sm:$0xf] %v1650_v24  ;;  %1653 = vst [vmem:[%s18004_s29 + $0x18c8] sm:$0xf] %v1652_v25  ;;  %v1656_v27 = vld [vmem:[%s18008_s16 + $0x18cc] sm:$0xf] }
 0x214   : > { %1655 = vst [vmem:[%s18004_s29 + $0x18d0] sm:$0xf] %v1654_v26  ;;  %v1658_v28 = vld [vmem:[%s18008_s16 + $0x18d0] sm:$0xf]  ;;  %v1660_v29 = vld [vmem:[%s18008_s16 + $0x18d4] sm:$0xf] }
 0x215   : > { %1657 = vst [vmem:[%s18004_s29 + $0x18d8] sm:$0xf] %v1656_v27  ;;  %1659 = vst [vmem:[%s18004_s29 + $0x18e0] sm:$0xf] %v1658_v28  ;;  %v1662_v30 = vld [vmem:[%s18008_s16 + $0x18d8] sm:$0xf] }
 0x216   : > { %1661 = vst [vmem:[%s18004_s29 + $0x18e8] sm:$0xf] %v1660_v29  ;;  %v1664_v31 = vld [vmem:[%s18008_s16 + $0x18dc] sm:$0xf]  ;;  %v1666_v32 = vld [vmem:[%s18008_s16 + $0x1900] sm:$0xf] }
 0x217   : > { %1663 = vst [vmem:[%s18004_s29 + $0x18f0] sm:$0xf] %v1662_v30  ;;  %1665 = vst [vmem:[%s18004_s29 + $0x18f8] sm:$0xf] %v1664_v31  ;;  %v1668_v33 = vld [vmem:[%s18008_s16 + $0x1904] sm:$0xf] }
 0x218   : > { %1667 = vst [vmem:[%s18004_s29 + $0x1900] sm:$0xf] %v1666_v32  ;;  %v1670_v34 = vld [vmem:[%s18008_s16 + $0x1908] sm:$0xf]  ;;  %v1672_v35 = vld [vmem:[%s18008_s16 + $0x190c] sm:$0xf] }
 0x219   : > { %1669 = vst [vmem:[%s18004_s29 + $0x1908] sm:$0xf] %v1668_v33  ;;  %1671 = vst [vmem:[%s18004_s29 + $0x1910] sm:$0xf] %v1670_v34  ;;  %v1674_v36 = vld [vmem:[%s18008_s16 + $0x1910] sm:$0xf] }
 0x21a   : > { %1673 = vst [vmem:[%s18004_s29 + $0x1918] sm:$0xf] %v1672_v35  ;;  %v1676_v37 = vld [vmem:[%s18008_s16 + $0x1914] sm:$0xf]  ;;  %v1678_v38 = vld [vmem:[%s18008_s16 + $0x1918] sm:$0xf] }
 0x21b   : > { %1675 = vst [vmem:[%s18004_s29 + $0x1920] sm:$0xf] %v1674_v36  ;;  %1677 = vst [vmem:[%s18004_s29 + $0x1928] sm:$0xf] %v1676_v37  ;;  %v1680_v39 = vld [vmem:[%s18008_s16 + $0x191c] sm:$0xf] }
 0x21c   : > { %1679 = vst [vmem:[%s18004_s29 + $0x1930] sm:$0xf] %v1678_v38  ;;  %v1682_v40 = vld [vmem:[%s18008_s16 + $0x1940] sm:$0xf]  ;;  %v1684_v41 = vld [vmem:[%s18008_s16 + $0x1944] sm:$0xf] }
 0x21d   : > { %1681 = vst [vmem:[%s18004_s29 + $0x1938] sm:$0xf] %v1680_v39  ;;  %1683 = vst [vmem:[%s18004_s29 + $0x1940] sm:$0xf] %v1682_v40  ;;  %v1686_v42 = vld [vmem:[%s18008_s16 + $0x1948] sm:$0xf] }
 0x21e   : > { %1685 = vst [vmem:[%s18004_s29 + $0x1948] sm:$0xf] %v1684_v41  ;;  %v1688_v43 = vld [vmem:[%s18008_s16 + $0x194c] sm:$0xf]  ;;  %v1690_v44 = vld [vmem:[%s18008_s16 + $0x1950] sm:$0xf] }
 0x21f   : > { %1687 = vst [vmem:[%s18004_s29 + $0x1950] sm:$0xf] %v1686_v42  ;;  %1689 = vst [vmem:[%s18004_s29 + $0x1958] sm:$0xf] %v1688_v43  ;;  %v1692_v45 = vld [vmem:[%s18008_s16 + $0x1954] sm:$0xf] }
 0x220   : > { %1691 = vst [vmem:[%s18004_s29 + $0x1960] sm:$0xf] %v1690_v44  ;;  %v1694_v46 = vld [vmem:[%s18008_s16 + $0x1958] sm:$0xf]  ;;  %v1696_v47 = vld [vmem:[%s18008_s16 + $0x195c] sm:$0xf] }
 0x221   : > { %1693 = vst [vmem:[%s18004_s29 + $0x1968] sm:$0xf] %v1692_v45  ;;  %1695 = vst [vmem:[%s18004_s29 + $0x1970] sm:$0xf] %v1694_v46  ;;  %v1698_v48 = vld [vmem:[%s18008_s16 + $0x1980] sm:$0xf] }
 0x222   : > { %1697 = vst [vmem:[%s18004_s29 + $0x1978] sm:$0xf] %v1696_v47  ;;  %v1700_v49 = vld [vmem:[%s18008_s16 + $0x1984] sm:$0xf]  ;;  %v1702_v50 = vld [vmem:[%s18008_s16 + $0x1988] sm:$0xf] }
 0x223   : > { %1699 = vst [vmem:[%s18004_s29 + $0x1980] sm:$0xf] %v1698_v48  ;;  %1701 = vst [vmem:[%s18004_s29 + $0x1988] sm:$0xf] %v1700_v49  ;;  %v1704_v51 = vld [vmem:[%s18008_s16 + $0x198c] sm:$0xf] }
 0x224   : > { %1703 = vst [vmem:[%s18004_s29 + $0x1990] sm:$0xf] %v1702_v50  ;;  %v1706_v52 = vld [vmem:[%s18008_s16 + $0x1990] sm:$0xf]  ;;  %v1708_v53 = vld [vmem:[%s18008_s16 + $0x1994] sm:$0xf] }
 0x225   : > { %1705 = vst [vmem:[%s18004_s29 + $0x1998] sm:$0xf] %v1704_v51  ;;  %1707 = vst [vmem:[%s18004_s29 + $0x19a0] sm:$0xf] %v1706_v52  ;;  %v1710_v54 = vld [vmem:[%s18008_s16 + $0x1998] sm:$0xf] }
 0x226   : > { %1709 = vst [vmem:[%s18004_s29 + $0x19a8] sm:$0xf] %v1708_v53  ;;  %v1712_v55 = vld [vmem:[%s18008_s16 + $0x199c] sm:$0xf]  ;;  %v1714_v56 = vld [vmem:[%s18008_s16 + $0x19c0] sm:$0xf] }
 0x227   : > { %1711 = vst [vmem:[%s18004_s29 + $0x19b0] sm:$0xf] %v1710_v54  ;;  %1713 = vst [vmem:[%s18004_s29 + $0x19b8] sm:$0xf] %v1712_v55  ;;  %v1716_v57 = vld [vmem:[%s18008_s16 + $0x19c4] sm:$0xf] }
 0x228   : > { %1715 = vst [vmem:[%s18004_s29 + $0x19c0] sm:$0xf] %v1714_v56  ;;  %v1718_v58 = vld [vmem:[%s18008_s16 + $0x19c8] sm:$0xf]  ;;  %v1720_v59 = vld [vmem:[%s18008_s16 + $0x19cc] sm:$0xf] }
 0x229   : > { %1717 = vst [vmem:[%s18004_s29 + $0x19c8] sm:$0xf] %v1716_v57  ;;  %1719 = vst [vmem:[%s18004_s29 + $0x19d0] sm:$0xf] %v1718_v58  ;;  %v1722_v60 = vld [vmem:[%s18008_s16 + $0x19d0] sm:$0xf] }
 0x22a   : > { %1721 = vst [vmem:[%s18004_s29 + $0x19d8] sm:$0xf] %v1720_v59  ;;  %v1724_v61 = vld [vmem:[%s18008_s16 + $0x19d4] sm:$0xf]  ;;  %v1726_v62 = vld [vmem:[%s18008_s16 + $0x19d8] sm:$0xf] }
 0x22b   : > { %1723 = vst [vmem:[%s18004_s29 + $0x19e0] sm:$0xf] %v1722_v60  ;;  %1725 = vst [vmem:[%s18004_s29 + $0x19e8] sm:$0xf] %v1724_v61  ;;  %v1728_v63 = vld [vmem:[%s18008_s16 + $0x19dc] sm:$0xf] }
 0x22c   : > { %1727 = vst [vmem:[%s18004_s29 + $0x19f0] sm:$0xf] %v1726_v62  ;;  %v1730_v0 = vld [vmem:[%s18008_s16 + $0x1a00] sm:$0xf]  ;;  %v1732_v1 = vld [vmem:[%s18008_s16 + $0x1a04] sm:$0xf] }
 0x22d   : > { %1729 = vst [vmem:[%s18004_s29 + $0x19f8] sm:$0xf] %v1728_v63  ;;  %1731 = vst [vmem:[%s18004_s29 + $0x1a00] sm:$0xf] %v1730_v0  ;;  %v1734_v2 = vld [vmem:[%s18008_s16 + $0x1a08] sm:$0xf] }
 0x22e   : > { %1733 = vst [vmem:[%s18004_s29 + $0x1a08] sm:$0xf] %v1732_v1  ;;  %v1736_v3 = vld [vmem:[%s18008_s16 + $0x1a0c] sm:$0xf]  ;;  %v1738_v4 = vld [vmem:[%s18008_s16 + $0x1a10] sm:$0xf] }
 0x22f   : > { %1735 = vst [vmem:[%s18004_s29 + $0x1a10] sm:$0xf] %v1734_v2  ;;  %1737 = vst [vmem:[%s18004_s29 + $0x1a18] sm:$0xf] %v1736_v3  ;;  %v1740_v5 = vld [vmem:[%s18008_s16 + $0x1a14] sm:$0xf] }
 0x230   : > { %1739 = vst [vmem:[%s18004_s29 + $0x1a20] sm:$0xf] %v1738_v4  ;;  %v1742_v6 = vld [vmem:[%s18008_s16 + $0x1a18] sm:$0xf]  ;;  %v1744_v7 = vld [vmem:[%s18008_s16 + $0x1a1c] sm:$0xf] }
 0x231   : > { %1741 = vst [vmem:[%s18004_s29 + $0x1a28] sm:$0xf] %v1740_v5  ;;  %1743 = vst [vmem:[%s18004_s29 + $0x1a30] sm:$0xf] %v1742_v6  ;;  %v1746_v8 = vld [vmem:[%s18008_s16 + $0x1a40] sm:$0xf] }
 0x232   : > { %1745 = vst [vmem:[%s18004_s29 + $0x1a38] sm:$0xf] %v1744_v7  ;;  %v1748_v9 = vld [vmem:[%s18008_s16 + $0x1a44] sm:$0xf]  ;;  %v1750_v10 = vld [vmem:[%s18008_s16 + $0x1a48] sm:$0xf] }
 0x233   : > { %1747 = vst [vmem:[%s18004_s29 + $0x1a40] sm:$0xf] %v1746_v8  ;;  %1749 = vst [vmem:[%s18004_s29 + $0x1a48] sm:$0xf] %v1748_v9  ;;  %v1752_v11 = vld [vmem:[%s18008_s16 + $0x1a4c] sm:$0xf] }
 0x234   : > { %1751 = vst [vmem:[%s18004_s29 + $0x1a50] sm:$0xf] %v1750_v10  ;;  %v1754_v12 = vld [vmem:[%s18008_s16 + $0x1a50] sm:$0xf]  ;;  %v1756_v13 = vld [vmem:[%s18008_s16 + $0x1a54] sm:$0xf] }
 0x235   : > { %1753 = vst [vmem:[%s18004_s29 + $0x1a58] sm:$0xf] %v1752_v11  ;;  %1755 = vst [vmem:[%s18004_s29 + $0x1a60] sm:$0xf] %v1754_v12  ;;  %v1758_v14 = vld [vmem:[%s18008_s16 + $0x1a58] sm:$0xf] }
 0x236   : > { %1757 = vst [vmem:[%s18004_s29 + $0x1a68] sm:$0xf] %v1756_v13  ;;  %v1760_v15 = vld [vmem:[%s18008_s16 + $0x1a5c] sm:$0xf]  ;;  %v1762_v16 = vld [vmem:[%s18008_s16 + $0x1a80] sm:$0xf] }
 0x237   : > { %1759 = vst [vmem:[%s18004_s29 + $0x1a70] sm:$0xf] %v1758_v14  ;;  %1761 = vst [vmem:[%s18004_s29 + $0x1a78] sm:$0xf] %v1760_v15  ;;  %v1764_v17 = vld [vmem:[%s18008_s16 + $0x1a84] sm:$0xf] }
 0x238   : > { %1763 = vst [vmem:[%s18004_s29 + $0x1a80] sm:$0xf] %v1762_v16  ;;  %v1766_v18 = vld [vmem:[%s18008_s16 + $0x1a88] sm:$0xf]  ;;  %v1768_v19 = vld [vmem:[%s18008_s16 + $0x1a8c] sm:$0xf] }
 0x239   : > { %1765 = vst [vmem:[%s18004_s29 + $0x1a88] sm:$0xf] %v1764_v17  ;;  %1767 = vst [vmem:[%s18004_s29 + $0x1a90] sm:$0xf] %v1766_v18  ;;  %v1770_v20 = vld [vmem:[%s18008_s16 + $0x1a90] sm:$0xf] }
 0x23a   : > { %1769 = vst [vmem:[%s18004_s29 + $0x1a98] sm:$0xf] %v1768_v19  ;;  %v1772_v21 = vld [vmem:[%s18008_s16 + $0x1a94] sm:$0xf]  ;;  %v1774_v22 = vld [vmem:[%s18008_s16 + $0x1a98] sm:$0xf] }
 0x23b   : > { %1771 = vst [vmem:[%s18004_s29 + $0x1aa0] sm:$0xf] %v1770_v20  ;;  %1773 = vst [vmem:[%s18004_s29 + $0x1aa8] sm:$0xf] %v1772_v21  ;;  %v1776_v23 = vld [vmem:[%s18008_s16 + $0x1a9c] sm:$0xf] }
 0x23c   : > { %1775 = vst [vmem:[%s18004_s29 + $0x1ab0] sm:$0xf] %v1774_v22  ;;  %v1778_v24 = vld [vmem:[%s18008_s16 + $0x1ac0] sm:$0xf]  ;;  %v1780_v25 = vld [vmem:[%s18008_s16 + $0x1ac4] sm:$0xf] }
 0x23d   : > { %1777 = vst [vmem:[%s18004_s29 + $0x1ab8] sm:$0xf] %v1776_v23  ;;  %1779 = vst [vmem:[%s18004_s29 + $0x1ac0] sm:$0xf] %v1778_v24  ;;  %v1782_v26 = vld [vmem:[%s18008_s16 + $0x1ac8] sm:$0xf] }
 0x23e   : > { %1781 = vst [vmem:[%s18004_s29 + $0x1ac8] sm:$0xf] %v1780_v25  ;;  %v1784_v27 = vld [vmem:[%s18008_s16 + $0x1acc] sm:$0xf]  ;;  %v1786_v28 = vld [vmem:[%s18008_s16 + $0x1ad0] sm:$0xf] }
 0x23f   : > { %1783 = vst [vmem:[%s18004_s29 + $0x1ad0] sm:$0xf] %v1782_v26  ;;  %1785 = vst [vmem:[%s18004_s29 + $0x1ad8] sm:$0xf] %v1784_v27  ;;  %v1788_v29 = vld [vmem:[%s18008_s16 + $0x1ad4] sm:$0xf] }
 0x240   : > { %1787 = vst [vmem:[%s18004_s29 + $0x1ae0] sm:$0xf] %v1786_v28  ;;  %v1790_v30 = vld [vmem:[%s18008_s16 + $0x1ad8] sm:$0xf]  ;;  %v1792_v31 = vld [vmem:[%s18008_s16 + $0x1adc] sm:$0xf] }
 0x241   : > { %1789 = vst [vmem:[%s18004_s29 + $0x1ae8] sm:$0xf] %v1788_v29  ;;  %1791 = vst [vmem:[%s18004_s29 + $0x1af0] sm:$0xf] %v1790_v30  ;;  %v1794_v32 = vld [vmem:[%s18008_s16 + $0x1b00] sm:$0xf] }
 0x242   : > { %1793 = vst [vmem:[%s18004_s29 + $0x1af8] sm:$0xf] %v1792_v31  ;;  %v1796_v33 = vld [vmem:[%s18008_s16 + $0x1b04] sm:$0xf]  ;;  %v1798_v34 = vld [vmem:[%s18008_s16 + $0x1b08] sm:$0xf] }
 0x243   : > { %1795 = vst [vmem:[%s18004_s29 + $0x1b00] sm:$0xf] %v1794_v32  ;;  %1797 = vst [vmem:[%s18004_s29 + $0x1b08] sm:$0xf] %v1796_v33  ;;  %v1800_v35 = vld [vmem:[%s18008_s16 + $0x1b0c] sm:$0xf] }
 0x244   : > { %1799 = vst [vmem:[%s18004_s29 + $0x1b10] sm:$0xf] %v1798_v34  ;;  %v1802_v36 = vld [vmem:[%s18008_s16 + $0x1b10] sm:$0xf]  ;;  %v1804_v37 = vld [vmem:[%s18008_s16 + $0x1b14] sm:$0xf] }
 0x245   : > { %1801 = vst [vmem:[%s18004_s29 + $0x1b18] sm:$0xf] %v1800_v35  ;;  %1803 = vst [vmem:[%s18004_s29 + $0x1b20] sm:$0xf] %v1802_v36  ;;  %v1806_v38 = vld [vmem:[%s18008_s16 + $0x1b18] sm:$0xf] }
 0x246   : > { %1805 = vst [vmem:[%s18004_s29 + $0x1b28] sm:$0xf] %v1804_v37  ;;  %v1808_v39 = vld [vmem:[%s18008_s16 + $0x1b1c] sm:$0xf]  ;;  %v1810_v40 = vld [vmem:[%s18008_s16 + $0x1b40] sm:$0xf] }
 0x247   : > { %1807 = vst [vmem:[%s18004_s29 + $0x1b30] sm:$0xf] %v1806_v38  ;;  %1809 = vst [vmem:[%s18004_s29 + $0x1b38] sm:$0xf] %v1808_v39  ;;  %v1812_v41 = vld [vmem:[%s18008_s16 + $0x1b44] sm:$0xf] }
 0x248   : > { %1811 = vst [vmem:[%s18004_s29 + $0x1b40] sm:$0xf] %v1810_v40  ;;  %v1814_v42 = vld [vmem:[%s18008_s16 + $0x1b48] sm:$0xf]  ;;  %v1816_v43 = vld [vmem:[%s18008_s16 + $0x1b4c] sm:$0xf] }
 0x249   : > { %1813 = vst [vmem:[%s18004_s29 + $0x1b48] sm:$0xf] %v1812_v41  ;;  %1815 = vst [vmem:[%s18004_s29 + $0x1b50] sm:$0xf] %v1814_v42  ;;  %v1818_v44 = vld [vmem:[%s18008_s16 + $0x1b50] sm:$0xf] }
 0x24a   : > { %1817 = vst [vmem:[%s18004_s29 + $0x1b58] sm:$0xf] %v1816_v43  ;;  %v1820_v45 = vld [vmem:[%s18008_s16 + $0x1b54] sm:$0xf]  ;;  %v1822_v46 = vld [vmem:[%s18008_s16 + $0x1b58] sm:$0xf] }
 0x24b   : > { %1819 = vst [vmem:[%s18004_s29 + $0x1b60] sm:$0xf] %v1818_v44  ;;  %1821 = vst [vmem:[%s18004_s29 + $0x1b68] sm:$0xf] %v1820_v45  ;;  %v1824_v47 = vld [vmem:[%s18008_s16 + $0x1b5c] sm:$0xf] }
 0x24c   : > { %1823 = vst [vmem:[%s18004_s29 + $0x1b70] sm:$0xf] %v1822_v46  ;;  %v1826_v48 = vld [vmem:[%s18008_s16 + $0x1b80] sm:$0xf]  ;;  %v1828_v49 = vld [vmem:[%s18008_s16 + $0x1b84] sm:$0xf] }
 0x24d   : > { %1825 = vst [vmem:[%s18004_s29 + $0x1b78] sm:$0xf] %v1824_v47  ;;  %1827 = vst [vmem:[%s18004_s29 + $0x1b80] sm:$0xf] %v1826_v48  ;;  %v1830_v50 = vld [vmem:[%s18008_s16 + $0x1b88] sm:$0xf] }
 0x24e   : > { %1829 = vst [vmem:[%s18004_s29 + $0x1b88] sm:$0xf] %v1828_v49  ;;  %v1832_v51 = vld [vmem:[%s18008_s16 + $0x1b8c] sm:$0xf]  ;;  %v1834_v52 = vld [vmem:[%s18008_s16 + $0x1b90] sm:$0xf] }
 0x24f   : > { %1831 = vst [vmem:[%s18004_s29 + $0x1b90] sm:$0xf] %v1830_v50  ;;  %1833 = vst [vmem:[%s18004_s29 + $0x1b98] sm:$0xf] %v1832_v51  ;;  %v1836_v53 = vld [vmem:[%s18008_s16 + $0x1b94] sm:$0xf] }
 0x250   : > { %1835 = vst [vmem:[%s18004_s29 + $0x1ba0] sm:$0xf] %v1834_v52  ;;  %v1838_v54 = vld [vmem:[%s18008_s16 + $0x1b98] sm:$0xf]  ;;  %v1840_v55 = vld [vmem:[%s18008_s16 + $0x1b9c] sm:$0xf] }
 0x251   : > { %1837 = vst [vmem:[%s18004_s29 + $0x1ba8] sm:$0xf] %v1836_v53  ;;  %1839 = vst [vmem:[%s18004_s29 + $0x1bb0] sm:$0xf] %v1838_v54  ;;  %v1842_v56 = vld [vmem:[%s18008_s16 + $0x1bc0] sm:$0xf] }
 0x252   : > { %1841 = vst [vmem:[%s18004_s29 + $0x1bb8] sm:$0xf] %v1840_v55  ;;  %v1844_v57 = vld [vmem:[%s18008_s16 + $0x1bc4] sm:$0xf]  ;;  %v1846_v58 = vld [vmem:[%s18008_s16 + $0x1bc8] sm:$0xf] }
 0x253   : > { %1843 = vst [vmem:[%s18004_s29 + $0x1bc0] sm:$0xf] %v1842_v56  ;;  %1845 = vst [vmem:[%s18004_s29 + $0x1bc8] sm:$0xf] %v1844_v57  ;;  %v1848_v59 = vld [vmem:[%s18008_s16 + $0x1bcc] sm:$0xf] }
 0x254   : > { %1847 = vst [vmem:[%s18004_s29 + $0x1bd0] sm:$0xf] %v1846_v58  ;;  %v1850_v60 = vld [vmem:[%s18008_s16 + $0x1bd0] sm:$0xf]  ;;  %v1852_v61 = vld [vmem:[%s18008_s16 + $0x1bd4] sm:$0xf] }
 0x255   : > { %1849 = vst [vmem:[%s18004_s29 + $0x1bd8] sm:$0xf] %v1848_v59  ;;  %1851 = vst [vmem:[%s18004_s29 + $0x1be0] sm:$0xf] %v1850_v60  ;;  %v1854_v62 = vld [vmem:[%s18008_s16 + $0x1bd8] sm:$0xf] }
 0x256   : > { %1853 = vst [vmem:[%s18004_s29 + $0x1be8] sm:$0xf] %v1852_v61  ;;  %v1856_v63 = vld [vmem:[%s18008_s16 + $0x1bdc] sm:$0xf]  ;;  %v1858_v0 = vld [vmem:[%s18008_s16 + $0x1c00] sm:$0xf] }
 0x257   : > { %1855 = vst [vmem:[%s18004_s29 + $0x1bf0] sm:$0xf] %v1854_v62  ;;  %1857 = vst [vmem:[%s18004_s29 + $0x1bf8] sm:$0xf] %v1856_v63  ;;  %v1860_v1 = vld [vmem:[%s18008_s16 + $0x1c04] sm:$0xf] }
 0x258   : > { %1859 = vst [vmem:[%s18004_s29 + $0x1c00] sm:$0xf] %v1858_v0  ;;  %v1862_v2 = vld [vmem:[%s18008_s16 + $0x1c08] sm:$0xf]  ;;  %v1864_v3 = vld [vmem:[%s18008_s16 + $0x1c0c] sm:$0xf] }
 0x259   : > { %1861 = vst [vmem:[%s18004_s29 + $0x1c08] sm:$0xf] %v1860_v1  ;;  %1863 = vst [vmem:[%s18004_s29 + $0x1c10] sm:$0xf] %v1862_v2  ;;  %v1866_v4 = vld [vmem:[%s18008_s16 + $0x1c10] sm:$0xf] }
 0x25a   : > { %1865 = vst [vmem:[%s18004_s29 + $0x1c18] sm:$0xf] %v1864_v3  ;;  %v1868_v5 = vld [vmem:[%s18008_s16 + $0x1c14] sm:$0xf]  ;;  %v1870_v6 = vld [vmem:[%s18008_s16 + $0x1c18] sm:$0xf] }
 0x25b   : > { %1867 = vst [vmem:[%s18004_s29 + $0x1c20] sm:$0xf] %v1866_v4  ;;  %1869 = vst [vmem:[%s18004_s29 + $0x1c28] sm:$0xf] %v1868_v5  ;;  %v1872_v7 = vld [vmem:[%s18008_s16 + $0x1c1c] sm:$0xf] }
 0x25c   : > { %1871 = vst [vmem:[%s18004_s29 + $0x1c30] sm:$0xf] %v1870_v6  ;;  %v1874_v8 = vld [vmem:[%s18008_s16 + $0x1c40] sm:$0xf]  ;;  %v1876_v9 = vld [vmem:[%s18008_s16 + $0x1c44] sm:$0xf] }
 0x25d   : > { %1873 = vst [vmem:[%s18004_s29 + $0x1c38] sm:$0xf] %v1872_v7  ;;  %1875 = vst [vmem:[%s18004_s29 + $0x1c40] sm:$0xf] %v1874_v8  ;;  %v1878_v10 = vld [vmem:[%s18008_s16 + $0x1c48] sm:$0xf] }
 0x25e   : > { %1877 = vst [vmem:[%s18004_s29 + $0x1c48] sm:$0xf] %v1876_v9  ;;  %v1880_v11 = vld [vmem:[%s18008_s16 + $0x1c4c] sm:$0xf]  ;;  %v1882_v12 = vld [vmem:[%s18008_s16 + $0x1c50] sm:$0xf] }
 0x25f   : > { %1879 = vst [vmem:[%s18004_s29 + $0x1c50] sm:$0xf] %v1878_v10  ;;  %1881 = vst [vmem:[%s18004_s29 + $0x1c58] sm:$0xf] %v1880_v11  ;;  %v1884_v13 = vld [vmem:[%s18008_s16 + $0x1c54] sm:$0xf] }
 0x260   : > { %1883 = vst [vmem:[%s18004_s29 + $0x1c60] sm:$0xf] %v1882_v12  ;;  %v1886_v14 = vld [vmem:[%s18008_s16 + $0x1c58] sm:$0xf]  ;;  %v1888_v15 = vld [vmem:[%s18008_s16 + $0x1c5c] sm:$0xf] }
 0x261   : > { %1885 = vst [vmem:[%s18004_s29 + $0x1c68] sm:$0xf] %v1884_v13  ;;  %1887 = vst [vmem:[%s18004_s29 + $0x1c70] sm:$0xf] %v1886_v14  ;;  %v1890_v16 = vld [vmem:[%s18008_s16 + $0x1c80] sm:$0xf] }
 0x262   : > { %1889 = vst [vmem:[%s18004_s29 + $0x1c78] sm:$0xf] %v1888_v15  ;;  %v1892_v17 = vld [vmem:[%s18008_s16 + $0x1c84] sm:$0xf]  ;;  %v1894_v18 = vld [vmem:[%s18008_s16 + $0x1c88] sm:$0xf] }
 0x263   : > { %1891 = vst [vmem:[%s18004_s29 + $0x1c80] sm:$0xf] %v1890_v16  ;;  %1893 = vst [vmem:[%s18004_s29 + $0x1c88] sm:$0xf] %v1892_v17  ;;  %v1896_v19 = vld [vmem:[%s18008_s16 + $0x1c8c] sm:$0xf] }
 0x264   : > { %1895 = vst [vmem:[%s18004_s29 + $0x1c90] sm:$0xf] %v1894_v18  ;;  %v1898_v20 = vld [vmem:[%s18008_s16 + $0x1c90] sm:$0xf]  ;;  %v1900_v21 = vld [vmem:[%s18008_s16 + $0x1c94] sm:$0xf] }
 0x265   : > { %1897 = vst [vmem:[%s18004_s29 + $0x1c98] sm:$0xf] %v1896_v19  ;;  %1899 = vst [vmem:[%s18004_s29 + $0x1ca0] sm:$0xf] %v1898_v20  ;;  %v1902_v22 = vld [vmem:[%s18008_s16 + $0x1c98] sm:$0xf] }
 0x266   : > { %1901 = vst [vmem:[%s18004_s29 + $0x1ca8] sm:$0xf] %v1900_v21  ;;  %v1904_v23 = vld [vmem:[%s18008_s16 + $0x1c9c] sm:$0xf]  ;;  %v1906_v24 = vld [vmem:[%s18008_s16 + $0x1cc0] sm:$0xf] }
 0x267   : > { %1903 = vst [vmem:[%s18004_s29 + $0x1cb0] sm:$0xf] %v1902_v22  ;;  %1905 = vst [vmem:[%s18004_s29 + $0x1cb8] sm:$0xf] %v1904_v23  ;;  %v1908_v25 = vld [vmem:[%s18008_s16 + $0x1cc4] sm:$0xf] }
 0x268   : > { %1907 = vst [vmem:[%s18004_s29 + $0x1cc0] sm:$0xf] %v1906_v24  ;;  %v1910_v26 = vld [vmem:[%s18008_s16 + $0x1cc8] sm:$0xf]  ;;  %v1912_v27 = vld [vmem:[%s18008_s16 + $0x1ccc] sm:$0xf] }
 0x269   : > { %1909 = vst [vmem:[%s18004_s29 + $0x1cc8] sm:$0xf] %v1908_v25  ;;  %1911 = vst [vmem:[%s18004_s29 + $0x1cd0] sm:$0xf] %v1910_v26  ;;  %v1914_v28 = vld [vmem:[%s18008_s16 + $0x1cd0] sm:$0xf] }
 0x26a   : > { %1913 = vst [vmem:[%s18004_s29 + $0x1cd8] sm:$0xf] %v1912_v27  ;;  %v1916_v29 = vld [vmem:[%s18008_s16 + $0x1cd4] sm:$0xf]  ;;  %v1918_v30 = vld [vmem:[%s18008_s16 + $0x1cd8] sm:$0xf] }
 0x26b   : > { %1915 = vst [vmem:[%s18004_s29 + $0x1ce0] sm:$0xf] %v1914_v28  ;;  %1917 = vst [vmem:[%s18004_s29 + $0x1ce8] sm:$0xf] %v1916_v29  ;;  %v1920_v31 = vld [vmem:[%s18008_s16 + $0x1cdc] sm:$0xf] }
 0x26c   : > { %1919 = vst [vmem:[%s18004_s29 + $0x1cf0] sm:$0xf] %v1918_v30  ;;  %v1922_v32 = vld [vmem:[%s18008_s16 + $0x1d00] sm:$0xf]  ;;  %v1924_v33 = vld [vmem:[%s18008_s16 + $0x1d04] sm:$0xf] }
 0x26d   : > { %1921 = vst [vmem:[%s18004_s29 + $0x1cf8] sm:$0xf] %v1920_v31  ;;  %1923 = vst [vmem:[%s18004_s29 + $0x1d00] sm:$0xf] %v1922_v32  ;;  %v1926_v34 = vld [vmem:[%s18008_s16 + $0x1d08] sm:$0xf] }
 0x26e   : > { %1925 = vst [vmem:[%s18004_s29 + $0x1d08] sm:$0xf] %v1924_v33  ;;  %v1928_v35 = vld [vmem:[%s18008_s16 + $0x1d0c] sm:$0xf]  ;;  %v1930_v36 = vld [vmem:[%s18008_s16 + $0x1d10] sm:$0xf] }
 0x26f   : > { %1927 = vst [vmem:[%s18004_s29 + $0x1d10] sm:$0xf] %v1926_v34  ;;  %1929 = vst [vmem:[%s18004_s29 + $0x1d18] sm:$0xf] %v1928_v35  ;;  %v1932_v37 = vld [vmem:[%s18008_s16 + $0x1d14] sm:$0xf] }
 0x270   : > { %1931 = vst [vmem:[%s18004_s29 + $0x1d20] sm:$0xf] %v1930_v36  ;;  %v1934_v38 = vld [vmem:[%s18008_s16 + $0x1d18] sm:$0xf]  ;;  %v1936_v39 = vld [vmem:[%s18008_s16 + $0x1d1c] sm:$0xf] }
 0x271   : > { %1933 = vst [vmem:[%s18004_s29 + $0x1d28] sm:$0xf] %v1932_v37  ;;  %1935 = vst [vmem:[%s18004_s29 + $0x1d30] sm:$0xf] %v1934_v38  ;;  %v1938_v40 = vld [vmem:[%s18008_s16 + $0x1d40] sm:$0xf] }
 0x272   : > { %1937 = vst [vmem:[%s18004_s29 + $0x1d38] sm:$0xf] %v1936_v39  ;;  %v1940_v41 = vld [vmem:[%s18008_s16 + $0x1d44] sm:$0xf]  ;;  %v1942_v42 = vld [vmem:[%s18008_s16 + $0x1d48] sm:$0xf] }
 0x273   : > { %1939 = vst [vmem:[%s18004_s29 + $0x1d40] sm:$0xf] %v1938_v40  ;;  %1941 = vst [vmem:[%s18004_s29 + $0x1d48] sm:$0xf] %v1940_v41  ;;  %v1944_v43 = vld [vmem:[%s18008_s16 + $0x1d4c] sm:$0xf] }
 0x274   : > { %1943 = vst [vmem:[%s18004_s29 + $0x1d50] sm:$0xf] %v1942_v42  ;;  %v1946_v44 = vld [vmem:[%s18008_s16 + $0x1d50] sm:$0xf]  ;;  %v1948_v45 = vld [vmem:[%s18008_s16 + $0x1d54] sm:$0xf] }
 0x275   : > { %1945 = vst [vmem:[%s18004_s29 + $0x1d58] sm:$0xf] %v1944_v43  ;;  %1947 = vst [vmem:[%s18004_s29 + $0x1d60] sm:$0xf] %v1946_v44  ;;  %v1950_v46 = vld [vmem:[%s18008_s16 + $0x1d58] sm:$0xf] }
 0x276   : > { %1949 = vst [vmem:[%s18004_s29 + $0x1d68] sm:$0xf] %v1948_v45  ;;  %v1952_v47 = vld [vmem:[%s18008_s16 + $0x1d5c] sm:$0xf]  ;;  %v1954_v48 = vld [vmem:[%s18008_s16 + $0x1d80] sm:$0xf] }
 0x277   : > { %1951 = vst [vmem:[%s18004_s29 + $0x1d70] sm:$0xf] %v1950_v46  ;;  %1953 = vst [vmem:[%s18004_s29 + $0x1d78] sm:$0xf] %v1952_v47  ;;  %v1956_v49 = vld [vmem:[%s18008_s16 + $0x1d84] sm:$0xf] }
 0x278   : > { %1955 = vst [vmem:[%s18004_s29 + $0x1d80] sm:$0xf] %v1954_v48  ;;  %v1958_v50 = vld [vmem:[%s18008_s16 + $0x1d88] sm:$0xf]  ;;  %v1960_v51 = vld [vmem:[%s18008_s16 + $0x1d8c] sm:$0xf] }
 0x279   : > { %1957 = vst [vmem:[%s18004_s29 + $0x1d88] sm:$0xf] %v1956_v49  ;;  %1959 = vst [vmem:[%s18004_s29 + $0x1d90] sm:$0xf] %v1958_v50  ;;  %v1962_v52 = vld [vmem:[%s18008_s16 + $0x1d90] sm:$0xf] }
 0x27a   : > { %1961 = vst [vmem:[%s18004_s29 + $0x1d98] sm:$0xf] %v1960_v51  ;;  %v1964_v53 = vld [vmem:[%s18008_s16 + $0x1d94] sm:$0xf]  ;;  %v1966_v54 = vld [vmem:[%s18008_s16 + $0x1d98] sm:$0xf] }
 0x27b   : > { %1963 = vst [vmem:[%s18004_s29 + $0x1da0] sm:$0xf] %v1962_v52  ;;  %1965 = vst [vmem:[%s18004_s29 + $0x1da8] sm:$0xf] %v1964_v53  ;;  %v1968_v55 = vld [vmem:[%s18008_s16 + $0x1d9c] sm:$0xf] }
 0x27c   : > { %1967 = vst [vmem:[%s18004_s29 + $0x1db0] sm:$0xf] %v1966_v54  ;;  %v1970_v56 = vld [vmem:[%s18008_s16 + $0x1dc0] sm:$0xf]  ;;  %v1972_v57 = vld [vmem:[%s18008_s16 + $0x1dc4] sm:$0xf] }
 0x27d   : > { %1969 = vst [vmem:[%s18004_s29 + $0x1db8] sm:$0xf] %v1968_v55  ;;  %1971 = vst [vmem:[%s18004_s29 + $0x1dc0] sm:$0xf] %v1970_v56  ;;  %v1974_v58 = vld [vmem:[%s18008_s16 + $0x1dc8] sm:$0xf] }
 0x27e   : > { %1973 = vst [vmem:[%s18004_s29 + $0x1dc8] sm:$0xf] %v1972_v57  ;;  %v1976_v59 = vld [vmem:[%s18008_s16 + $0x1dcc] sm:$0xf]  ;;  %v1978_v60 = vld [vmem:[%s18008_s16 + $0x1dd0] sm:$0xf] }
 0x27f   : > { %1975 = vst [vmem:[%s18004_s29 + $0x1dd0] sm:$0xf] %v1974_v58  ;;  %1977 = vst [vmem:[%s18004_s29 + $0x1dd8] sm:$0xf] %v1976_v59  ;;  %v1980_v61 = vld [vmem:[%s18008_s16 + $0x1dd4] sm:$0xf] }
 0x280   : > { %1979 = vst [vmem:[%s18004_s29 + $0x1de0] sm:$0xf] %v1978_v60  ;;  %v1982_v62 = vld [vmem:[%s18008_s16 + $0x1dd8] sm:$0xf]  ;;  %v1984_v63 = vld [vmem:[%s18008_s16 + $0x1ddc] sm:$0xf] }
 0x281   : > { %1981 = vst [vmem:[%s18004_s29 + $0x1de8] sm:$0xf] %v1980_v61  ;;  %1983 = vst [vmem:[%s18004_s29 + $0x1df0] sm:$0xf] %v1982_v62  ;;  %v1986_v0 = vld [vmem:[%s18008_s16 + $0x1e00] sm:$0xf] }
 0x282   : > { %1985 = vst [vmem:[%s18004_s29 + $0x1df8] sm:$0xf] %v1984_v63  ;;  %v1988_v1 = vld [vmem:[%s18008_s16 + $0x1e04] sm:$0xf]  ;;  %v1990_v2 = vld [vmem:[%s18008_s16 + $0x1e08] sm:$0xf] }
 0x283   : > { %1987 = vst [vmem:[%s18004_s29 + $0x1e00] sm:$0xf] %v1986_v0  ;;  %1989 = vst [vmem:[%s18004_s29 + $0x1e08] sm:$0xf] %v1988_v1  ;;  %v1992_v3 = vld [vmem:[%s18008_s16 + $0x1e0c] sm:$0xf] }
 0x284   : > { %1991 = vst [vmem:[%s18004_s29 + $0x1e10] sm:$0xf] %v1990_v2  ;;  %v1994_v4 = vld [vmem:[%s18008_s16 + $0x1e10] sm:$0xf]  ;;  %v1996_v5 = vld [vmem:[%s18008_s16 + $0x1e14] sm:$0xf] }
 0x285   : > { %1993 = vst [vmem:[%s18004_s29 + $0x1e18] sm:$0xf] %v1992_v3  ;;  %1995 = vst [vmem:[%s18004_s29 + $0x1e20] sm:$0xf] %v1994_v4  ;;  %v1998_v6 = vld [vmem:[%s18008_s16 + $0x1e18] sm:$0xf] }
 0x286   : > { %1997 = vst [vmem:[%s18004_s29 + $0x1e28] sm:$0xf] %v1996_v5  ;;  %v2000_v7 = vld [vmem:[%s18008_s16 + $0x1e1c] sm:$0xf]  ;;  %v2002_v8 = vld [vmem:[%s18008_s16 + $0x1e40] sm:$0xf] }
 0x287   : > { %1999 = vst [vmem:[%s18004_s29 + $0x1e30] sm:$0xf] %v1998_v6  ;;  %2001 = vst [vmem:[%s18004_s29 + $0x1e38] sm:$0xf] %v2000_v7  ;;  %v2004_v9 = vld [vmem:[%s18008_s16 + $0x1e44] sm:$0xf] }
 0x288   : > { %2003 = vst [vmem:[%s18004_s29 + $0x1e40] sm:$0xf] %v2002_v8  ;;  %v2006_v10 = vld [vmem:[%s18008_s16 + $0x1e48] sm:$0xf]  ;;  %v2008_v11 = vld [vmem:[%s18008_s16 + $0x1e4c] sm:$0xf] }
 0x289   : > { %2005 = vst [vmem:[%s18004_s29 + $0x1e48] sm:$0xf] %v2004_v9  ;;  %2007 = vst [vmem:[%s18004_s29 + $0x1e50] sm:$0xf] %v2006_v10  ;;  %v2010_v12 = vld [vmem:[%s18008_s16 + $0x1e50] sm:$0xf] }
 0x28a   : > { %2009 = vst [vmem:[%s18004_s29 + $0x1e58] sm:$0xf] %v2008_v11  ;;  %v2012_v13 = vld [vmem:[%s18008_s16 + $0x1e54] sm:$0xf]  ;;  %v2014_v14 = vld [vmem:[%s18008_s16 + $0x1e58] sm:$0xf] }
 0x28b   : > { %2011 = vst [vmem:[%s18004_s29 + $0x1e60] sm:$0xf] %v2010_v12  ;;  %2013 = vst [vmem:[%s18004_s29 + $0x1e68] sm:$0xf] %v2012_v13  ;;  %v2016_v15 = vld [vmem:[%s18008_s16 + $0x1e5c] sm:$0xf] }
 0x28c   : > { %2015 = vst [vmem:[%s18004_s29 + $0x1e70] sm:$0xf] %v2014_v14  ;;  %v2018_v16 = vld [vmem:[%s18008_s16 + $0x1e80] sm:$0xf]  ;;  %v2020_v17 = vld [vmem:[%s18008_s16 + $0x1e84] sm:$0xf] }
 0x28d   : > { %2017 = vst [vmem:[%s18004_s29 + $0x1e78] sm:$0xf] %v2016_v15  ;;  %2019 = vst [vmem:[%s18004_s29 + $0x1e80] sm:$0xf] %v2018_v16  ;;  %v2022_v18 = vld [vmem:[%s18008_s16 + $0x1e88] sm:$0xf] }
 0x28e   : > { %2021 = vst [vmem:[%s18004_s29 + $0x1e88] sm:$0xf] %v2020_v17  ;;  %v2024_v19 = vld [vmem:[%s18008_s16 + $0x1e8c] sm:$0xf]  ;;  %v2026_v20 = vld [vmem:[%s18008_s16 + $0x1e90] sm:$0xf] }
 0x28f   : > { %2023 = vst [vmem:[%s18004_s29 + $0x1e90] sm:$0xf] %v2022_v18  ;;  %2025 = vst [vmem:[%s18004_s29 + $0x1e98] sm:$0xf] %v2024_v19  ;;  %v2028_v21 = vld [vmem:[%s18008_s16 + $0x1e94] sm:$0xf] }
 0x290   : > { %2027 = vst [vmem:[%s18004_s29 + $0x1ea0] sm:$0xf] %v2026_v20  ;;  %v2030_v22 = vld [vmem:[%s18008_s16 + $0x1e98] sm:$0xf]  ;;  %v2032_v23 = vld [vmem:[%s18008_s16 + $0x1e9c] sm:$0xf] }
 0x291   : > { %2029 = vst [vmem:[%s18004_s29 + $0x1ea8] sm:$0xf] %v2028_v21  ;;  %2031 = vst [vmem:[%s18004_s29 + $0x1eb0] sm:$0xf] %v2030_v22  ;;  %v2034_v24 = vld [vmem:[%s18008_s16 + $0x1ec0] sm:$0xf] }
 0x292   : > { %2033 = vst [vmem:[%s18004_s29 + $0x1eb8] sm:$0xf] %v2032_v23  ;;  %v2036_v25 = vld [vmem:[%s18008_s16 + $0x1ec4] sm:$0xf]  ;;  %v2038_v26 = vld [vmem:[%s18008_s16 + $0x1ec8] sm:$0xf] }
 0x293   : > { %2035 = vst [vmem:[%s18004_s29 + $0x1ec0] sm:$0xf] %v2034_v24  ;;  %2037 = vst [vmem:[%s18004_s29 + $0x1ec8] sm:$0xf] %v2036_v25  ;;  %v2040_v27 = vld [vmem:[%s18008_s16 + $0x1ecc] sm:$0xf] }
 0x294   : > { %2039 = vst [vmem:[%s18004_s29 + $0x1ed0] sm:$0xf] %v2038_v26  ;;  %v2042_v28 = vld [vmem:[%s18008_s16 + $0x1ed0] sm:$0xf]  ;;  %v2044_v29 = vld [vmem:[%s18008_s16 + $0x1ed4] sm:$0xf] }
 0x295   : > { %2041 = vst [vmem:[%s18004_s29 + $0x1ed8] sm:$0xf] %v2040_v27  ;;  %2043 = vst [vmem:[%s18004_s29 + $0x1ee0] sm:$0xf] %v2042_v28  ;;  %v2046_v30 = vld [vmem:[%s18008_s16 + $0x1ed8] sm:$0xf] }
 0x296   : > { %2045 = vst [vmem:[%s18004_s29 + $0x1ee8] sm:$0xf] %v2044_v29  ;;  %v2048_v31 = vld [vmem:[%s18008_s16 + $0x1edc] sm:$0xf]  ;;  %v2050_v32 = vld [vmem:[%s18008_s16 + $0x1f00] sm:$0xf] }
 0x297   : > { %2047 = vst [vmem:[%s18004_s29 + $0x1ef0] sm:$0xf] %v2046_v30  ;;  %2049 = vst [vmem:[%s18004_s29 + $0x1ef8] sm:$0xf] %v2048_v31  ;;  %v2052_v33 = vld [vmem:[%s18008_s16 + $0x1f04] sm:$0xf] }
 0x298   : > { %2051 = vst [vmem:[%s18004_s29 + $0x1f00] sm:$0xf] %v2050_v32  ;;  %v2054_v34 = vld [vmem:[%s18008_s16 + $0x1f08] sm:$0xf]  ;;  %v2056_v35 = vld [vmem:[%s18008_s16 + $0x1f0c] sm:$0xf] }
 0x299   : > { %2053 = vst [vmem:[%s18004_s29 + $0x1f08] sm:$0xf] %v2052_v33  ;;  %2055 = vst [vmem:[%s18004_s29 + $0x1f10] sm:$0xf] %v2054_v34  ;;  %v2058_v36 = vld [vmem:[%s18008_s16 + $0x1f10] sm:$0xf] }
 0x29a   : > { %2057 = vst [vmem:[%s18004_s29 + $0x1f18] sm:$0xf] %v2056_v35  ;;  %v2060_v37 = vld [vmem:[%s18008_s16 + $0x1f14] sm:$0xf]  ;;  %v2062_v38 = vld [vmem:[%s18008_s16 + $0x1f18] sm:$0xf] }
 0x29b   : > { %2059 = vst [vmem:[%s18004_s29 + $0x1f20] sm:$0xf] %v2058_v36  ;;  %2061 = vst [vmem:[%s18004_s29 + $0x1f28] sm:$0xf] %v2060_v37  ;;  %v2064_v39 = vld [vmem:[%s18008_s16 + $0x1f1c] sm:$0xf] }
 0x29c   : > { %2063 = vst [vmem:[%s18004_s29 + $0x1f30] sm:$0xf] %v2062_v38  ;;  %v2066_v40 = vld [vmem:[%s18008_s16 + $0x1f40] sm:$0xf]  ;;  %v2068_v41 = vld [vmem:[%s18008_s16 + $0x1f44] sm:$0xf] }
 0x29d   : > { %2065 = vst [vmem:[%s18004_s29 + $0x1f38] sm:$0xf] %v2064_v39  ;;  %2067 = vst [vmem:[%s18004_s29 + $0x1f40] sm:$0xf] %v2066_v40  ;;  %v2070_v42 = vld [vmem:[%s18008_s16 + $0x1f48] sm:$0xf] }
 0x29e   : > { %2069 = vst [vmem:[%s18004_s29 + $0x1f48] sm:$0xf] %v2068_v41  ;;  %v2072_v43 = vld [vmem:[%s18008_s16 + $0x1f4c] sm:$0xf]  ;;  %v2074_v44 = vld [vmem:[%s18008_s16 + $0x1f50] sm:$0xf] }
 0x29f   : > { %2071 = vst [vmem:[%s18004_s29 + $0x1f50] sm:$0xf] %v2070_v42  ;;  %2073 = vst [vmem:[%s18004_s29 + $0x1f58] sm:$0xf] %v2072_v43  ;;  %v2076_v45 = vld [vmem:[%s18008_s16 + $0x1f54] sm:$0xf] }
 0x2a0   : > { %2075 = vst [vmem:[%s18004_s29 + $0x1f60] sm:$0xf] %v2074_v44  ;;  %v2078_v46 = vld [vmem:[%s18008_s16 + $0x1f58] sm:$0xf]  ;;  %v2080_v47 = vld [vmem:[%s18008_s16 + $0x1f5c] sm:$0xf] }
 0x2a1   : > { %2077 = vst [vmem:[%s18004_s29 + $0x1f68] sm:$0xf] %v2076_v45  ;;  %2079 = vst [vmem:[%s18004_s29 + $0x1f70] sm:$0xf] %v2078_v46  ;;  %v2082_v48 = vld [vmem:[%s18008_s16 + $0x1f80] sm:$0xf] }
 0x2a2   : > { %2081 = vst [vmem:[%s18004_s29 + $0x1f78] sm:$0xf] %v2080_v47  ;;  %v2084_v49 = vld [vmem:[%s18008_s16 + $0x1f84] sm:$0xf]  ;;  %v2086_v50 = vld [vmem:[%s18008_s16 + $0x1f88] sm:$0xf] }
 0x2a3   : > { %2083 = vst [vmem:[%s18004_s29 + $0x1f80] sm:$0xf] %v2082_v48  ;;  %2085 = vst [vmem:[%s18004_s29 + $0x1f88] sm:$0xf] %v2084_v49  ;;  %v2088_v51 = vld [vmem:[%s18008_s16 + $0x1f8c] sm:$0xf] }
 0x2a4   : > { %2087 = vst [vmem:[%s18004_s29 + $0x1f90] sm:$0xf] %v2086_v50  ;;  %v2090_v52 = vld [vmem:[%s18008_s16 + $0x1f90] sm:$0xf]  ;;  %v2092_v53 = vld [vmem:[%s18008_s16 + $0x1f94] sm:$0xf] }
 0x2a5   : > { %2089 = vst [vmem:[%s18004_s29 + $0x1f98] sm:$0xf] %v2088_v51  ;;  %2091 = vst [vmem:[%s18004_s29 + $0x1fa0] sm:$0xf] %v2090_v52  ;;  %v2094_v54 = vld [vmem:[%s18008_s16 + $0x1f98] sm:$0xf] }
 0x2a6   : > { %2093 = vst [vmem:[%s18004_s29 + $0x1fa8] sm:$0xf] %v2092_v53  ;;  %v2096_v55 = vld [vmem:[%s18008_s16 + $0x1f9c] sm:$0xf]  ;;  %v2098_v56 = vld [vmem:[%s18008_s16 + $0x1fc0] sm:$0xf] }
 0x2a7   : > { %2095 = vst [vmem:[%s18004_s29 + $0x1fb0] sm:$0xf] %v2094_v54  ;;  %2097 = vst [vmem:[%s18004_s29 + $0x1fb8] sm:$0xf] %v2096_v55  ;;  %v2100_v57 = vld [vmem:[%s18008_s16 + $0x1fc4] sm:$0xf] }
 0x2a8   : > { %2099 = vst [vmem:[%s18004_s29 + $0x1fc0] sm:$0xf] %v2098_v56  ;;  %v2102_v58 = vld [vmem:[%s18008_s16 + $0x1fc8] sm:$0xf]  ;;  %v2104_v59 = vld [vmem:[%s18008_s16 + $0x1fcc] sm:$0xf] }
 0x2a9   : > { %2101 = vst [vmem:[%s18004_s29 + $0x1fc8] sm:$0xf] %v2100_v57  ;;  %2103 = vst [vmem:[%s18004_s29 + $0x1fd0] sm:$0xf] %v2102_v58  ;;  %v2106_v60 = vld [vmem:[%s18008_s16 + $0x1fd0] sm:$0xf] }
 0x2aa   : > { %2105 = vst [vmem:[%s18004_s29 + $0x1fd8] sm:$0xf] %v2104_v59  ;;  %v2108_v61 = vld [vmem:[%s18008_s16 + $0x1fd4] sm:$0xf]  ;;  %v2110_v62 = vld [vmem:[%s18008_s16 + $0x1fd8] sm:$0xf] }
 0x2ab   : > { %2107 = vst [vmem:[%s18004_s29 + $0x1fe0] sm:$0xf] %v2106_v60  ;;  %2109 = vst [vmem:[%s18004_s29 + $0x1fe8] sm:$0xf] %v2108_v61  ;;  %v2112_v63 = vld [vmem:[%s18008_s16 + $0x1fdc] sm:$0xf] }
 0x2ac   : > { %2111 = vst [vmem:[%s18004_s29 + $0x1ff0] sm:$0xf] %v2110_v62  ;;  %2113 = vst [vmem:[%s18004_s29 + $0x1ff8] sm:$0xf] %v2112_v63  ;;  %p2115_p0 = scmp.ge.s32.totalorder %s2114_s19, 2  ;;  %s62_s18 = sadd.s32 1, %s18016_s18  }
 0x2ad   : > { %p59_p1 = scmp.ge.s32.totalorder %s62_s18, 2  }
 0x2ae   : > { %s21879_s19 = smov (%p2115_p0, %s2114_s19), 0 }
 0x2af   : > { %s16336_s20 = sshll.u32 %s21879_s19, 5  ;;  %s16337_s21 = sshll.u32 %s21879_s19, 2 }
 0x2b0   : > { %s2119_s16 = scalar_lea.vmem %s21869_s8, %s16336_s20   ;;  %s2120_s29 = scalar_lea.vmem [#allocation2], %s16337_s21  }
 0x2b1   : > { %s21877_s17 = smov %s21879_s19  ;;  %61 = sbr.rel (!%p59_p1) target bundleno = 2 (0x2), region = 208 }
 0x2b8   :  { %8362 = vsyncadd [#allocation3], 131072  ;;  %v17762_v0 = vld [vmem:[%s21862_s1 + $0x40] sm:$0xff]   ;;  %v17764_v2 = vld [vmem:[%s21862_s1 + $0x48] sm:$0xff]  }
 0x2b9   :  { %v17763_v1 = vld [vmem:[%s21862_s1] sm:$0xff]   ;;  %16749 = vmatprep.subr.bf16.mxu0 %v17762_v0  ;;  %v17765_v3 = vld [vmem:[%s21862_s1 + $0x8] sm:$0xff]   ;;  %v17766_v4 = vld [vmem:[%s21862_s1 + $0x50] sm:$0xff]  }
 0x2ba   :  { %16750 = vmatpush3.bf16.msra.mxu0 %v17763_v1  ;;  %v17767_v5 = vld [vmem:[%s21862_s1 + $0x10] sm:$0xff]   ;;  %v17768_v6 = vld [vmem:[%s21862_s1 + $0x58] sm:$0xff]   ;;  %v17770_v8 = vld [vmem:[%s21862_s1 + $0x60] sm:$0xff]  }
 0x2bb   :  { %16751 = vmatprep.subr.bf16.mxu0 %v17764_v2  ;;  %v17769_v7 = vld [vmem:[%s21862_s1 + $0x18] sm:$0xff]   ;;  %v17771_v9 = vld [vmem:[%s21862_s1 + $0x20] sm:$0xff]   ;;  %v17772_v10 = vld [vmem:[%s21862_s1 + $0x68] sm:$0xff]  }
 0x2bc   :  { %v17780_v11 = vld [vmem:[%s21861_s0 + $0x4] ss:$8 sps:$4 sm:$0xff]   ;;  %v17774_v13 = vld [vmem:[%s21862_s1 + $0x70] sm:$0xff]   ;;  %v17776_v15 = vld [vmem:[%s21862_s1 + $0x78] sm:$0xff]  }
 0x2bd   :  { %8626 = vmatprep.mubr.bf16.mxu0 %v17780_v11  ;;  %v17773_v12 = vld [vmem:[%s21862_s1 + $0x28] sm:$0xff]   ;;  %v17775_v14 = vld [vmem:[%s21862_s1 + $0x30] sm:$0xff]   ;;  %v17777_v16 = vld [vmem:[%s21862_s1 + $0x38] sm:$0xff]  }
 0x2be   :  { %16752 = vmatpush3.bf16.msra.mxu0 %v17765_v3  ;;  %v17778_v17 = vld [vmem:[%s21861_s0] ss:$8 sps:$4 sm:$0xff]   ;;  %v17781_v18 = vld [vmem:[%s21861_s0 + $0x14] ss:$8 sps:$4 sm:$0xff]   ;;  %v17783_v19 = vld [vmem:[%s21861_s0 + $0x10] ss:$8 sps:$4 sm:$0xff]  }
 0x2bf   :  { %16753 = vmatprep.subr.bf16.mxu0 %v17766_v4  ;;  %v17784_v20 = vld [vmem:[%s21861_s0 + $0x24] ss:$8 sps:$4 sm:$0xff]   ;;  %v17786_v21 = vld [vmem:[%s21861_s0 + $0x20] ss:$8 sps:$4 sm:$0xff]   ;;  %v17787_v22 = vld [vmem:[%s21861_s0 + $0x34] ss:$8 sps:$4 sm:$0xff]  }
 0x2c0   :  { %v17789_v23 = vld [vmem:[%s21861_s0 + $0x30] ss:$8 sps:$4 sm:$0xff]   ;;  %v17790_v24 = vld [vmem:[%s21861_s0 + $0x44] ss:$8 sps:$4 sm:$0xff]   ;;  %v17792_v25 = vld [vmem:[%s21861_s0 + $0x40] ss:$8 sps:$4 sm:$0xff]  }
 0x2c1   :  { %v17793_v26 = vld [vmem:[%s21861_s0 + $0x54] ss:$8 sps:$4 sm:$0xff]   ;;  %v17795_v27 = vld [vmem:[%s21861_s0 + $0x50] ss:$8 sps:$4 sm:$0xff]   ;;  %v17796_v28 = vld [vmem:[%s21861_s0 + $0x64] ss:$8 sps:$4 sm:$0xff]  }
 0x2c2   :  { %16754 = vmatpush3.bf16.msra.mxu0 %v17767_v5  ;;  %v17798_v29 = vld [vmem:[%s21861_s0 + $0x60] ss:$8 sps:$4 sm:$0xff]   ;;  %v17799_v30 = vld [vmem:[%s21861_s0 + $0x74] ss:$8 sps:$4 sm:$0xff]   ;;  %v17801_v31 = vld [vmem:[%s21861_s0 + $0x70] ss:$8 sps:$4 sm:$0xff]  }
 0x2c3   :  { %16755 = vmatprep.subr.bf16.mxu0 %v17768_v6  ;;  %v17802_v32 = vld [vmem:[%s21864_s3] sm:$0xff]  }
 0x2c4   :  { %v17804_v33 = vld [vmem:[%s21864_s3 + $0x20] sm:$0xff]   ;;  %17173 = vmatprep.mubr.bf16.mxu1 %v17802_v32 }
 0x2c5   :  { %v20283_v35 = vld [vmem:[%s21863_s2] ss:$0 sm:$0xff] }
 0x2c6   :  { %16756 = vmatpush3.bf16.msra.mxu0 %v17769_v7 }
 0x2c7   :  { %16757 = vmatprep.subr.bf16.mxu0 %v17770_v8 }
 0x2ca   :  { %16758 = vmatpush3.bf16.msra.mxu0 %v17771_v9 }
 0x2cb   :  { %16759 = vmatprep.subr.bf16.mxu0 %v17772_v10 }
 0x2ce   :  { %16760 = vmatpush3.bf16.msra.mxu0 %v17773_v12 }
 0x2cf   :  { %16761 = vmatprep.subr.bf16.mxu0 %v17774_v13 }
 0x2d2   :  { %16762 = vmatpush3.bf16.msra.mxu0 %v17775_v14 }
 0x2d3   :  { %16763 = vmatprep.subr.bf16.mxu0 %v17776_v15 }
 0x2d6   :  { %16764 = vmatpush3.bf16.msra.mxu0 %v17777_v16 }
 0x2d9   :  { %8627 = vmatmul.mubr.bf16.vlgmr.msra.gmra.mrb[0].mxu0 %v17778_v17 }
 0x2da   :  { %8634 = vmatprep.mubr.bf16.mxu0 %v17781_v18 }
 0x2e1   :  { %8635 = vmatmul.mubr.bf16.gmra.mrb[4].mxu0 %v17783_v19 }
 0x2e2   :  { %8642 = vmatprep.mubr.bf16.mxu0 %v17784_v20 }
 0x2e9   :  { %8643 = vmatmul.mubr.bf16.gmra.mrb[8].mxu0 %v17786_v21 }
 0x2ea   :  { %8650 = vmatprep.mubr.bf16.mxu0 %v17787_v22 }
 0x2f1   :  { %8651 = vmatmul.mubr.bf16.gmra.mrb[12].mxu0 %v17789_v23 }
 0x2f2   :  { %8658 = vmatprep.mubr.bf16.mxu0 %v17790_v24 }
 0x2f9   :  { %8659 = vmatmul.mubr.bf16.gmra.mrb[16].mxu0 %v17792_v25 }
 0x2fa   :  { %8666 = vmatprep.mubr.bf16.mxu0 %v17793_v26 }
 0x301   :  { %8667 = vmatmul.mubr.bf16.gmra.mrb[20].mxu0 %v17795_v27 }
 0x302   :  { %8674 = vmatprep.mubr.bf16.mxu0 %v17796_v28 }
 0x309   :  { %8675 = vmatmul.mubr.bf16.gmra.mrb[24].mxu0 %v17798_v29 }
 0x30a   :  { %8682 = vmatprep.mubr.bf16.mxu0 %v17799_v30 }
 0x311   :  { %8683 = vmatmul.mubr.bf16.gmra.mrb[28].mxu0 %v17801_v31 }
 0x312   :  { %17237 = vmatprep.mubr.bf16.mxu0 %v17804_v33 }
 0x3ac   :  { %v16765_v34 = vpop.f32.mrb[0].mxu0 }
 0x3ad   :  { %v16766_v36 = vpop.f32.mrb[1].mxu0 }
 0x3ae   :  { %v16767_v37 = vadd.f32 %v16766_v36, %v16765_v34  ;;  %v16768_v38 = vpop.f32.mrb[2].mxu0 }
 0x3af   :  { %v16769_v39 = vpop.f32.mrb[3].mxu0 }
 0x3b0   :  { %v8629_v40 = vadd.f32 %v16767_v37, %v20283_v35  ;;  %v16770_v41 = vadd.f32 %v16769_v39, %v16768_v38 }
 0x3b2   :  { %v8707_v42 = vmul.f32 0.2, %v8629_v40  ;;  %v8632_v43 = vadd.f32 %v16770_v41, %v20283_v35  ;;  %vm8691_vm0 = vcmp.gt.f32.partialorder %v8629_v40, 0.0 }
 0x3b4   :  { %vm8692_vm1 = vcmp.gt.f32.partialorder %v8632_v43, 0.0  ;;  %v8708_v44 = vmul.f32 0.2, %v8632_v43  ;;  %v16771_v45 = vpop.f32.mrb[4].mxu0  ;;  %v8723_v47 = vsel %vm8691_vm0, %v8629_v40, %v8707_v42  ;;  %vm8923_vm0 = vcmask 523264  }
 0x3b5   :  { %v16772_v46 = vpop.f32.mrb[5].mxu0 }
 0x3b6   :  { %v8724_v48 = vsel %vm8692_vm1, %v8632_v43, %v8708_v44  ;;  %v16773_v49 = vadd.f32 %v16772_v46, %v16771_v45  ;;  %v16774_v50 = vpop.f32.mrb[6].mxu0 }
 0x3b7   :  { %v20287_v51 = vpack.c.bf16 %v8724_v48, %v8723_v47  ;;  %v16775_v52 = vpop.f32.mrb[7].mxu0 }
 0x3b8   :  { %v8637_v53 = vadd.f32 %v16773_v49, %v20283_v35  ;;  %v16776_v54 = vadd.f32 %v16775_v52, %v16774_v50 }
 0x3b9   :  { %17157 = vmatprep.subr.bf16.mxu1 %v20287_v51  ;;  %17221 = vmatprep.subr.bf16.mxu0 %v20287_v51 }
 0x3ba   :  { %v8709_v55 = vmul.f32 0.2, %v8637_v53  ;;  %v8640_v56 = vadd.f32 %v16776_v54, %v20283_v35  ;;  %17158 = vmatpush3.bf16.msra.mxu1 %v20287_v51  ;;  %17222 = vmatpush3.bf16.msra.mxu0 %v20287_v51  ;;  %vm8693_vm2 = vcmp.gt.f32.partialorder %v8637_v53, 0.0 }
 0x3bc   :  { %vm8694_vm3 = vcmp.gt.f32.partialorder %v8640_v56, 0.0  ;;  %v8710_v57 = vmul.f32 0.2, %v8640_v56  ;;  %v16777_v58 = vpop.f32.mrb[8].mxu0  ;;  %v8725_v60 = vsel %vm8693_vm2, %v8637_v53, %v8709_v55 }
 0x3bd   :  { %v16778_v59 = vpop.f32.mrb[9].mxu0 }
 0x3be   :  { %v8726_v61 = vsel %vm8694_vm3, %v8640_v56, %v8710_v57  ;;  %v16779_v62 = vadd.f32 %v16778_v59, %v16777_v58  ;;  %v16780_v63 = vpop.f32.mrb[10].mxu0 }
 0x3bf   :  { %v20295_v0 = vpack.c.bf16 %v8726_v61, %v8725_v60  ;;  %v16781_v1 = vpop.f32.mrb[11].mxu0 }
 0x3c0   :  { %v8645_v2 = vadd.f32 %v16779_v62, %v20283_v35  ;;  %v16782_v3 = vadd.f32 %v16781_v1, %v16780_v63 }
 0x3c1   :  { %17159 = vmatprep.subr.bf16.mxu1 %v20295_v0  ;;  %17223 = vmatprep.subr.bf16.mxu0 %v20295_v0 }
 0x3c2   :  { %v8711_v4 = vmul.f32 0.2, %v8645_v2  ;;  %v8648_v5 = vadd.f32 %v16782_v3, %v20283_v35  ;;  %17160 = vmatpush3.bf16.msra.mxu1 %v20295_v0  ;;  %17224 = vmatpush3.bf16.msra.mxu0 %v20295_v0  ;;  %vm8695_vm4 = vcmp.gt.f32.partialorder %v8645_v2, 0.0 }
 0x3c4   :  { %vm8696_vm5 = vcmp.gt.f32.partialorder %v8648_v5, 0.0  ;;  %v8712_v6 = vmul.f32 0.2, %v8648_v5  ;;  %v16783_v7 = vpop.f32.mrb[12].mxu0  ;;  %v8727_v9 = vsel %vm8695_vm4, %v8645_v2, %v8711_v4 }
 0x3c5   :  { %v16784_v8 = vpop.f32.mrb[13].mxu0 }
 0x3c6   :  { %v8728_v10 = vsel %vm8696_vm5, %v8648_v5, %v8712_v6  ;;  %v16785_v11 = vadd.f32 %v16784_v8, %v16783_v7  ;;  %v16786_v12 = vpop.f32.mrb[14].mxu0 }
 0x3c7   :  { %v20303_v13 = vpack.c.bf16 %v8728_v10, %v8727_v9  ;;  %v16787_v14 = vpop.f32.mrb[15].mxu0 }
 0x3c8   :  { %v8653_v15 = vadd.f32 %v16785_v11, %v20283_v35  ;;  %v16788_v16 = vadd.f32 %v16787_v14, %v16786_v12 }
 0x3c9   :  { %17161 = vmatprep.subr.bf16.mxu1 %v20303_v13  ;;  %17225 = vmatprep.subr.bf16.mxu0 %v20303_v13 }
 0x3ca   :  { %v8713_v17 = vmul.f32 0.2, %v8653_v15  ;;  %v8656_v18 = vadd.f32 %v16788_v16, %v20283_v35  ;;  %17162 = vmatpush3.bf16.msra.mxu1 %v20303_v13  ;;  %17226 = vmatpush3.bf16.msra.mxu0 %v20303_v13  ;;  %vm8697_vm6 = vcmp.gt.f32.partialorder %v8653_v15, 0.0  ;;  %v17806_v16 = vld [vmem:[%s21864_s3 + $0x10] sm:$0xff]  }
 0x3cc   :  { %vm8698_vm7 = vcmp.gt.f32.partialorder %v8656_v18, 0.0  ;;  %v8714_v19 = vmul.f32 0.2, %v8656_v18  ;;  %v16789_v20 = vpop.f32.mrb[16].mxu0  ;;  %v8729_v22 = vsel %vm8697_vm6, %v8653_v15, %v8713_v17  ;;  %v17803_v15 = vld [vmem:[%s21864_s3 + $0x8] sm:$0xff]   ;;  %v17808_v17 = vld [vmem:[%s21864_s3 + $0x30] sm:$0xff]  }
 0x3cd   :  { %v16790_v21 = vpop.f32.mrb[17].mxu0 }
 0x3ce   :  { %v8730_v23 = vsel %vm8698_vm7, %v8656_v18, %v8714_v19  ;;  %v16791_v24 = vadd.f32 %v16790_v21, %v16789_v20  ;;  %v16792_v25 = vpop.f32.mrb[18].mxu0  ;;  %v17807_v18 = vld [vmem:[%s21864_s3 + $0x18] sm:$0xff]   ;;  %v17810_v20 = vld [vmem:[%s21864_s3 + $0x40] sm:$0xff]   ;;  %v17811_v21 = vld [vmem:[%s21864_s3 + $0x48] sm:$0xff]  }
 0x3cf   :  { %v20311_v26 = vpack.c.bf16 %v8730_v23, %v8729_v22  ;;  %v16793_v27 = vpop.f32.mrb[19].mxu0  ;;  %v17809_v19 = vld [vmem:[%s21864_s3 + $0x38] sm:$0xff]   ;;  %v17812_v22 = vld [vmem:[%s21864_s3 + $0x60] sm:$0xff]   ;;  %v17813_v23 = vld [vmem:[%s21864_s3 + $0x68] sm:$0xff]  }
 0x3d0   :  { %v8661_v28 = vadd.f32 %v16791_v24, %v20283_v35  ;;  %v16794_v29 = vadd.f32 %v16793_v27, %v16792_v25  ;;  %v17814_v24 = vld [vmem:[%s21864_s3 + $0x70] sm:$0xff]   ;;  %v17822_v25 = vld [vmem:[%s21865_s4 + $0x20] sm:$0xff]   ;;  %v17823_v27 = vld [vmem:[%s21865_s4 + $0x28] sm:$0xff]  }
 0x3d1   :  { %17163 = vmatprep.subr.bf16.mxu1 %v20311_v26  ;;  %17227 = vmatprep.subr.bf16.mxu0 %v20311_v26 }
 0x3d2   :  { %v8715_v30 = vmul.f32 0.2, %v8661_v28  ;;  %v8664_v31 = vadd.f32 %v16794_v29, %v20283_v35  ;;  %17164 = vmatpush3.bf16.msra.mxu1 %v20311_v26  ;;  %17228 = vmatpush3.bf16.msra.mxu0 %v20311_v26  ;;  %vm8699_vm8 = vcmp.gt.f32.partialorder %v8661_v28, 0.0  ;;  %v17825_v29 = vld [vmem:[%s21865_s4 + $0x38] sm:$0xff]  }
 0x3d4   :  { %vm8700_vm9 = vcmp.gt.f32.partialorder %v8664_v31, 0.0  ;;  %v8716_v32 = vmul.f32 0.2, %v8664_v31  ;;  %v16795_v33 = vpop.f32.mrb[20].mxu0  ;;  %v8731_v36 = vsel %vm8699_vm8, %v8661_v28, %v8715_v30  ;;  %v17824_v28 = vld [vmem:[%s21865_s4 + $0x30] sm:$0xff]   ;;  %v20474_v30 = vld [vmem:[%s21865_s4] sm:$0xff]  }
 0x3d5   :  { %v16796_v34 = vpop.f32.mrb[21].mxu0 }
 0x3d6   :  { %v8732_v37 = vsel %vm8700_vm9, %v8664_v31, %v8716_v32  ;;  %v16797_v38 = vadd.f32 %v16796_v34, %v16795_v33  ;;  %v16798_v39 = vpop.f32.mrb[22].mxu0  ;;  %v17815_v31 = vld [vmem:[%s21864_s3 + $0x78] sm:$0xff]   ;;  %v17816_v32 = vld [vmem:[%s21864_s3 + $0x80] sm:$0xff]   ;;  %v17817_v33 = vld [vmem:[%s21864_s3 + $0x88] sm:$0xff]  }
 0x3d7   :  { %v20319_v40 = vpack.c.bf16 %v8732_v37, %v8731_v36  ;;  %v16799_v41 = vpop.f32.mrb[23].mxu0  ;;  %v17818_v34 = vld [vmem:[%s21864_s3 + $0xa0] sm:$0xff]   ;;  %v17819_v36 = vld [vmem:[%s21864_s3 + $0xa8] sm:$0xff]   ;;  %v17820_v37 = vld [vmem:[%s21864_s3 + $0xb0] sm:$0xff]  }
 0x3d8   :  { %v8669_v42 = vadd.f32 %v16797_v38, %v20283_v35  ;;  %v16800_v43 = vadd.f32 %v16799_v41, %v16798_v39 }
 0x3d9   :  { %17165 = vmatprep.subr.bf16.mxu1 %v20319_v40  ;;  %17229 = vmatprep.subr.bf16.mxu0 %v20319_v40 }
 0x3da   :  { %v8717_v44 = vmul.f32 0.2, %v8669_v42  ;;  %v8672_v45 = vadd.f32 %v16800_v43, %v20283_v35  ;;  %17166 = vmatpush3.bf16.msra.mxu1 %v20319_v40  ;;  %17230 = vmatpush3.bf16.msra.mxu0 %v20319_v40  ;;  %vm8701_vm10 = vcmp.gt.f32.partialorder %v8669_v42, 0.0 }
 0x3dc   :  { %vm8702_vm11 = vcmp.gt.f32.partialorder %v8672_v45, 0.0  ;;  %v8718_v46 = vmul.f32 0.2, %v8672_v45  ;;  %v16801_v47 = vpop.f32.mrb[24].mxu0  ;;  %v8733_v49 = vsel %vm8701_vm10, %v8669_v42, %v8717_v44 }
 0x3dd   :  { %v16802_v48 = vpop.f32.mrb[25].mxu0 }
 0x3de   :  { %v8734_v50 = vsel %vm8702_vm11, %v8672_v45, %v8718_v46  ;;  %v16803_v52 = vadd.f32 %v16802_v48, %v16801_v47  ;;  %v16804_v53 = vpop.f32.mrb[26].mxu0 }
 0x3df   :  { %v20327_v54 = vpack.c.bf16 %v8734_v50, %v8733_v49  ;;  %v16805_v55 = vpop.f32.mrb[27].mxu0 }
 0x3e0   :  { %v8677_v56 = vadd.f32 %v16803_v52, %v20283_v35  ;;  %v16806_v57 = vadd.f32 %v16805_v55, %v16804_v53  ;;  %v17821_v52 = vld [vmem:[%s21864_s3 + $0xb8] sm:$0xff]   ;;  %v17828_v53 = vld [vmem:[%s21864_s3 + $0xc0] sm:$0xff]  }
 0x3e1   :  { %17167 = vmatprep.subr.bf16.mxu1 %v20327_v54  ;;  %17231 = vmatprep.subr.bf16.mxu0 %v20327_v54 }
 0x3e2   :  { %v8719_v58 = vmul.f32 0.2, %v8677_v56  ;;  %v8680_v59 = vadd.f32 %v16806_v57, %v20283_v35  ;;  %17168 = vmatpush3.bf16.msra.mxu1 %v20327_v54  ;;  %17232 = vmatpush3.bf16.msra.mxu0 %v20327_v54  ;;  %vm8703_vm12 = vcmp.gt.f32.partialorder %v8677_v56, 0.0 }
 0x3e4   :  { %vm8704_vm13 = vcmp.gt.f32.partialorder %v8680_v59, 0.0  ;;  %v8720_v60 = vmul.f32 0.2, %v8680_v59  ;;  %v16807_v61 = vpop.f32.mrb[28].mxu0  ;;  %v8735_v63 = vsel %vm8703_vm12, %v8677_v56, %v8719_v58 }
 0x3e5   :  { %v16808_v62 = vpop.f32.mrb[29].mxu0 }
 0x3e6   :  { %v8736_v1 = vsel %vm8704_vm13, %v8680_v59, %v8720_v60  ;;  %v16809_v2 = vadd.f32 %v16808_v62, %v16807_v61  ;;  %v16810_v3 = vpop.f32.mrb[30].mxu0 }
 0x3e7   :  { %v20335_v4 = vpack.c.bf16 %v8736_v1, %v8735_v63  ;;  %v16811_v5 = vpop.f32.mrb[31].mxu0 }
 0x3e8   :  { %v8685_v6 = vadd.f32 %v16809_v2, %v20283_v35  ;;  %v16812_v7 = vadd.f32 %v16811_v5, %v16810_v3  ;;  %v17827_v5 = vld [vmem:[%s21865_s4 + $0x8] sm:$0xff]  }
 0x3e9   :  { %17169 = vmatprep.subr.bf16.mxu1 %v20335_v4  ;;  %17233 = vmatprep.subr.bf16.mxu0 %v20335_v4 }
 0x3ea   :  { %v8721_v8 = vmul.f32 0.2, %v8685_v6  ;;  %v8688_v9 = vadd.f32 %v16812_v7, %v20283_v35  ;;  %17170 = vmatpush3.bf16.msra.mxu1 %v20335_v4  ;;  %17234 = vmatpush3.bf16.msra.mxu0 %v20335_v4  ;;  %vm8705_vm14 = vcmp.gt.f32.partialorder %v8685_v6, 0.0  ;;  %v17805_v35 = vld [vmem:[%s21864_s3 + $0x28] sm:$0xff]  }
 0x3eb   :  { %v17830_v7 = vld [vmem:[%s21864_s3 + $0xc8] sm:$0xff]  }
 0x3ec   :  { %vm8706_vm15 = vcmp.gt.f32.partialorder %v8688_v9, 0.0  ;;  %v8722_v10 = vmul.f32 0.2, %v8688_v9  ;;  %v8737_v11 = vsel %vm8705_vm14, %v8685_v6, %v8721_v8  ;;  %v17829_v6 = vld [vmem:[%s21865_s4 + $0x10] sm:$0xff]   ;;  %v17838_v8 = vld [vmem:[%s21864_s3 + $0xe0] sm:$0xff]  }
 0x3ee   :  { %v8738_v12 = vsel %vm8706_vm15, %v8688_v9, %v8722_v10  ;;  %v17831_v9 = vld [vmem:[%s21865_s4 + $0x18] sm:$0xff]   ;;  %v17832_v10 = vld [vmem:[%s21865_s4 + $0x40] sm:$0xff]  }
 0x3ef   :  { %v20343_v14 = vpack.c.bf16 %v8738_v12, %v8737_v11  ;;  %v17833_v11 = vld [vmem:[%s21865_s4 + $0x48] sm:$0xff]   ;;  %v17834_v12 = vld [vmem:[%s21865_s4 + $0x50] sm:$0xff]  }
 0x3f1   :  { %17171 = vmatprep.subr.bf16.mxu1 %v20343_v14  ;;  %17235 = vmatprep.subr.bf16.mxu0 %v20343_v14 }
 0x3f2   :  { %17172 = vmatpush3.bf16.msra.mxu1 %v20343_v14  ;;  %17236 = vmatpush3.bf16.msra.mxu0 %v20343_v14 }
 0x3f3   :  { %17177 = vmatprep.subr.bf16.mxu1 %v20287_v51  ;;  %17253 = vmatprep.subr.bf16.mxu0 %v20287_v51 }
 0x3f5   :  { %17174 = vmatmul.mubr.bf16.vlgmr.msra.gmra.mrb[0].mxu1 %v17803_v15  ;;  %17238 = vmatmul.mubr.bf16.vlgmr.msra.gmra.mrb[32].mxu0 %v17805_v35  ;;  %v17835_v15 = vld [vmem:[%s21865_s4 + $0x58] sm:$0xff]  }
 0x3f6   :  { %17178 = vmatpush3.bf16.msra.mxu1 %v20287_v51  ;;  %17254 = vmatpush3.bf16.msra.mxu0 %v20287_v51 }
 0x3f7   :  { %17179 = vmatprep.subr.bf16.mxu1 %v20295_v0  ;;  %17255 = vmatprep.subr.bf16.mxu0 %v20295_v0 }
 0x3f8   :  { %17193 = vmatprep.mubr.bf16.mxu1 %v17806_v16  ;;  %17269 = vmatprep.mubr.bf16.mxu0 %v17808_v17  ;;  %v17836_v16 = vld [vmem:[%s21865_s4 + $0x60] sm:$0xff]  }
 0x3fa   :  { %17180 = vmatpush3.bf16.msra.mxu1 %v20295_v0  ;;  %17256 = vmatpush3.bf16.msra.mxu0 %v20295_v0 }
 0x3fb   :  { %17181 = vmatprep.subr.bf16.mxu1 %v20303_v13  ;;  %17257 = vmatprep.subr.bf16.mxu0 %v20303_v13 }
 0x3fe   :  { %17182 = vmatpush3.bf16.msra.mxu1 %v20303_v13  ;;  %17258 = vmatpush3.bf16.msra.mxu0 %v20303_v13 }
 0x3ff   :  { %17183 = vmatprep.subr.bf16.mxu1 %v20311_v26  ;;  %17259 = vmatprep.subr.bf16.mxu0 %v20311_v26 }
 0x402   :  { %17184 = vmatpush3.bf16.msra.mxu1 %v20311_v26  ;;  %17260 = vmatpush3.bf16.msra.mxu0 %v20311_v26 }
 0x403   :  { %17185 = vmatprep.subr.bf16.mxu1 %v20319_v40  ;;  %17261 = vmatprep.subr.bf16.mxu0 %v20319_v40 }
 0x406   :  { %17186 = vmatpush3.bf16.msra.mxu1 %v20319_v40  ;;  %17262 = vmatpush3.bf16.msra.mxu0 %v20319_v40 }
 0x407   :  { %17187 = vmatprep.subr.bf16.mxu1 %v20327_v54  ;;  %17263 = vmatprep.subr.bf16.mxu0 %v20327_v54 }
 0x40a   :  { %17188 = vmatpush3.bf16.msra.mxu1 %v20327_v54  ;;  %17264 = vmatpush3.bf16.msra.mxu0 %v20327_v54 }
 0x40b   :  { %17189 = vmatprep.subr.bf16.mxu1 %v20335_v4  ;;  %17265 = vmatprep.subr.bf16.mxu0 %v20335_v4 }
 0x40e   :  { %17190 = vmatpush3.bf16.msra.mxu1 %v20335_v4  ;;  %17266 = vmatpush3.bf16.msra.mxu0 %v20335_v4 }
 0x40f   :  { %17191 = vmatprep.subr.bf16.mxu1 %v20343_v14  ;;  %17267 = vmatprep.subr.bf16.mxu0 %v20343_v14 }
 0x412   :  { %17192 = vmatpush3.bf16.msra.mxu1 %v20343_v14  ;;  %17268 = vmatpush3.bf16.msra.mxu0 %v20343_v14 }
 0x413   :  { %17285 = vmatprep.subr.bf16.mxu0 %v20287_v51  ;;  %17197 = vmatprep.subr.bf16.mxu1 %v17822_v25 }
 0x415   :  { %17194 = vmatmul.mubr.bf16.vlgmr.msra.gmra.mrb[4].mxu1 %v17807_v18  ;;  %17270 = vmatmul.mubr.bf16.vlgmr.msra.gmra.mrb[36].mxu0 %v17809_v19 }
 0x416   :  { %17286 = vmatpush3.bf16.msra.mxu0 %v20287_v51  ;;  %17301 = vmatprep.mubr.bf16.mxu0 %v17810_v20 }
 0x417   :  { %17287 = vmatprep.subr.bf16.mxu0 %v20295_v0  ;;  %17198 = vmatpush3.bf16.msra.mxu1 %v17822_v25  ;;  %v17841_v25 = vld [vmem:[%s21865_s4 + $0x78] sm:$0xff]  }
 0x418   :  { %17199 = vmatprep.subr.bf16.mxu1 %v17823_v27 }
 0x41a   :  { %17288 = vmatpush3.bf16.msra.mxu0 %v20295_v0 }
 0x41b   :  { %17289 = vmatprep.subr.bf16.mxu0 %v20303_v13  ;;  %17200 = vmatpush3.bf16.msra.mxu1 %v17823_v27  ;;  %v17842_v27 = vld [vmem:[%s21865_s4 + $0x80] sm:$0xff]  }
 0x41c   :  { %17201 = vmatprep.subr.bf16.mxu1 %v17824_v28 }
 0x41e   :  { %17290 = vmatpush3.bf16.msra.mxu0 %v20303_v13 }
 0x41f   :  { %17291 = vmatprep.subr.bf16.mxu0 %v20311_v26  ;;  %17202 = vmatpush3.bf16.msra.mxu1 %v17824_v28  ;;  %v17843_v28 = vld [vmem:[%s21865_s4 + $0x88] sm:$0xff]  }
 0x420   :  { %17203 = vmatprep.subr.bf16.mxu1 %v17825_v29 }
 0x422   :  { %17292 = vmatpush3.bf16.msra.mxu0 %v20311_v26 }
 0x423   :  { %17293 = vmatprep.subr.bf16.mxu0 %v20319_v40  ;;  %17204 = vmatpush3.bf16.msra.mxu1 %v17825_v29  ;;  %v17844_v29 = vld [vmem:[%s21865_s4 + $0x90] sm:$0xff]  }
 0x424   :  { %17209 = vmatprep.subr.bf16.mxu1 %v20474_v30 }
 0x426   :  { %17294 = vmatpush3.bf16.msra.mxu0 %v20319_v40 }
 0x427   :  { %17295 = vmatprep.subr.bf16.mxu0 %v20327_v54 }
 0x42a   :  { %17296 = vmatpush3.bf16.msra.mxu0 %v20327_v54 }
 0x42b   :  { %17297 = vmatprep.subr.bf16.mxu0 %v20335_v4 }
 0x42e   :  { %17298 = vmatpush3.bf16.msra.mxu0 %v20335_v4 }
 0x42f   :  { %17299 = vmatprep.subr.bf16.mxu0 %v20343_v14 }
 0x432   :  { %17300 = vmatpush3.bf16.msra.mxu0 %v20343_v14 }
 0x433   :  { %17349 = vmatprep.subr.bf16.mxu0 %v20287_v51 }
 0x435   :  { %17302 = vmatmul.mubr.bf16.vlgmr.msra.gmra.mrb[40].mxu0 %v17811_v21 }
 0x436   :  { %17350 = vmatpush3.bf16.msra.mxu0 %v20287_v51  ;;  %17365 = vmatprep.mubr.bf16.mxu0 %v17812_v22  ;;  %v17837_v22 = vld [vmem:[%s21865_s4 + $0x68] sm:$0xff]  }
 0x437   :  { %17351 = vmatprep.subr.bf16.mxu0 %v20295_v0 }
 0x43a   :  { %17352 = vmatpush3.bf16.msra.mxu0 %v20295_v0 }
 0x43b   :  { %17353 = vmatprep.subr.bf16.mxu0 %v20303_v13 }
 0x43e   :  { %17354 = vmatpush3.bf16.msra.mxu0 %v20303_v13 }
 0x43f   :  { %17355 = vmatprep.subr.bf16.mxu0 %v20311_v26 }
 0x442   :  { %17356 = vmatpush3.bf16.msra.mxu0 %v20311_v26 }
 0x443   :  { %17357 = vmatprep.subr.bf16.mxu0 %v20319_v40 }
 0x446   :  { %17358 = vmatpush3.bf16.msra.mxu0 %v20319_v40 }
 0x447   :  { %17359 = vmatprep.subr.bf16.mxu0 %v20327_v54 }
 0x44a   :  { %17360 = vmatpush3.bf16.msra.mxu0 %v20327_v54 }
 0x44b   :  { %17361 = vmatprep.subr.bf16.mxu0 %v20335_v4 }
 0x44e   :  { %17362 = vmatpush3.bf16.msra.mxu0 %v20335_v4 }
 0x44f   :  { %17363 = vmatprep.subr.bf16.mxu0 %v20343_v14 }
 0x452   :  { %17364 = vmatpush3.bf16.msra.mxu0 %v20343_v14 }
 0x453   :  { %17381 = vmatprep.subr.bf16.mxu0 %v20287_v51 }
 0x455   :  { %17366 = vmatmul.mubr.bf16.vlgmr.msra.gmra.mrb[44].mxu0 %v17813_v23  ;;  %v17839_v23 = vld [vmem:[%s21865_s4 + $0x70] sm:$0xff]  }
 0x456   :  { %17382 = vmatpush3.bf16.msra.mxu0 %v20287_v51  ;;  %17397 = vmatprep.mubr.bf16.mxu0 %v17814_v24  ;;  %v17840_v24 = vld [vmem:[%s21864_s3 + $0xe8] sm:$0xff]  }
 0x457   :  { %17383 = vmatprep.subr.bf16.mxu0 %v20295_v0 }
 0x45a   :  { %17384 = vmatpush3.bf16.msra.mxu0 %v20295_v0 }
 0x45b   :  { %17385 = vmatprep.subr.bf16.mxu0 %v20303_v13 }
 0x45e   :  { %17386 = vmatpush3.bf16.msra.mxu0 %v20303_v13 }
 0x45f   :  { %17387 = vmatprep.subr.bf16.mxu0 %v20311_v26 }
 0x462   :  { %17388 = vmatpush3.bf16.msra.mxu0 %v20311_v26 }
 0x463   :  { %17389 = vmatprep.subr.bf16.mxu0 %v20319_v40 }
 0x466   :  { %17390 = vmatpush3.bf16.msra.mxu0 %v20319_v40 }
 0x467   :  { %17391 = vmatprep.subr.bf16.mxu0 %v20327_v54 }
 0x46a   :  { %17392 = vmatpush3.bf16.msra.mxu0 %v20327_v54 }
 0x46b   :  { %17393 = vmatprep.subr.bf16.mxu0 %v20335_v4 }
 0x46e   :  { %17394 = vmatpush3.bf16.msra.mxu0 %v20335_v4 }
 0x46f   :  { %17395 = vmatprep.subr.bf16.mxu0 %v20343_v14 }
 0x472   :  { %17396 = vmatpush3.bf16.msra.mxu0 %v20343_v14 }
 0x473   :  { %17413 = vmatprep.subr.bf16.mxu0 %v20287_v51 }
 0x475   :  { %17398 = vmatmul.mubr.bf16.vlgmr.msra.gmra.mrb[48].mxu0 %v17815_v31 }
 0x476   :  { %17414 = vmatpush3.bf16.msra.mxu0 %v20287_v51  ;;  %17429 = vmatprep.mubr.bf16.mxu0 %v17816_v32 }
 0x477   :  { %17415 = vmatprep.subr.bf16.mxu0 %v20295_v0 }
 0x47a   :  { %17416 = vmatpush3.bf16.msra.mxu0 %v20295_v0 }
 0x47b   :  { %17417 = vmatprep.subr.bf16.mxu0 %v20303_v13 }
 0x47e   :  { %17418 = vmatpush3.bf16.msra.mxu0 %v20303_v13 }
 0x47f   :  { %17419 = vmatprep.subr.bf16.mxu0 %v20311_v26 }
 0x482   :  { %17420 = vmatpush3.bf16.msra.mxu0 %v20311_v26 }
 0x483   :  { %17421 = vmatprep.subr.bf16.mxu0 %v20319_v40 }
 0x486   :  { %17422 = vmatpush3.bf16.msra.mxu0 %v20319_v40 }
 0x487   :  { %17423 = vmatprep.subr.bf16.mxu0 %v20327_v54 }
 0x48a   :  { %17424 = vmatpush3.bf16.msra.mxu0 %v20327_v54 }
 0x48b   :  { %17425 = vmatprep.subr.bf16.mxu0 %v20335_v4 }
 0x48e   :  { %17426 = vmatpush3.bf16.msra.mxu0 %v20335_v4 }
 0x48f   :  { %17427 = vmatprep.subr.bf16.mxu0 %v20343_v14 }
 0x492   :  { %17428 = vmatpush3.bf16.msra.mxu0 %v20343_v14 }
 0x493   :  { %17477 = vmatprep.subr.bf16.mxu0 %v20287_v51 }
 0x495   :  { %17430 = vmatmul.mubr.bf16.vlgmr.msra.gmra.mrb[52].mxu0 %v17817_v33 }
 0x496   :  { %17478 = vmatpush3.bf16.msra.mxu0 %v20287_v51  ;;  %17493 = vmatprep.mubr.bf16.mxu0 %v17818_v34 }
 0x497   :  { %17479 = vmatprep.subr.bf16.mxu0 %v20295_v0 }
 0x49a   :  { %17480 = vmatpush3.bf16.msra.mxu0 %v20295_v0 }
 0x49b   :  { %17481 = vmatprep.subr.bf16.mxu0 %v20303_v13 }
 0x49e   :  { %17482 = vmatpush3.bf16.msra.mxu0 %v20303_v13 }
 0x49f   :  { %17483 = vmatprep.subr.bf16.mxu0 %v20311_v26 }
 0x4a2   :  { %17484 = vmatpush3.bf16.msra.mxu0 %v20311_v26 }
 0x4a3   :  { %17485 = vmatprep.subr.bf16.mxu0 %v20319_v40 }
 0x4a6   :  { %17486 = vmatpush3.bf16.msra.mxu0 %v20319_v40 }
 0x4a7   :  { %17487 = vmatprep.subr.bf16.mxu0 %v20327_v54 }
 0x4aa   :  { %17488 = vmatpush3.bf16.msra.mxu0 %v20327_v54 }
 0x4ab   :  { %17489 = vmatprep.subr.bf16.mxu0 %v20335_v4 }
 0x4ae   :  { %17490 = vmatpush3.bf16.msra.mxu0 %v20335_v4 }
 0x4af   :  { %17491 = vmatprep.subr.bf16.mxu0 %v20343_v14 }
 0x4b2   :  { %17492 = vmatpush3.bf16.msra.mxu0 %v20343_v14 }
 0x4b3   :  { %17509 = vmatprep.subr.bf16.mxu0 %v20287_v51 }
 0x4b5   :  { %17494 = vmatmul.mubr.bf16.vlgmr.msra.gmra.mrb[56].mxu0 %v17819_v36 }
 0x4b6   :  { %17510 = vmatpush3.bf16.msra.mxu0 %v20287_v51  ;;  %17525 = vmatprep.mubr.bf16.mxu0 %v17820_v37  ;;  %v17846_v37 = vld [vmem:[%s21864_s3 + $0x50] sm:$0xff]  }
 0x4b7   :  { %17511 = vmatprep.subr.bf16.mxu0 %v20295_v0 }
 0x4ba   :  { %17512 = vmatpush3.bf16.msra.mxu0 %v20295_v0 }
 0x4bb   :  { %17513 = vmatprep.subr.bf16.mxu0 %v20303_v13 }
 0x4be   :  { %17514 = vmatpush3.bf16.msra.mxu0 %v20303_v13 }
 0x4bf   :  { %17515 = vmatprep.subr.bf16.mxu0 %v20311_v26 }
 0x4c2   :  { %17516 = vmatpush3.bf16.msra.mxu0 %v20311_v26 }
 0x4c3   :  { %17517 = vmatprep.subr.bf16.mxu0 %v20319_v40 }
 0x4c6   :  { %17518 = vmatpush3.bf16.msra.mxu0 %v20319_v40 }
 0x4c7   :  { %17519 = vmatprep.subr.bf16.mxu0 %v20327_v54 }
 0x4c8   :  { %v20541_v38 = vpop.f32.mrb[0].mxu1  ;;  %v20543_v39 = vpop.f32.mrb[32].mxu0 }
 0x4c9   :  { %v8797_v41 = vpop.f32.mrb[1].mxu1  ;;  %v20545_v42 = vpop.f32.mrb[33].mxu0 }
 0x4ca   :  { %v20547_v43 = vpop.f32.mrb[2].mxu1  ;;  %17520 = vmatpush3.bf16.msra.mxu0 %v20327_v54  ;;  %v20550_v44 = vpop.f32.mrb[34].mxu0 }
 0x4cb   :  { %v8813_v45 = vpack.c.bf16 %v20547_v43, %v20541_v38  ;;  %v8800_v46 = vpop.f32.mrb[3].mxu1  ;;  %17521 = vmatprep.subr.bf16.mxu0 %v20335_v4  ;;  %v9125_v47 = vpack.c.bf16 %v20550_v44, %v20543_v39  ;;  %v20557_v48 = vpop.f32.mrb[35].mxu0  ;;  %v17848_v39 = vld [vmem:[%s21865_s4 + $0xa0] sm:$0xff]   ;;  %v17850_v43 = vld [vmem:[%s21865_s4 + $0xb0] sm:$0xff]   ;;  %v17851_v44 = vld [vmem:[%s21865_s4 + $0xb8] sm:$0xff]  }
 0x4cc   :  { %v8812_v49 = vpack.c.bf16 %v8800_v46, %v8797_v41  ;;  %v9124_v50 = vpack.c.bf16 %v20557_v48, %v20545_v42  ;;  %v17847_v41 = vld [vmem:[%s21864_s3 + $0x58] sm:$0xff]   ;;  %v17849_v42 = vld [vmem:[%s21865_s4 + $0xa8] sm:$0xff]  }
 0x4ce   :  { %17522 = vmatpush3.bf16.msra.mxu0 %v20335_v4 }
 0x4cf   :  { %17523 = vmatprep.subr.bf16.mxu0 %v20343_v14 }
 0x4d2   :  { %17524 = vmatpush3.bf16.msra.mxu0 %v20343_v14 }
 0x4d3   :  { %17541 = vmatprep.subr.bf16.mxu0 %v20287_v51 }
 0x4d5   :  { %17526 = vmatmul.mubr.bf16.vlgmr.msra.gmra.mrb[60].mxu0 %v17821_v52 }
 0x4d6   :  { %17542 = vmatpush3.bf16.msra.mxu0 %v20287_v51  ;;  %17557 = vmatprep.mubr.bf16.mxu0 %v17828_v53 }
 0x4d7   :  { %17543 = vmatprep.subr.bf16.mxu0 %v20295_v0 }
 0x4da   :  { %17544 = vmatpush3.bf16.msra.mxu0 %v20295_v0 }
 0x4db   :  { %17545 = vmatprep.subr.bf16.mxu0 %v20303_v13 }
 0x4de   :  { %17546 = vmatpush3.bf16.msra.mxu0 %v20303_v13 }
 0x4df   :  { %17547 = vmatprep.subr.bf16.mxu0 %v20311_v26 }
 0x4e2   :  { %17548 = vmatpush3.bf16.msra.mxu0 %v20311_v26 }
 0x4e3   :  { %17549 = vmatprep.subr.bf16.mxu0 %v20319_v40 }
 0x4e6   :  { %17550 = vmatpush3.bf16.msra.mxu0 %v20319_v40 }
 0x4e7   :  { %17551 = vmatprep.subr.bf16.mxu0 %v20327_v54 }
 0x4e8   :  { %v17195_v55 = vpop.f32.mrb[4].mxu1  ;;  %v20581_v56 = vpop.f32.mrb[36].mxu0 }
 0x4e9   :  { %v8873_v57 = vpop.f32.mrb[5].mxu1  ;;  %v20583_v58 = vpop.f32.mrb[37].mxu0 }
 0x4ea   :  { %v17196_v59 = vpop.f32.mrb[6].mxu1  ;;  %17552 = vmatpush3.bf16.msra.mxu0 %v20327_v54  ;;  %v20586_v60 = vpop.f32.mrb[38].mxu0 }
 0x4eb   :  { %v8889_v61 = vpack.c.bf16 %v17196_v59, %v17195_v55  ;;  %v8876_v62 = vpop.f32.mrb[7].mxu1  ;;  %17553 = vmatprep.subr.bf16.mxu0 %v20335_v4  ;;  %v9285_v63 = vpack.c.bf16 %v20586_v60, %v20581_v56  ;;  %v20591_v1 = vpop.f32.mrb[39].mxu0 }
 0x4ec   :  { %v8888_v2 = vpack.c.bf16 %v8876_v62, %v8873_v57  ;;  %v9284_v3 = vpack.c.bf16 %v20591_v1, %v20583_v58 }
 0x4ee   :  { %17205 = vmatprep.mubr.msk.bf16.mxu1 %vm8923_vm0, %v8888_v2  ;;  %17554 = vmatpush3.bf16.msra.mxu0 %v20335_v4 }
 0x4ef   :  { %17206 = vmatmul.mubr.msk.bf16.vlgmr.msra.gmra.mrb[8].mxu1 %vm8923_vm0, %v8889_v61  ;;  %17555 = vmatprep.subr.bf16.mxu0 %v20343_v14 }
 0x4f0   :  { %17210 = vmatpush3.bf16.msra.mxu1 %v20474_v30  ;;  %17217 = vmatprep.mubr.msk.bf16.mxu1 %vm8923_vm0, %v8812_v49  ;;  %v17845_v30 = vld [vmem:[%s21865_s4 + $0x98] sm:$0xff]  }
 0x4f1   :  { %17211 = vmatprep.subr.bf16.mxu1 %v17827_v5 }
 0x4f2   :  { %17556 = vmatpush3.bf16.msra.mxu0 %v20343_v14 }
 0x4f3   :  { %17605 = vmatprep.subr.bf16.mxu0 %v20287_v51 }
 0x4f4   :  { %17212 = vmatpush3.bf16.msra.mxu1 %v17827_v5 }
 0x4f5   :  { %17213 = vmatprep.subr.bf16.mxu1 %v17829_v6  ;;  %17558 = vmatmul.mubr.bf16.vlgmr.msra.gmra.mrb[64].mxu0 %v17830_v7 }
 0x4f6   :  { %17606 = vmatpush3.bf16.msra.mxu0 %v20287_v51  ;;  %17621 = vmatprep.mubr.bf16.mxu0 %v17838_v8 }
 0x4f7   :  { %17607 = vmatprep.subr.bf16.mxu0 %v20295_v0 }
 0x4f8   :  { %17214 = vmatpush3.bf16.msra.mxu1 %v17829_v6 }
 0x4f9   :  { %17215 = vmatprep.subr.bf16.mxu1 %v17831_v9 }
 0x4fa   :  { %17608 = vmatpush3.bf16.msra.mxu0 %v20295_v0 }
 0x4fb   :  { %17609 = vmatprep.subr.bf16.mxu0 %v20303_v13 }
 0x4fc   :  { %17216 = vmatpush3.bf16.msra.mxu1 %v17831_v9 }
 0x4fd   :  { %17241 = vmatprep.subr.bf16.mxu1 %v17832_v10 }
 0x4fe   :  { %17610 = vmatpush3.bf16.msra.mxu0 %v20303_v13 }
 0x4ff   :  { %17218 = vmatmul.mubr.msk.bf16.vlgmr.msra.gmra.mrb[8].mxu1 %vm8923_vm0, %v8813_v45  ;;  %17611 = vmatprep.subr.bf16.mxu0 %v20311_v26  ;;  %v17852_v45 = vld [vmem:[%s21865_s4 + $0xc0] sm:$0xff]  }
 0x500   :  { %17242 = vmatpush3.bf16.msra.mxu1 %v17832_v10  ;;  %17249 = vmatprep.mubr.msk.bf16.mxu1 %vm8923_vm0, %v9124_v50  ;;  %v17853_v10 = vld [vmem:[%s21865_s4 + $0xc8] sm:$0xff]  }
 0x501   :  { %17243 = vmatprep.subr.bf16.mxu1 %v17833_v11 }
 0x502   :  { %17612 = vmatpush3.bf16.msra.mxu0 %v20311_v26 }
 0x503   :  { %17613 = vmatprep.subr.bf16.mxu0 %v20319_v40 }
 0x504   :  { %17244 = vmatpush3.bf16.msra.mxu1 %v17833_v11  ;;  %v17854_v11 = vld [vmem:[%s21865_s4 + $0xd0] sm:$0xff]  }
 0x505   :  { %17245 = vmatprep.subr.bf16.mxu1 %v17834_v12 }
 0x506   :  { %17614 = vmatpush3.bf16.msra.mxu0 %v20319_v40 }
 0x507   :  { %17615 = vmatprep.subr.bf16.mxu0 %v20327_v54 }
 0x508   :  { %17246 = vmatpush3.bf16.msra.mxu1 %v17834_v12  ;;  %v20648_v35 = vpop.f32.mrb[40].mxu0  ;;  %v17855_v12 = vld [vmem:[%s21865_s4 + $0xd8] sm:$0xff]  }
 0x509   :  { %17247 = vmatprep.subr.bf16.mxu1 %v17835_v15  ;;  %v9429_v17 = vpop.f32.mrb[41].mxu0 }
 0x50a   :  { %17616 = vmatpush3.bf16.msra.mxu0 %v20327_v54  ;;  %v17304_v18 = vpop.f32.mrb[42].mxu0 }
 0x50b   :  { %17617 = vmatprep.subr.bf16.mxu0 %v20335_v4  ;;  %v9445_v19 = vpack.c.bf16 %v17304_v18, %v20648_v35  ;;  %v9432_v20 = vpop.f32.mrb[43].mxu0  ;;  %v17857_v35 = vld [vmem:[%s21865_s4 + $0xe8] sm:$0xff]   ;;  %v17860_v18 = vld [vmem:[%s21865_s4 + $0x100] sm:$0xff]  }
 0x50c   :  { %17248 = vmatpush3.bf16.msra.mxu1 %v17835_v15  ;;  %v9444_v21 = vpack.c.bf16 %v9432_v20, %v9429_v17  ;;  %v17856_v15 = vld [vmem:[%s21865_s4 + $0xe0] sm:$0xff]   ;;  %v17859_v17 = vld [vmem:[%s21865_s4 + $0xf8] sm:$0xff]   ;;  %v17862_v20 = vld [vmem:[%s21865_s4 + $0x110] sm:$0xff]  }
 0x50d   :  { %17273 = vmatprep.subr.bf16.mxu1 %v17836_v16 }
 0x50e   :  { %17618 = vmatpush3.bf16.msra.mxu0 %v20335_v4 }
 0x50f   :  { %17250 = vmatmul.mubr.msk.bf16.vlgmr.msra.gmra.mrb[8].mxu1 %vm8923_vm0, %v9125_v47  ;;  %17619 = vmatprep.subr.bf16.mxu0 %v20343_v14 }
 0x510   :  { %17274 = vmatpush3.bf16.msra.mxu1 %v17836_v16  ;;  %17281 = vmatprep.mubr.msk.bf16.mxu1 %vm8923_vm0, %v9284_v3  ;;  %v17858_v16 = vld [vmem:[%s21865_s4 + $0xf0] sm:$0xff]  }
 0x511   :  { %17275 = vmatprep.subr.bf16.mxu1 %v17837_v22 }
 0x512   :  { %17620 = vmatpush3.bf16.msra.mxu0 %v20343_v14 }
 0x513   :  { %17637 = vmatprep.subr.bf16.mxu0 %v20287_v51 }
 0x514   :  { %17276 = vmatpush3.bf16.msra.mxu1 %v17837_v22  ;;  %v17864_v22 = vld [vmem:[%s21864_s3 + $0x90] sm:$0xff]  }
 0x515   :  { %17277 = vmatprep.subr.bf16.mxu1 %v17839_v23  ;;  %17622 = vmatmul.mubr.bf16.vlgmr.msra.gmra.mrb[68].mxu0 %v17840_v24  ;;  %v17865_v24 = vld [vmem:[%s21864_s3 + $0x98] sm:$0xff]  }
 0x516   :  { %17638 = vmatpush3.bf16.msra.mxu0 %v20287_v51 }
 0x517   :  { %17639 = vmatprep.subr.bf16.mxu0 %v20295_v0 }
 0x518   :  { %17278 = vmatpush3.bf16.msra.mxu1 %v17839_v23  ;;  %v17866_v23 = vld [vmem:[%s21865_s4 + $0x120] sm:$0xff]  }
 0x519   :  { %17279 = vmatprep.subr.bf16.mxu1 %v17841_v25 }
 0x51a   :  { %17640 = vmatpush3.bf16.msra.mxu0 %v20295_v0 }
 0x51b   :  { %17641 = vmatprep.subr.bf16.mxu0 %v20303_v13 }
 0x51c   :  { %17280 = vmatpush3.bf16.msra.mxu1 %v17841_v25  ;;  %v17867_v25 = vld [vmem:[%s21865_s4 + $0x128] sm:$0xff]  }
 0x51d   :  { %17305 = vmatprep.subr.bf16.mxu1 %v17842_v27 }
 0x51e   :  { %17642 = vmatpush3.bf16.msra.mxu0 %v20303_v13 }
 0x51f   :  { %17282 = vmatmul.mubr.msk.bf16.vlgmr.msra.gmra.mrb[8].mxu1 %vm8923_vm0, %v9285_v63  ;;  %17643 = vmatprep.subr.bf16.mxu0 %v20311_v26 }
 0x520   :  { %17306 = vmatpush3.bf16.msra.mxu1 %v17842_v27  ;;  %17313 = vmatprep.mubr.msk.bf16.mxu1 %vm8923_vm0, %v9444_v21  ;;  %v17863_v21 = vld [vmem:[%s21865_s4 + $0x118] sm:$0xff]   ;;  %v17868_v27 = vld [vmem:[%s21865_s4 + $0x130] sm:$0xff]  }
 0x521   :  { %17307 = vmatprep.subr.bf16.mxu1 %v17843_v28 }
 0x522   :  { %17644 = vmatpush3.bf16.msra.mxu0 %v20311_v26 }
 0x523   :  { %17645 = vmatprep.subr.bf16.mxu0 %v20319_v40 }
 0x524   :  { %17308 = vmatpush3.bf16.msra.mxu1 %v17843_v28  ;;  %v17869_v28 = vld [vmem:[%s21865_s4 + $0x138] sm:$0xff]  }
 0x525   :  { %17309 = vmatprep.subr.bf16.mxu1 %v17844_v29 }
 0x526   :  { %17646 = vmatpush3.bf16.msra.mxu0 %v20319_v40 }
 0x527   :  { %17647 = vmatprep.subr.bf16.mxu0 %v20327_v54 }
 0x528   :  { %17310 = vmatpush3.bf16.msra.mxu1 %v17844_v29  ;;  %v20704_v31 = vpop.f32.mrb[44].mxu0  ;;  %v17870_v29 = vld [vmem:[%s21865_s4 + $0x140] sm:$0xff]  }
 0x529   :  { %17311 = vmatprep.subr.bf16.mxu1 %v17845_v30  ;;  %v20706_v32 = vpop.f32.mrb[45].mxu0 }
 0x52a   :  { %17648 = vmatpush3.bf16.msra.mxu0 %v20327_v54  ;;  %v20709_v33 = vpop.f32.mrb[46].mxu0 }
 0x52b   :  { %17649 = vmatprep.subr.bf16.mxu0 %v20335_v4  ;;  %v9765_v34 = vpack.c.bf16 %v20709_v33, %v20704_v31  ;;  %v20714_v36 = vpop.f32.mrb[47].mxu0 }
 0x52c   :  { %17312 = vmatpush3.bf16.msra.mxu1 %v17845_v30  ;;  %v9764_v38 = vpack.c.bf16 %v20714_v36, %v20706_v32 }
 0x52d   :  { %17317 = vmatprep.subr.bf16.mxu1 %v20287_v51 }
 0x52e   :  { %17650 = vmatpush3.bf16.msra.mxu0 %v20335_v4 }
 0x52f   :  { %17314 = vmatmul.mubr.msk.bf16.vlgmr.msra.gmra.mrb[8].mxu1 %vm8923_vm0, %v9445_v19  ;;  %17651 = vmatprep.subr.bf16.mxu0 %v20343_v14  ;;  %v17861_v19 = vld [vmem:[%s21865_s4 + $0x108] sm:$0xff]  }
 0x530   :  { %17318 = vmatpush3.bf16.msra.mxu1 %v20287_v51  ;;  %17333 = vmatprep.mubr.bf16.mxu1 %v17846_v37 }
 0x531   :  { %17319 = vmatprep.subr.bf16.mxu1 %v20295_v0 }
 0x532   :  { %17652 = vmatpush3.bf16.msra.mxu0 %v20343_v14 }
 0x534   :  { %17320 = vmatpush3.bf16.msra.mxu1 %v20295_v0 }
 0x535   :  { %17321 = vmatprep.subr.bf16.mxu1 %v20303_v13 }
 0x538   :  { %17322 = vmatpush3.bf16.msra.mxu1 %v20303_v13 }
 0x539   :  { %17323 = vmatprep.subr.bf16.mxu1 %v20311_v26 }
 0x53c   :  { %17324 = vmatpush3.bf16.msra.mxu1 %v20311_v26 }
 0x53d   :  { %17325 = vmatprep.subr.bf16.mxu1 %v20319_v40 }
 0x540   :  { %17326 = vmatpush3.bf16.msra.mxu1 %v20319_v40 }
 0x541   :  { %17327 = vmatprep.subr.bf16.mxu1 %v20327_v54 }
 0x544   :  { %17328 = vmatpush3.bf16.msra.mxu1 %v20327_v54 }
 0x545   :  { %17329 = vmatprep.subr.bf16.mxu1 %v20335_v4 }
 0x548   :  { %17330 = vmatpush3.bf16.msra.mxu1 %v20335_v4  ;;  %v17399_v46 = vpop.f32.mrb[48].mxu0 }
 0x549   :  { %17331 = vmatprep.subr.bf16.mxu1 %v20343_v14  ;;  %v9909_v47 = vpop.f32.mrb[49].mxu0 }
 0x54a   :  { %v17400_v48 = vpop.f32.mrb[50].mxu0 }
 0x54b   :  { %v9925_v49 = vpack.c.bf16 %v17400_v48, %v17399_v46  ;;  %v9912_v50 = vpop.f32.mrb[51].mxu0 }
 0x54c   :  { %17332 = vmatpush3.bf16.msra.mxu1 %v20343_v14  ;;  %v9924_v52 = vpack.c.bf16 %v9912_v50, %v9909_v47 }
 0x54d   :  { %17337 = vmatprep.subr.bf16.mxu1 %v17848_v39 }
 0x54f   :  { %17334 = vmatmul.mubr.bf16.vlgmr.msra.gmra.mrb[12].mxu1 %v17847_v41 }
 0x550   :  { %17338 = vmatpush3.bf16.msra.mxu1 %v17848_v39 }
 0x551   :  { %17339 = vmatprep.subr.bf16.mxu1 %v17849_v42 }
 0x554   :  { %17340 = vmatpush3.bf16.msra.mxu1 %v17849_v42 }
 0x555   :  { %17341 = vmatprep.subr.bf16.mxu1 %v17850_v43 }
 0x558   :  { %17342 = vmatpush3.bf16.msra.mxu1 %v17850_v43 }
 0x559   :  { %17343 = vmatprep.subr.bf16.mxu1 %v17851_v44 }
 0x55c   :  { %17344 = vmatpush3.bf16.msra.mxu1 %v17851_v44  ;;  %v17884_v44 = vld [vmem:[%s21864_s3 + $0xf0] sm:$0xff]  }
 0x55d   :  { %17369 = vmatprep.subr.bf16.mxu1 %v17852_v45  ;;  %17653 = vmatprep.mubr.bf16.mxu0 %v17884_v44 }
 0x568   :  { %v17431_v53 = vpop.f32.mrb[52].mxu0 }
 0x569   :  { %v10069_v55 = vpop.f32.mrb[53].mxu0 }
 0x56a   :  { %v17432_v56 = vpop.f32.mrb[54].mxu0 }
 0x56b   :  { %v10085_v57 = vpack.c.bf16 %v17432_v56, %v17431_v53  ;;  %v10072_v58 = vpop.f32.mrb[55].mxu0 }
 0x56c   :  { %v10084_v59 = vpack.c.bf16 %v10072_v58, %v10069_v55  ;;  %v17871_v58 = vld [vmem:[%s21865_s4 + $0x148] sm:$0xff]  }
 0x588   :  { %v20759_v60 = vpop.f32.mrb[56].mxu0 }
 0x589   :  { %v20761_v61 = vpop.f32.mrb[57].mxu0 }
 0x58a   :  { %v20763_v62 = vpop.f32.mrb[58].mxu0 }
 0x58b   :  { %v10405_v63 = vpack.c.bf16 %v20763_v62, %v20759_v60  ;;  %v20767_v1 = vpop.f32.mrb[59].mxu0  ;;  %v17878_v60 = vld [vmem:[%s21865_s4 + $0x180] sm:$0xff]   ;;  %v17879_v62 = vld [vmem:[%s21865_s4 + $0x188] sm:$0xff]  }
 0x58c   :  { %v10404_v2 = vpack.c.bf16 %v20767_v1, %v20761_v61  ;;  %v17875_v61 = vld [vmem:[%s21865_s4 + $0x168] sm:$0xff]   ;;  %v17876_v1 = vld [vmem:[%s21865_s4 + $0x170] sm:$0xff]  }
 0x5a8   :  { %v17527_v30 = vpop.f32.mrb[60].mxu0 }
 0x5a9   :  { %v10549_v31 = vpop.f32.mrb[61].mxu0 }
 0x5aa   :  { %v17528_v32 = vpop.f32.mrb[62].mxu0 }
 0x5ab   :  { %v10565_v33 = vpack.c.bf16 %v17528_v32, %v17527_v30  ;;  %v16679_v30 = vld [vmem:[%s21866_s5] ss:$0 sm:$0xff] }
 0x622   :  { %v17335_v3 = vpop.f32.mrb[12].mxu1 }
 0x623   :  { %v9589_v5 = vpop.f32.mrb[13].mxu1 }
 0x624   :  { %v17336_v6 = vpop.f32.mrb[14].mxu1 }
 0x625   :  { %v9605_v7 = vpack.c.bf16 %v17336_v6, %v17335_v3  ;;  %v9592_v8 = vpop.f32.mrb[15].mxu1  ;;  %v17873_v3 = vld [vmem:[%s21865_s4 + $0x158] sm:$0xff]  }
 0x626   :  { %v9604_v9 = vpack.c.bf16 %v9592_v8, %v9589_v5  ;;  %v17874_v5 = vld [vmem:[%s21865_s4 + $0x160] sm:$0xff]   ;;  %v17881_v6 = vld [vmem:[%s21865_s4 + $0x198] sm:$0xff]  }
 0x628   :  { %17345 = vmatprep.mubr.msk.bf16.mxu1 %vm8923_vm0, %v9604_v9 }
 0x629   :  { %17346 = vmatmul.mubr.msk.bf16.vlgmr.msra.gmra.mrb[8].mxu1 %vm8923_vm0, %v9605_v7  ;;  %v17882_v7 = vld [vmem:[%s21864_s3 + $0xd0] sm:$0xff]  }
 0x62a   :  { %17370 = vmatpush3.bf16.msra.mxu1 %v17852_v45  ;;  %17377 = vmatprep.mubr.msk.bf16.mxu1 %vm8923_vm0, %v9764_v38  ;;  %v17885_v45 = vld [vmem:[%s21864_s3 + $0xf8] sm:$0xff]  }
 0x62b   :  { %17371 = vmatprep.subr.bf16.mxu1 %v17853_v10  ;;  %17654 = vmatmul.mubr.bf16.vlgmr.msra.gmra.mrb[72].mxu0 %v17885_v45 }
 0x62e   :  { %17372 = vmatpush3.bf16.msra.mxu1 %v17853_v10 }
 0x62f   :  { %17373 = vmatprep.subr.bf16.mxu1 %v17854_v11 }
 0x632   :  { %17374 = vmatpush3.bf16.msra.mxu1 %v17854_v11 }
 0x633   :  { %17375 = vmatprep.subr.bf16.mxu1 %v17855_v12 }
 0x636   :  { %17376 = vmatpush3.bf16.msra.mxu1 %v17855_v12 }
 0x637   :  { %17401 = vmatprep.subr.bf16.mxu1 %v17856_v15 }
 0x639   :  { %17378 = vmatmul.mubr.msk.bf16.vlgmr.msra.gmra.mrb[8].mxu1 %vm8923_vm0, %v9765_v34  ;;  %v10552_v34 = vpop.f32.mrb[63].mxu0 }
 0x63a   :  { %17402 = vmatpush3.bf16.msra.mxu1 %v17856_v15  ;;  %17409 = vmatprep.mubr.msk.bf16.mxu1 %vm8923_vm0, %v9924_v52  ;;  %v10564_v36 = vpack.c.bf16 %v10552_v34, %v10549_v31  ;;  %v20855_v37 = vpop.f32.mrb[64].mxu0 }
 0x63b   :  { %17403 = vmatprep.subr.bf16.mxu1 %v17857_v35  ;;  %v10709_v38 = vpop.f32.mrb[65].mxu0 }
 0x63c   :  { %v17560_v39 = vpop.f32.mrb[66].mxu0 }
 0x63d   :  { %v10725_v41 = vpack.c.bf16 %v17560_v39, %v20855_v37  ;;  %v10712_v42 = vpop.f32.mrb[67].mxu0 }
 0x63e   :  { %17404 = vmatpush3.bf16.msra.mxu1 %v17857_v35  ;;  %v10724_v43 = vpack.c.bf16 %v10712_v42, %v10709_v38  ;;  %v20864_v46 = vpop.f32.mrb[68].mxu0 }
 0x63f   :  { %17405 = vmatprep.subr.bf16.mxu1 %v17858_v16  ;;  %v20866_v47 = vpop.f32.mrb[69].mxu0 }
 0x640   :  { %v20868_v48 = vpop.f32.mrb[70].mxu0 }
 0x642   :  { %17406 = vmatpush3.bf16.msra.mxu1 %v17858_v16 }
 0x643   :  { %17407 = vmatprep.subr.bf16.mxu1 %v17859_v17 }
 0x646   :  { %17408 = vmatpush3.bf16.msra.mxu1 %v17859_v17 }
 0x647   :  { %17433 = vmatprep.subr.bf16.mxu1 %v17860_v18 }
 0x649   :  { %17410 = vmatmul.mubr.msk.bf16.vlgmr.msra.gmra.mrb[8].mxu1 %vm8923_vm0, %v9925_v49  ;;  %v11045_v49 = vpack.c.bf16 %v20868_v48, %v20864_v46 }
 0x64a   :  { %17434 = vmatpush3.bf16.msra.mxu1 %v17860_v18  ;;  %17441 = vmatprep.mubr.msk.bf16.mxu1 %vm8923_vm0, %v10084_v59  ;;  %v17872_v59 = vld [vmem:[%s21865_s4 + $0x150] sm:$0xff]  }
 0x64b   :  { %17435 = vmatprep.subr.bf16.mxu1 %v17861_v19 }
 0x64e   :  { %17436 = vmatpush3.bf16.msra.mxu1 %v17861_v19 }
 0x64f   :  { %17437 = vmatprep.subr.bf16.mxu1 %v17862_v20 }
 0x652   :  { %17438 = vmatpush3.bf16.msra.mxu1 %v17862_v20 }
 0x653   :  { %17439 = vmatprep.subr.bf16.mxu1 %v17863_v21 }
 0x656   :  { %17440 = vmatpush3.bf16.msra.mxu1 %v17863_v21  ;;  %v17891_v21 = vld [vmem:[%s21865_s4 + $0x1c8] sm:$0xff]  }
 0x657   :  { %17445 = vmatprep.subr.bf16.mxu1 %v20287_v51 }
 0x659   :  { %17442 = vmatmul.mubr.msk.bf16.vlgmr.msra.gmra.mrb[8].mxu1 %vm8923_vm0, %v10085_v57 }
 0x65a   :  { %17446 = vmatpush3.bf16.msra.mxu1 %v20287_v51  ;;  %17461 = vmatprep.mubr.bf16.mxu1 %v17864_v22  ;;  %v17892_v22 = vld [vmem:[%s21865_s4 + $0x1d0] sm:$0xff]  }
 0x65b   :  { %17447 = vmatprep.subr.bf16.mxu1 %v20295_v0 }
 0x65e   :  { %17448 = vmatpush3.bf16.msra.mxu1 %v20295_v0 }
 0x65f   :  { %17449 = vmatprep.subr.bf16.mxu1 %v20303_v13 }
 0x662   :  { %17450 = vmatpush3.bf16.msra.mxu1 %v20303_v13 }
 0x663   :  { %17451 = vmatprep.subr.bf16.mxu1 %v20311_v26 }
 0x666   :  { %17452 = vmatpush3.bf16.msra.mxu1 %v20311_v26 }
 0x667   :  { %17453 = vmatprep.subr.bf16.mxu1 %v20319_v40 }
 0x66a   :  { %17454 = vmatpush3.bf16.msra.mxu1 %v20319_v40 }
 0x66b   :  { %17455 = vmatprep.subr.bf16.mxu1 %v20327_v54 }
 0x66e   :  { %17456 = vmatpush3.bf16.msra.mxu1 %v20327_v54 }
 0x66f   :  { %17457 = vmatprep.subr.bf16.mxu1 %v20335_v4 }
 0x672   :  { %17458 = vmatpush3.bf16.msra.mxu1 %v20335_v4 }
 0x673   :  { %17459 = vmatprep.subr.bf16.mxu1 %v20343_v14 }
 0x676   :  { %17460 = vmatpush3.bf16.msra.mxu1 %v20343_v14 }
 0x677   :  { %17465 = vmatprep.subr.bf16.mxu1 %v17866_v23 }
 0x679   :  { %17462 = vmatmul.mubr.bf16.vlgmr.msra.gmra.mrb[16].mxu1 %v17865_v24  ;;  %v17894_v24 = vld [vmem:[%s21865_s4 + $0x1e0] sm:$0xff]  }
 0x67a   :  { %17466 = vmatpush3.bf16.msra.mxu1 %v17866_v23  ;;  %v17893_v23 = vld [vmem:[%s21865_s4 + $0x1d8] sm:$0xff]  }
 0x67b   :  { %17467 = vmatprep.subr.bf16.mxu1 %v17867_v25 }
 0x67e   :  { %17468 = vmatpush3.bf16.msra.mxu1 %v17867_v25  ;;  %v17895_v25 = vld [vmem:[%s21865_s4 + $0x1e8] sm:$0xff]  }
 0x67f   :  { %17469 = vmatprep.subr.bf16.mxu1 %v17868_v27 }
 0x682   :  { %17470 = vmatpush3.bf16.msra.mxu1 %v17868_v27  ;;  %v17896_v27 = vld [vmem:[%s21865_s4 + $0x1f0] sm:$0xff]  }
 0x683   :  { %17471 = vmatprep.subr.bf16.mxu1 %v17869_v28 }
 0x686   :  { %17472 = vmatpush3.bf16.msra.mxu1 %v17869_v28  ;;  %v17897_v28 = vld [vmem:[%s21865_s4 + $0x1f8] sm:$0xff]  }
 0x687   :  { %17497 = vmatprep.subr.bf16.mxu1 %v17870_v29 }
 0x74c   :  { %v17463_v50 = vpop.f32.mrb[16].mxu1 }
 0x74d   :  { %v10229_v52 = vpop.f32.mrb[17].mxu1 }
 0x74e   :  { %v17464_v53 = vpop.f32.mrb[18].mxu1 }
 0x74f   :  { %v10245_v55 = vpack.c.bf16 %v17464_v53, %v17463_v50  ;;  %v10232_v56 = vpop.f32.mrb[19].mxu1 }
 0x750   :  { %v10244_v57 = vpack.c.bf16 %v10232_v56, %v10229_v52 }
 0x752   :  { %17473 = vmatprep.mubr.msk.bf16.mxu1 %vm8923_vm0, %v10244_v57 }
 0x753   :  { %17474 = vmatmul.mubr.msk.bf16.vlgmr.msra.gmra.mrb[8].mxu1 %vm8923_vm0, %v10245_v55 }
 0x754   :  { %17498 = vmatpush3.bf16.msra.mxu1 %v17870_v29  ;;  %17505 = vmatprep.mubr.msk.bf16.mxu1 %vm8923_vm0, %v10404_v2  ;;  %v17877_v2 = vld [vmem:[%s21865_s4 + $0x178] sm:$0xff]  }
 0x755   :  { %17499 = vmatprep.subr.bf16.mxu1 %v17871_v58 }
 0x758   :  { %17500 = vmatpush3.bf16.msra.mxu1 %v17871_v58 }
 0x759   :  { %17501 = vmatprep.subr.bf16.mxu1 %v17872_v59 }
 0x75c   :  { %17502 = vmatpush3.bf16.msra.mxu1 %v17872_v59 }
 0x75d   :  { %17503 = vmatprep.subr.bf16.mxu1 %v17873_v3 }
 0x760   :  { %17504 = vmatpush3.bf16.msra.mxu1 %v17873_v3 }
 0x761   :  { %17529 = vmatprep.subr.bf16.mxu1 %v17874_v5 }
 0x763   :  { %17506 = vmatmul.mubr.msk.bf16.vlgmr.msra.gmra.mrb[8].mxu1 %vm8923_vm0, %v10405_v63  ;;  %v17880_v63 = vld [vmem:[%s21865_s4 + $0x190] sm:$0xff]  }
 0x764   :  { %17530 = vmatpush3.bf16.msra.mxu1 %v17874_v5  ;;  %17537 = vmatprep.mubr.msk.bf16.mxu1 %vm8923_vm0, %v10564_v36 }
 0x765   :  { %17531 = vmatprep.subr.bf16.mxu1 %v17875_v61 }
 0x768   :  { %17532 = vmatpush3.bf16.msra.mxu1 %v17875_v61 }
 0x769   :  { %17533 = vmatprep.subr.bf16.mxu1 %v17876_v1 }
 0x76c   :  { %17534 = vmatpush3.bf16.msra.mxu1 %v17876_v1 }
 0x76d   :  { %17535 = vmatprep.subr.bf16.mxu1 %v17877_v2 }
 0x770   :  { %17536 = vmatpush3.bf16.msra.mxu1 %v17877_v2 }
 0x771   :  { %17561 = vmatprep.subr.bf16.mxu1 %v17878_v60 }
 0x773   :  { %17538 = vmatmul.mubr.msk.bf16.vlgmr.msra.gmra.mrb[8].mxu1 %vm8923_vm0, %v10565_v33 }
 0x774   :  { %17562 = vmatpush3.bf16.msra.mxu1 %v17878_v60  ;;  %17569 = vmatprep.mubr.msk.bf16.mxu1 %vm8923_vm0, %v10724_v43 }
 0x775   :  { %17563 = vmatprep.subr.bf16.mxu1 %v17879_v62 }
 0x778   :  { %17564 = vmatpush3.bf16.msra.mxu1 %v17879_v62 }
 0x779   :  { %17565 = vmatprep.subr.bf16.mxu1 %v17880_v63 }
 0x77c   :  { %17566 = vmatpush3.bf16.msra.mxu1 %v17880_v63 }
 0x77d   :  { %17567 = vmatprep.subr.bf16.mxu1 %v17881_v6 }
 0x780   :  { %17568 = vmatpush3.bf16.msra.mxu1 %v17881_v6 }
 0x781   :  { %17573 = vmatprep.subr.bf16.mxu1 %v20287_v51 }
 0x783   :  { %17570 = vmatmul.mubr.msk.bf16.vlgmr.msra.gmra.mrb[8].mxu1 %vm8923_vm0, %v10725_v41 }
 0x784   :  { %17574 = vmatpush3.bf16.msra.mxu1 %v20287_v51  ;;  %17589 = vmatprep.mubr.bf16.mxu1 %v17882_v7  ;;  %v17886_v51 = vld [vmem:[%s21865_s4 + $0x1a0] sm:$0xff]  }
 0x785   :  { %17575 = vmatprep.subr.bf16.mxu1 %v20295_v0 }
 0x788   :  { %17576 = vmatpush3.bf16.msra.mxu1 %v20295_v0  ;;  %v17883_v0 = vld [vmem:[%s21864_s3 + $0xd8] sm:$0xff]  }
 0x789   :  { %17577 = vmatprep.subr.bf16.mxu1 %v20303_v13 }
 0x78c   :  { %17578 = vmatpush3.bf16.msra.mxu1 %v20303_v13  ;;  %v17887_v13 = vld [vmem:[%s21865_s4 + $0x1a8] sm:$0xff]  }
 0x78d   :  { %17579 = vmatprep.subr.bf16.mxu1 %v20311_v26 }
 0x790   :  { %17580 = vmatpush3.bf16.msra.mxu1 %v20311_v26  ;;  %v17888_v26 = vld [vmem:[%s21865_s4 + $0x1b0] sm:$0xff]  }
 0x791   :  { %17581 = vmatprep.subr.bf16.mxu1 %v20319_v40 }
 0x794   :  { %17582 = vmatpush3.bf16.msra.mxu1 %v20319_v40  ;;  %v11032_v40 = vpop.f32.mrb[71].mxu0 }
 0x795   :  { %17583 = vmatprep.subr.bf16.mxu1 %v20327_v54  ;;  %v17655_v8 = vpop.f32.mrb[72].mxu0 }
 0x796   :  { %v11189_v9 = vpop.f32.mrb[73].mxu0 }
 0x797   :  { %v17656_v10 = vpop.f32.mrb[74].mxu0 }
 0x798   :  { %17584 = vmatpush3.bf16.msra.mxu1 %v20327_v54  ;;  %v17889_v54 = vld [vmem:[%s21865_s4 + $0x1b8] sm:$0xff]   ;;  %v11205_v11 = vpack.c.bf16 %v17656_v10, %v17655_v8  ;;  %v11192_v12 = vpop.f32.mrb[75].mxu0 }
 0x799   :  { %17585 = vmatprep.subr.bf16.mxu1 %v20335_v4  ;;  %v11204_v15 = vpack.c.bf16 %v11192_v12, %v11189_v9 }
 0x79c   :  { %17586 = vmatpush3.bf16.msra.mxu1 %v20335_v4  ;;  %v11044_v4 = vpack.c.bf16 %v11032_v40, %v20866_v47 }
 0x79d   :  { %17587 = vmatprep.subr.bf16.mxu1 %v20343_v14 }
 0x7a0   :  { %17588 = vmatpush3.bf16.msra.mxu1 %v20343_v14  ;;  %v17890_v14 = vld [vmem:[%s21865_s4 + $0x1c0] sm:$0xff]  }
 0x7a1   :  { %17593 = vmatprep.subr.bf16.mxu1 %v17886_v51 }
 0x7a3   :  { %17590 = vmatmul.mubr.bf16.vlgmr.msra.gmra.mrb[20].mxu1 %v17883_v0 }
 0x7a4   :  { %17594 = vmatpush3.bf16.msra.mxu1 %v17886_v51 }
 0x7a5   :  { %17595 = vmatprep.subr.bf16.mxu1 %v17887_v13 }
 0x7a8   :  { %17596 = vmatpush3.bf16.msra.mxu1 %v17887_v13  ;;  %v16680_v13 = vld [vmem:[%s21867_s6] ss:$0 sm:$0xff] }
 0x7a9   :  { %17597 = vmatprep.subr.bf16.mxu1 %v17888_v26 }
 0x7ac   :  { %17598 = vmatpush3.bf16.msra.mxu1 %v17888_v26 }
 0x7ad   :  { %17599 = vmatprep.subr.bf16.mxu1 %v17889_v54 }
 0x7b0   :  { %17600 = vmatpush3.bf16.msra.mxu1 %v17889_v54 }
 0x7b1   :  { %17625 = vmatprep.subr.bf16.mxu1 %v17890_v14 }
 0x876   :  { %v17591_v35 = vpop.f32.mrb[20].mxu1 }
 0x877   :  { %v10869_v16 = vpop.f32.mrb[21].mxu1 }
 0x878   :  { %v17592_v17 = vpop.f32.mrb[22].mxu1 }
 0x879   :  { %v10885_v18 = vpack.c.bf16 %v17592_v17, %v17591_v35  ;;  %v10872_v19 = vpop.f32.mrb[23].mxu1 }
 0x87a   :  { %v10884_v20 = vpack.c.bf16 %v10872_v19, %v10869_v16 }
 0x87c   :  { %17601 = vmatprep.mubr.msk.bf16.mxu1 %vm8923_vm0, %v10884_v20 }
 0x87d   :  { %17602 = vmatmul.mubr.msk.bf16.vlgmr.msra.gmra.mrb[8].mxu1 %vm8923_vm0, %v10885_v18 }
 0x87e   :  { %17626 = vmatpush3.bf16.msra.mxu1 %v17890_v14  ;;  %17633 = vmatprep.mubr.msk.bf16.mxu1 %vm8923_vm0, %v11044_v4  ;;  %v16681_v14 = vld [vmem:[%s21868_s7] ss:$0 sm:$0xff] }
 0x87f   :  { %17627 = vmatprep.subr.bf16.mxu1 %v17891_v21 }
 0x882   :  { %17628 = vmatpush3.bf16.msra.mxu1 %v17891_v21 }
 0x883   :  { %17629 = vmatprep.subr.bf16.mxu1 %v17892_v22 }
 0x886   :  { %17630 = vmatpush3.bf16.msra.mxu1 %v17892_v22 }
 0x887   :  { %17631 = vmatprep.subr.bf16.mxu1 %v17893_v23 }
 0x88a   :  { %17632 = vmatpush3.bf16.msra.mxu1 %v17893_v23 }
 0x88b   :  { %17657 = vmatprep.subr.bf16.mxu1 %v17894_v24 }
 0x88d   :  { %17634 = vmatmul.mubr.msk.bf16.vlgmr.msra.gmra.mrb[8].mxu1 %vm8923_vm0, %v11045_v49 }
 0x88e   :  { %17658 = vmatpush3.bf16.msra.mxu1 %v17894_v24  ;;  %17665 = vmatprep.mubr.msk.bf16.mxu1 %vm8923_vm0, %v11204_v15 }
 0x88f   :  { %17659 = vmatprep.subr.bf16.mxu1 %v17895_v25 }
 0x892   :  { %17660 = vmatpush3.bf16.msra.mxu1 %v17895_v25 }
 0x893   :  { %17661 = vmatprep.subr.bf16.mxu1 %v17896_v27 }
 0x896   :  { %17662 = vmatpush3.bf16.msra.mxu1 %v17896_v27 }
 0x897   :  { %17663 = vmatprep.subr.bf16.mxu1 %v17897_v28 }
 0x89a   :  { %17664 = vmatpush3.bf16.msra.mxu1 %v17897_v28 }
 0x89d   :  { %17666 = vmatmul.mubr.msk.bf16.vlgmr.msra.gmra.mrb[8].mxu1 %vm8923_vm0, %v11205_v11 }
 0x970   :  { %v17667_v29 = vpop.f32.mrb[8].mxu1 }
 0x971   :  { %v11279_v31 = vpop.f32.mrb[9].mxu1  ;;  %v11307_v37 = vadd.f32 %v17667_v29, %v16679_v30 }
 0x972   :  { %v17668_v32 = vpop.f32.mrb[10].mxu1  ;;  %v11305_v34 = vadd.f32 %v16679_v30, %v11279_v31 }
 0x973   :  { %v11282_v33 = vpop.f32.mrb[11].mxu1  ;;  %v11308_v39 = vadd.f32 %v17668_v32, %v16679_v30 }
 0x974   :  { %v11306_v36 = vadd.f32 %v16679_v30, %v11282_v33 }
 0x976   :  { %v11309_v38 = vadd.f32 %v11306_v36, %v11305_v34 }
 0x978   :  { %v11310_v41 = vadd.f32 %v11309_v38, %v11307_v37 }
 0x97a   :  { %v11311_v42 = vadd.f32 %v11310_v41, %v11308_v39 }
 0x97c   :  { %v11312_v43 = vrot.slane %v11311_v42, 4 }
 0x97e   :  { %v11313_v44 = vadd.f32 %v11312_v43, %v11311_v42 }
 0x980   :  { %v11314_v45 = vrot.slane %v11313_v44, 2 }
 0x982   :  { %v11315_v46 = vadd.f32 %v11314_v45, %v11313_v44 }
 0x984   :  { %v11316_v47 = vrot.slane %v11315_v46, 1 }
 0x986   :  { %v11317_v48 = vadd.f32 %v11316_v47, %v11315_v46 }
 0x988   :  { %v11319_v49 = vmul.f32 0.03125, %v11317_v48 }
 0x98a   :  { %v11320_v50 = vsub.f32 %v11305_v34, %v11319_v49  ;;  %v11321_v52 = vsub.f32 %v11306_v36, %v11319_v49  ;;  %v11322_v53 = vsub.f32 %v11307_v37, %v11319_v49  ;;  %v11323_v55 = vsub.f32 %v11308_v39, %v11319_v49 }
 0x98c   :  { %v11324_v56 = vmul.f32 %v11320_v50, %v11320_v50  ;;  %v11325_v57 = vmul.f32 %v11321_v52, %v11321_v52  ;;  %v11326_v58 = vmul.f32 %v11322_v53, %v11322_v53  ;;  %v11327_v3 = vmul.f32 %v11323_v55, %v11323_v55 }
 0x98e   :  { %v11328_v59 = vadd.f32 %v11325_v57, %v11324_v56 }
 0x990   :  { %v11329_v5 = vadd.f32 %v11328_v59, %v11326_v58 }
 0x992   :  { %v11330_v61 = vadd.f32 %v11329_v5, %v11327_v3 }
 0x994   :  { %v11331_v1 = vrot.slane %v11330_v61, 4 }
 0x996   :  { %v11332_v2 = vadd.f32 %v11331_v1, %v11330_v61 }
 0x998   :  { %v11333_v60 = vrot.slane %v11332_v2, 2 }
 0x99a   :  { %v11334_v62 = vadd.f32 %v11333_v60, %v11332_v2 }
 0x99c   :  { %v11335_v63 = vrot.slane %v11334_v62, 1 }
 0x99e   :  { %v11336_v6 = vadd.f32 %v11335_v63, %v11334_v62 }
 0x9a0   :  { %v11337_v7 = vmul.f32 0.03125, %v11336_v6 }
 0x9a2   :  { %v11339_v51 = vadd.f32 1e-05, %v11337_v7 }
 0x9a4   :  { %17898 = vrsqrt.f32 %v11339_v51 }
 0x9ae   :  { %v17899_v0 = vpop.eup %17898 }
 0x9af   :  { %v11341_v26 = vmul.f32 %v17899_v0, %v11320_v50  ;;  %v11342_v40 = vmul.f32 %v17899_v0, %v11321_v52  ;;  %v11343_v54 = vmul.f32 %v17899_v0, %v11322_v53  ;;  %v11344_v4 = vmul.f32 %v17899_v0, %v11323_v55 }
 0x9b1   :  { %v11351_v8 = vmul.f32 %v16680_v13, %v11341_v26  ;;  %v11352_v9 = vmul.f32 %v16680_v13, %v11342_v40  ;;  %v11353_v10 = vmul.f32 %v16680_v13, %v11343_v54  ;;  %v11354_v11 = vmul.f32 %v16680_v13, %v11344_v4 }
 0x9b3   :  { %v11362_v12 = vadd.f32 %v16681_v14, %v11351_v8  ;;  %v11363_v15 = vadd.f32 %v16681_v14, %v11352_v9  ;;  %v11364_v35 = vadd.f32 %v16681_v14, %v11353_v10  ;;  %v11365_v16 = vadd.f32 %v16681_v14, %v11354_v11 }
 0x9b5   :  { %vm11366_vm1 = vcmp.gt.f32.partialorder %v11362_v12, 0.0  ;;  %vm11367_vm2 = vcmp.gt.f32.partialorder %v11363_v15, 0.0  ;;  %vm11368_vm3 = vcmp.gt.f32.partialorder %v11364_v35, 0.0  ;;  %vm11369_vm4 = vcmp.gt.f32.partialorder %v11365_v16, 0.0 }
 0x9b6   :  { %v11370_v17 = vmul.f32 0.2, %v11362_v12  ;;  %v11371_v18 = vmul.f32 0.2, %v11363_v15  ;;  %v11372_v19 = vmul.f32 0.2, %v11364_v35 }
 0x9b7   :  { %v11373_v20 = vmul.f32 0.2, %v11365_v16 }
 0x9b8   :  { %v20996_v21 = vsel %vm11366_vm1, %v11362_v12, %v11370_v17  ;;  %v20998_v22 = vsel %vm11367_vm2, %v11363_v15, %v11371_v18  ;;  %v21000_v23 = vsel %vm11368_vm3, %v11364_v35, %v11372_v19 }
 0x9b9   :  { %v21002_v24 = vsel %vm11369_vm4, %v11365_v16, %v11373_v20 }
 0x9ba   :  { %18000 = dma.done.wait [#allocation3], 131072 }
 0x9bb   :  { %18001 = vsyncadd [#allocation3], 4294836224  ;;  %v18018_v25 = vmov 0   ;;  %v11450_v27 = vld [vmem:[#allocation2 + $0x208] sm:$0xff]  ;;  %v11452_v28 = vld [vmem:[#allocation2 + $0x218] sm:$0xff]  ;;  %v21008_v5 = vpack.c.bf16 %v20996_v21, %v20996_v21  ;;  %vm15240_vm5 = vcmask 1041408  }
 0x9bc   :  { %11548 = vmatprep.mubr.bf16.mxu0 %v18018_v25  ;;  %11589 = vmatprep.mubr.bf16.mxu1 %v18018_v25  ;;  %v11449_v29 = vld [vmem:[#allocation2 + $0x200] sm:$0xff]  ;;  %v11451_v30 = vld [vmem:[#allocation2 + $0x210] sm:$0xff]  ;;  %v11458_v31 = vld [vmem:[#allocation2 + $0x248] sm:$0xff] }
 0x9bd   :  { %11516 = vmatprep.subr.bf16.mxu0 %v11450_v27  ;;  %11557 = vmatprep.subr.bf16.mxu1 %v11452_v28  ;;  %v11460_v32 = vld [vmem:[#allocation2 + $0x258] sm:$0xff]  ;;  %v11457_v33 = vld [vmem:[#allocation2 + $0x240] sm:$0xff]  ;;  %v11459_v34 = vld [vmem:[#allocation2 + $0x250] sm:$0xff]  ;;  %v21011_v62 = vrot.slane %v21008_v5, 1 }
 0x9be   :  { %11517 = vmatpush1.bf16.msra.mxu0 %v11449_v29  ;;  %11558 = vmatpush1.bf16.msra.mxu1 %v11451_v30  ;;  %v11466_v36 = vld [vmem:[#allocation2 + $0x288] sm:$0xff]  ;;  %v11468_v37 = vld [vmem:[#allocation2 + $0x298] sm:$0xff]  ;;  %v11465_v38 = vld [vmem:[#allocation2 + $0x280] sm:$0xff] }
 0x9bf   :  { %11518 = vmatprep.subr.bf16.mxu0 %v11458_v31  ;;  %11559 = vmatprep.subr.bf16.mxu1 %v11460_v32  ;;  %v11467_v39 = vld [vmem:[#allocation2 + $0x290] sm:$0xff]  ;;  %v11474_v41 = vld [vmem:[#allocation2 + $0x2c8] sm:$0xff]  ;;  %v11476_v42 = vld [vmem:[#allocation2 + $0x2d8] sm:$0xff] }
 0x9c0   :  { %v11473_v43 = vld [vmem:[#allocation2 + $0x2c0] sm:$0xff]  ;;  %v11475_v44 = vld [vmem:[#allocation2 + $0x2d0] sm:$0xff]  ;;  %v11482_v45 = vld [vmem:[#allocation2 + $0x308] sm:$0xff] }
 0x9c1   :  { %v11484_v46 = vld [vmem:[#allocation2 + $0x318] sm:$0xff]  ;;  %v11481_v47 = vld [vmem:[#allocation2 + $0x300] sm:$0xff]  ;;  %v11483_v48 = vld [vmem:[#allocation2 + $0x310] sm:$0xff] }
 0x9c2   :  { %11519 = vmatpush1.bf16.msra.mxu0 %v11457_v33  ;;  %11560 = vmatpush1.bf16.msra.mxu1 %v11459_v34  ;;  %v11490_v49 = vld [vmem:[#allocation2 + $0x348] sm:$0xff]  ;;  %v11492_v50 = vld [vmem:[#allocation2 + $0x358] sm:$0xff]  ;;  %v11489_v52 = vld [vmem:[#allocation2 + $0x340] sm:$0xff] }
 0x9c3   :  { %11520 = vmatprep.subr.bf16.mxu0 %v11466_v36  ;;  %11561 = vmatprep.subr.bf16.mxu1 %v11468_v37  ;;  %v11491_v53 = vld [vmem:[#allocation2 + $0x350] sm:$0xff]  ;;  %v11498_v55 = vld [vmem:[#allocation2 + $0x388] sm:$0xff]  ;;  %v11500_v56 = vld [vmem:[#allocation2 + $0x398] sm:$0xff] }
 0x9c4   :  { %v11497_v57 = vld [vmem:[#allocation2 + $0x380] sm:$0xff]  ;;  %v11499_v58 = vld [vmem:[#allocation2 + $0x390] sm:$0xff]  ;;  %v11506_v59 = vld [vmem:[#allocation2 + $0x3c8] sm:$0xff] }
 0x9c5   :  { %v11508_v3 = vld [vmem:[#allocation2 + $0x3d8] sm:$0xff]  ;;  %v11505_v61 = vld [vmem:[#allocation2 + $0x3c0] sm:$0xff]  ;;  %v11507_v1 = vld [vmem:[#allocation2 + $0x3d0] sm:$0xff] }
 0x9c6   :  { %11521 = vmatpush1.bf16.msra.mxu0 %v11465_v38  ;;  %11562 = vmatpush1.bf16.msra.mxu1 %v11467_v39  ;;  %v11454_v2 = vld [vmem:[#allocation2 + $0x228] sm:$0xff]  ;;  %v11456_v60 = vld [vmem:[#allocation2 + $0x238] sm:$0xff]  ;;  %v11453_v63 = vld [vmem:[#allocation2 + $0x220] sm:$0xff] }
 0x9c7   :  { %11522 = vmatprep.subr.bf16.mxu0 %v11474_v41  ;;  %11563 = vmatprep.subr.bf16.mxu1 %v11476_v42  ;;  %v11455_v6 = vld [vmem:[#allocation2 + $0x230] sm:$0xff]  ;;  %v11462_v7 = vld [vmem:[#allocation2 + $0x268] sm:$0xff]  ;;  %v11464_v51 = vld [vmem:[#allocation2 + $0x278] sm:$0xff] }
 0x9c8   :  { %v11461_v0 = vld [vmem:[#allocation2 + $0x260] sm:$0xff]  ;;  %v11463_v13 = vld [vmem:[#allocation2 + $0x270] sm:$0xff]  ;;  %v11470_v26 = vld [vmem:[#allocation2 + $0x2a8] sm:$0xff] }
 0x9c9   :  { %v11472_v40 = vld [vmem:[#allocation2 + $0x2b8] sm:$0xff]  ;;  %v11469_v54 = vld [vmem:[#allocation2 + $0x2a0] sm:$0xff]  ;;  %v11471_v4 = vld [vmem:[#allocation2 + $0x2b0] sm:$0xff] }
 0x9ca   :  { %11523 = vmatpush1.bf16.msra.mxu0 %v11473_v43  ;;  %11564 = vmatpush1.bf16.msra.mxu1 %v11475_v44  ;;  %v11478_v14 = vld [vmem:[#allocation2 + $0x2e8] sm:$0xff]  ;;  %v11480_v8 = vld [vmem:[#allocation2 + $0x2f8] sm:$0xff]  ;;  %v11477_v9 = vld [vmem:[#allocation2 + $0x2e0] sm:$0xff] }
 0x9cb   :  { %11524 = vmatprep.subr.bf16.mxu0 %v11482_v45  ;;  %11565 = vmatprep.subr.bf16.mxu1 %v11484_v46  ;;  %v11479_v10 = vld [vmem:[#allocation2 + $0x2f0] sm:$0xff]  ;;  %v11486_v11 = vld [vmem:[#allocation2 + $0x328] sm:$0xff]  ;;  %v11488_v12 = vld [vmem:[#allocation2 + $0x338] sm:$0xff] }
 0x9cc   :  { %v11485_v15 = vld [vmem:[#allocation2 + $0x320] sm:$0xff]  ;;  %v11487_v35 = vld [vmem:[#allocation2 + $0x330] sm:$0xff]  ;;  %v11494_v16 = vld [vmem:[#allocation2 + $0x368] sm:$0xff] }
 0x9cd   :  { %v11496_v17 = vld [vmem:[#allocation2 + $0x378] sm:$0xff]  ;;  %v11493_v18 = vld [vmem:[#allocation2 + $0x360] sm:$0xff]  ;;  %v11495_v19 = vld [vmem:[#allocation2 + $0x370] sm:$0xff] }
 0x9ce   :  { %11525 = vmatpush1.bf16.msra.mxu0 %v11481_v47  ;;  %11566 = vmatpush1.bf16.msra.mxu1 %v11483_v48  ;;  %v11502_v20 = vld [vmem:[#allocation2 + $0x3a8] sm:$0xff]  ;;  %v11504_v21 = vld [vmem:[#allocation2 + $0x3b8] sm:$0xff]  ;;  %v11501_v27 = vld [vmem:[#allocation2 + $0x3a0] sm:$0xff] }
 0x9cf   :  { %11526 = vmatprep.subr.bf16.mxu0 %v11490_v49  ;;  %11567 = vmatprep.subr.bf16.mxu1 %v11492_v50  ;;  %v11503_v28 = vld [vmem:[#allocation2 + $0x3b0] sm:$0xff]  ;;  %v11510_v29 = vld [vmem:[#allocation2 + $0x3e8] sm:$0xff]  ;;  %v11512_v30 = vld [vmem:[#allocation2 + $0x3f8] sm:$0xff] }
 0x9d0   :  { %v11509_v31 = vld [vmem:[#allocation2 + $0x3e0] sm:$0xff]  ;;  %v11511_v32 = vld [vmem:[#allocation2 + $0x3f0] sm:$0xff]  ;;  %v11385_v33 = vld [vmem:[#allocation2 + $0x8] sm:$0xff] }
 0x9d1   :  { %v11387_v34 = vld [vmem:[#allocation2 + $0x18] sm:$0xff]  ;;  %v11384_v36 = vld [vmem:[#allocation2] sm:$0xff]  ;;  %v11386_v37 = vld [vmem:[#allocation2 + $0x10] sm:$0xff] }
 0x9d2   :  { %11527 = vmatpush1.bf16.msra.mxu0 %v11489_v52  ;;  %11568 = vmatpush1.bf16.msra.mxu1 %v11491_v53  ;;  %v11393_v38 = vld [vmem:[#allocation2 + $0x48] sm:$0xff]  ;;  %v11395_v39 = vld [vmem:[#allocation2 + $0x58] sm:$0xff]  ;;  %v11392_v41 = vld [vmem:[#allocation2 + $0x40] sm:$0xff] }
 0x9d3   :  { %11528 = vmatprep.subr.bf16.mxu0 %v11498_v55  ;;  %11569 = vmatprep.subr.bf16.mxu1 %v11500_v56  ;;  %v11394_v42 = vld [vmem:[#allocation2 + $0x50] sm:$0xff]  ;;  %v11401_v43 = vld [vmem:[#allocation2 + $0x88] sm:$0xff]  ;;  %v11403_v44 = vld [vmem:[#allocation2 + $0x98] sm:$0xff] }
 0x9d4   :  { %v11400_v45 = vld [vmem:[#allocation2 + $0x80] sm:$0xff]  ;;  %v11402_v46 = vld [vmem:[#allocation2 + $0x90] sm:$0xff]  ;;  %v11409_v47 = vld [vmem:[#allocation2 + $0xc8] sm:$0xff] }
 0x9d5   :  { %v11411_v48 = vld [vmem:[#allocation2 + $0xd8] sm:$0xff]  ;;  %v11408_v49 = vld [vmem:[#allocation2 + $0xc0] sm:$0xff]  ;;  %v11410_v50 = vld [vmem:[#allocation2 + $0xd0] sm:$0xff] }
 0x9d6   :  { %11529 = vmatpush1.bf16.msra.mxu0 %v11497_v57  ;;  %11570 = vmatpush1.bf16.msra.mxu1 %v11499_v58  ;;  %v11417_v52 = vld [vmem:[#allocation2 + $0x108] sm:$0xff]  ;;  %v11419_v53 = vld [vmem:[#allocation2 + $0x118] sm:$0xff]  ;;  %v11416_v55 = vld [vmem:[#allocation2 + $0x100] sm:$0xff] }
 0x9d7   :  { %11530 = vmatprep.subr.bf16.mxu0 %v11506_v59  ;;  %11571 = vmatprep.subr.bf16.mxu1 %v11508_v3  ;;  %v11418_v56 = vld [vmem:[#allocation2 + $0x110] sm:$0xff]  ;;  %v11425_v57 = vld [vmem:[#allocation2 + $0x148] sm:$0xff]  ;;  %v11427_v58 = vld [vmem:[#allocation2 + $0x158] sm:$0xff] }
 0x9d8   :  { %v11424_v59 = vld [vmem:[#allocation2 + $0x140] sm:$0xff]  ;;  %v11426_v3 = vld [vmem:[#allocation2 + $0x150] sm:$0xff] }
 0x9da   :  { %11531 = vmatpush1.bf16.msra.mxu0 %v11505_v61  ;;  %11572 = vmatpush1.bf16.msra.mxu1 %v11507_v1  ;;  %v11433_v61 = vld [vmem:[#allocation2 + $0x188] sm:$0xff]  ;;  %v11435_v1 = vld [vmem:[#allocation2 + $0x198] sm:$0xff] }
 0x9db   :  { %11598 = vmatprep.subr.bf16.mxu0 %v11454_v2  ;;  %11639 = vmatprep.subr.bf16.mxu1 %v11456_v60  ;;  %v11432_v2 = vld [vmem:[#allocation2 + $0x180] sm:$0xff]  ;;  %v11434_v60 = vld [vmem:[#allocation2 + $0x190] sm:$0xff] }
 0x9dd   :  { %11549 = vmatmul.mubr.bf16.vlgmr.msra.gmra.mrb[76].mxu0 %v21011_v62  ;;  %11590 = vmatmul.mubr.bf16.vlgmr.msra.gmra.mrb[24].mxu1 %v21011_v62 }
 0x9de   :  { %11599 = vmatpush1.bf16.msra.mxu0 %v11453_v63  ;;  %11640 = vmatpush1.bf16.msra.mxu1 %v11455_v6  ;;  %v11443_v63 = vld [vmem:[#allocation2 + $0x1d8] sm:$0xff]  ;;  %v11440_v6 = vld [vmem:[#allocation2 + $0x1c0] sm:$0xff] }
 0x9df   :  { %11600 = vmatprep.subr.bf16.mxu0 %v11462_v7  ;;  %11641 = vmatprep.subr.bf16.mxu1 %v11464_v51  ;;  %v11442_v7 = vld [vmem:[#allocation2 + $0x1d0] sm:$0xff]  ;;  %v11389_v51 = vld [vmem:[#allocation2 + $0x28] sm:$0xff] }
 0x9e0   :  { %11630 = vmatprep.mubr.bf16.mxu0 %v18018_v25  ;;  %11671 = vmatprep.mubr.bf16.mxu1 %v18018_v25 }
 0x9e2   :  { %11601 = vmatpush1.bf16.msra.mxu0 %v11461_v0  ;;  %11642 = vmatpush1.bf16.msra.mxu1 %v11463_v13  ;;  %v11391_v0 = vld [vmem:[#allocation2 + $0x38] sm:$0xff]  ;;  %v11388_v13 = vld [vmem:[#allocation2 + $0x20] sm:$0xff] }
 0x9e3   :  { %11602 = vmatprep.subr.bf16.mxu0 %v11470_v26  ;;  %11643 = vmatprep.subr.bf16.mxu1 %v11472_v40  ;;  %v11390_v26 = vld [vmem:[#allocation2 + $0x30] sm:$0xff]  ;;  %v11397_v40 = vld [vmem:[#allocation2 + $0x68] sm:$0xff] }
 0x9e6   :  { %11603 = vmatpush1.bf16.msra.mxu0 %v11469_v54  ;;  %11644 = vmatpush1.bf16.msra.mxu1 %v11471_v4  ;;  %v11399_v54 = vld [vmem:[#allocation2 + $0x78] sm:$0xff]  ;;  %v11396_v4 = vld [vmem:[#allocation2 + $0x60] sm:$0xff] }
 0x9e7   :  { %11604 = vmatprep.subr.bf16.mxu0 %v11478_v14  ;;  %11645 = vmatprep.subr.bf16.mxu1 %v11480_v8  ;;  %v11398_v14 = vld [vmem:[#allocation2 + $0x70] sm:$0xff]  ;;  %v11405_v8 = vld [vmem:[#allocation2 + $0xa8] sm:$0xff] }
 0x9ea   :  { %11605 = vmatpush1.bf16.msra.mxu0 %v11477_v9  ;;  %11646 = vmatpush1.bf16.msra.mxu1 %v11479_v10  ;;  %v11407_v9 = vld [vmem:[#allocation2 + $0xb8] sm:$0xff]  ;;  %v11404_v10 = vld [vmem:[#allocation2 + $0xa0] sm:$0xff] }
 0x9eb   :  { %11606 = vmatprep.subr.bf16.mxu0 %v11486_v11  ;;  %11647 = vmatprep.subr.bf16.mxu1 %v11488_v12  ;;  %v11406_v11 = vld [vmem:[#allocation2 + $0xb0] sm:$0xff]  ;;  %v11413_v12 = vld [vmem:[#allocation2 + $0xe8] sm:$0xff] }
 0x9ee   :  { %11607 = vmatpush1.bf16.msra.mxu0 %v11485_v15  ;;  %11648 = vmatpush1.bf16.msra.mxu1 %v11487_v35  ;;  %v11415_v15 = vld [vmem:[#allocation2 + $0xf8] sm:$0xff]  ;;  %v11412_v35 = vld [vmem:[#allocation2 + $0xe0] sm:$0xff] }
 0x9ef   :  { %11608 = vmatprep.subr.bf16.mxu0 %v11494_v16  ;;  %11649 = vmatprep.subr.bf16.mxu1 %v11496_v17  ;;  %v11414_v16 = vld [vmem:[#allocation2 + $0xf0] sm:$0xff]  ;;  %v11421_v17 = vld [vmem:[#allocation2 + $0x128] sm:$0xff] }
 0x9f2   :  { %11609 = vmatpush1.bf16.msra.mxu0 %v11493_v18  ;;  %11650 = vmatpush1.bf16.msra.mxu1 %v11495_v19  ;;  %v11423_v18 = vld [vmem:[#allocation2 + $0x138] sm:$0xff]  ;;  %v11420_v19 = vld [vmem:[#allocation2 + $0x120] sm:$0xff] }
 0x9f3   :  { %11610 = vmatprep.subr.bf16.mxu0 %v11502_v20  ;;  %11651 = vmatprep.subr.bf16.mxu1 %v11504_v21  ;;  %v11422_v20 = vld [vmem:[#allocation2 + $0x130] sm:$0xff]  ;;  %v11429_v21 = vld [vmem:[#allocation2 + $0x168] sm:$0xff] }
 0x9f6   :  { %11611 = vmatpush1.bf16.msra.mxu0 %v11501_v27  ;;  %11652 = vmatpush1.bf16.msra.mxu1 %v11503_v28  ;;  %v11431_v27 = vld [vmem:[#allocation2 + $0x178] sm:$0xff]  ;;  %v11428_v28 = vld [vmem:[#allocation2 + $0x160] sm:$0xff] }
 0x9f7   :  { %11612 = vmatprep.subr.bf16.mxu0 %v11510_v29  ;;  %11653 = vmatprep.subr.bf16.mxu1 %v11512_v30  ;;  %v11430_v29 = vld [vmem:[#allocation2 + $0x170] sm:$0xff]  ;;  %v11437_v30 = vld [vmem:[#allocation2 + $0x1a8] sm:$0xff] }
 0x9fa   :  { %11613 = vmatpush1.bf16.msra.mxu0 %v11509_v31  ;;  %11654 = vmatpush1.bf16.msra.mxu1 %v11511_v32  ;;  %v11439_v31 = vld [vmem:[#allocation2 + $0x1b8] sm:$0xff]  ;;  %v11436_v32 = vld [vmem:[#allocation2 + $0x1a0] sm:$0xff] }
 0x9fb   :  { %11680 = vmatprep.subr.bf16.mxu0 %v11385_v33  ;;  %11721 = vmatprep.subr.bf16.mxu1 %v11387_v34  ;;  %v11438_v33 = vld [vmem:[#allocation2 + $0x1b0] sm:$0xff]  ;;  %v11445_v34 = vld [vmem:[#allocation2 + $0x1e8] sm:$0xff] }
 0x9fd   :  { %11631 = vmatmul.mubr.bf16.vlgmr.msra.gmra.mrb[80].mxu0 %v21011_v62  ;;  %11672 = vmatmul.mubr.bf16.vlgmr.msra.gmra.mrb[28].mxu1 %v21011_v62  ;;  %v11441_v62 = vld [vmem:[#allocation2 + $0x1c8] sm:$0xff] }
 0x9fe   :  { %11681 = vmatpush1.bf16.msra.mxu0 %v11384_v36  ;;  %11722 = vmatpush1.bf16.msra.mxu1 %v11386_v37  ;;  %v11447_v36 = vld [vmem:[#allocation2 + $0x1f8] sm:$0xff]  ;;  %v11444_v37 = vld [vmem:[#allocation2 + $0x1e0] sm:$0xff] }
 0x9ff   :  { %11682 = vmatprep.subr.bf16.mxu0 %v11393_v38  ;;  %11723 = vmatprep.subr.bf16.mxu1 %v11395_v39  ;;  %v11446_v38 = vld [vmem:[#allocation2 + $0x1f0] sm:$0xff]  ;;  %v11846_v39 = vld [vmem:[#allocation2 + $0x408] sm:$0xff] }
 0xa00   :  { %11712 = vmatprep.mubr.bf16.mxu0 %v18018_v25  ;;  %11753 = vmatprep.mubr.bf16.mxu1 %v18018_v25 }
 0xa02   :  { %11683 = vmatpush1.bf16.msra.mxu0 %v11392_v41  ;;  %11724 = vmatpush1.bf16.msra.mxu1 %v11394_v42  ;;  %v11848_v41 = vld [vmem:[#allocation2 + $0x418] sm:$0xff]  ;;  %v11845_v42 = vld [vmem:[#allocation2 + $0x400] sm:$0xff] }
 0xa03   :  { %11684 = vmatprep.subr.bf16.mxu0 %v11401_v43  ;;  %11725 = vmatprep.subr.bf16.mxu1 %v11403_v44  ;;  %v11847_v43 = vld [vmem:[#allocation2 + $0x410] sm:$0xff]  ;;  %v11854_v44 = vld [vmem:[#allocation2 + $0x448] sm:$0xff] }
 0xa06   :  { %11685 = vmatpush1.bf16.msra.mxu0 %v11400_v45  ;;  %11726 = vmatpush1.bf16.msra.mxu1 %v11402_v46  ;;  %v11856_v45 = vld [vmem:[#allocation2 + $0x458] sm:$0xff]  ;;  %v11853_v46 = vld [vmem:[#allocation2 + $0x440] sm:$0xff] }
 0xa07   :  { %11686 = vmatprep.subr.bf16.mxu0 %v11409_v47  ;;  %11727 = vmatprep.subr.bf16.mxu1 %v11411_v48  ;;  %v11855_v47 = vld [vmem:[#allocation2 + $0x450] sm:$0xff]  ;;  %v11862_v48 = vld [vmem:[#allocation2 + $0x488] sm:$0xff] }
 0xa0a   :  { %11687 = vmatpush1.bf16.msra.mxu0 %v11408_v49  ;;  %11728 = vmatpush1.bf16.msra.mxu1 %v11410_v50  ;;  %v11864_v49 = vld [vmem:[#allocation2 + $0x498] sm:$0xff]  ;;  %v11861_v50 = vld [vmem:[#allocation2 + $0x480] sm:$0xff] }
 0xa0b   :  { %11688 = vmatprep.subr.bf16.mxu0 %v11417_v52  ;;  %11729 = vmatprep.subr.bf16.mxu1 %v11419_v53  ;;  %v11863_v52 = vld [vmem:[#allocation2 + $0x490] sm:$0xff]  ;;  %v11870_v53 = vld [vmem:[#allocation2 + $0x4c8] sm:$0xff] }
 0xa0e   :  { %11689 = vmatpush1.bf16.msra.mxu0 %v11416_v55  ;;  %11730 = vmatpush1.bf16.msra.mxu1 %v11418_v56  ;;  %v11872_v55 = vld [vmem:[#allocation2 + $0x4d8] sm:$0xff]  ;;  %v11869_v56 = vld [vmem:[#allocation2 + $0x4c0] sm:$0xff] }
 0xa0f   :  { %11690 = vmatprep.subr.bf16.mxu0 %v11425_v57  ;;  %11731 = vmatprep.subr.bf16.mxu1 %v11427_v58  ;;  %v11871_v57 = vld [vmem:[#allocation2 + $0x4d0] sm:$0xff]  ;;  %v11878_v58 = vld [vmem:[#allocation2 + $0x508] sm:$0xff] }
 0xa12   :  { %11691 = vmatpush1.bf16.msra.mxu0 %v11424_v59  ;;  %11732 = vmatpush1.bf16.msra.mxu1 %v11426_v3  ;;  %v11880_v59 = vld [vmem:[#allocation2 + $0x518] sm:$0xff]  ;;  %v11877_v3 = vld [vmem:[#allocation2 + $0x500] sm:$0xff] }
 0xa13   :  { %11692 = vmatprep.subr.bf16.mxu0 %v11433_v61  ;;  %11733 = vmatprep.subr.bf16.mxu1 %v11435_v1  ;;  %v11879_v61 = vld [vmem:[#allocation2 + $0x510] sm:$0xff]  ;;  %v11886_v1 = vld [vmem:[#allocation2 + $0x548] sm:$0xff] }
 0xa16   :  { %11693 = vmatpush1.bf16.msra.mxu0 %v11432_v2  ;;  %11734 = vmatpush1.bf16.msra.mxu1 %v11434_v60  ;;  %v11888_v2 = vld [vmem:[#allocation2 + $0x558] sm:$0xff]  ;;  %v11885_v60 = vld [vmem:[#allocation2 + $0x540] sm:$0xff] }
 0xa17   :  { %11694 = vmatprep.subr.bf16.mxu0 %v11441_v62  ;;  %11735 = vmatprep.subr.bf16.mxu1 %v11443_v63  ;;  %v11887_v62 = vld [vmem:[#allocation2 + $0x550] sm:$0xff]  ;;  %v11894_v63 = vld [vmem:[#allocation2 + $0x588] sm:$0xff] }
 0xa1a   :  { %11695 = vmatpush1.bf16.msra.mxu0 %v11440_v6  ;;  %11736 = vmatpush1.bf16.msra.mxu1 %v11442_v7  ;;  %v11896_v6 = vld [vmem:[#allocation2 + $0x598] sm:$0xff]  ;;  %v11893_v7 = vld [vmem:[#allocation2 + $0x580] sm:$0xff] }
 0xa1b   :  { %11762 = vmatprep.subr.bf16.mxu0 %v11389_v51  ;;  %11803 = vmatprep.subr.bf16.mxu1 %v11391_v0  ;;  %v11895_v51 = vld [vmem:[#allocation2 + $0x590] sm:$0xff]  ;;  %v11902_v0 = vld [vmem:[#allocation2 + $0x5c8] sm:$0xff] }
 0xa1d   :  { %11713 = vmatmul.mubr.bf16.vlgmr.msra.gmra.mrb[84].mxu0 %v21008_v5  ;;  %11754 = vmatmul.mubr.bf16.vlgmr.msra.gmra.mrb[32].mxu1 %v21008_v5 }
 0xa1e   :  { %11763 = vmatpush1.bf16.msra.mxu0 %v11388_v13  ;;  %11804 = vmatpush1.bf16.msra.mxu1 %v11390_v26  ;;  %v11904_v13 = vld [vmem:[#allocation2 + $0x5d8] sm:$0xff]  ;;  %v11901_v26 = vld [vmem:[#allocation2 + $0x5c0] sm:$0xff] }
 0xa1f   :  { %11764 = vmatprep.subr.bf16.mxu0 %v11397_v40  ;;  %11805 = vmatprep.subr.bf16.mxu1 %v11399_v54  ;;  %v11903_v40 = vld [vmem:[#allocation2 + $0x5d0] sm:$0xff]  ;;  %v11850_v54 = vld [vmem:[#allocation2 + $0x428] sm:$0xff] }
 0xa20   :  { %11794 = vmatprep.mubr.bf16.mxu0 %v18018_v25  ;;  %11835 = vmatprep.mubr.bf16.mxu1 %v18018_v25 }
 0xa22   :  { %11765 = vmatpush1.bf16.msra.mxu0 %v11396_v4  ;;  %11806 = vmatpush1.bf16.msra.mxu1 %v11398_v14  ;;  %v11852_v4 = vld [vmem:[#allocation2 + $0x438] sm:$0xff]  ;;  %v21030_v14 = vrot.slane %v21008_v5, 2 }
 0xa23   :  { %11766 = vmatprep.subr.bf16.mxu0 %v11405_v8  ;;  %11807 = vmatprep.subr.bf16.mxu1 %v11407_v9  ;;  %v11849_v8 = vld [vmem:[#allocation2 + $0x420] sm:$0xff]  ;;  %v11851_v9 = vld [vmem:[#allocation2 + $0x430] sm:$0xff] }
 0xa26   :  { %11767 = vmatpush1.bf16.msra.mxu0 %v11404_v10  ;;  %11808 = vmatpush1.bf16.msra.mxu1 %v11406_v11  ;;  %v11858_v10 = vld [vmem:[#allocation2 + $0x468] sm:$0xff]  ;;  %v11860_v11 = vld [vmem:[#allocation2 + $0x478] sm:$0xff] }
 0xa27   :  { %11768 = vmatprep.subr.bf16.mxu0 %v11413_v12  ;;  %11809 = vmatprep.subr.bf16.mxu1 %v11415_v15  ;;  %v11857_v12 = vld [vmem:[#allocation2 + $0x460] sm:$0xff]  ;;  %v11859_v15 = vld [vmem:[#allocation2 + $0x470] sm:$0xff] }
 0xa2a   :  { %11769 = vmatpush1.bf16.msra.mxu0 %v11412_v35  ;;  %11810 = vmatpush1.bf16.msra.mxu1 %v11414_v16  ;;  %v11866_v35 = vld [vmem:[#allocation2 + $0x4a8] sm:$0xff]  ;;  %v11868_v16 = vld [vmem:[#allocation2 + $0x4b8] sm:$0xff] }
 0xa2b   :  { %11770 = vmatprep.subr.bf16.mxu0 %v11421_v17  ;;  %11811 = vmatprep.subr.bf16.mxu1 %v11423_v18  ;;  %v11865_v17 = vld [vmem:[#allocation2 + $0x4a0] sm:$0xff]  ;;  %v11867_v18 = vld [vmem:[#allocation2 + $0x4b0] sm:$0xff] }
 0xa2e   :  { %11771 = vmatpush1.bf16.msra.mxu0 %v11420_v19  ;;  %11812 = vmatpush1.bf16.msra.mxu1 %v11422_v20  ;;  %v11874_v19 = vld [vmem:[#allocation2 + $0x4e8] sm:$0xff]  ;;  %v11876_v20 = vld [vmem:[#allocation2 + $0x4f8] sm:$0xff] }
 0xa2f   :  { %11772 = vmatprep.subr.bf16.mxu0 %v11429_v21  ;;  %11813 = vmatprep.subr.bf16.mxu1 %v11431_v27  ;;  %v11873_v21 = vld [vmem:[#allocation2 + $0x4e0] sm:$0xff]  ;;  %v11875_v27 = vld [vmem:[#allocation2 + $0x4f0] sm:$0xff] }
 0xa32   :  { %11773 = vmatpush1.bf16.msra.mxu0 %v11428_v28  ;;  %11814 = vmatpush1.bf16.msra.mxu1 %v11430_v29  ;;  %v11882_v28 = vld [vmem:[#allocation2 + $0x528] sm:$0xff]  ;;  %v11884_v29 = vld [vmem:[#allocation2 + $0x538] sm:$0xff] }
 0xa33   :  { %11774 = vmatprep.subr.bf16.mxu0 %v11437_v30  ;;  %11815 = vmatprep.subr.bf16.mxu1 %v11439_v31  ;;  %v11881_v30 = vld [vmem:[#allocation2 + $0x520] sm:$0xff]  ;;  %v11883_v31 = vld [vmem:[#allocation2 + $0x530] sm:$0xff] }
 0xa36   :  { %11775 = vmatpush1.bf16.msra.mxu0 %v11436_v32  ;;  %11816 = vmatpush1.bf16.msra.mxu1 %v11438_v33  ;;  %v11890_v32 = vld [vmem:[#allocation2 + $0x568] sm:$0xff]  ;;  %v11892_v33 = vld [vmem:[#allocation2 + $0x578] sm:$0xff] }
 0xa37   :  { %11776 = vmatprep.subr.bf16.mxu0 %v11445_v34  ;;  %11817 = vmatprep.subr.bf16.mxu1 %v11447_v36  ;;  %v11889_v34 = vld [vmem:[#allocation2 + $0x560] sm:$0xff]  ;;  %v11891_v36 = vld [vmem:[#allocation2 + $0x570] sm:$0xff] }
 0xa3a   :  { %11777 = vmatpush1.bf16.msra.mxu0 %v11444_v37  ;;  %11818 = vmatpush1.bf16.msra.mxu1 %v11446_v38  ;;  %v11898_v37 = vld [vmem:[#allocation2 + $0x5a8] sm:$0xff]  ;;  %v11900_v38 = vld [vmem:[#allocation2 + $0x5b8] sm:$0xff] }
 0xa3b   :  { %11911 = vmatprep.subr.bf16.mxu0 %v11846_v39  ;;  %11952 = vmatprep.subr.bf16.mxu1 %v11848_v41  ;;  %v11897_v39 = vld [vmem:[#allocation2 + $0x5a0] sm:$0xff]  ;;  %v11899_v41 = vld [vmem:[#allocation2 + $0x5b0] sm:$0xff] }
 0xa3d   :  { %11795 = vmatmul.mubr.bf16.vlgmr.msra.gmra.mrb[88].mxu0 %v21008_v5  ;;  %11836 = vmatmul.mubr.bf16.vlgmr.msra.gmra.mrb[36].mxu1 %v21008_v5 }
 0xa3e   :  { %11912 = vmatpush1.bf16.msra.mxu0 %v11845_v42  ;;  %11953 = vmatpush1.bf16.msra.mxu1 %v11847_v43  ;;  %v11906_v42 = vld [vmem:[#allocation2 + $0x5e8] sm:$0xff]  ;;  %v11908_v43 = vld [vmem:[#allocation2 + $0x5f8] sm:$0xff] }
 0xa3f   :  { %11913 = vmatprep.subr.bf16.mxu0 %v11854_v44  ;;  %11954 = vmatprep.subr.bf16.mxu1 %v11856_v45  ;;  %v11905_v44 = vld [vmem:[#allocation2 + $0x5e0] sm:$0xff]  ;;  %v11907_v45 = vld [vmem:[#allocation2 + $0x5f0] sm:$0xff] }
 0xa40   :  { %11943 = vmatprep.mubr.bf16.mxu0 %v18018_v25  ;;  %11984 = vmatprep.mubr.bf16.mxu1 %v18018_v25 }
 0xa42   :  { %11914 = vmatpush1.bf16.msra.mxu0 %v11853_v46  ;;  %11955 = vmatpush1.bf16.msra.mxu1 %v11855_v47  ;;  %v12085_v46 = vld [vmem:[#allocation2 + $0x608] sm:$0xff]  ;;  %v12087_v47 = vld [vmem:[#allocation2 + $0x618] sm:$0xff] }
 0xa43   :  { %11915 = vmatprep.subr.bf16.mxu0 %v11862_v48  ;;  %11956 = vmatprep.subr.bf16.mxu1 %v11864_v49  ;;  %v12084_v48 = vld [vmem:[#allocation2 + $0x600] sm:$0xff]  ;;  %v12086_v49 = vld [vmem:[#allocation2 + $0x610] sm:$0xff] }
 0xa46   :  { %11916 = vmatpush1.bf16.msra.mxu0 %v11861_v50  ;;  %11957 = vmatpush1.bf16.msra.mxu1 %v11863_v52  ;;  %v12093_v50 = vld [vmem:[#allocation2 + $0x648] sm:$0xff]  ;;  %v12095_v52 = vld [vmem:[#allocation2 + $0x658] sm:$0xff] }
 0xa47   :  { %11917 = vmatprep.subr.bf16.mxu0 %v11870_v53  ;;  %11958 = vmatprep.subr.bf16.mxu1 %v11872_v55  ;;  %v12092_v53 = vld [vmem:[#allocation2 + $0x640] sm:$0xff]  ;;  %v12094_v55 = vld [vmem:[#allocation2 + $0x650] sm:$0xff] }
 0xa4a   :  { %11918 = vmatpush1.bf16.msra.mxu0 %v11869_v56  ;;  %11959 = vmatpush1.bf16.msra.mxu1 %v11871_v57  ;;  %v12101_v56 = vld [vmem:[#allocation2 + $0x688] sm:$0xff]  ;;  %v12103_v57 = vld [vmem:[#allocation2 + $0x698] sm:$0xff] }
 0xa4b   :  { %11919 = vmatprep.subr.bf16.mxu0 %v11878_v58  ;;  %11960 = vmatprep.subr.bf16.mxu1 %v11880_v59  ;;  %v12100_v58 = vld [vmem:[#allocation2 + $0x680] sm:$0xff]  ;;  %v12102_v59 = vld [vmem:[#allocation2 + $0x690] sm:$0xff] }
 0xa4e   :  { %11920 = vmatpush1.bf16.msra.mxu0 %v11877_v3  ;;  %11961 = vmatpush1.bf16.msra.mxu1 %v11879_v61  ;;  %v12109_v3 = vld [vmem:[#allocation2 + $0x6c8] sm:$0xff]  ;;  %v12111_v61 = vld [vmem:[#allocation2 + $0x6d8] sm:$0xff] }
 0xa4f   :  { %11921 = vmatprep.subr.bf16.mxu0 %v11886_v1  ;;  %11962 = vmatprep.subr.bf16.mxu1 %v11888_v2  ;;  %v12108_v1 = vld [vmem:[#allocation2 + $0x6c0] sm:$0xff]  ;;  %v12110_v2 = vld [vmem:[#allocation2 + $0x6d0] sm:$0xff] }
 0xa52   :  { %11922 = vmatpush1.bf16.msra.mxu0 %v11885_v60  ;;  %11963 = vmatpush1.bf16.msra.mxu1 %v11887_v62  ;;  %v12117_v60 = vld [vmem:[#allocation2 + $0x708] sm:$0xff]  ;;  %v12119_v62 = vld [vmem:[#allocation2 + $0x718] sm:$0xff] }
 0xa53   :  { %11923 = vmatprep.subr.bf16.mxu0 %v11894_v63  ;;  %11964 = vmatprep.subr.bf16.mxu1 %v11896_v6  ;;  %v12116_v63 = vld [vmem:[#allocation2 + $0x700] sm:$0xff]  ;;  %v12118_v6 = vld [vmem:[#allocation2 + $0x710] sm:$0xff] }
 0xa56   :  { %11924 = vmatpush1.bf16.msra.mxu0 %v11893_v7  ;;  %11965 = vmatpush1.bf16.msra.mxu1 %v11895_v51  ;;  %v12125_v7 = vld [vmem:[#allocation2 + $0x748] sm:$0xff]  ;;  %v12127_v51 = vld [vmem:[#allocation2 + $0x758] sm:$0xff] }
 0xa57   :  { %11925 = vmatprep.subr.bf16.mxu0 %v11902_v0  ;;  %11966 = vmatprep.subr.bf16.mxu1 %v11904_v13  ;;  %v12124_v0 = vld [vmem:[#allocation2 + $0x740] sm:$0xff]  ;;  %v12126_v13 = vld [vmem:[#allocation2 + $0x750] sm:$0xff] }
 0xa5a   :  { %11926 = vmatpush1.bf16.msra.mxu0 %v11901_v26  ;;  %11967 = vmatpush1.bf16.msra.mxu1 %v11903_v40  ;;  %v12133_v26 = vld [vmem:[#allocation2 + $0x788] sm:$0xff]  ;;  %v12135_v40 = vld [vmem:[#allocation2 + $0x798] sm:$0xff] }
 0xa5b   :  { %11993 = vmatprep.subr.bf16.mxu0 %v11850_v54  ;;  %12034 = vmatprep.subr.bf16.mxu1 %v11852_v4  ;;  %v12132_v54 = vld [vmem:[#allocation2 + $0x780] sm:$0xff]  ;;  %v12134_v4 = vld [vmem:[#allocation2 + $0x790] sm:$0xff] }
 0xa5d   :  { %11944 = vmatmul.mubr.bf16.vlgmr.msra.gmra.mrb[92].mxu0 %v21030_v14  ;;  %11985 = vmatmul.mubr.bf16.vlgmr.msra.gmra.mrb[40].mxu1 %v21030_v14 }
 0xa5e   :  { %11994 = vmatpush1.bf16.msra.mxu0 %v11849_v8  ;;  %12035 = vmatpush1.bf16.msra.mxu1 %v11851_v9  ;;  %v12143_v8 = vld [vmem:[#allocation2 + $0x7d8] sm:$0xff]  ;;  %v12140_v9 = vld [vmem:[#allocation2 + $0x7c0] sm:$0xff] }
 0xa5f   :  { %11995 = vmatprep.subr.bf16.mxu0 %v11858_v10  ;;  %12036 = vmatprep.subr.bf16.mxu1 %v11860_v11  ;;  %v12142_v10 = vld [vmem:[#allocation2 + $0x7d0] sm:$0xff]  ;;  %v12089_v11 = vld [vmem:[#allocation2 + $0x628] sm:$0xff] }
 0xa60   :  { %12025 = vmatprep.mubr.bf16.mxu0 %v18018_v25  ;;  %12066 = vmatprep.mubr.bf16.mxu1 %v18018_v25 }
 0xa62   :  { %11996 = vmatpush1.bf16.msra.mxu0 %v11857_v12  ;;  %12037 = vmatpush1.bf16.msra.mxu1 %v11859_v15  ;;  %v12091_v12 = vld [vmem:[#allocation2 + $0x638] sm:$0xff]  ;;  %v21041_v15 = vrot.slane %v21008_v5, 3  ;;  %v12105_v5 = vld [vmem:[#allocation2 + $0x6a8] sm:$0xff] }
 0xa63   :  { %11997 = vmatprep.subr.bf16.mxu0 %v11866_v35  ;;  %12038 = vmatprep.subr.bf16.mxu1 %v11868_v16  ;;  %v12088_v35 = vld [vmem:[#allocation2 + $0x620] sm:$0xff]  ;;  %v12090_v16 = vld [vmem:[#allocation2 + $0x630] sm:$0xff] }
 0xa66   :  { %11998 = vmatpush1.bf16.msra.mxu0 %v11865_v17  ;;  %12039 = vmatpush1.bf16.msra.mxu1 %v11867_v18  ;;  %v12097_v17 = vld [vmem:[#allocation2 + $0x668] sm:$0xff]  ;;  %v12099_v18 = vld [vmem:[#allocation2 + $0x678] sm:$0xff] }
 0xa67   :  { %11999 = vmatprep.subr.bf16.mxu0 %v11874_v19  ;;  %12040 = vmatprep.subr.bf16.mxu1 %v11876_v20  ;;  %v12096_v19 = vld [vmem:[#allocation2 + $0x660] sm:$0xff]  ;;  %v12098_v20 = vld [vmem:[#allocation2 + $0x670] sm:$0xff] }
 0xa6a   :  { %12000 = vmatpush1.bf16.msra.mxu0 %v11873_v21  ;;  %12041 = vmatpush1.bf16.msra.mxu1 %v11875_v27  ;;  %v12107_v21 = vld [vmem:[#allocation2 + $0x6b8] sm:$0xff]  ;;  %v12104_v27 = vld [vmem:[#allocation2 + $0x6a0] sm:$0xff] }
 0xa6b   :  { %12001 = vmatprep.subr.bf16.mxu0 %v11882_v28  ;;  %12042 = vmatprep.subr.bf16.mxu1 %v11884_v29  ;;  %v12106_v28 = vld [vmem:[#allocation2 + $0x6b0] sm:$0xff]  ;;  %v12113_v29 = vld [vmem:[#allocation2 + $0x6e8] sm:$0xff] }
 0xa6e   :  { %12002 = vmatpush1.bf16.msra.mxu0 %v11881_v30  ;;  %12043 = vmatpush1.bf16.msra.mxu1 %v11883_v31  ;;  %v12115_v30 = vld [vmem:[#allocation2 + $0x6f8] sm:$0xff]  ;;  %v12112_v31 = vld [vmem:[#allocation2 + $0x6e0] sm:$0xff] }
 0xa6f   :  { %12003 = vmatprep.subr.bf16.mxu0 %v11890_v32  ;;  %12044 = vmatprep.subr.bf16.mxu1 %v11892_v33  ;;  %v12114_v32 = vld [vmem:[#allocation2 + $0x6f0] sm:$0xff]  ;;  %v12121_v33 = vld [vmem:[#allocation2 + $0x728] sm:$0xff] }
 0xa72   :  { %12004 = vmatpush1.bf16.msra.mxu0 %v11889_v34  ;;  %12045 = vmatpush1.bf16.msra.mxu1 %v11891_v36  ;;  %v12123_v34 = vld [vmem:[#allocation2 + $0x738] sm:$0xff]  ;;  %v12120_v36 = vld [vmem:[#allocation2 + $0x720] sm:$0xff] }
 0xa73   :  { %12005 = vmatprep.subr.bf16.mxu0 %v11898_v37  ;;  %12046 = vmatprep.subr.bf16.mxu1 %v11900_v38  ;;  %v12122_v37 = vld [vmem:[#allocation2 + $0x730] sm:$0xff]  ;;  %v12129_v38 = vld [vmem:[#allocation2 + $0x768] sm:$0xff] }
 0xa76   :  { %12006 = vmatpush1.bf16.msra.mxu0 %v11897_v39  ;;  %12047 = vmatpush1.bf16.msra.mxu1 %v11899_v41  ;;  %v12131_v39 = vld [vmem:[#allocation2 + $0x778] sm:$0xff]  ;;  %v12128_v41 = vld [vmem:[#allocation2 + $0x760] sm:$0xff] }
 0xa77   :  { %12007 = vmatprep.subr.bf16.mxu0 %v11906_v42  ;;  %12048 = vmatprep.subr.bf16.mxu1 %v11908_v43  ;;  %v12130_v42 = vld [vmem:[#allocation2 + $0x770] sm:$0xff] }
 0xa7a   :  { %12008 = vmatpush1.bf16.msra.mxu0 %v11905_v44  ;;  %12049 = vmatpush1.bf16.msra.mxu1 %v11907_v45  ;;  %v12137_v45 = vld [vmem:[#allocation2 + $0x7a8] sm:$0xff] }
 0xa7b   :  { %12150 = vmatprep.subr.bf16.mxu0 %v12085_v46  ;;  %12191 = vmatprep.subr.bf16.mxu1 %v12087_v47  ;;  %v12139_v46 = vld [vmem:[#allocation2 + $0x7b8] sm:$0xff] }
 0xa7d   :  { %12026 = vmatmul.mubr.bf16.vlgmr.msra.gmra.mrb[96].mxu0 %v21030_v14  ;;  %12067 = vmatmul.mubr.bf16.vlgmr.msra.gmra.mrb[44].mxu1 %v21030_v14  ;;  %v12141_v14 = vld [vmem:[#allocation2 + $0x7c8] sm:$0xff] }
 0xa7e   :  { %12151 = vmatpush1.bf16.msra.mxu0 %v12084_v48  ;;  %12192 = vmatpush1.bf16.msra.mxu1 %v12086_v49 }
 0xa7f   :  { %12152 = vmatprep.subr.bf16.mxu0 %v12093_v50  ;;  %12193 = vmatprep.subr.bf16.mxu1 %v12095_v52 }
 0xa80   :  { %12182 = vmatprep.mubr.bf16.mxu0 %v18018_v25  ;;  %12223 = vmatprep.mubr.bf16.mxu1 %v18018_v25 }
 0xa82   :  { %12153 = vmatpush1.bf16.msra.mxu0 %v12092_v53  ;;  %12194 = vmatpush1.bf16.msra.mxu1 %v12094_v55  ;;  %v12136_v55 = vld [vmem:[#allocation2 + $0x7a0] sm:$0xff] }
 0xa83   :  { %12154 = vmatprep.subr.bf16.mxu0 %v12101_v56  ;;  %12195 = vmatprep.subr.bf16.mxu1 %v12103_v57  ;;  %v12138_v56 = vld [vmem:[#allocation2 + $0x7b0] sm:$0xff]  ;;  %v12145_v57 = vld [vmem:[#allocation2 + $0x7e8] sm:$0xff] }
 0xa86   :  { %12155 = vmatpush1.bf16.msra.mxu0 %v12100_v58  ;;  %12196 = vmatpush1.bf16.msra.mxu1 %v12102_v59  ;;  %v12147_v58 = vld [vmem:[#allocation2 + $0x7f8] sm:$0xff]  ;;  %v12144_v59 = vld [vmem:[#allocation2 + $0x7e0] sm:$0xff] }
 0xa87   :  { %12156 = vmatprep.subr.bf16.mxu0 %v12109_v3  ;;  %12197 = vmatprep.subr.bf16.mxu1 %v12111_v61  ;;  %v12146_v3 = vld [vmem:[#allocation2 + $0x7f0] sm:$0xff]  ;;  %v12325_v61 = vld [vmem:[#allocation2 + $0x808] sm:$0xff] }
 0xa8a   :  { %12157 = vmatpush1.bf16.msra.mxu0 %v12108_v1  ;;  %12198 = vmatpush1.bf16.msra.mxu1 %v12110_v2  ;;  %v12327_v1 = vld [vmem:[#allocation2 + $0x818] sm:$0xff]  ;;  %v12324_v2 = vld [vmem:[#allocation2 + $0x800] sm:$0xff] }
 0xa8b   :  { %12158 = vmatprep.subr.bf16.mxu0 %v12117_v60  ;;  %12199 = vmatprep.subr.bf16.mxu1 %v12119_v62  ;;  %v12326_v60 = vld [vmem:[#allocation2 + $0x810] sm:$0xff]  ;;  %v12333_v62 = vld [vmem:[#allocation2 + $0x848] sm:$0xff] }
 0xa8e   :  { %12159 = vmatpush1.bf16.msra.mxu0 %v12116_v63  ;;  %12200 = vmatpush1.bf16.msra.mxu1 %v12118_v6  ;;  %v12335_v63 = vld [vmem:[#allocation2 + $0x858] sm:$0xff]  ;;  %v12332_v6 = vld [vmem:[#allocation2 + $0x840] sm:$0xff] }
 0xa8f   :  { %12160 = vmatprep.subr.bf16.mxu0 %v12125_v7  ;;  %12201 = vmatprep.subr.bf16.mxu1 %v12127_v51  ;;  %v12334_v7 = vld [vmem:[#allocation2 + $0x850] sm:$0xff]  ;;  %v12341_v51 = vld [vmem:[#allocation2 + $0x888] sm:$0xff] }
 0xa92   :  { %12161 = vmatpush1.bf16.msra.mxu0 %v12124_v0  ;;  %12202 = vmatpush1.bf16.msra.mxu1 %v12126_v13  ;;  %v12343_v0 = vld [vmem:[#allocation2 + $0x898] sm:$0xff]  ;;  %v12340_v13 = vld [vmem:[#allocation2 + $0x880] sm:$0xff] }
 0xa93   :  { %12162 = vmatprep.subr.bf16.mxu0 %v12133_v26  ;;  %12203 = vmatprep.subr.bf16.mxu1 %v12135_v40  ;;  %v12342_v26 = vld [vmem:[#allocation2 + $0x890] sm:$0xff]  ;;  %v12349_v40 = vld [vmem:[#allocation2 + $0x8c8] sm:$0xff] }
 0xa96   :  { %12163 = vmatpush1.bf16.msra.mxu0 %v12132_v54  ;;  %12204 = vmatpush1.bf16.msra.mxu1 %v12134_v4  ;;  %v12351_v54 = vld [vmem:[#allocation2 + $0x8d8] sm:$0xff]  ;;  %v12348_v4 = vld [vmem:[#allocation2 + $0x8c0] sm:$0xff] }
 0xa97   :  { %12164 = vmatprep.subr.bf16.mxu0 %v12141_v14  ;;  %12205 = vmatprep.subr.bf16.mxu1 %v12143_v8  ;;  %v12350_v14 = vld [vmem:[#allocation2 + $0x8d0] sm:$0xff]  ;;  %v12357_v8 = vld [vmem:[#allocation2 + $0x908] sm:$0xff] }
 0xa9a   :  { %12165 = vmatpush1.bf16.msra.mxu0 %v12140_v9  ;;  %12206 = vmatpush1.bf16.msra.mxu1 %v12142_v10  ;;  %v12359_v9 = vld [vmem:[#allocation2 + $0x918] sm:$0xff]  ;;  %v12356_v10 = vld [vmem:[#allocation2 + $0x900] sm:$0xff] }
 0xa9b   :  { %12232 = vmatprep.subr.bf16.mxu0 %v12089_v11  ;;  %12273 = vmatprep.subr.bf16.mxu1 %v12091_v12  ;;  %v12358_v11 = vld [vmem:[#allocation2 + $0x910] sm:$0xff]  ;;  %v12365_v12 = vld [vmem:[#allocation2 + $0x948] sm:$0xff] }
 0xa9d   :  { %12183 = vmatmul.mubr.bf16.vlgmr.msra.gmra.mrb[100].mxu0 %v21041_v15  ;;  %12224 = vmatmul.mubr.bf16.vlgmr.msra.gmra.mrb[48].mxu1 %v21041_v15 }
 0xa9e   :  { %12233 = vmatpush1.bf16.msra.mxu0 %v12088_v35  ;;  %12274 = vmatpush1.bf16.msra.mxu1 %v12090_v16  ;;  %v12364_v35 = vld [vmem:[#allocation2 + $0x940] sm:$0xff]  ;;  %v12366_v16 = vld [vmem:[#allocation2 + $0x950] sm:$0xff] }
 0xa9f   :  { %12234 = vmatprep.subr.bf16.mxu0 %v12097_v17  ;;  %12275 = vmatprep.subr.bf16.mxu1 %v12099_v18 }
 0xaa0   :  { %12264 = vmatprep.mubr.bf16.mxu0 %v18018_v25  ;;  %12305 = vmatprep.mubr.bf16.mxu1 %v18018_v25 }
 0xaa2   :  { %12235 = vmatpush1.bf16.msra.mxu0 %v12096_v19  ;;  %12276 = vmatpush1.bf16.msra.mxu1 %v12098_v20  ;;  %v12373_v19 = vld [vmem:[#allocation2 + $0x988] sm:$0xff]  ;;  %v12375_v20 = vld [vmem:[#allocation2 + $0x998] sm:$0xff] }
 0xaa3   :  { %12236 = vmatprep.subr.bf16.mxu0 %v12105_v5  ;;  %12277 = vmatprep.subr.bf16.mxu1 %v12107_v21 }
 0xaa6   :  { %12237 = vmatpush1.bf16.msra.mxu0 %v12104_v27  ;;  %12278 = vmatpush1.bf16.msra.mxu1 %v12106_v28 }
 0xaa7   :  { %12238 = vmatprep.subr.bf16.mxu0 %v12113_v29  ;;  %12279 = vmatprep.subr.bf16.mxu1 %v12115_v30 }
 0xaaa   :  { %12239 = vmatpush1.bf16.msra.mxu0 %v12112_v31  ;;  %12280 = vmatpush1.bf16.msra.mxu1 %v12114_v32  ;;  %v12372_v31 = vld [vmem:[#allocation2 + $0x980] sm:$0xff]  ;;  %v12374_v32 = vld [vmem:[#allocation2 + $0x990] sm:$0xff] }
 0xaab   :  { %12240 = vmatprep.subr.bf16.mxu0 %v12121_v33  ;;  %12281 = vmatprep.subr.bf16.mxu1 %v12123_v34  ;;  %v12381_v33 = vld [vmem:[#allocation2 + $0x9c8] sm:$0xff]  ;;  %v12383_v34 = vld [vmem:[#allocation2 + $0x9d8] sm:$0xff] }
 0xaae   :  { %12241 = vmatpush1.bf16.msra.mxu0 %v12120_v36  ;;  %12282 = vmatpush1.bf16.msra.mxu1 %v12122_v37  ;;  %v12380_v36 = vld [vmem:[#allocation2 + $0x9c0] sm:$0xff]  ;;  %v12382_v37 = vld [vmem:[#allocation2 + $0x9d0] sm:$0xff] }
 0xaaf   :  { %12242 = vmatprep.subr.bf16.mxu0 %v12129_v38  ;;  %12283 = vmatprep.subr.bf16.mxu1 %v12131_v39  ;;  %v12329_v38 = vld [vmem:[#allocation2 + $0x828] sm:$0xff]  ;;  %v12331_v39 = vld [vmem:[#allocation2 + $0x838] sm:$0xff] }
 0xab0   :  { %v21047_v43 = vpop.f32.mrb[76].mxu0  ;;  %v21049_v44 = vpop.f32.mrb[24].mxu1 }
 0xab1   :  { %v21051_v47 = vpop.f32.mrb[77].mxu0  ;;  %v21053_v48 = vpop.f32.mrb[25].mxu1 }
 0xab2   :  { %v11554_v49 = vpop.f32.mrb[78].mxu0  ;;  %v11595_v50 = vpop.f32.mrb[26].mxu1  ;;  %12243 = vmatpush1.bf16.msra.mxu0 %v12128_v41  ;;  %12284 = vmatpush1.bf16.msra.mxu1 %v12130_v42  ;;  %v21069_v41 = vpack.c.bf16 %v20998_v22, %v20998_v22  ;;  %v12328_v42 = vld [vmem:[#allocation2 + $0x820] sm:$0xff]  ;;  %v12345_v22 = vld [vmem:[#allocation2 + $0x8a8] sm:$0xff] }
 0xab3   :  { %v11555_v52 = vpop.f32.mrb[79].mxu0  ;;  %v11596_v53 = vpop.f32.mrb[27].mxu1  ;;  %12244 = vmatprep.subr.bf16.mxu0 %v12137_v45  ;;  %12285 = vmatprep.subr.bf16.mxu1 %v12139_v46  ;;  %v12330_v45 = vld [vmem:[#allocation2 + $0x830] sm:$0xff]  ;;  %v12337_v46 = vld [vmem:[#allocation2 + $0x868] sm:$0xff]  ;;  %v12339_v49 = vld [vmem:[#allocation2 + $0x878] sm:$0xff] }
 0xab4   :  { %v12336_v50 = vld [vmem:[#allocation2 + $0x860] sm:$0xff]  ;;  %v12338_v52 = vld [vmem:[#allocation2 + $0x870] sm:$0xff]  ;;  %v12347_v53 = vld [vmem:[#allocation2 + $0x8b8] sm:$0xff] }
 0xab6   :  { %12245 = vmatpush1.bf16.msra.mxu0 %v12136_v55  ;;  %12286 = vmatpush1.bf16.msra.mxu1 %v12138_v56  ;;  %v12344_v55 = vld [vmem:[#allocation2 + $0x8a0] sm:$0xff]  ;;  %v12346_v56 = vld [vmem:[#allocation2 + $0x8b0] sm:$0xff] }
 0xab7   :  { %12246 = vmatprep.subr.bf16.mxu0 %v12145_v57  ;;  %12287 = vmatprep.subr.bf16.mxu1 %v12147_v58  ;;  %v12353_v57 = vld [vmem:[#allocation2 + $0x8e8] sm:$0xff]  ;;  %v12355_v58 = vld [vmem:[#allocation2 + $0x8f8] sm:$0xff] }
 0xaba   :  { %12247 = vmatpush1.bf16.msra.mxu0 %v12144_v59  ;;  %12288 = vmatpush1.bf16.msra.mxu1 %v12146_v3  ;;  %v12352_v59 = vld [vmem:[#allocation2 + $0x8e0] sm:$0xff]  ;;  %v12354_v3 = vld [vmem:[#allocation2 + $0x8f0] sm:$0xff] }
 0xabb   :  { %12388 = vmatprep.subr.bf16.mxu0 %v12325_v61  ;;  %12429 = vmatprep.subr.bf16.mxu1 %v12327_v1  ;;  %v12361_v61 = vld [vmem:[#allocation2 + $0x928] sm:$0xff]  ;;  %v12363_v1 = vld [vmem:[#allocation2 + $0x938] sm:$0xff] }
 0xabd   :  { %12265 = vmatmul.mubr.bf16.vlgmr.msra.gmra.mrb[104].mxu0 %v21041_v15  ;;  %12306 = vmatmul.mubr.bf16.vlgmr.msra.gmra.mrb[52].mxu1 %v21041_v15  ;;  %v12367_v15 = vld [vmem:[#allocation2 + $0x958] sm:$0xff] }
 0xabe   :  { %12389 = vmatpush1.bf16.msra.mxu0 %v12324_v2  ;;  %12430 = vmatpush1.bf16.msra.mxu1 %v12326_v60  ;;  %v12360_v2 = vld [vmem:[#allocation2 + $0x920] sm:$0xff]  ;;  %v12362_v60 = vld [vmem:[#allocation2 + $0x930] sm:$0xff] }
 0xabf   :  { %12390 = vmatprep.subr.bf16.mxu0 %v12333_v62  ;;  %12431 = vmatprep.subr.bf16.mxu1 %v12335_v63  ;;  %v12369_v62 = vld [vmem:[#allocation2 + $0x968] sm:$0xff]  ;;  %v12371_v63 = vld [vmem:[#allocation2 + $0x978] sm:$0xff] }
 0xac0   :  { %12420 = vmatprep.mubr.bf16.mxu0 %v18018_v25  ;;  %12461 = vmatprep.mubr.bf16.mxu1 %v18018_v25 }
 0xac2   :  { %12391 = vmatpush1.bf16.msra.mxu0 %v12332_v6  ;;  %12432 = vmatpush1.bf16.msra.mxu1 %v12334_v7  ;;  %v12368_v6 = vld [vmem:[#allocation2 + $0x960] sm:$0xff]  ;;  %v12370_v7 = vld [vmem:[#allocation2 + $0x970] sm:$0xff] }
 0xac3   :  { %12392 = vmatprep.subr.bf16.mxu0 %v12341_v51  ;;  %12433 = vmatprep.subr.bf16.mxu1 %v12343_v0 }
 0xac6   :  { %12393 = vmatpush1.bf16.msra.mxu0 %v12340_v13  ;;  %12434 = vmatpush1.bf16.msra.mxu1 %v12342_v26  ;;  %v12377_v13 = vld [vmem:[#allocation2 + $0x9a8] sm:$0xff]  ;;  %v12379_v26 = vld [vmem:[#allocation2 + $0x9b8] sm:$0xff] }
 0xac7   :  { %12394 = vmatprep.subr.bf16.mxu0 %v12349_v40  ;;  %12435 = vmatprep.subr.bf16.mxu1 %v12351_v54 }
 0xaca   :  { %12395 = vmatpush1.bf16.msra.mxu0 %v12348_v4  ;;  %12436 = vmatpush1.bf16.msra.mxu1 %v12350_v14 }
 0xacb   :  { %12396 = vmatprep.subr.bf16.mxu0 %v12357_v8  ;;  %12437 = vmatprep.subr.bf16.mxu1 %v12359_v9 }
 0xace   :  { %12397 = vmatpush1.bf16.msra.mxu0 %v12356_v10  ;;  %12438 = vmatpush1.bf16.msra.mxu1 %v12358_v11 }
 0xacf   :  { %12398 = vmatprep.subr.bf16.mxu0 %v12365_v12  ;;  %12439 = vmatprep.subr.bf16.mxu1 %v12367_v15 }
 0xad0   :  { %v21059_v17 = vpop.f32.mrb[80].mxu0  ;;  %v21061_v18 = vpop.f32.mrb[28].mxu1 }
 0xad1   :  { %v21063_v5 = vpop.f32.mrb[81].mxu0  ;;  %v21065_v21 = vpop.f32.mrb[29].mxu1 }
 0xad2   :  { %v11636_v27 = vpop.f32.mrb[82].mxu0  ;;  %v11677_v28 = vpop.f32.mrb[30].mxu1  ;;  %12399 = vmatpush1.bf16.msra.mxu0 %v12364_v35  ;;  %12440 = vmatpush1.bf16.msra.mxu1 %v12366_v16  ;;  %v12378_v35 = vld [vmem:[#allocation2 + $0x9b0] sm:$0xff]  ;;  %v12387_v16 = vld [vmem:[#allocation2 + $0x9f8] sm:$0xff] }
 0xad3   :  { %v11637_v29 = vpop.f32.mrb[83].mxu0  ;;  %v11678_v30 = vpop.f32.mrb[31].mxu1  ;;  %12400 = vmatprep.subr.bf16.mxu0 %v12373_v19  ;;  %12441 = vmatprep.subr.bf16.mxu1 %v12375_v20  ;;  %v12386_v19 = vld [vmem:[#allocation2 + $0x9f0] sm:$0xff]  ;;  %v12564_v20 = vld [vmem:[#allocation2 + $0xa18] sm:$0xff]  ;;  %v12561_v27 = vld [vmem:[#allocation2 + $0xa00] sm:$0xff] }
 0xad4   :  { %v12563_v28 = vld [vmem:[#allocation2 + $0xa10] sm:$0xff]  ;;  %v12570_v29 = vld [vmem:[#allocation2 + $0xa48] sm:$0xff]  ;;  %v12572_v30 = vld [vmem:[#allocation2 + $0xa58] sm:$0xff] }
 0xad6   :  { %12401 = vmatpush1.bf16.msra.mxu0 %v12372_v31  ;;  %12442 = vmatpush1.bf16.msra.mxu1 %v12374_v32  ;;  %v12569_v31 = vld [vmem:[#allocation2 + $0xa40] sm:$0xff]  ;;  %v12571_v32 = vld [vmem:[#allocation2 + $0xa50] sm:$0xff] }
 0xad7   :  { %12402 = vmatprep.subr.bf16.mxu0 %v12381_v33  ;;  %12443 = vmatprep.subr.bf16.mxu1 %v12383_v34  ;;  %v12578_v33 = vld [vmem:[#allocation2 + $0xa88] sm:$0xff]  ;;  %v12580_v34 = vld [vmem:[#allocation2 + $0xa98] sm:$0xff] }
 0xada   :  { %12403 = vmatpush1.bf16.msra.mxu0 %v12380_v36  ;;  %12444 = vmatpush1.bf16.msra.mxu1 %v12382_v37  ;;  %v12577_v36 = vld [vmem:[#allocation2 + $0xa80] sm:$0xff]  ;;  %v12579_v37 = vld [vmem:[#allocation2 + $0xa90] sm:$0xff] }
 0xadb   :  { %12470 = vmatprep.subr.bf16.mxu0 %v12329_v38  ;;  %12511 = vmatprep.subr.bf16.mxu1 %v12331_v39  ;;  %v12586_v38 = vld [vmem:[#allocation2 + $0xac8] sm:$0xff]  ;;  %v12588_v39 = vld [vmem:[#allocation2 + $0xad8] sm:$0xff] }
 0xadd   :  { %12421 = vmatmul.mubr.bf16.vlgmr.msra.gmra.mrb[108].mxu0 %v21069_v41  ;;  %12462 = vmatmul.mubr.bf16.vlgmr.msra.gmra.mrb[56].mxu1 %v21069_v41 }
 0xade   :  { %12471 = vmatpush1.bf16.msra.mxu0 %v12328_v42  ;;  %12512 = vmatpush1.bf16.msra.mxu1 %v12330_v45  ;;  %v12585_v42 = vld [vmem:[#allocation2 + $0xac0] sm:$0xff]  ;;  %v12587_v45 = vld [vmem:[#allocation2 + $0xad0] sm:$0xff] }
 0xadf   :  { %12472 = vmatprep.subr.bf16.mxu0 %v12337_v46  ;;  %12513 = vmatprep.subr.bf16.mxu1 %v12339_v49  ;;  %v12594_v46 = vld [vmem:[#allocation2 + $0xb08] sm:$0xff]  ;;  %v12596_v49 = vld [vmem:[#allocation2 + $0xb18] sm:$0xff] }
 0xae0   :  { %12502 = vmatprep.mubr.bf16.mxu0 %v18018_v25  ;;  %12543 = vmatprep.mubr.bf16.mxu1 %v18018_v25 }
 0xae2   :  { %12473 = vmatpush1.bf16.msra.mxu0 %v12336_v50  ;;  %12514 = vmatpush1.bf16.msra.mxu1 %v12338_v52  ;;  %v12593_v50 = vld [vmem:[#allocation2 + $0xb00] sm:$0xff]  ;;  %v12595_v52 = vld [vmem:[#allocation2 + $0xb10] sm:$0xff] }
 0xae3   :  { %12474 = vmatprep.subr.bf16.mxu0 %v12345_v22  ;;  %12515 = vmatprep.subr.bf16.mxu1 %v12347_v53  ;;  %v12602_v22 = vld [vmem:[#allocation2 + $0xb48] sm:$0xff]  ;;  %v12604_v53 = vld [vmem:[#allocation2 + $0xb58] sm:$0xff] }
 0xae6   :  { %12475 = vmatpush1.bf16.msra.mxu0 %v12344_v55  ;;  %12516 = vmatpush1.bf16.msra.mxu1 %v12346_v56  ;;  %v12601_v55 = vld [vmem:[#allocation2 + $0xb40] sm:$0xff]  ;;  %v12603_v56 = vld [vmem:[#allocation2 + $0xb50] sm:$0xff] }
 0xae7   :  { %12476 = vmatprep.subr.bf16.mxu0 %v12353_v57  ;;  %12517 = vmatprep.subr.bf16.mxu1 %v12355_v58 }
 0xaea   :  { %12477 = vmatpush1.bf16.msra.mxu0 %v12352_v59  ;;  %12518 = vmatpush1.bf16.msra.mxu1 %v12354_v3  ;;  %v12610_v59 = vld [vmem:[#allocation2 + $0xb88] sm:$0xff]  ;;  %v12612_v3 = vld [vmem:[#allocation2 + $0xb98] sm:$0xff] }
 0xaeb   :  { %12478 = vmatprep.subr.bf16.mxu0 %v12361_v61  ;;  %12519 = vmatprep.subr.bf16.mxu1 %v12363_v1 }
 0xaee   :  { %12479 = vmatpush1.bf16.msra.mxu0 %v12360_v2  ;;  %12520 = vmatpush1.bf16.msra.mxu1 %v12362_v60 }
 0xaef   :  { %12480 = vmatprep.subr.bf16.mxu0 %v12369_v62  ;;  %12521 = vmatprep.subr.bf16.mxu1 %v12371_v63 }
 0xaf0   :  { %v11714_v51 = vpop.f32.mrb[84].mxu0  ;;  %v11755_v0 = vpop.f32.mrb[32].mxu1 }
 0xaf1   :  { %v21076_v40 = vadd.f32 %v11714_v51, %v21047_v43  ;;  %v21079_v54 = vadd.f32 %v11755_v0, %v21049_v44  ;;  %v11716_v4 = vpop.f32.mrb[85].mxu0  ;;  %v11757_v14 = vpop.f32.mrb[33].mxu1  ;;  %v12376_v43 = vld [vmem:[#allocation2 + $0x9a0] sm:$0xff]  ;;  %v12385_v44 = vld [vmem:[#allocation2 + $0x9e8] sm:$0xff] }
 0xaf2   :  { %v21082_v8 = vadd.f32 %v11716_v4, %v21051_v47  ;;  %v21085_v9 = vadd.f32 %v11757_v14, %v21053_v48  ;;  %v11718_v10 = vpop.f32.mrb[86].mxu0  ;;  %v11759_v11 = vpop.f32.mrb[34].mxu1  ;;  %12481 = vmatpush1.bf16.msra.mxu0 %v12368_v6  ;;  %12522 = vmatpush1.bf16.msra.mxu1 %v12370_v7  ;;  %v12384_v47 = vld [vmem:[#allocation2 + $0x9e0] sm:$0xff]  ;;  %v12562_v48 = vld [vmem:[#allocation2 + $0xa08] sm:$0xff]  ;;  %v12619_v4 = vld [vmem:[#allocation2 + $0xbd0] sm:$0xff] }
 0xaf3   :  { %v11719_v12 = vpop.f32.mrb[87].mxu0  ;;  %v11760_v15 = vpop.f32.mrb[35].mxu1  ;;  %12482 = vmatprep.subr.bf16.mxu0 %v12377_v13  ;;  %12523 = vmatprep.subr.bf16.mxu1 %v12379_v26  ;;  %v12611_v13 = vld [vmem:[#allocation2 + $0xb90] sm:$0xff]  ;;  %v12620_v26 = vld [vmem:[#allocation2 + $0xbd8] sm:$0xff]  ;;  %v21104_v10 = vrot.slane %v21069_v41, 1  ;;  %v12565_v11 = vld [vmem:[#allocation2 + $0xa20] sm:$0xff] }
 0xaf4   :  { %v12568_v14 = vld [vmem:[#allocation2 + $0xa38] sm:$0xff]  ;;  %v12567_v12 = vld [vmem:[#allocation2 + $0xa30] sm:$0xff]  ;;  %v12574_v15 = vld [vmem:[#allocation2 + $0xa68] sm:$0xff] }
 0xaf6   :  { %12483 = vmatpush1.bf16.msra.mxu0 %v12376_v43  ;;  %12524 = vmatpush1.bf16.msra.mxu1 %v12378_v35  ;;  %v12576_v43 = vld [vmem:[#allocation2 + $0xa78] sm:$0xff]  ;;  %v12573_v35 = vld [vmem:[#allocation2 + $0xa60] sm:$0xff] }
 0xaf7   :  { %12484 = vmatprep.subr.bf16.mxu0 %v12385_v44  ;;  %12525 = vmatprep.subr.bf16.mxu1 %v12387_v16  ;;  %v12575_v44 = vld [vmem:[#allocation2 + $0xa70] sm:$0xff]  ;;  %v12582_v16 = vld [vmem:[#allocation2 + $0xaa8] sm:$0xff] }
 0xafa   :  { %12485 = vmatpush1.bf16.msra.mxu0 %v12384_v47  ;;  %12526 = vmatpush1.bf16.msra.mxu1 %v12386_v19  ;;  %v12584_v47 = vld [vmem:[#allocation2 + $0xab8] sm:$0xff]  ;;  %v12581_v19 = vld [vmem:[#allocation2 + $0xaa0] sm:$0xff] }
 0xafb   :  { %12628 = vmatprep.subr.bf16.mxu0 %v12562_v48  ;;  %12669 = vmatprep.subr.bf16.mxu1 %v12564_v20  ;;  %v12583_v48 = vld [vmem:[#allocation2 + $0xab0] sm:$0xff]  ;;  %v12590_v20 = vld [vmem:[#allocation2 + $0xae8] sm:$0xff] }
 0xafd   :  { %12503 = vmatmul.mubr.bf16.vlgmr.msra.gmra.mrb[112].mxu0 %v21069_v41  ;;  %12544 = vmatmul.mubr.bf16.vlgmr.msra.gmra.mrb[60].mxu1 %v21069_v41 }
 0xafe   :  { %12629 = vmatpush1.bf16.msra.mxu0 %v12561_v27  ;;  %12670 = vmatpush1.bf16.msra.mxu1 %v12563_v28  ;;  %v12592_v27 = vld [vmem:[#allocation2 + $0xaf8] sm:$0xff]  ;;  %v12589_v28 = vld [vmem:[#allocation2 + $0xae0] sm:$0xff] }
 0xaff   :  { %12630 = vmatprep.subr.bf16.mxu0 %v12570_v29  ;;  %12671 = vmatprep.subr.bf16.mxu1 %v12572_v30  ;;  %v12591_v29 = vld [vmem:[#allocation2 + $0xaf0] sm:$0xff]  ;;  %v12598_v30 = vld [vmem:[#allocation2 + $0xb28] sm:$0xff] }
 0xb00   :  { %12660 = vmatprep.mubr.bf16.mxu0 %v18018_v25  ;;  %12701 = vmatprep.mubr.bf16.mxu1 %v18018_v25 }
 0xb02   :  { %12631 = vmatpush1.bf16.msra.mxu0 %v12569_v31  ;;  %12672 = vmatpush1.bf16.msra.mxu1 %v12571_v32  ;;  %v12600_v31 = vld [vmem:[#allocation2 + $0xb38] sm:$0xff]  ;;  %v12597_v32 = vld [vmem:[#allocation2 + $0xb20] sm:$0xff] }
 0xb03   :  { %12632 = vmatprep.subr.bf16.mxu0 %v12578_v33  ;;  %12673 = vmatprep.subr.bf16.mxu1 %v12580_v34  ;;  %v12599_v33 = vld [vmem:[#allocation2 + $0xb30] sm:$0xff]  ;;  %v12606_v34 = vld [vmem:[#allocation2 + $0xb68] sm:$0xff] }
 0xb06   :  { %12633 = vmatpush1.bf16.msra.mxu0 %v12577_v36  ;;  %12674 = vmatpush1.bf16.msra.mxu1 %v12579_v37  ;;  %v12608_v36 = vld [vmem:[#allocation2 + $0xb78] sm:$0xff]  ;;  %v12605_v37 = vld [vmem:[#allocation2 + $0xb60] sm:$0xff] }
 0xb07   :  { %12634 = vmatprep.subr.bf16.mxu0 %v12586_v38  ;;  %12675 = vmatprep.subr.bf16.mxu1 %v12588_v39  ;;  %v12607_v38 = vld [vmem:[#allocation2 + $0xb70] sm:$0xff] }
 0xb0a   :  { %12635 = vmatpush1.bf16.msra.mxu0 %v12585_v42  ;;  %12676 = vmatpush1.bf16.msra.mxu1 %v12587_v45  ;;  %v12614_v45 = vld [vmem:[#allocation2 + $0xba8] sm:$0xff] }
 0xb0b   :  { %12636 = vmatprep.subr.bf16.mxu0 %v12594_v46  ;;  %12677 = vmatprep.subr.bf16.mxu1 %v12596_v49  ;;  %v12616_v46 = vld [vmem:[#allocation2 + $0xbb8] sm:$0xff] }
 0xb0e   :  { %12637 = vmatpush1.bf16.msra.mxu0 %v12593_v50  ;;  %12678 = vmatpush1.bf16.msra.mxu1 %v12595_v52 }
 0xb0f   :  { %12638 = vmatprep.subr.bf16.mxu0 %v12602_v22  ;;  %12679 = vmatprep.subr.bf16.mxu1 %v12604_v53 }
 0xb10   :  { %v11796_v57 = vpop.f32.mrb[88].mxu0  ;;  %v11837_v58 = vpop.f32.mrb[36].mxu1 }
 0xb11   :  { %v21092_v61 = vadd.f32 %v11796_v57, %v21059_v17  ;;  %v21095_v1 = vadd.f32 %v11837_v58, %v21061_v18  ;;  %v11798_v2 = vpop.f32.mrb[89].mxu0  ;;  %v11839_v60 = vpop.f32.mrb[37].mxu1  ;;  %v12609_v17 = vld [vmem:[#allocation2 + $0xb80] sm:$0xff]  ;;  %v12618_v18 = vld [vmem:[#allocation2 + $0xbc8] sm:$0xff] }
 0xb12   :  { %v21098_v62 = vadd.f32 %v11798_v2, %v21063_v5  ;;  %v21101_v63 = vadd.f32 %v11839_v60, %v21065_v21  ;;  %v11800_v6 = vpop.f32.mrb[90].mxu0  ;;  %v11841_v7 = vpop.f32.mrb[38].mxu1  ;;  %12639 = vmatpush1.bf16.msra.mxu0 %v12601_v55  ;;  %12680 = vmatpush1.bf16.msra.mxu1 %v12603_v56  ;;  %v12617_v5 = vld [vmem:[#allocation2 + $0xbc0] sm:$0xff]  ;;  %v12566_v21 = vld [vmem:[#allocation2 + $0xa28] sm:$0xff]  ;;  %v12624_v2 = vld [vmem:[#allocation2 + $0xbf8] sm:$0xff] }
 0xb13   :  { %v11801_v51 = vpop.f32.mrb[91].mxu0  ;;  %v11842_v0 = vpop.f32.mrb[39].mxu1  ;;  %12640 = vmatprep.subr.bf16.mxu0 %v12610_v59  ;;  %12681 = vmatprep.subr.bf16.mxu1 %v12612_v3  ;;  %v12615_v3 = vld [vmem:[#allocation2 + $0xbb0] sm:$0xff]  ;;  %v12804_v6 = vld [vmem:[#allocation2 + $0xc18] sm:$0xff]  ;;  %v12801_v7 = vld [vmem:[#allocation2 + $0xc00] sm:$0xff] }
 0xb14   :  { %v12623_v60 = vld [vmem:[#allocation2 + $0xbf0] sm:$0xff]  ;;  %v12810_v0 = vld [vmem:[#allocation2 + $0xc48] sm:$0xff] }
 0xb15   :  { %v12803_v51 = vld [vmem:[#allocation2 + $0xc10] sm:$0xff] }
 0xb16   :  { %12641 = vmatpush1.bf16.msra.mxu0 %v12609_v17  ;;  %12682 = vmatpush1.bf16.msra.mxu1 %v12611_v13  ;;  %v12812_v17 = vld [vmem:[#allocation2 + $0xc58] sm:$0xff]  ;;  %v12809_v13 = vld [vmem:[#allocation2 + $0xc40] sm:$0xff] }
 0xb17   :  { %12642 = vmatprep.subr.bf16.mxu0 %v12618_v18  ;;  %12683 = vmatprep.subr.bf16.mxu1 %v12620_v26  ;;  %v12811_v18 = vld [vmem:[#allocation2 + $0xc50] sm:$0xff]  ;;  %v12818_v26 = vld [vmem:[#allocation2 + $0xc88] sm:$0xff] }
 0xb1a   :  { %12643 = vmatpush1.bf16.msra.mxu0 %v12617_v5  ;;  %12684 = vmatpush1.bf16.msra.mxu1 %v12619_v4  ;;  %v12820_v5 = vld [vmem:[#allocation2 + $0xc98] sm:$0xff]  ;;  %v12817_v4 = vld [vmem:[#allocation2 + $0xc80] sm:$0xff] }
 0xb1b   :  { %12710 = vmatprep.subr.bf16.mxu0 %v12566_v21  ;;  %12751 = vmatprep.subr.bf16.mxu1 %v12568_v14  ;;  %v12819_v21 = vld [vmem:[#allocation2 + $0xc90] sm:$0xff]  ;;  %v12826_v14 = vld [vmem:[#allocation2 + $0xcc8] sm:$0xff] }
 0xb1d   :  { %12661 = vmatmul.mubr.bf16.vlgmr.msra.gmra.mrb[116].mxu0 %v21104_v10  ;;  %12702 = vmatmul.mubr.bf16.vlgmr.msra.gmra.mrb[64].mxu1 %v21104_v10 }
 0xb1e   :  { %12711 = vmatpush1.bf16.msra.mxu0 %v12565_v11  ;;  %12752 = vmatpush1.bf16.msra.mxu1 %v12567_v12  ;;  %v12825_v11 = vld [vmem:[#allocation2 + $0xcc0] sm:$0xff]  ;;  %v12827_v12 = vld [vmem:[#allocation2 + $0xcd0] sm:$0xff] }
 0xb1f   :  { %12712 = vmatprep.subr.bf16.mxu0 %v12574_v15  ;;  %12753 = vmatprep.subr.bf16.mxu1 %v12576_v43  ;;  %v12834_v15 = vld [vmem:[#allocation2 + $0xd08] sm:$0xff]  ;;  %v12836_v43 = vld [vmem:[#allocation2 + $0xd18] sm:$0xff] }
 0xb20   :  { %12742 = vmatprep.mubr.bf16.mxu0 %v18018_v25  ;;  %12783 = vmatprep.mubr.bf16.mxu1 %v18018_v25 }
 0xb22   :  { %12713 = vmatpush1.bf16.msra.mxu0 %v12573_v35  ;;  %12754 = vmatpush1.bf16.msra.mxu1 %v12575_v44  ;;  %v12833_v35 = vld [vmem:[#allocation2 + $0xd00] sm:$0xff]  ;;  %v12835_v44 = vld [vmem:[#allocation2 + $0xd10] sm:$0xff] }
 0xb23   :  { %12714 = vmatprep.subr.bf16.mxu0 %v12582_v16  ;;  %12755 = vmatprep.subr.bf16.mxu1 %v12584_v47  ;;  %v12842_v16 = vld [vmem:[#allocation2 + $0xd48] sm:$0xff]  ;;  %v12844_v47 = vld [vmem:[#allocation2 + $0xd58] sm:$0xff] }
 0xb26   :  { %12715 = vmatpush1.bf16.msra.mxu0 %v12581_v19  ;;  %12756 = vmatpush1.bf16.msra.mxu1 %v12583_v48  ;;  %v12841_v19 = vld [vmem:[#allocation2 + $0xd40] sm:$0xff]  ;;  %v12843_v48 = vld [vmem:[#allocation2 + $0xd50] sm:$0xff] }
 0xb27   :  { %12716 = vmatprep.subr.bf16.mxu0 %v12590_v20  ;;  %12757 = vmatprep.subr.bf16.mxu1 %v12592_v27 }
 0xb2a   :  { %12717 = vmatpush1.bf16.msra.mxu0 %v12589_v28  ;;  %12758 = vmatpush1.bf16.msra.mxu1 %v12591_v29  ;;  %v12850_v28 = vld [vmem:[#allocation2 + $0xd88] sm:$0xff]  ;;  %v12852_v29 = vld [vmem:[#allocation2 + $0xd98] sm:$0xff] }
 0xb2b   :  { %12718 = vmatprep.subr.bf16.mxu0 %v12598_v30  ;;  %12759 = vmatprep.subr.bf16.mxu1 %v12600_v31 }
 0xb2e   :  { %12719 = vmatpush1.bf16.msra.mxu0 %v12597_v32  ;;  %12760 = vmatpush1.bf16.msra.mxu1 %v12599_v33 }
 0xb2f   :  { %12720 = vmatprep.subr.bf16.mxu0 %v12606_v34  ;;  %12761 = vmatprep.subr.bf16.mxu1 %v12608_v36 }
 0xb30   :  { %v11945_v39 = vpop.f32.mrb[92].mxu0  ;;  %v11986_v42 = vpop.f32.mrb[40].mxu1 }
 0xb31   :  { %v21111_v49 = vadd.f32 %v11945_v39, %v21076_v40  ;;  %v21114_v50 = vadd.f32 %v11986_v42, %v21079_v54  ;;  %v11947_v52 = vpop.f32.mrb[93].mxu0  ;;  %v11988_v22 = vpop.f32.mrb[41].mxu1  ;;  %v12613_v40 = vld [vmem:[#allocation2 + $0xba0] sm:$0xff]  ;;  %v12622_v54 = vld [vmem:[#allocation2 + $0xbe8] sm:$0xff] }
 0xb32   :  { %v21117_v53 = vadd.f32 %v11947_v52, %v21082_v8  ;;  %v21120_v55 = vadd.f32 %v11988_v22, %v21085_v9  ;;  %v11949_v56 = vpop.f32.mrb[94].mxu0  ;;  %v11990_v57 = vpop.f32.mrb[42].mxu1  ;;  %12721 = vmatpush1.bf16.msra.mxu0 %v12605_v37  ;;  %12762 = vmatpush1.bf16.msra.mxu1 %v12607_v38  ;;  %v12621_v8 = vld [vmem:[#allocation2 + $0xbe0] sm:$0xff]  ;;  %v12802_v9 = vld [vmem:[#allocation2 + $0xc08] sm:$0xff]  ;;  %v12859_v52 = vld [vmem:[#allocation2 + $0xdd0] sm:$0xff] }
 0xb33   :  { %v11950_v58 = vpop.f32.mrb[95].mxu0  ;;  %v11991_v59 = vpop.f32.mrb[43].mxu1  ;;  %12722 = vmatprep.subr.bf16.mxu0 %v12614_v45  ;;  %12763 = vmatprep.subr.bf16.mxu1 %v12616_v46  ;;  %v12851_v45 = vld [vmem:[#allocation2 + $0xd90] sm:$0xff]  ;;  %v12860_v46 = vld [vmem:[#allocation2 + $0xdd8] sm:$0xff]  ;;  %v21139_v56 = vrot.slane %v21069_v41, 2  ;;  %v12805_v57 = vld [vmem:[#allocation2 + $0xc20] sm:$0xff] }
 0xb34   :  { %v12808_v22 = vld [vmem:[#allocation2 + $0xc38] sm:$0xff]  ;;  %v12807_v58 = vld [vmem:[#allocation2 + $0xc30] sm:$0xff]  ;;  %v12814_v59 = vld [vmem:[#allocation2 + $0xc68] sm:$0xff] }
 0xb36   :  { %12723 = vmatpush1.bf16.msra.mxu0 %v12613_v40  ;;  %12764 = vmatpush1.bf16.msra.mxu1 %v12615_v3  ;;  %v12816_v40 = vld [vmem:[#allocation2 + $0xc78] sm:$0xff]  ;;  %v12813_v3 = vld [vmem:[#allocation2 + $0xc60] sm:$0xff] }
 0xb37   :  { %12724 = vmatprep.subr.bf16.mxu0 %v12622_v54  ;;  %12765 = vmatprep.subr.bf16.mxu1 %v12624_v2  ;;  %v12815_v54 = vld [vmem:[#allocation2 + $0xc70] sm:$0xff]  ;;  %v12822_v2 = vld [vmem:[#allocation2 + $0xca8] sm:$0xff] }
 0xb3a   :  { %12725 = vmatpush1.bf16.msra.mxu0 %v12621_v8  ;;  %12766 = vmatpush1.bf16.msra.mxu1 %v12623_v60  ;;  %v12824_v8 = vld [vmem:[#allocation2 + $0xcb8] sm:$0xff]  ;;  %v12821_v60 = vld [vmem:[#allocation2 + $0xca0] sm:$0xff] }
 0xb3b   :  { %12867 = vmatprep.subr.bf16.mxu0 %v12802_v9  ;;  %12908 = vmatprep.subr.bf16.mxu1 %v12804_v6  ;;  %v12823_v9 = vld [vmem:[#allocation2 + $0xcb0] sm:$0xff]  ;;  %v12830_v6 = vld [vmem:[#allocation2 + $0xce8] sm:$0xff] }
 0xb3d   :  { %12743 = vmatmul.mubr.bf16.vlgmr.msra.gmra.mrb[120].mxu0 %v21104_v10  ;;  %12784 = vmatmul.mubr.bf16.vlgmr.msra.gmra.mrb[68].mxu1 %v21104_v10  ;;  %v12828_v10 = vld [vmem:[#allocation2 + $0xcd8] sm:$0xff] }
 0xb3e   :  { %12868 = vmatpush1.bf16.msra.mxu0 %v12801_v7  ;;  %12909 = vmatpush1.bf16.msra.mxu1 %v12803_v51  ;;  %v12832_v7 = vld [vmem:[#allocation2 + $0xcf8] sm:$0xff]  ;;  %v12829_v51 = vld [vmem:[#allocation2 + $0xce0] sm:$0xff] }
 0xb3f   :  { %12869 = vmatprep.subr.bf16.mxu0 %v12810_v0  ;;  %12910 = vmatprep.subr.bf16.mxu1 %v12812_v17  ;;  %v12831_v0 = vld [vmem:[#allocation2 + $0xcf0] sm:$0xff]  ;;  %v12838_v17 = vld [vmem:[#allocation2 + $0xd28] sm:$0xff] }
 0xb40   :  { %12899 = vmatprep.mubr.bf16.mxu0 %v18018_v25  ;;  %12940 = vmatprep.mubr.bf16.mxu1 %v18018_v25 }
 0xb42   :  { %12870 = vmatpush1.bf16.msra.mxu0 %v12809_v13  ;;  %12911 = vmatpush1.bf16.msra.mxu1 %v12811_v18  ;;  %v12840_v13 = vld [vmem:[#allocation2 + $0xd38] sm:$0xff]  ;;  %v12837_v18 = vld [vmem:[#allocation2 + $0xd20] sm:$0xff] }
 0xb43   :  { %12871 = vmatprep.subr.bf16.mxu0 %v12818_v26  ;;  %12912 = vmatprep.subr.bf16.mxu1 %v12820_v5  ;;  %v12839_v26 = vld [vmem:[#allocation2 + $0xd30] sm:$0xff]  ;;  %v12846_v5 = vld [vmem:[#allocation2 + $0xd68] sm:$0xff] }
 0xb46   :  { %12872 = vmatpush1.bf16.msra.mxu0 %v12817_v4  ;;  %12913 = vmatpush1.bf16.msra.mxu1 %v12819_v21  ;;  %v12848_v4 = vld [vmem:[#allocation2 + $0xd78] sm:$0xff]  ;;  %v12845_v21 = vld [vmem:[#allocation2 + $0xd60] sm:$0xff] }
 0xb47   :  { %12873 = vmatprep.subr.bf16.mxu0 %v12826_v14  ;;  %12914 = vmatprep.subr.bf16.mxu1 %v12828_v10  ;;  %v12847_v14 = vld [vmem:[#allocation2 + $0xd70] sm:$0xff] }
 0xb4a   :  { %12874 = vmatpush1.bf16.msra.mxu0 %v12825_v11  ;;  %12915 = vmatpush1.bf16.msra.mxu1 %v12827_v12  ;;  %v12854_v12 = vld [vmem:[#allocation2 + $0xda8] sm:$0xff] }
 0xb4b   :  { %12875 = vmatprep.subr.bf16.mxu0 %v12834_v15  ;;  %12916 = vmatprep.subr.bf16.mxu1 %v12836_v43  ;;  %v12856_v15 = vld [vmem:[#allocation2 + $0xdb8] sm:$0xff] }
 0xb4e   :  { %12876 = vmatpush1.bf16.msra.mxu0 %v12833_v35  ;;  %12917 = vmatpush1.bf16.msra.mxu1 %v12835_v44 }
 0xb4f   :  { %12877 = vmatprep.subr.bf16.mxu0 %v12842_v16  ;;  %12918 = vmatprep.subr.bf16.mxu1 %v12844_v47 }
 0xb50   :  { %v12027_v20 = vpop.f32.mrb[96].mxu0  ;;  %v12068_v27 = vpop.f32.mrb[44].mxu1 }
 0xb51   :  { %v21127_v30 = vadd.f32 %v12027_v20, %v21092_v61  ;;  %v21130_v31 = vadd.f32 %v12068_v27, %v21095_v1  ;;  %v12029_v32 = vpop.f32.mrb[97].mxu0  ;;  %v12070_v33 = vpop.f32.mrb[45].mxu1  ;;  %v12849_v61 = vld [vmem:[#allocation2 + $0xd80] sm:$0xff]  ;;  %v12858_v1 = vld [vmem:[#allocation2 + $0xdc8] sm:$0xff] }
 0xb52   :  { %v21133_v34 = vadd.f32 %v12029_v32, %v21098_v62  ;;  %v21136_v36 = vadd.f32 %v12070_v33, %v21101_v63  ;;  %v12031_v37 = vpop.f32.mrb[98].mxu0  ;;  %v12072_v38 = vpop.f32.mrb[46].mxu1  ;;  %12878 = vmatpush1.bf16.msra.mxu0 %v12841_v19  ;;  %12919 = vmatpush1.bf16.msra.mxu1 %v12843_v48  ;;  %v12857_v62 = vld [vmem:[#allocation2 + $0xdc0] sm:$0xff]  ;;  %v12806_v63 = vld [vmem:[#allocation2 + $0xc28] sm:$0xff]  ;;  %v12864_v32 = vld [vmem:[#allocation2 + $0xdf8] sm:$0xff] }
 0xb53   :  { %v12032_v39 = vpop.f32.mrb[99].mxu0  ;;  %v12073_v42 = vpop.f32.mrb[47].mxu1  ;;  %12879 = vmatprep.subr.bf16.mxu0 %v12850_v28  ;;  %12920 = vmatprep.subr.bf16.mxu1 %v12852_v29  ;;  %v12855_v29 = vld [vmem:[#allocation2 + $0xdb0] sm:$0xff]  ;;  %v13043_v37 = vld [vmem:[#allocation2 + $0xe18] sm:$0xff]  ;;  %v13040_v38 = vld [vmem:[#allocation2 + $0xe00] sm:$0xff] }
 0xb54   :  { %v12863_v33 = vld [vmem:[#allocation2 + $0xdf0] sm:$0xff]  ;;  %v13049_v42 = vld [vmem:[#allocation2 + $0xe48] sm:$0xff] }
 0xb55   :  { %v13042_v39 = vld [vmem:[#allocation2 + $0xe10] sm:$0xff] }
 0xb56   :  { %12880 = vmatpush1.bf16.msra.mxu0 %v12849_v61  ;;  %12921 = vmatpush1.bf16.msra.mxu1 %v12851_v45  ;;  %v13051_v61 = vld [vmem:[#allocation2 + $0xe58] sm:$0xff]  ;;  %v13048_v45 = vld [vmem:[#allocation2 + $0xe40] sm:$0xff] }
 0xb57   :  { %12881 = vmatprep.subr.bf16.mxu0 %v12858_v1  ;;  %12922 = vmatprep.subr.bf16.mxu1 %v12860_v46  ;;  %v13050_v1 = vld [vmem:[#allocation2 + $0xe50] sm:$0xff]  ;;  %v13057_v46 = vld [vmem:[#allocation2 + $0xe88] sm:$0xff] }
 0xb5a   :  { %12882 = vmatpush1.bf16.msra.mxu0 %v12857_v62  ;;  %12923 = vmatpush1.bf16.msra.mxu1 %v12859_v52  ;;  %v13059_v62 = vld [vmem:[#allocation2 + $0xe98] sm:$0xff]  ;;  %v13056_v52 = vld [vmem:[#allocation2 + $0xe80] sm:$0xff] }
 0xb5b   :  { %12949 = vmatprep.subr.bf16.mxu0 %v12806_v63  ;;  %12990 = vmatprep.subr.bf16.mxu1 %v12808_v22  ;;  %v13058_v63 = vld [vmem:[#allocation2 + $0xe90] sm:$0xff]  ;;  %v13065_v22 = vld [vmem:[#allocation2 + $0xec8] sm:$0xff] }
 0xb5d   :  { %12900 = vmatmul.mubr.bf16.vlgmr.msra.gmra.mrb[124].mxu0 %v21139_v56  ;;  %12941 = vmatmul.mubr.bf16.vlgmr.msra.gmra.mrb[72].mxu1 %v21139_v56 }
 0xb5e   :  { %12950 = vmatpush1.bf16.msra.mxu0 %v12805_v57  ;;  %12991 = vmatpush1.bf16.msra.mxu1 %v12807_v58  ;;  %v13064_v57 = vld [vmem:[#allocation2 + $0xec0] sm:$0xff]  ;;  %v13066_v58 = vld [vmem:[#allocation2 + $0xed0] sm:$0xff] }
 0xb5f   :  { %12951 = vmatprep.subr.bf16.mxu0 %v12814_v59  ;;  %12992 = vmatprep.subr.bf16.mxu1 %v12816_v40  ;;  %v13073_v59 = vld [vmem:[#allocation2 + $0xf08] sm:$0xff]  ;;  %v13075_v40 = vld [vmem:[#allocation2 + $0xf18] sm:$0xff] }
 0xb60   :  { %12981 = vmatprep.mubr.bf16.mxu0 %v18018_v25  ;;  %13022 = vmatprep.mubr.bf16.mxu1 %v18018_v25 }
 0xb62   :  { %12952 = vmatpush1.bf16.msra.mxu0 %v12813_v3  ;;  %12993 = vmatpush1.bf16.msra.mxu1 %v12815_v54  ;;  %v13072_v3 = vld [vmem:[#allocation2 + $0xf00] sm:$0xff]  ;;  %v13074_v54 = vld [vmem:[#allocation2 + $0xf10] sm:$0xff] }
 0xb63   :  { %12953 = vmatprep.subr.bf16.mxu0 %v12822_v2  ;;  %12994 = vmatprep.subr.bf16.mxu1 %v12824_v8  ;;  %v13081_v2 = vld [vmem:[#allocation2 + $0xf48] sm:$0xff]  ;;  %v13083_v8 = vld [vmem:[#allocation2 + $0xf58] sm:$0xff] }
 0xb66   :  { %12954 = vmatpush1.bf16.msra.mxu0 %v12821_v60  ;;  %12995 = vmatpush1.bf16.msra.mxu1 %v12823_v9  ;;  %v13080_v60 = vld [vmem:[#allocation2 + $0xf40] sm:$0xff]  ;;  %v13082_v9 = vld [vmem:[#allocation2 + $0xf50] sm:$0xff] }
 0xb67   :  { %12955 = vmatprep.subr.bf16.mxu0 %v12830_v6  ;;  %12996 = vmatprep.subr.bf16.mxu1 %v12832_v7 }
 0xb6a   :  { %12956 = vmatpush1.bf16.msra.mxu0 %v12829_v51  ;;  %12997 = vmatpush1.bf16.msra.mxu1 %v12831_v0  ;;  %v13089_v51 = vld [vmem:[#allocation2 + $0xf88] sm:$0xff]  ;;  %v13091_v0 = vld [vmem:[#allocation2 + $0xf98] sm:$0xff] }
 0xb6b   :  { %12957 = vmatprep.subr.bf16.mxu0 %v12838_v17  ;;  %12998 = vmatprep.subr.bf16.mxu1 %v12840_v13 }
 0xb6e   :  { %12958 = vmatpush1.bf16.msra.mxu0 %v12837_v18  ;;  %12999 = vmatpush1.bf16.msra.mxu1 %v12839_v26 }
 0xb6f   :  { %12959 = vmatprep.subr.bf16.mxu0 %v12846_v5  ;;  %13000 = vmatprep.subr.bf16.mxu1 %v12848_v4 }
 0xb70   :  { %v12184_v10 = vpop.f32.mrb[100].mxu0  ;;  %v12225_v11 = vpop.f32.mrb[48].mxu1 }
 0xb71   :  { %v21146_v43 = vadd.f32 %v12184_v10, %v21111_v49  ;;  %v21149_v35 = vadd.f32 %v12225_v11, %v21114_v50  ;;  %v12186_v44 = vpop.f32.mrb[101].mxu0  ;;  %v12227_v16 = vpop.f32.mrb[49].mxu1  ;;  %v12853_v49 = vld [vmem:[#allocation2 + $0xda0] sm:$0xff]  ;;  %v12862_v50 = vld [vmem:[#allocation2 + $0xde8] sm:$0xff] }
 0xb72   :  { %v21152_v47 = vadd.f32 %v12186_v44, %v21117_v53  ;;  %v21155_v19 = vadd.f32 %v12227_v16, %v21120_v55  ;;  %v12188_v48 = vpop.f32.mrb[102].mxu0  ;;  %v12229_v20 = vpop.f32.mrb[50].mxu1  ;;  %12960 = vmatpush1.bf16.msra.mxu0 %v12845_v21  ;;  %13001 = vmatpush1.bf16.msra.mxu1 %v12847_v14  ;;  %v12861_v53 = vld [vmem:[#allocation2 + $0xde0] sm:$0xff]  ;;  %v13041_v55 = vld [vmem:[#allocation2 + $0xe08] sm:$0xff]  ;;  %v13098_v44 = vld [vmem:[#allocation2 + $0xfd0] sm:$0xff] }
 0xb73   :  { %v12189_v27 = vpop.f32.mrb[103].mxu0  ;;  %v12230_v28 = vpop.f32.mrb[51].mxu1  ;;  %12961 = vmatprep.subr.bf16.mxu0 %v12854_v12  ;;  %13002 = vmatprep.subr.bf16.mxu1 %v12856_v15  ;;  %v13090_v12 = vld [vmem:[#allocation2 + $0xf90] sm:$0xff]  ;;  %v13099_v15 = vld [vmem:[#allocation2 + $0xfd8] sm:$0xff]  ;;  %v21174_v48 = vrot.slane %v21069_v41, 3  ;;  %v13044_v20 = vld [vmem:[#allocation2 + $0xe20] sm:$0xff] }
 0xb74   :  { %v13047_v16 = vld [vmem:[#allocation2 + $0xe38] sm:$0xff]  ;;  %v13046_v27 = vld [vmem:[#allocation2 + $0xe30] sm:$0xff]  ;;  %v13053_v28 = vld [vmem:[#allocation2 + $0xe68] sm:$0xff] }
 0xb75   :  { %v13061_v41 = vld [vmem:[#allocation2 + $0xea8] sm:$0xff] }
 0xb76   :  { %12962 = vmatpush1.bf16.msra.mxu0 %v12853_v49  ;;  %13003 = vmatpush1.bf16.msra.mxu1 %v12855_v29  ;;  %v13055_v49 = vld [vmem:[#allocation2 + $0xe78] sm:$0xff]  ;;  %v13052_v29 = vld [vmem:[#allocation2 + $0xe60] sm:$0xff] }
 0xb77   :  { %12963 = vmatprep.subr.bf16.mxu0 %v12862_v50  ;;  %13004 = vmatprep.subr.bf16.mxu1 %v12864_v32  ;;  %v13054_v50 = vld [vmem:[#allocation2 + $0xe70] sm:$0xff]  ;;  %v13063_v32 = vld [vmem:[#allocation2 + $0xeb8] sm:$0xff] }
 0xb7a   :  { %12964 = vmatpush1.bf16.msra.mxu0 %v12861_v53  ;;  %13005 = vmatpush1.bf16.msra.mxu1 %v12863_v33  ;;  %v13060_v53 = vld [vmem:[#allocation2 + $0xea0] sm:$0xff]  ;;  %v13062_v33 = vld [vmem:[#allocation2 + $0xeb0] sm:$0xff] }
 0xb7b   :  { %13106 = vmatprep.subr.bf16.mxu0 %v13041_v55  ;;  %13147 = vmatprep.subr.bf16.mxu1 %v13043_v37  ;;  %v13069_v55 = vld [vmem:[#allocation2 + $0xee8] sm:$0xff]  ;;  %v13071_v37 = vld [vmem:[#allocation2 + $0xef8] sm:$0xff] }
 0xb7d   :  { %12982 = vmatmul.mubr.bf16.vlgmr.msra.gmra.mrb[128].mxu0 %v21139_v56  ;;  %13023 = vmatmul.mubr.bf16.vlgmr.msra.gmra.mrb[76].mxu1 %v21139_v56  ;;  %v13067_v56 = vld [vmem:[#allocation2 + $0xed8] sm:$0xff] }
 0xb7e   :  { %13107 = vmatpush1.bf16.msra.mxu0 %v13040_v38  ;;  %13148 = vmatpush1.bf16.msra.mxu1 %v13042_v39  ;;  %v13068_v38 = vld [vmem:[#allocation2 + $0xee0] sm:$0xff]  ;;  %v13070_v39 = vld [vmem:[#allocation2 + $0xef0] sm:$0xff] }
 0xb7f   :  { %13108 = vmatprep.subr.bf16.mxu0 %v13049_v42  ;;  %13149 = vmatprep.subr.bf16.mxu1 %v13051_v61  ;;  %v13077_v42 = vld [vmem:[#allocation2 + $0xf28] sm:$0xff]  ;;  %v13079_v61 = vld [vmem:[#allocation2 + $0xf38] sm:$0xff] }
 0xb80   :  { %13138 = vmatprep.mubr.bf16.mxu0 %v18018_v25  ;;  %13179 = vmatprep.mubr.bf16.mxu1 %v18018_v25 }
 0xb82   :  { %13109 = vmatpush1.bf16.msra.mxu0 %v13048_v45  ;;  %13150 = vmatpush1.bf16.msra.mxu1 %v13050_v1  ;;  %v13076_v45 = vld [vmem:[#allocation2 + $0xf20] sm:$0xff]  ;;  %v13078_v1 = vld [vmem:[#allocation2 + $0xf30] sm:$0xff] }
 0xb83   :  { %13110 = vmatprep.subr.bf16.mxu0 %v13057_v46  ;;  %13151 = vmatprep.subr.bf16.mxu1 %v13059_v62  ;;  %v13085_v46 = vld [vmem:[#allocation2 + $0xf68] sm:$0xff]  ;;  %v13087_v62 = vld [vmem:[#allocation2 + $0xf78] sm:$0xff] }
 0xb86   :  { %13111 = vmatpush1.bf16.msra.mxu0 %v13056_v52  ;;  %13152 = vmatpush1.bf16.msra.mxu1 %v13058_v63  ;;  %v13084_v52 = vld [vmem:[#allocation2 + $0xf60] sm:$0xff]  ;;  %v13086_v63 = vld [vmem:[#allocation2 + $0xf70] sm:$0xff] }
 0xb87   :  { %13112 = vmatprep.subr.bf16.mxu0 %v13065_v22  ;;  %13153 = vmatprep.subr.bf16.mxu1 %v13067_v56 }
 0xb8a   :  { %13113 = vmatpush1.bf16.msra.mxu0 %v13064_v57  ;;  %13154 = vmatpush1.bf16.msra.mxu1 %v13066_v58  ;;  %v13093_v57 = vld [vmem:[#allocation2 + $0xfa8] sm:$0xff]  ;;  %v13095_v58 = vld [vmem:[#allocation2 + $0xfb8] sm:$0xff] }
 0xb8b   :  { %13114 = vmatprep.subr.bf16.mxu0 %v13073_v59  ;;  %13155 = vmatprep.subr.bf16.mxu1 %v13075_v40 }
 0xb8e   :  { %13115 = vmatpush1.bf16.msra.mxu0 %v13072_v3  ;;  %13156 = vmatpush1.bf16.msra.mxu1 %v13074_v54 }
 0xb8f   :  { %13116 = vmatprep.subr.bf16.mxu0 %v13081_v2  ;;  %13157 = vmatprep.subr.bf16.mxu1 %v13083_v8 }
 0xb90   :  { %v12266_v6 = vpop.f32.mrb[104].mxu0  ;;  %v12307_v7 = vpop.f32.mrb[52].mxu1 }
 0xb91   :  { %v21162_v17 = vadd.f32 %v12266_v6, %v21127_v30  ;;  %v21165_v13 = vadd.f32 %v12307_v7, %v21130_v31  ;;  %v12268_v18 = vpop.f32.mrb[105].mxu0  ;;  %v12309_v26 = vpop.f32.mrb[53].mxu1  ;;  %v13088_v30 = vld [vmem:[#allocation2 + $0xf80] sm:$0xff]  ;;  %v13097_v31 = vld [vmem:[#allocation2 + $0xfc8] sm:$0xff] }
 0xb92   :  { %v21168_v5 = vadd.f32 %v12268_v18, %v21133_v34  ;;  %v21171_v4 = vadd.f32 %v12309_v26, %v21136_v36  ;;  %v12270_v21 = vpop.f32.mrb[106].mxu0  ;;  %v12311_v14 = vpop.f32.mrb[54].mxu1  ;;  %13117 = vmatpush1.bf16.msra.mxu0 %v13080_v60  ;;  %13158 = vmatpush1.bf16.msra.mxu1 %v13082_v9  ;;  %v13096_v34 = vld [vmem:[#allocation2 + $0xfc0] sm:$0xff]  ;;  %v13045_v36 = vld [vmem:[#allocation2 + $0xe28] sm:$0xff]  ;;  %v13102_v18 = vld [vmem:[#allocation2 + $0xff0] sm:$0xff] }
 0xb93   :  { %v12271_v10 = vpop.f32.mrb[107].mxu0  ;;  %v12312_v11 = vpop.f32.mrb[55].mxu1  ;;  %13118 = vmatprep.subr.bf16.mxu0 %v13089_v51  ;;  %13159 = vmatprep.subr.bf16.mxu1 %v13091_v0  ;;  %v13094_v51 = vld [vmem:[#allocation2 + $0xfb0] sm:$0xff]  ;;  %v13103_v0 = vld [vmem:[#allocation2 + $0xff8] sm:$0xff]  ;;  %v13280_v21 = vld [vmem:[#allocation2 + $0x1000] sm:$0xff] }
 0xb94   :  { %v13283_v26 = vld [vmem:[#allocation2 + $0x1018] sm:$0xff]  ;;  %v13282_v14 = vld [vmem:[#allocation2 + $0x1010] sm:$0xff]  ;;  %v13289_v10 = vld [vmem:[#allocation2 + $0x1048] sm:$0xff] }
 0xb95   :  { %v13291_v11 = vld [vmem:[#allocation2 + $0x1058] sm:$0xff] }
 0xb96   :  { %13119 = vmatpush1.bf16.msra.mxu0 %v13088_v30  ;;  %13160 = vmatpush1.bf16.msra.mxu1 %v13090_v12  ;;  %v13288_v30 = vld [vmem:[#allocation2 + $0x1040] sm:$0xff]  ;;  %v13290_v12 = vld [vmem:[#allocation2 + $0x1050] sm:$0xff] }
 0xb97   :  { %13120 = vmatprep.subr.bf16.mxu0 %v13097_v31  ;;  %13161 = vmatprep.subr.bf16.mxu1 %v13099_v15  ;;  %v13297_v31 = vld [vmem:[#allocation2 + $0x1088] sm:$0xff]  ;;  %v13299_v15 = vld [vmem:[#allocation2 + $0x1098] sm:$0xff] }
 0xb9a   :  { %13121 = vmatpush1.bf16.msra.mxu0 %v13096_v34  ;;  %13162 = vmatpush1.bf16.msra.mxu1 %v13098_v44  ;;  %v13296_v34 = vld [vmem:[#allocation2 + $0x1080] sm:$0xff]  ;;  %v13298_v44 = vld [vmem:[#allocation2 + $0x1090] sm:$0xff] }
 0xb9b   :  { %13188 = vmatprep.subr.bf16.mxu0 %v13045_v36  ;;  %13229 = vmatprep.subr.bf16.mxu1 %v13047_v16  ;;  %v13305_v36 = vld [vmem:[#allocation2 + $0x10c8] sm:$0xff]  ;;  %v13307_v16 = vld [vmem:[#allocation2 + $0x10d8] sm:$0xff] }
 0xb9d   :  { %13139 = vmatmul.mubr.bf16.vlgmr.msra.gmra.mrb[132].mxu0 %v21174_v48  ;;  %13180 = vmatmul.mubr.bf16.vlgmr.msra.gmra.mrb[80].mxu1 %v21174_v48 }
 0xb9e   :  { %13189 = vmatpush1.bf16.msra.mxu0 %v13044_v20  ;;  %13230 = vmatpush1.bf16.msra.mxu1 %v13046_v27  ;;  %v13306_v20 = vld [vmem:[#allocation2 + $0x10d0] sm:$0xff]  ;;  %v13313_v27 = vld [vmem:[#allocation2 + $0x1108] sm:$0xff] }
 0xb9f   :  { %13190 = vmatprep.subr.bf16.mxu0 %v13053_v28  ;;  %13231 = vmatprep.subr.bf16.mxu1 %v13055_v49  ;;  %v13315_v28 = vld [vmem:[#allocation2 + $0x1118] sm:$0xff]  ;;  %v13312_v49 = vld [vmem:[#allocation2 + $0x1100] sm:$0xff] }
 0xba0   :  { %13220 = vmatprep.mubr.bf16.mxu0 %v18018_v25  ;;  %13261 = vmatprep.mubr.bf16.mxu1 %v18018_v25 }
 0xba2   :  { %13191 = vmatpush1.bf16.msra.mxu0 %v13052_v29  ;;  %13232 = vmatpush1.bf16.msra.mxu1 %v13054_v50  ;;  %v13314_v29 = vld [vmem:[#allocation2 + $0x1110] sm:$0xff]  ;;  %v13321_v50 = vld [vmem:[#allocation2 + $0x1148] sm:$0xff] }
 0xba3   :  { %13192 = vmatprep.subr.bf16.mxu0 %v13061_v41  ;;  %13233 = vmatprep.subr.bf16.mxu1 %v13063_v32  ;;  %v13323_v41 = vld [vmem:[#allocation2 + $0x1158] sm:$0xff]  ;;  %v13320_v32 = vld [vmem:[#allocation2 + $0x1140] sm:$0xff] }
 0xba6   :  { %13193 = vmatpush1.bf16.msra.mxu0 %v13060_v53  ;;  %13234 = vmatpush1.bf16.msra.mxu1 %v13062_v33  ;;  %v13322_v53 = vld [vmem:[#allocation2 + $0x1150] sm:$0xff] }
 0xba7   :  { %13194 = vmatprep.subr.bf16.mxu0 %v13069_v55  ;;  %13235 = vmatprep.subr.bf16.mxu1 %v13071_v37  ;;  %v13329_v37 = vld [vmem:[#allocation2 + $0x1188] sm:$0xff] }
 0xbaa   :  { %13195 = vmatpush1.bf16.msra.mxu0 %v13068_v38  ;;  %13236 = vmatpush1.bf16.msra.mxu1 %v13070_v39  ;;  %v13331_v38 = vld [vmem:[#allocation2 + $0x1198] sm:$0xff] }
 0xbab   :  { %13196 = vmatprep.subr.bf16.mxu0 %v13077_v42  ;;  %13237 = vmatprep.subr.bf16.mxu1 %v13079_v61 }
 0xbae   :  { %13197 = vmatpush1.bf16.msra.mxu0 %v13076_v45  ;;  %13238 = vmatpush1.bf16.msra.mxu1 %v13078_v1 }
 0xbaf   :  { %13198 = vmatprep.subr.bf16.mxu0 %v13085_v46  ;;  %13239 = vmatprep.subr.bf16.mxu1 %v13087_v62 }
 0xbb0   :  { %v12422_v22 = vpop.f32.mrb[108].mxu0  ;;  %v12463_v56 = vpop.f32.mrb[56].mxu1 }
 0xbb1   :  { %v21181_v59 = vadd.f32 %v12422_v22, %v21146_v43  ;;  %v21184_v40 = vadd.f32 %v12463_v56, %v21149_v35  ;;  %v12424_v3 = vpop.f32.mrb[109].mxu0  ;;  %v12465_v54 = vpop.f32.mrb[57].mxu1  ;;  %v13092_v43 = vld [vmem:[#allocation2 + $0xfa0] sm:$0xff]  ;;  %v13101_v35 = vld [vmem:[#allocation2 + $0xfe8] sm:$0xff]  ;;  %v13330_v56 = vld [vmem:[#allocation2 + $0x1190] sm:$0xff] }
 0xbb2   :  { %v21187_v2 = vadd.f32 %v12424_v3, %v21152_v47  ;;  %v21190_v8 = vadd.f32 %v12465_v54, %v21155_v19  ;;  %v12426_v60 = vpop.f32.mrb[110].mxu0  ;;  %v12467_v9 = vpop.f32.mrb[58].mxu1  ;;  %13199 = vmatpush1.bf16.msra.mxu0 %v13084_v52  ;;  %13240 = vmatpush1.bf16.msra.mxu1 %v13086_v63  ;;  %v13100_v47 = vld [vmem:[#allocation2 + $0xfe0] sm:$0xff]  ;;  %v13281_v19 = vld [vmem:[#allocation2 + $0x1008] sm:$0xff]  ;;  %v13287_v3 = vld [vmem:[#allocation2 + $0x1038] sm:$0xff]  ;;  %v21210_v54 = vpack.c.bf16 %v21000_v23, %v21000_v23 }
 0xbb3   :  { %v12427_v6 = vpop.f32.mrb[111].mxu0  ;;  %v12468_v7 = vpop.f32.mrb[59].mxu1  ;;  %13200 = vmatprep.subr.bf16.mxu0 %v13093_v57  ;;  %13241 = vmatprep.subr.bf16.mxu1 %v13095_v58  ;;  %v13339_v57 = vld [vmem:[#allocation2 + $0x11d8] sm:$0xff]  ;;  %v13338_v58 = vld [vmem:[#allocation2 + $0x11d0] sm:$0xff]  ;;  %v13284_v60 = vld [vmem:[#allocation2 + $0x1020] sm:$0xff] }
 0xbb4   :  { %v13286_v9 = vld [vmem:[#allocation2 + $0x1030] sm:$0xff]  ;;  %v13293_v6 = vld [vmem:[#allocation2 + $0x1068] sm:$0xff]  ;;  %v13295_v7 = vld [vmem:[#allocation2 + $0x1078] sm:$0xff] }
 0xbb5   :  { %v13301_v23 = vld [vmem:[#allocation2 + $0x10a8] sm:$0xff] }
 0xbb6   :  { %13201 = vmatpush1.bf16.msra.mxu0 %v13092_v43  ;;  %13242 = vmatpush1.bf16.msra.mxu1 %v13094_v51  ;;  %v13292_v43 = vld [vmem:[#allocation2 + $0x1060] sm:$0xff]  ;;  %v13294_v51 = vld [vmem:[#allocation2 + $0x1070] sm:$0xff] }
 0xbb7   :  { %13202 = vmatprep.subr.bf16.mxu0 %v13101_v35  ;;  %13243 = vmatprep.subr.bf16.mxu1 %v13103_v0  ;;  %v13303_v35 = vld [vmem:[#allocation2 + $0x10b8] sm:$0xff]  ;;  %v13300_v0 = vld [vmem:[#allocation2 + $0x10a0] sm:$0xff] }
 0xbba   :  { %13203 = vmatpush1.bf16.msra.mxu0 %v13100_v47  ;;  %13244 = vmatpush1.bf16.msra.mxu1 %v13102_v18  ;;  %v13302_v47 = vld [vmem:[#allocation2 + $0x10b0] sm:$0xff]  ;;  %v13309_v18 = vld [vmem:[#allocation2 + $0x10e8] sm:$0xff] }
 0xbbb   :  { %13344 = vmatprep.subr.bf16.mxu0 %v13281_v19  ;;  %13385 = vmatprep.subr.bf16.mxu1 %v13283_v26  ;;  %v13311_v19 = vld [vmem:[#allocation2 + $0x10f8] sm:$0xff]  ;;  %v13308_v26 = vld [vmem:[#allocation2 + $0x10e0] sm:$0xff] }
 0xbbd   :  { %13221 = vmatmul.mubr.bf16.vlgmr.msra.gmra.mrb[136].mxu0 %v21174_v48  ;;  %13262 = vmatmul.mubr.bf16.vlgmr.msra.gmra.mrb[84].mxu1 %v21174_v48  ;;  %v13304_v48 = vld [vmem:[#allocation2 + $0x10c0] sm:$0xff] }
 0xbbe   :  { %13345 = vmatpush1.bf16.msra.mxu0 %v13280_v21  ;;  %13386 = vmatpush1.bf16.msra.mxu1 %v13282_v14  ;;  %v13310_v21 = vld [vmem:[#allocation2 + $0x10f0] sm:$0xff]  ;;  %v13317_v14 = vld [vmem:[#allocation2 + $0x1128] sm:$0xff] }
 0xbbf   :  { %13346 = vmatprep.subr.bf16.mxu0 %v13289_v10  ;;  %13387 = vmatprep.subr.bf16.mxu1 %v13291_v11  ;;  %v13319_v10 = vld [vmem:[#allocation2 + $0x1138] sm:$0xff]  ;;  %v13316_v11 = vld [vmem:[#allocation2 + $0x1120] sm:$0xff] }
 0xbc0   :  { %13376 = vmatprep.mubr.bf16.mxu0 %v18018_v25  ;;  %13417 = vmatprep.mubr.bf16.mxu1 %v18018_v25 }
 0xbc2   :  { %13347 = vmatpush1.bf16.msra.mxu0 %v13288_v30  ;;  %13388 = vmatpush1.bf16.msra.mxu1 %v13290_v12  ;;  %v13318_v30 = vld [vmem:[#allocation2 + $0x1130] sm:$0xff]  ;;  %v13325_v12 = vld [vmem:[#allocation2 + $0x1168] sm:$0xff] }
 0xbc3   :  { %13348 = vmatprep.subr.bf16.mxu0 %v13297_v31  ;;  %13389 = vmatprep.subr.bf16.mxu1 %v13299_v15  ;;  %v13327_v31 = vld [vmem:[#allocation2 + $0x1178] sm:$0xff]  ;;  %v13324_v15 = vld [vmem:[#allocation2 + $0x1160] sm:$0xff] }
 0xbc6   :  { %13349 = vmatpush1.bf16.msra.mxu0 %v13296_v34  ;;  %13390 = vmatpush1.bf16.msra.mxu1 %v13298_v44  ;;  %v13326_v34 = vld [vmem:[#allocation2 + $0x1170] sm:$0xff] }
 0xbc7   :  { %13350 = vmatprep.subr.bf16.mxu0 %v13305_v36  ;;  %13391 = vmatprep.subr.bf16.mxu1 %v13307_v16  ;;  %v13333_v16 = vld [vmem:[#allocation2 + $0x11a8] sm:$0xff] }
 0xbca   :  { %13351 = vmatpush1.bf16.msra.mxu0 %v13304_v48  ;;  %13392 = vmatpush1.bf16.msra.mxu1 %v13306_v20  ;;  %v13335_v48 = vld [vmem:[#allocation2 + $0x11b8] sm:$0xff] }
 0xbcb   :  { %13352 = vmatprep.subr.bf16.mxu0 %v13313_v27  ;;  %13393 = vmatprep.subr.bf16.mxu1 %v13315_v28 }
 0xbce   :  { %13353 = vmatpush1.bf16.msra.mxu0 %v13312_v49  ;;  %13394 = vmatpush1.bf16.msra.mxu1 %v13314_v29 }
 0xbcf   :  { %13354 = vmatprep.subr.bf16.mxu0 %v13321_v50  ;;  %13395 = vmatprep.subr.bf16.mxu1 %v13323_v41 }
 0xbd0   :  { %v12504_v33 = vpop.f32.mrb[112].mxu0  ;;  %v12545_v55 = vpop.f32.mrb[60].mxu1 }
 0xbd1   :  { %v21197_v39 = vadd.f32 %v12504_v33, %v21162_v17  ;;  %v21200_v42 = vadd.f32 %v12545_v55, %v21165_v13  ;;  %v12506_v61 = vpop.f32.mrb[113].mxu0  ;;  %v12547_v45 = vpop.f32.mrb[61].mxu1  ;;  %v13328_v17 = vld [vmem:[#allocation2 + $0x1180] sm:$0xff]  ;;  %v13337_v13 = vld [vmem:[#allocation2 + $0x11c8] sm:$0xff]  ;;  %v13334_v55 = vld [vmem:[#allocation2 + $0x11b0] sm:$0xff] }
 0xbd2   :  { %v21203_v1 = vadd.f32 %v12506_v61, %v21168_v5  ;;  %v21206_v46 = vadd.f32 %v12547_v45, %v21171_v4  ;;  %v12508_v62 = vpop.f32.mrb[114].mxu0  ;;  %v12549_v52 = vpop.f32.mrb[62].mxu1  ;;  %13355 = vmatpush1.bf16.msra.mxu0 %v13320_v32  ;;  %13396 = vmatpush1.bf16.msra.mxu1 %v13322_v53  ;;  %v13336_v5 = vld [vmem:[#allocation2 + $0x11c0] sm:$0xff]  ;;  %v13285_v4 = vld [vmem:[#allocation2 + $0x1028] sm:$0xff]  ;;  %v13520_v61 = vld [vmem:[#allocation2 + $0x1218] sm:$0xff] }
 0xbd3   :  { %v12509_v63 = vpop.f32.mrb[115].mxu0  ;;  %v12550_v22 = vpop.f32.mrb[63].mxu1  ;;  %13356 = vmatprep.subr.bf16.mxu0 %v13329_v37  ;;  %13397 = vmatprep.subr.bf16.mxu1 %v13331_v38  ;;  %v13343_v37 = vld [vmem:[#allocation2 + $0x11f8] sm:$0xff]  ;;  %v13342_v38 = vld [vmem:[#allocation2 + $0x11f0] sm:$0xff]  ;;  %v13517_v45 = vld [vmem:[#allocation2 + $0x1200] sm:$0xff] }
 0xbd4   :  { %v13519_v62 = vld [vmem:[#allocation2 + $0x1210] sm:$0xff]  ;;  %v13526_v52 = vld [vmem:[#allocation2 + $0x1248] sm:$0xff]  ;;  %v13528_v63 = vld [vmem:[#allocation2 + $0x1258] sm:$0xff] }
 0xbd5   :  { %v13525_v22 = vld [vmem:[#allocation2 + $0x1240] sm:$0xff] }
 0xbd6   :  { %13357 = vmatpush1.bf16.msra.mxu0 %v13328_v17  ;;  %13398 = vmatpush1.bf16.msra.mxu1 %v13330_v56  ;;  %v13527_v17 = vld [vmem:[#allocation2 + $0x1250] sm:$0xff]  ;;  %v13534_v56 = vld [vmem:[#allocation2 + $0x1288] sm:$0xff] }
 0xbd7   :  { %13358 = vmatprep.subr.bf16.mxu0 %v13337_v13  ;;  %13399 = vmatprep.subr.bf16.mxu1 %v13339_v57  ;;  %v13536_v13 = vld [vmem:[#allocation2 + $0x1298] sm:$0xff]  ;;  %v13533_v57 = vld [vmem:[#allocation2 + $0x1280] sm:$0xff] }
 0xbda   :  { %13359 = vmatpush1.bf16.msra.mxu0 %v13336_v5  ;;  %13400 = vmatpush1.bf16.msra.mxu1 %v13338_v58  ;;  %v13535_v5 = vld [vmem:[#allocation2 + $0x1290] sm:$0xff]  ;;  %v13542_v58 = vld [vmem:[#allocation2 + $0x12c8] sm:$0xff] }
 0xbdb   :  { %13426 = vmatprep.subr.bf16.mxu0 %v13285_v4  ;;  %13467 = vmatprep.subr.bf16.mxu1 %v13287_v3  ;;  %v13544_v4 = vld [vmem:[#allocation2 + $0x12d8] sm:$0xff]  ;;  %v13541_v3 = vld [vmem:[#allocation2 + $0x12c0] sm:$0xff] }
 0xbdd   :  { %13377 = vmatmul.mubr.bf16.vlgmr.msra.gmra.mrb[140].mxu0 %v21210_v54  ;;  %13418 = vmatmul.mubr.bf16.vlgmr.msra.gmra.mrb[88].mxu1 %v21210_v54 }
 0xbde   :  { %13427 = vmatpush1.bf16.msra.mxu0 %v13284_v60  ;;  %13468 = vmatpush1.bf16.msra.mxu1 %v13286_v9  ;;  %v13543_v60 = vld [vmem:[#allocation2 + $0x12d0] sm:$0xff]  ;;  %v13550_v9 = vld [vmem:[#allocation2 + $0x1308] sm:$0xff] }
 0xbdf   :  { %13428 = vmatprep.subr.bf16.mxu0 %v13293_v6  ;;  %13469 = vmatprep.subr.bf16.mxu1 %v13295_v7  ;;  %v13552_v6 = vld [vmem:[#allocation2 + $0x1318] sm:$0xff]  ;;  %v13549_v7 = vld [vmem:[#allocation2 + $0x1300] sm:$0xff] }
 0xbe0   :  { %13458 = vmatprep.mubr.bf16.mxu0 %v18018_v25  ;;  %13499 = vmatprep.mubr.bf16.mxu1 %v18018_v25 }
 0xbe2   :  { %13429 = vmatpush1.bf16.msra.mxu0 %v13292_v43  ;;  %13470 = vmatpush1.bf16.msra.mxu1 %v13294_v51  ;;  %v13551_v43 = vld [vmem:[#allocation2 + $0x1310] sm:$0xff]  ;;  %v13558_v51 = vld [vmem:[#allocation2 + $0x1348] sm:$0xff] }
 0xbe3   :  { %13430 = vmatprep.subr.bf16.mxu0 %v13301_v23  ;;  %13471 = vmatprep.subr.bf16.mxu1 %v13303_v35  ;;  %v13560_v23 = vld [vmem:[#allocation2 + $0x1358] sm:$0xff]  ;;  %v13557_v35 = vld [vmem:[#allocation2 + $0x1340] sm:$0xff] }
 0xbe6   :  { %13431 = vmatpush1.bf16.msra.mxu0 %v13300_v0  ;;  %13472 = vmatpush1.bf16.msra.mxu1 %v13302_v47  ;;  %v13559_v0 = vld [vmem:[#allocation2 + $0x1350] sm:$0xff] }
 0xbe7   :  { %13432 = vmatprep.subr.bf16.mxu0 %v13309_v18  ;;  %13473 = vmatprep.subr.bf16.mxu1 %v13311_v19  ;;  %v13566_v19 = vld [vmem:[#allocation2 + $0x1388] sm:$0xff] }
 0xbea   :  { %13433 = vmatpush1.bf16.msra.mxu0 %v13308_v26  ;;  %13474 = vmatpush1.bf16.msra.mxu1 %v13310_v21  ;;  %v13568_v26 = vld [vmem:[#allocation2 + $0x1398] sm:$0xff] }
 0xbeb   :  { %13434 = vmatprep.subr.bf16.mxu0 %v13317_v14  ;;  %13475 = vmatprep.subr.bf16.mxu1 %v13319_v10 }
 0xbee   :  { %13435 = vmatpush1.bf16.msra.mxu0 %v13316_v11  ;;  %13476 = vmatpush1.bf16.msra.mxu1 %v13318_v30 }
 0xbef   :  { %13436 = vmatprep.subr.bf16.mxu0 %v13325_v12  ;;  %13477 = vmatprep.subr.bf16.mxu1 %v13327_v31 }
 0xbf0   :  { %v12662_v44 = vpop.f32.mrb[116].mxu0  ;;  %v12703_v36 = vpop.f32.mrb[64].mxu1 }
 0xbf1   :  { %v21217_v20 = vadd.f32 %v12662_v44, %v21181_v59  ;;  %v21220_v27 = vadd.f32 %v12703_v36, %v21184_v40  ;;  %v12664_v28 = vpop.f32.mrb[117].mxu0  ;;  %v12705_v49 = vpop.f32.mrb[65].mxu1  ;;  %v13332_v59 = vld [vmem:[#allocation2 + $0x11a0] sm:$0xff]  ;;  %v13341_v40 = vld [vmem:[#allocation2 + $0x11e8] sm:$0xff]  ;;  %v13567_v36 = vld [vmem:[#allocation2 + $0x1390] sm:$0xff] }
 0xbf2   :  { %v21223_v29 = vadd.f32 %v12664_v28, %v21187_v2  ;;  %v21226_v50 = vadd.f32 %v12705_v49, %v21190_v8  ;;  %v12666_v41 = vpop.f32.mrb[118].mxu0  ;;  %v12707_v32 = vpop.f32.mrb[66].mxu1  ;;  %13437 = vmatpush1.bf16.msra.mxu0 %v13324_v15  ;;  %13478 = vmatpush1.bf16.msra.mxu1 %v13326_v34  ;;  %v13340_v2 = vld [vmem:[#allocation2 + $0x11e0] sm:$0xff]  ;;  %v13518_v8 = vld [vmem:[#allocation2 + $0x1208] sm:$0xff]  ;;  %v13524_v28 = vld [vmem:[#allocation2 + $0x1238] sm:$0xff]  ;;  %v21245_v49 = vrot.slane %v21210_v54, 1 }
 0xbf3   :  { %v12667_v53 = vpop.f32.mrb[119].mxu0  ;;  %v12708_v33 = vpop.f32.mrb[67].mxu1  ;;  %13438 = vmatprep.subr.bf16.mxu0 %v13333_v16  ;;  %13479 = vmatprep.subr.bf16.mxu1 %v13335_v48  ;;  %v13576_v16 = vld [vmem:[#allocation2 + $0x13d8] sm:$0xff]  ;;  %v13575_v48 = vld [vmem:[#allocation2 + $0x13d0] sm:$0xff]  ;;  %v13521_v41 = vld [vmem:[#allocation2 + $0x1220] sm:$0xff] }
 0xbf4   :  { %v13523_v32 = vld [vmem:[#allocation2 + $0x1230] sm:$0xff]  ;;  %v13530_v53 = vld [vmem:[#allocation2 + $0x1268] sm:$0xff]  ;;  %v13532_v33 = vld [vmem:[#allocation2 + $0x1278] sm:$0xff] }
 0xbf6   :  { %13439 = vmatpush1.bf16.msra.mxu0 %v13332_v59  ;;  %13480 = vmatpush1.bf16.msra.mxu1 %v13334_v55  ;;  %v13529_v59 = vld [vmem:[#allocation2 + $0x1260] sm:$0xff]  ;;  %v13531_v55 = vld [vmem:[#allocation2 + $0x1270] sm:$0xff] }
 0xbf7   :  { %13440 = vmatprep.subr.bf16.mxu0 %v13341_v40  ;;  %13481 = vmatprep.subr.bf16.mxu1 %v13343_v37  ;;  %v13538_v40 = vld [vmem:[#allocation2 + $0x12a8] sm:$0xff]  ;;  %v13540_v37 = vld [vmem:[#allocation2 + $0x12b8] sm:$0xff] }
 0xbfa   :  { %13441 = vmatpush1.bf16.msra.mxu0 %v13340_v2  ;;  %13482 = vmatpush1.bf16.msra.mxu1 %v13342_v38  ;;  %v13537_v2 = vld [vmem:[#allocation2 + $0x12a0] sm:$0xff]  ;;  %v13539_v38 = vld [vmem:[#allocation2 + $0x12b0] sm:$0xff] }
 0xbfb   :  { %13584 = vmatprep.subr.bf16.mxu0 %v13518_v8  ;;  %13625 = vmatprep.subr.bf16.mxu1 %v13520_v61  ;;  %v13546_v8 = vld [vmem:[#allocation2 + $0x12e8] sm:$0xff]  ;;  %v13548_v61 = vld [vmem:[#allocation2 + $0x12f8] sm:$0xff] }
 0xbfd   :  { %13459 = vmatmul.mubr.bf16.vlgmr.msra.gmra.mrb[144].mxu0 %v21210_v54  ;;  %13500 = vmatmul.mubr.bf16.vlgmr.msra.gmra.mrb[92].mxu1 %v21210_v54 }
 0xbfe   :  { %13585 = vmatpush1.bf16.msra.mxu0 %v13517_v45  ;;  %13626 = vmatpush1.bf16.msra.mxu1 %v13519_v62  ;;  %v13545_v45 = vld [vmem:[#allocation2 + $0x12e0] sm:$0xff]  ;;  %v13547_v62 = vld [vmem:[#allocation2 + $0x12f0] sm:$0xff] }
 0xbff   :  { %13586 = vmatprep.subr.bf16.mxu0 %v13526_v52  ;;  %13627 = vmatprep.subr.bf16.mxu1 %v13528_v63  ;;  %v13554_v52 = vld [vmem:[#allocation2 + $0x1328] sm:$0xff]  ;;  %v13556_v63 = vld [vmem:[#allocation2 + $0x1338] sm:$0xff] }
 0xc00   :  { %13616 = vmatprep.mubr.bf16.mxu0 %v18018_v25  ;;  %13657 = vmatprep.mubr.bf16.mxu1 %v18018_v25 }
 0xc02   :  { %13587 = vmatpush1.bf16.msra.mxu0 %v13525_v22  ;;  %13628 = vmatpush1.bf16.msra.mxu1 %v13527_v17  ;;  %v13553_v22 = vld [vmem:[#allocation2 + $0x1320] sm:$0xff]  ;;  %v13555_v17 = vld [vmem:[#allocation2 + $0x1330] sm:$0xff] }
 0xc03   :  { %13588 = vmatprep.subr.bf16.mxu0 %v13534_v56  ;;  %13629 = vmatprep.subr.bf16.mxu1 %v13536_v13  ;;  %v13562_v56 = vld [vmem:[#allocation2 + $0x1368] sm:$0xff]  ;;  %v13564_v13 = vld [vmem:[#allocation2 + $0x1378] sm:$0xff] }
 0xc06   :  { %13589 = vmatpush1.bf16.msra.mxu0 %v13533_v57  ;;  %13630 = vmatpush1.bf16.msra.mxu1 %v13535_v5  ;;  %v13561_v57 = vld [vmem:[#allocation2 + $0x1360] sm:$0xff]  ;;  %v13563_v5 = vld [vmem:[#allocation2 + $0x1370] sm:$0xff] }
 0xc07   :  { %13590 = vmatprep.subr.bf16.mxu0 %v13542_v58  ;;  %13631 = vmatprep.subr.bf16.mxu1 %v13544_v4 }
 0xc0a   :  { %13591 = vmatpush1.bf16.msra.mxu0 %v13541_v3  ;;  %13632 = vmatpush1.bf16.msra.mxu1 %v13543_v60  ;;  %v13570_v3 = vld [vmem:[#allocation2 + $0x13a8] sm:$0xff]  ;;  %v13572_v60 = vld [vmem:[#allocation2 + $0x13b8] sm:$0xff] }
 0xc0b   :  { %13592 = vmatprep.subr.bf16.mxu0 %v13550_v9  ;;  %13633 = vmatprep.subr.bf16.mxu1 %v13552_v6 }
 0xc0e   :  { %13593 = vmatpush1.bf16.msra.mxu0 %v13549_v7  ;;  %13634 = vmatpush1.bf16.msra.mxu1 %v13551_v43 }
 0xc0f   :  { %13594 = vmatprep.subr.bf16.mxu0 %v13558_v51  ;;  %13635 = vmatprep.subr.bf16.mxu1 %v13560_v23 }
 0xc10   :  { %v12744_v47 = vpop.f32.mrb[120].mxu0  ;;  %v12785_v18 = vpop.f32.mrb[68].mxu1 }
 0xc11   :  { %v21233_v21 = vadd.f32 %v12744_v47, %v21197_v39  ;;  %v21236_v14 = vadd.f32 %v12785_v18, %v21200_v42  ;;  %v12746_v10 = vpop.f32.mrb[121].mxu0  ;;  %v12787_v11 = vpop.f32.mrb[69].mxu1  ;;  %v13565_v39 = vld [vmem:[#allocation2 + $0x1380] sm:$0xff]  ;;  %v13574_v42 = vld [vmem:[#allocation2 + $0x13c8] sm:$0xff] }
 0xc12   :  { %v21239_v30 = vadd.f32 %v12746_v10, %v21203_v1  ;;  %v21242_v12 = vadd.f32 %v12787_v11, %v21206_v46  ;;  %v12748_v31 = vpop.f32.mrb[122].mxu0  ;;  %v12789_v15 = vpop.f32.mrb[70].mxu1  ;;  %13595 = vmatpush1.bf16.msra.mxu0 %v13557_v35  ;;  %13636 = vmatpush1.bf16.msra.mxu1 %v13559_v0  ;;  %v13573_v1 = vld [vmem:[#allocation2 + $0x13c0] sm:$0xff]  ;;  %v13522_v46 = vld [vmem:[#allocation2 + $0x1228] sm:$0xff]  ;;  %v13579_v10 = vld [vmem:[#allocation2 + $0x13f0] sm:$0xff] }
 0xc13   :  { %v12749_v34 = vpop.f32.mrb[123].mxu0  ;;  %v12790_v44 = vpop.f32.mrb[71].mxu1  ;;  %13596 = vmatprep.subr.bf16.mxu0 %v13566_v19  ;;  %13637 = vmatprep.subr.bf16.mxu1 %v13568_v26  ;;  %v13571_v19 = vld [vmem:[#allocation2 + $0x13b0] sm:$0xff]  ;;  %v13580_v26 = vld [vmem:[#allocation2 + $0x13f8] sm:$0xff]  ;;  %v13757_v31 = vld [vmem:[#allocation2 + $0x1400] sm:$0xff] }
 0xc14   :  { %v13760_v11 = vld [vmem:[#allocation2 + $0x1418] sm:$0xff]  ;;  %v13759_v15 = vld [vmem:[#allocation2 + $0x1410] sm:$0xff]  ;;  %v13766_v34 = vld [vmem:[#allocation2 + $0x1448] sm:$0xff] }
 0xc15   :  { %v13768_v44 = vld [vmem:[#allocation2 + $0x1458] sm:$0xff] }
 0xc16   :  { %13597 = vmatpush1.bf16.msra.mxu0 %v13565_v39  ;;  %13638 = vmatpush1.bf16.msra.mxu1 %v13567_v36  ;;  %v13765_v39 = vld [vmem:[#allocation2 + $0x1440] sm:$0xff]  ;;  %v13767_v36 = vld [vmem:[#allocation2 + $0x1450] sm:$0xff] }
 0xc17   :  { %13598 = vmatprep.subr.bf16.mxu0 %v13574_v42  ;;  %13639 = vmatprep.subr.bf16.mxu1 %v13576_v16  ;;  %v13774_v42 = vld [vmem:[#allocation2 + $0x1488] sm:$0xff]  ;;  %v13776_v16 = vld [vmem:[#allocation2 + $0x1498] sm:$0xff] }
 0xc1a   :  { %13599 = vmatpush1.bf16.msra.mxu0 %v13573_v1  ;;  %13640 = vmatpush1.bf16.msra.mxu1 %v13575_v48  ;;  %v13773_v1 = vld [vmem:[#allocation2 + $0x1480] sm:$0xff]  ;;  %v13775_v48 = vld [vmem:[#allocation2 + $0x1490] sm:$0xff] }
 0xc1b   :  { %13666 = vmatprep.subr.bf16.mxu0 %v13522_v46  ;;  %13707 = vmatprep.subr.bf16.mxu1 %v13524_v28  ;;  %v13782_v46 = vld [vmem:[#allocation2 + $0x14c8] sm:$0xff]  ;;  %v13784_v28 = vld [vmem:[#allocation2 + $0x14d8] sm:$0xff] }
 0xc1d   :  { %13617 = vmatmul.mubr.bf16.vlgmr.msra.gmra.mrb[148].mxu0 %v21245_v49  ;;  %13658 = vmatmul.mubr.bf16.vlgmr.msra.gmra.mrb[96].mxu1 %v21245_v49 }
 0xc1e   :  { %13667 = vmatpush1.bf16.msra.mxu0 %v13521_v41  ;;  %13708 = vmatpush1.bf16.msra.mxu1 %v13523_v32  ;;  %v13783_v41 = vld [vmem:[#allocation2 + $0x14d0] sm:$0xff]  ;;  %v13790_v32 = vld [vmem:[#allocation2 + $0x1508] sm:$0xff] }
 0xc1f   :  { %13668 = vmatprep.subr.bf16.mxu0 %v13530_v53  ;;  %13709 = vmatprep.subr.bf16.mxu1 %v13532_v33  ;;  %v13792_v53 = vld [vmem:[#allocation2 + $0x1518] sm:$0xff]  ;;  %v13789_v33 = vld [vmem:[#allocation2 + $0x1500] sm:$0xff] }
 0xc20   :  { %13698 = vmatprep.mubr.bf16.mxu0 %v18018_v25  ;;  %13739 = vmatprep.mubr.bf16.mxu1 %v18018_v25 }
 0xc22   :  { %13669 = vmatpush1.bf16.msra.mxu0 %v13529_v59  ;;  %13710 = vmatpush1.bf16.msra.mxu1 %v13531_v55  ;;  %v13791_v59 = vld [vmem:[#allocation2 + $0x1510] sm:$0xff]  ;;  %v13798_v55 = vld [vmem:[#allocation2 + $0x1548] sm:$0xff] }
 0xc23   :  { %13670 = vmatprep.subr.bf16.mxu0 %v13538_v40  ;;  %13711 = vmatprep.subr.bf16.mxu1 %v13540_v37  ;;  %v13800_v40 = vld [vmem:[#allocation2 + $0x1558] sm:$0xff]  ;;  %v13797_v37 = vld [vmem:[#allocation2 + $0x1540] sm:$0xff] }
 0xc26   :  { %13671 = vmatpush1.bf16.msra.mxu0 %v13537_v2  ;;  %13712 = vmatpush1.bf16.msra.mxu1 %v13539_v38  ;;  %v13799_v2 = vld [vmem:[#allocation2 + $0x1550] sm:$0xff] }
 0xc27   :  { %13672 = vmatprep.subr.bf16.mxu0 %v13546_v8  ;;  %13713 = vmatprep.subr.bf16.mxu1 %v13548_v61  ;;  %v13806_v61 = vld [vmem:[#allocation2 + $0x1588] sm:$0xff] }
 0xc2a   :  { %13673 = vmatpush1.bf16.msra.mxu0 %v13545_v45  ;;  %13714 = vmatpush1.bf16.msra.mxu1 %v13547_v62  ;;  %v13808_v45 = vld [vmem:[#allocation2 + $0x1598] sm:$0xff] }
 0xc2b   :  { %13674 = vmatprep.subr.bf16.mxu0 %v13554_v52  ;;  %13715 = vmatprep.subr.bf16.mxu1 %v13556_v63 }
 0xc2e   :  { %13675 = vmatpush1.bf16.msra.mxu0 %v13553_v22  ;;  %13716 = vmatpush1.bf16.msra.mxu1 %v13555_v17 }
 0xc2f   :  { %13676 = vmatprep.subr.bf16.mxu0 %v13562_v56  ;;  %13717 = vmatprep.subr.bf16.mxu1 %v13564_v13 }
 0xc30   :  { %v12901_v58 = vpop.f32.mrb[124].mxu0  ;;  %v12942_v4 = vpop.f32.mrb[72].mxu1 }
 0xc31   :  { %v21252_v9 = vadd.f32 %v12901_v58, %v21217_v20  ;;  %v21255_v6 = vadd.f32 %v12942_v4, %v21220_v27  ;;  %v12903_v7 = vpop.f32.mrb[125].mxu0  ;;  %v12944_v43 = vpop.f32.mrb[73].mxu1  ;;  %v13569_v20 = vld [vmem:[#allocation2 + $0x13a0] sm:$0xff]  ;;  %v13578_v27 = vld [vmem:[#allocation2 + $0x13e8] sm:$0xff]  ;;  %v13807_v4 = vld [vmem:[#allocation2 + $0x1590] sm:$0xff] }
 0xc32   :  { %v21258_v51 = vadd.f32 %v12903_v7, %v21223_v29  ;;  %v21261_v23 = vadd.f32 %v12944_v43, %v21226_v50  ;;  %v12905_v35 = vpop.f32.mrb[126].mxu0  ;;  %v12946_v0 = vpop.f32.mrb[74].mxu1  ;;  %13677 = vmatpush1.bf16.msra.mxu0 %v13561_v57  ;;  %13718 = vmatpush1.bf16.msra.mxu1 %v13563_v5  ;;  %v13577_v29 = vld [vmem:[#allocation2 + $0x13e0] sm:$0xff]  ;;  %v13758_v50 = vld [vmem:[#allocation2 + $0x1408] sm:$0xff]  ;;  %v13764_v7 = vld [vmem:[#allocation2 + $0x1438] sm:$0xff]  ;;  %v21280_v43 = vrot.slane %v21210_v54, 2 }
 0xc33   :  { %v12906_v47 = vpop.f32.mrb[127].mxu0  ;;  %v12947_v18 = vpop.f32.mrb[75].mxu1  ;;  %13678 = vmatprep.subr.bf16.mxu0 %v13570_v3  ;;  %13719 = vmatprep.subr.bf16.mxu1 %v13572_v60  ;;  %v13816_v3 = vld [vmem:[#allocation2 + $0x15d8] sm:$0xff]  ;;  %v13815_v60 = vld [vmem:[#allocation2 + $0x15d0] sm:$0xff]  ;;  %v13761_v35 = vld [vmem:[#allocation2 + $0x1420] sm:$0xff] }
 0xc34   :  { %v13763_v0 = vld [vmem:[#allocation2 + $0x1430] sm:$0xff]  ;;  %v13770_v47 = vld [vmem:[#allocation2 + $0x1468] sm:$0xff]  ;;  %v13772_v18 = vld [vmem:[#allocation2 + $0x1478] sm:$0xff] }
 0xc36   :  { %13679 = vmatpush1.bf16.msra.mxu0 %v13569_v20  ;;  %13720 = vmatpush1.bf16.msra.mxu1 %v13571_v19  ;;  %v13769_v20 = vld [vmem:[#allocation2 + $0x1460] sm:$0xff]  ;;  %v13771_v19 = vld [vmem:[#allocation2 + $0x1470] sm:$0xff] }
 0xc37   :  { %13680 = vmatprep.subr.bf16.mxu0 %v13578_v27  ;;  %13721 = vmatprep.subr.bf16.mxu1 %v13580_v26  ;;  %v13778_v27 = vld [vmem:[#allocation2 + $0x14a8] sm:$0xff]  ;;  %v13780_v26 = vld [vmem:[#allocation2 + $0x14b8] sm:$0xff] }
 0xc3a   :  { %13681 = vmatpush1.bf16.msra.mxu0 %v13577_v29  ;;  %13722 = vmatpush1.bf16.msra.mxu1 %v13579_v10  ;;  %v13777_v29 = vld [vmem:[#allocation2 + $0x14a0] sm:$0xff]  ;;  %v13779_v10 = vld [vmem:[#allocation2 + $0x14b0] sm:$0xff] }
 0xc3b   :  { %13823 = vmatprep.subr.bf16.mxu0 %v13758_v50  ;;  %13864 = vmatprep.subr.bf16.mxu1 %v13760_v11  ;;  %v13786_v50 = vld [vmem:[#allocation2 + $0x14e8] sm:$0xff]  ;;  %v13788_v11 = vld [vmem:[#allocation2 + $0x14f8] sm:$0xff] }
 0xc3d   :  { %13699 = vmatmul.mubr.bf16.vlgmr.msra.gmra.mrb[152].mxu0 %v21245_v49  ;;  %13740 = vmatmul.mubr.bf16.vlgmr.msra.gmra.mrb[100].mxu1 %v21245_v49  ;;  %v13781_v49 = vld [vmem:[#allocation2 + $0x14c0] sm:$0xff] }
 0xc3e   :  { %13824 = vmatpush1.bf16.msra.mxu0 %v13757_v31  ;;  %13865 = vmatpush1.bf16.msra.mxu1 %v13759_v15  ;;  %v13785_v31 = vld [vmem:[#allocation2 + $0x14e0] sm:$0xff]  ;;  %v13787_v15 = vld [vmem:[#allocation2 + $0x14f0] sm:$0xff] }
 0xc3f   :  { %13825 = vmatprep.subr.bf16.mxu0 %v13766_v34  ;;  %13866 = vmatprep.subr.bf16.mxu1 %v13768_v44  ;;  %v13794_v34 = vld [vmem:[#allocation2 + $0x1528] sm:$0xff]  ;;  %v13796_v44 = vld [vmem:[#allocation2 + $0x1538] sm:$0xff] }
 0xc40   :  { %13855 = vmatprep.mubr.bf16.mxu0 %v18018_v25  ;;  %13896 = vmatprep.mubr.bf16.mxu1 %v18018_v25 }
 0xc42   :  { %13826 = vmatpush1.bf16.msra.mxu0 %v13765_v39  ;;  %13867 = vmatpush1.bf16.msra.mxu1 %v13767_v36  ;;  %v13793_v39 = vld [vmem:[#allocation2 + $0x1520] sm:$0xff]  ;;  %v13795_v36 = vld [vmem:[#allocation2 + $0x1530] sm:$0xff] }
 0xc43   :  { %13827 = vmatprep.subr.bf16.mxu0 %v13774_v42  ;;  %13868 = vmatprep.subr.bf16.mxu1 %v13776_v16  ;;  %v13802_v42 = vld [vmem:[#allocation2 + $0x1568] sm:$0xff]  ;;  %v13804_v16 = vld [vmem:[#allocation2 + $0x1578] sm:$0xff] }
 0xc46   :  { %13828 = vmatpush1.bf16.msra.mxu0 %v13773_v1  ;;  %13869 = vmatpush1.bf16.msra.mxu1 %v13775_v48  ;;  %v13801_v1 = vld [vmem:[#allocation2 + $0x1560] sm:$0xff]  ;;  %v13803_v48 = vld [vmem:[#allocation2 + $0x1570] sm:$0xff] }
 0xc47   :  { %13829 = vmatprep.subr.bf16.mxu0 %v13782_v46  ;;  %13870 = vmatprep.subr.bf16.mxu1 %v13784_v28 }
 0xc4a   :  { %13830 = vmatpush1.bf16.msra.mxu0 %v13781_v49  ;;  %13871 = vmatpush1.bf16.msra.mxu1 %v13783_v41  ;;  %v13810_v49 = vld [vmem:[#allocation2 + $0x15a8] sm:$0xff]  ;;  %v13812_v41 = vld [vmem:[#allocation2 + $0x15b8] sm:$0xff] }
 0xc4b   :  { %13831 = vmatprep.subr.bf16.mxu0 %v13790_v32  ;;  %13872 = vmatprep.subr.bf16.mxu1 %v13792_v53 }
 0xc4e   :  { %13832 = vmatpush1.bf16.msra.mxu0 %v13789_v33  ;;  %13873 = vmatpush1.bf16.msra.mxu1 %v13791_v59 }
 0xc4f   :  { %13833 = vmatprep.subr.bf16.mxu0 %v13798_v55  ;;  %13874 = vmatprep.subr.bf16.mxu1 %v13800_v40 }
 0xc50   :  { %v12983_v38 = vpop.f32.mrb[128].mxu0  ;;  %v13024_v8 = vpop.f32.mrb[76].mxu1 }
 0xc51   :  { %v21268_v62 = vadd.f32 %v12983_v38, %v21233_v21  ;;  %v21271_v52 = vadd.f32 %v13024_v8, %v21236_v14  ;;  %v12985_v63 = vpop.f32.mrb[129].mxu0  ;;  %v13026_v22 = vpop.f32.mrb[77].mxu1  ;;  %v13805_v21 = vld [vmem:[#allocation2 + $0x1580] sm:$0xff]  ;;  %v13814_v14 = vld [vmem:[#allocation2 + $0x15c8] sm:$0xff] }
 0xc52   :  { %v21274_v17 = vadd.f32 %v12985_v63, %v21239_v30  ;;  %v21277_v56 = vadd.f32 %v13026_v22, %v21242_v12  ;;  %v12987_v13 = vpop.f32.mrb[130].mxu0  ;;  %v13028_v57 = vpop.f32.mrb[78].mxu1  ;;  %13834 = vmatpush1.bf16.msra.mxu0 %v13797_v37  ;;  %13875 = vmatpush1.bf16.msra.mxu1 %v13799_v2  ;;  %v13813_v30 = vld [vmem:[#allocation2 + $0x15c0] sm:$0xff]  ;;  %v13762_v12 = vld [vmem:[#allocation2 + $0x1428] sm:$0xff]  ;;  %v13819_v63 = vld [vmem:[#allocation2 + $0x15f0] sm:$0xff] }
 0xc53   :  { %v12988_v5 = vpop.f32.mrb[131].mxu0  ;;  %v13029_v58 = vpop.f32.mrb[79].mxu1  ;;  %13835 = vmatprep.subr.bf16.mxu0 %v13806_v61  ;;  %13876 = vmatprep.subr.bf16.mxu1 %v13808_v45  ;;  %v13811_v61 = vld [vmem:[#allocation2 + $0x15b0] sm:$0xff]  ;;  %v13820_v45 = vld [vmem:[#allocation2 + $0x15f8] sm:$0xff]  ;;  %v13996_v13 = vld [vmem:[#allocation2 + $0x1600] sm:$0xff] }
 0xc54   :  { %v13999_v22 = vld [vmem:[#allocation2 + $0x1618] sm:$0xff]  ;;  %v13998_v57 = vld [vmem:[#allocation2 + $0x1610] sm:$0xff]  ;;  %v14005_v5 = vld [vmem:[#allocation2 + $0x1648] sm:$0xff] }
 0xc55   :  { %v14007_v58 = vld [vmem:[#allocation2 + $0x1658] sm:$0xff] }
 0xc56   :  { %13836 = vmatpush1.bf16.msra.mxu0 %v13805_v21  ;;  %13877 = vmatpush1.bf16.msra.mxu1 %v13807_v4  ;;  %v14004_v21 = vld [vmem:[#allocation2 + $0x1640] sm:$0xff]  ;;  %v14006_v4 = vld [vmem:[#allocation2 + $0x1650] sm:$0xff] }
 0xc57   :  { %13837 = vmatprep.subr.bf16.mxu0 %v13814_v14  ;;  %13878 = vmatprep.subr.bf16.mxu1 %v13816_v3  ;;  %v14013_v14 = vld [vmem:[#allocation2 + $0x1688] sm:$0xff]  ;;  %v14015_v3 = vld [vmem:[#allocation2 + $0x1698] sm:$0xff] }
 0xc5a   :  { %13838 = vmatpush1.bf16.msra.mxu0 %v13813_v30  ;;  %13879 = vmatpush1.bf16.msra.mxu1 %v13815_v60  ;;  %v14012_v30 = vld [vmem:[#allocation2 + $0x1680] sm:$0xff]  ;;  %v14014_v60 = vld [vmem:[#allocation2 + $0x1690] sm:$0xff] }
 0xc5b   :  { %13905 = vmatprep.subr.bf16.mxu0 %v13762_v12  ;;  %13946 = vmatprep.subr.bf16.mxu1 %v13764_v7  ;;  %v14021_v12 = vld [vmem:[#allocation2 + $0x16c8] sm:$0xff]  ;;  %v14023_v7 = vld [vmem:[#allocation2 + $0x16d8] sm:$0xff] }
 0xc5d   :  { %13856 = vmatmul.mubr.bf16.vlgmr.msra.gmra.mrb[156].mxu0 %v21280_v43  ;;  %13897 = vmatmul.mubr.bf16.vlgmr.msra.gmra.mrb[104].mxu1 %v21280_v43 }
 0xc5e   :  { %13906 = vmatpush1.bf16.msra.mxu0 %v13761_v35  ;;  %13947 = vmatpush1.bf16.msra.mxu1 %v13763_v0  ;;  %v14022_v35 = vld [vmem:[#allocation2 + $0x16d0] sm:$0xff]  ;;  %v14029_v0 = vld [vmem:[#allocation2 + $0x1708] sm:$0xff] }
 0xc5f   :  { %13907 = vmatprep.subr.bf16.mxu0 %v13770_v47  ;;  %13948 = vmatprep.subr.bf16.mxu1 %v13772_v18  ;;  %v14031_v47 = vld [vmem:[#allocation2 + $0x1718] sm:$0xff]  ;;  %v14028_v18 = vld [vmem:[#allocation2 + $0x1700] sm:$0xff] }
 0xc60   :  { %13937 = vmatprep.mubr.bf16.mxu0 %v18018_v25  ;;  %13978 = vmatprep.mubr.bf16.mxu1 %v18018_v25 }
 0xc62   :  { %13908 = vmatpush1.bf16.msra.mxu0 %v13769_v20  ;;  %13949 = vmatpush1.bf16.msra.mxu1 %v13771_v19  ;;  %v14030_v20 = vld [vmem:[#allocation2 + $0x1710] sm:$0xff]  ;;  %v14037_v19 = vld [vmem:[#allocation2 + $0x1748] sm:$0xff] }
 0xc63   :  { %13909 = vmatprep.subr.bf16.mxu0 %v13778_v27  ;;  %13950 = vmatprep.subr.bf16.mxu1 %v13780_v26  ;;  %v14039_v27 = vld [vmem:[#allocation2 + $0x1758] sm:$0xff]  ;;  %v14036_v26 = vld [vmem:[#allocation2 + $0x1740] sm:$0xff] }
 0xc66   :  { %13910 = vmatpush1.bf16.msra.mxu0 %v13777_v29  ;;  %13951 = vmatpush1.bf16.msra.mxu1 %v13779_v10  ;;  %v14038_v29 = vld [vmem:[#allocation2 + $0x1750] sm:$0xff] }
 0xc67   :  { %13911 = vmatprep.subr.bf16.mxu0 %v13786_v50  ;;  %13952 = vmatprep.subr.bf16.mxu1 %v13788_v11  ;;  %v14045_v11 = vld [vmem:[#allocation2 + $0x1788] sm:$0xff] }
 0xc6a   :  { %13912 = vmatpush1.bf16.msra.mxu0 %v13785_v31  ;;  %13953 = vmatpush1.bf16.msra.mxu1 %v13787_v15  ;;  %v14047_v31 = vld [vmem:[#allocation2 + $0x1798] sm:$0xff] }
 0xc6b   :  { %13913 = vmatprep.subr.bf16.mxu0 %v13794_v34  ;;  %13954 = vmatprep.subr.bf16.mxu1 %v13796_v44 }
 0xc6e   :  { %13914 = vmatpush1.bf16.msra.mxu0 %v13793_v39  ;;  %13955 = vmatpush1.bf16.msra.mxu1 %v13795_v36 }
 0xc6f   :  { %13915 = vmatprep.subr.bf16.mxu0 %v13802_v42  ;;  %13956 = vmatprep.subr.bf16.mxu1 %v13804_v16 }
 0xc70   :  { %v13140_v46 = vpop.f32.mrb[132].mxu0  ;;  %v13181_v28 = vpop.f32.mrb[80].mxu1 }
 0xc71   :  { %v21287_v32 = vadd.f32 %v13140_v46, %v21252_v9  ;;  %v21290_v53 = vadd.f32 %v13181_v28, %v21255_v6  ;;  %v13142_v33 = vpop.f32.mrb[133].mxu0  ;;  %v13183_v59 = vpop.f32.mrb[81].mxu1  ;;  %v13809_v9 = vld [vmem:[#allocation2 + $0x15a0] sm:$0xff]  ;;  %v13818_v6 = vld [vmem:[#allocation2 + $0x15e8] sm:$0xff]  ;;  %v14046_v28 = vld [vmem:[#allocation2 + $0x1790] sm:$0xff] }
 0xc72   :  { %v21293_v55 = vadd.f32 %v13142_v33, %v21258_v51  ;;  %v21296_v40 = vadd.f32 %v13183_v59, %v21261_v23  ;;  %v13144_v37 = vpop.f32.mrb[134].mxu0  ;;  %v13185_v2 = vpop.f32.mrb[82].mxu1  ;;  %13916 = vmatpush1.bf16.msra.mxu0 %v13801_v1  ;;  %13957 = vmatpush1.bf16.msra.mxu1 %v13803_v48  ;;  %v13817_v51 = vld [vmem:[#allocation2 + $0x15e0] sm:$0xff]  ;;  %v13997_v23 = vld [vmem:[#allocation2 + $0x1608] sm:$0xff]  ;;  %v14003_v33 = vld [vmem:[#allocation2 + $0x1638] sm:$0xff]  ;;  %v21315_v59 = vrot.slane %v21210_v54, 3 }
 0xc73   :  { %v13145_v38 = vpop.f32.mrb[135].mxu0  ;;  %v13186_v8 = vpop.f32.mrb[83].mxu1  ;;  %13917 = vmatprep.subr.bf16.mxu0 %v13810_v49  ;;  %13958 = vmatprep.subr.bf16.mxu1 %v13812_v41  ;;  %v14055_v49 = vld [vmem:[#allocation2 + $0x17d8] sm:$0xff]  ;;  %v14054_v41 = vld [vmem:[#allocation2 + $0x17d0] sm:$0xff]  ;;  %v14000_v37 = vld [vmem:[#allocation2 + $0x1620] sm:$0xff] }
 0xc74   :  { %v14002_v2 = vld [vmem:[#allocation2 + $0x1630] sm:$0xff]  ;;  %v14009_v38 = vld [vmem:[#allocation2 + $0x1668] sm:$0xff]  ;;  %v14011_v8 = vld [vmem:[#allocation2 + $0x1678] sm:$0xff] }
 0xc75   :  { %v14017_v54 = vld [vmem:[#allocation2 + $0x16a8] sm:$0xff] }
 0xc76   :  { %13918 = vmatpush1.bf16.msra.mxu0 %v13809_v9  ;;  %13959 = vmatpush1.bf16.msra.mxu1 %v13811_v61  ;;  %v14008_v9 = vld [vmem:[#allocation2 + $0x1660] sm:$0xff]  ;;  %v14010_v61 = vld [vmem:[#allocation2 + $0x1670] sm:$0xff] }
 0xc77   :  { %13919 = vmatprep.subr.bf16.mxu0 %v13818_v6  ;;  %13960 = vmatprep.subr.bf16.mxu1 %v13820_v45  ;;  %v14019_v6 = vld [vmem:[#allocation2 + $0x16b8] sm:$0xff]  ;;  %v14016_v45 = vld [vmem:[#allocation2 + $0x16a0] sm:$0xff] }
 0xc7a   :  { %13920 = vmatpush1.bf16.msra.mxu0 %v13817_v51  ;;  %13961 = vmatpush1.bf16.msra.mxu1 %v13819_v63  ;;  %v14018_v51 = vld [vmem:[#allocation2 + $0x16b0] sm:$0xff]  ;;  %v14025_v63 = vld [vmem:[#allocation2 + $0x16e8] sm:$0xff] }
 0xc7b   :  { %14062 = vmatprep.subr.bf16.mxu0 %v13997_v23  ;;  %14103 = vmatprep.subr.bf16.mxu1 %v13999_v22  ;;  %v14027_v23 = vld [vmem:[#allocation2 + $0x16f8] sm:$0xff]  ;;  %v14024_v22 = vld [vmem:[#allocation2 + $0x16e0] sm:$0xff] }
 0xc7d   :  { %13938 = vmatmul.mubr.bf16.vlgmr.msra.gmra.mrb[160].mxu0 %v21280_v43  ;;  %13979 = vmatmul.mubr.bf16.vlgmr.msra.gmra.mrb[108].mxu1 %v21280_v43  ;;  %v14020_v43 = vld [vmem:[#allocation2 + $0x16c0] sm:$0xff] }
 0xc7e   :  { %14063 = vmatpush1.bf16.msra.mxu0 %v13996_v13  ;;  %14104 = vmatpush1.bf16.msra.mxu1 %v13998_v57  ;;  %v14026_v13 = vld [vmem:[#allocation2 + $0x16f0] sm:$0xff]  ;;  %v14033_v57 = vld [vmem:[#allocation2 + $0x1728] sm:$0xff] }
 0xc7f   :  { %14064 = vmatprep.subr.bf16.mxu0 %v14005_v5  ;;  %14105 = vmatprep.subr.bf16.mxu1 %v14007_v58  ;;  %v14035_v5 = vld [vmem:[#allocation2 + $0x1738] sm:$0xff]  ;;  %v14032_v58 = vld [vmem:[#allocation2 + $0x1720] sm:$0xff] }
 0xc80   :  { %14094 = vmatprep.mubr.bf16.mxu0 %v18018_v25  ;;  %14135 = vmatprep.mubr.bf16.mxu1 %v18018_v25 }
 0xc82   :  { %14065 = vmatpush1.bf16.msra.mxu0 %v14004_v21  ;;  %14106 = vmatpush1.bf16.msra.mxu1 %v14006_v4  ;;  %v14034_v21 = vld [vmem:[#allocation2 + $0x1730] sm:$0xff]  ;;  %v14041_v4 = vld [vmem:[#allocation2 + $0x1768] sm:$0xff] }
 0xc83   :  { %14066 = vmatprep.subr.bf16.mxu0 %v14013_v14  ;;  %14107 = vmatprep.subr.bf16.mxu1 %v14015_v3  ;;  %v14043_v14 = vld [vmem:[#allocation2 + $0x1778] sm:$0xff]  ;;  %v14040_v3 = vld [vmem:[#allocation2 + $0x1760] sm:$0xff] }
 0xc86   :  { %14067 = vmatpush1.bf16.msra.mxu0 %v14012_v30  ;;  %14108 = vmatpush1.bf16.msra.mxu1 %v14014_v60  ;;  %v14042_v30 = vld [vmem:[#allocation2 + $0x1770] sm:$0xff] }
 0xc87   :  { %14068 = vmatprep.subr.bf16.mxu0 %v14021_v12  ;;  %14109 = vmatprep.subr.bf16.mxu1 %v14023_v7  ;;  %v14049_v7 = vld [vmem:[#allocation2 + $0x17a8] sm:$0xff] }
 0xc8a   :  { %14069 = vmatpush1.bf16.msra.mxu0 %v14020_v43  ;;  %14110 = vmatpush1.bf16.msra.mxu1 %v14022_v35  ;;  %v14051_v43 = vld [vmem:[#allocation2 + $0x17b8] sm:$0xff] }
 0xc8b   :  { %14070 = vmatprep.subr.bf16.mxu0 %v14029_v0  ;;  %14111 = vmatprep.subr.bf16.mxu1 %v14031_v47 }
 0xc8e   :  { %14071 = vmatpush1.bf16.msra.mxu0 %v14028_v18  ;;  %14112 = vmatpush1.bf16.msra.mxu1 %v14030_v20 }
 0xc8f   :  { %14072 = vmatprep.subr.bf16.mxu0 %v14037_v19  ;;  %14113 = vmatprep.subr.bf16.mxu1 %v14039_v27 }
 0xc90   :  { %v13222_v10 = vpop.f32.mrb[136].mxu0  ;;  %v13263_v50 = vpop.f32.mrb[84].mxu1 }
 0xc91   :  { %v21303_v15 = vadd.f32 %v13222_v10, %v21268_v62  ;;  %v21306_v34 = vadd.f32 %v13263_v50, %v21271_v52  ;;  %v13224_v44 = vpop.f32.mrb[137].mxu0  ;;  %v13265_v39 = vpop.f32.mrb[85].mxu1  ;;  %v14044_v62 = vld [vmem:[#allocation2 + $0x1780] sm:$0xff]  ;;  %v14053_v52 = vld [vmem:[#allocation2 + $0x17c8] sm:$0xff]  ;;  %v14050_v50 = vld [vmem:[#allocation2 + $0x17b0] sm:$0xff] }
 0xc92   :  { %v21309_v36 = vadd.f32 %v13224_v44, %v21274_v17  ;;  %v21312_v42 = vadd.f32 %v13265_v39, %v21277_v56  ;;  %v13226_v16 = vpop.f32.mrb[138].mxu0  ;;  %v13267_v1 = vpop.f32.mrb[86].mxu1  ;;  %14073 = vmatpush1.bf16.msra.mxu0 %v14036_v26  ;;  %14114 = vmatpush1.bf16.msra.mxu1 %v14038_v29  ;;  %v14052_v17 = vld [vmem:[#allocation2 + $0x17c0] sm:$0xff]  ;;  %v14001_v56 = vld [vmem:[#allocation2 + $0x1628] sm:$0xff]  ;;  %v14239_v44 = vld [vmem:[#allocation2 + $0x1818] sm:$0xff] }
 0xc93   :  { %v13227_v48 = vpop.f32.mrb[139].mxu0  ;;  %v13268_v46 = vpop.f32.mrb[87].mxu1  ;;  %14074 = vmatprep.subr.bf16.mxu0 %v14045_v11  ;;  %14115 = vmatprep.subr.bf16.mxu1 %v14047_v31  ;;  %v14059_v11 = vld [vmem:[#allocation2 + $0x17f8] sm:$0xff]  ;;  %v14058_v31 = vld [vmem:[#allocation2 + $0x17f0] sm:$0xff]  ;;  %v14236_v39 = vld [vmem:[#allocation2 + $0x1800] sm:$0xff] }
 0xc94   :  { %v14238_v16 = vld [vmem:[#allocation2 + $0x1810] sm:$0xff]  ;;  %v14245_v1 = vld [vmem:[#allocation2 + $0x1848] sm:$0xff]  ;;  %v14247_v48 = vld [vmem:[#allocation2 + $0x1858] sm:$0xff] }
 0xc95   :  { %v14244_v46 = vld [vmem:[#allocation2 + $0x1840] sm:$0xff] }
 0xc96   :  { %14075 = vmatpush1.bf16.msra.mxu0 %v14044_v62  ;;  %14116 = vmatpush1.bf16.msra.mxu1 %v14046_v28  ;;  %v14246_v62 = vld [vmem:[#allocation2 + $0x1850] sm:$0xff]  ;;  %v14253_v28 = vld [vmem:[#allocation2 + $0x1888] sm:$0xff] }
 0xc97   :  { %14076 = vmatprep.subr.bf16.mxu0 %v14053_v52  ;;  %14117 = vmatprep.subr.bf16.mxu1 %v14055_v49  ;;  %v14255_v52 = vld [vmem:[#allocation2 + $0x1898] sm:$0xff]  ;;  %v14252_v49 = vld [vmem:[#allocation2 + $0x1880] sm:$0xff] }
 0xc9a   :  { %14077 = vmatpush1.bf16.msra.mxu0 %v14052_v17  ;;  %14118 = vmatpush1.bf16.msra.mxu1 %v14054_v41  ;;  %v14254_v17 = vld [vmem:[#allocation2 + $0x1890] sm:$0xff]  ;;  %v14261_v41 = vld [vmem:[#allocation2 + $0x18c8] sm:$0xff] }
 0xc9b   :  { %14144 = vmatprep.subr.bf16.mxu0 %v14001_v56  ;;  %14185 = vmatprep.subr.bf16.mxu1 %v14003_v33  ;;  %v14263_v56 = vld [vmem:[#allocation2 + $0x18d8] sm:$0xff]  ;;  %v14260_v33 = vld [vmem:[#allocation2 + $0x18c0] sm:$0xff] }
 0xc9d   :  { %14095 = vmatmul.mubr.bf16.vlgmr.msra.gmra.mrb[164].mxu0 %v21315_v59  ;;  %14136 = vmatmul.mubr.bf16.vlgmr.msra.gmra.mrb[112].mxu1 %v21315_v59 }
 0xc9e   :  { %14145 = vmatpush1.bf16.msra.mxu0 %v14000_v37  ;;  %14186 = vmatpush1.bf16.msra.mxu1 %v14002_v2  ;;  %v14269_v37 = vld [vmem:[#allocation2 + $0x1908] sm:$0xff]  ;;  %v14271_v2 = vld [vmem:[#allocation2 + $0x1918] sm:$0xff] }
 0xc9f   :  { %14146 = vmatprep.subr.bf16.mxu0 %v14009_v38  ;;  %14187 = vmatprep.subr.bf16.mxu1 %v14011_v8  ;;  %v14268_v38 = vld [vmem:[#allocation2 + $0x1900] sm:$0xff]  ;;  %v14270_v8 = vld [vmem:[#allocation2 + $0x1910] sm:$0xff] }
 0xca0   :  { %14176 = vmatprep.mubr.bf16.mxu0 %v18018_v25  ;;  %14217 = vmatprep.mubr.bf16.mxu1 %v18018_v25 }
 0xca2   :  { %14147 = vmatpush1.bf16.msra.mxu0 %v14008_v9  ;;  %14188 = vmatpush1.bf16.msra.mxu1 %v14010_v61  ;;  %v14277_v9 = vld [vmem:[#allocation2 + $0x1948] sm:$0xff]  ;;  %v14279_v61 = vld [vmem:[#allocation2 + $0x1958] sm:$0xff] }
 0xca3   :  { %14148 = vmatprep.subr.bf16.mxu0 %v14017_v54  ;;  %14189 = vmatprep.subr.bf16.mxu1 %v14019_v6  ;;  %v14276_v54 = vld [vmem:[#allocation2 + $0x1940] sm:$0xff]  ;;  %v14278_v6 = vld [vmem:[#allocation2 + $0x1950] sm:$0xff] }
 0xca6   :  { %14149 = vmatpush1.bf16.msra.mxu0 %v14016_v45  ;;  %14190 = vmatpush1.bf16.msra.mxu1 %v14018_v51 }
 0xca7   :  { %14150 = vmatprep.subr.bf16.mxu0 %v14025_v63  ;;  %14191 = vmatprep.subr.bf16.mxu1 %v14027_v23  ;;  %v14285_v63 = vld [vmem:[#allocation2 + $0x1988] sm:$0xff]  ;;  %v14287_v23 = vld [vmem:[#allocation2 + $0x1998] sm:$0xff] }
 0xcaa   :  { %14151 = vmatpush1.bf16.msra.mxu0 %v14024_v22  ;;  %14192 = vmatpush1.bf16.msra.mxu1 %v14026_v13 }
 0xcab   :  { %14152 = vmatprep.subr.bf16.mxu0 %v14033_v57  ;;  %14193 = vmatprep.subr.bf16.mxu1 %v14035_v5 }
 0xcae   :  { %14153 = vmatpush1.bf16.msra.mxu0 %v14032_v58  ;;  %14194 = vmatpush1.bf16.msra.mxu1 %v14034_v21 }
 0xcaf   :  { %14154 = vmatprep.subr.bf16.mxu0 %v14041_v4  ;;  %14195 = vmatprep.subr.bf16.mxu1 %v14043_v14 }
 0xcb0   :  { %v13378_v60 = vpop.f32.mrb[140].mxu0  ;;  %v13419_v12 = vpop.f32.mrb[88].mxu1 }
 0xcb1   :  { %v21322_v35 = vadd.f32 %v13378_v60, %v21287_v32  ;;  %v21325_v0 = vadd.f32 %v13419_v12, %v21290_v53  ;;  %v13380_v47 = vpop.f32.mrb[141].mxu0  ;;  %v13421_v18 = vpop.f32.mrb[89].mxu1  ;;  %v14048_v32 = vld [vmem:[#allocation2 + $0x17a0] sm:$0xff]  ;;  %v14057_v53 = vld [vmem:[#allocation2 + $0x17e8] sm:$0xff]  ;;  %v14286_v60 = vld [vmem:[#allocation2 + $0x1990] sm:$0xff] }
 0xcb2   :  { %v21328_v20 = vadd.f32 %v13380_v47, %v21293_v55  ;;  %v21331_v19 = vadd.f32 %v13421_v18, %v21296_v40  ;;  %v13382_v27 = vpop.f32.mrb[142].mxu0  ;;  %v13423_v26 = vpop.f32.mrb[90].mxu1  ;;  %14155 = vmatpush1.bf16.msra.mxu0 %v14040_v3  ;;  %14196 = vmatpush1.bf16.msra.mxu1 %v14042_v30  ;;  %v14056_v55 = vld [vmem:[#allocation2 + $0x17e0] sm:$0xff]  ;;  %v14237_v40 = vld [vmem:[#allocation2 + $0x1808] sm:$0xff]  ;;  %v14295_v12 = vld [vmem:[#allocation2 + $0x19d8] sm:$0xff]  ;;  %v21351_v47 = vpack.c.bf16 %v21002_v24, %v21002_v24 }
 0xcb3   :  { %v13383_v29 = vpop.f32.mrb[143].mxu0  ;;  %v13424_v10 = vpop.f32.mrb[91].mxu1  ;;  %14156 = vmatprep.subr.bf16.mxu0 %v14049_v7  ;;  %14197 = vmatprep.subr.bf16.mxu1 %v14051_v43  ;;  %v14294_v7 = vld [vmem:[#allocation2 + $0x19d0] sm:$0xff]  ;;  %v14243_v43 = vld [vmem:[#allocation2 + $0x1838] sm:$0xff]  ;;  %v14240_v18 = vld [vmem:[#allocation2 + $0x1820] sm:$0xff] }
 0xcb4   :  { %v14242_v27 = vld [vmem:[#allocation2 + $0x1830] sm:$0xff]  ;;  %v14249_v26 = vld [vmem:[#allocation2 + $0x1868] sm:$0xff]  ;;  %v14251_v29 = vld [vmem:[#allocation2 + $0x1878] sm:$0xff] }
 0xcb5   :  { %v14248_v10 = vld [vmem:[#allocation2 + $0x1860] sm:$0xff]  ;;  %v14257_v24 = vld [vmem:[#allocation2 + $0x18a8] sm:$0xff] }
 0xcb6   :  { %14157 = vmatpush1.bf16.msra.mxu0 %v14048_v32  ;;  %14198 = vmatpush1.bf16.msra.mxu1 %v14050_v50  ;;  %v14250_v32 = vld [vmem:[#allocation2 + $0x1870] sm:$0xff]  ;;  %v14259_v50 = vld [vmem:[#allocation2 + $0x18b8] sm:$0xff] }
 0xcb7   :  { %14158 = vmatprep.subr.bf16.mxu0 %v14057_v53  ;;  %14199 = vmatprep.subr.bf16.mxu1 %v14059_v11  ;;  %v14256_v53 = vld [vmem:[#allocation2 + $0x18a0] sm:$0xff]  ;;  %v14258_v11 = vld [vmem:[#allocation2 + $0x18b0] sm:$0xff] }
 0xcba   :  { %14159 = vmatpush1.bf16.msra.mxu0 %v14056_v55  ;;  %14200 = vmatpush1.bf16.msra.mxu1 %v14058_v31  ;;  %v14265_v55 = vld [vmem:[#allocation2 + $0x18e8] sm:$0xff]  ;;  %v14267_v31 = vld [vmem:[#allocation2 + $0x18f8] sm:$0xff] }
 0xcbb   :  { %14300 = vmatprep.subr.bf16.mxu0 %v14237_v40  ;;  %14341 = vmatprep.subr.bf16.mxu1 %v14239_v44  ;;  %v14264_v40 = vld [vmem:[#allocation2 + $0x18e0] sm:$0xff]  ;;  %v14266_v44 = vld [vmem:[#allocation2 + $0x18f0] sm:$0xff] }
 0xcbd   :  { %14177 = vmatmul.mubr.bf16.vlgmr.msra.gmra.mrb[168].mxu0 %v21315_v59  ;;  %14218 = vmatmul.mubr.bf16.vlgmr.msra.gmra.mrb[116].mxu1 %v21315_v59  ;;  %v14262_v59 = vld [vmem:[#allocation2 + $0x18d0] sm:$0xff] }
 0xcbe   :  { %14301 = vmatpush1.bf16.msra.mxu0 %v14236_v39  ;;  %14342 = vmatpush1.bf16.msra.mxu1 %v14238_v16  ;;  %v14273_v39 = vld [vmem:[#allocation2 + $0x1928] sm:$0xff]  ;;  %v14275_v16 = vld [vmem:[#allocation2 + $0x1938] sm:$0xff] }
 0xcbf   :  { %14302 = vmatprep.subr.bf16.mxu0 %v14245_v1  ;;  %14343 = vmatprep.subr.bf16.mxu1 %v14247_v48  ;;  %v14272_v1 = vld [vmem:[#allocation2 + $0x1920] sm:$0xff]  ;;  %v14274_v48 = vld [vmem:[#allocation2 + $0x1930] sm:$0xff] }
 0xcc0   :  { %14332 = vmatprep.mubr.bf16.mxu0 %v18018_v25  ;;  %14373 = vmatprep.mubr.bf16.mxu1 %v18018_v25 }
 0xcc2   :  { %14303 = vmatpush1.bf16.msra.mxu0 %v14244_v46  ;;  %14344 = vmatpush1.bf16.msra.mxu1 %v14246_v62  ;;  %v14281_v46 = vld [vmem:[#allocation2 + $0x1968] sm:$0xff]  ;;  %v14283_v62 = vld [vmem:[#allocation2 + $0x1978] sm:$0xff] }
 0xcc3   :  { %14304 = vmatprep.subr.bf16.mxu0 %v14253_v28  ;;  %14345 = vmatprep.subr.bf16.mxu1 %v14255_v52  ;;  %v14280_v28 = vld [vmem:[#allocation2 + $0x1960] sm:$0xff]  ;;  %v14282_v52 = vld [vmem:[#allocation2 + $0x1970] sm:$0xff] }
 0xcc6   :  { %14305 = vmatpush1.bf16.msra.mxu0 %v14252_v49  ;;  %14346 = vmatpush1.bf16.msra.mxu1 %v14254_v17 }
 0xcc7   :  { %14306 = vmatprep.subr.bf16.mxu0 %v14261_v41  ;;  %14347 = vmatprep.subr.bf16.mxu1 %v14263_v56  ;;  %v14289_v41 = vld [vmem:[#allocation2 + $0x19a8] sm:$0xff]  ;;  %v14291_v56 = vld [vmem:[#allocation2 + $0x19b8] sm:$0xff] }
 0xcca   :  { %14307 = vmatpush1.bf16.msra.mxu0 %v14260_v33  ;;  %14348 = vmatpush1.bf16.msra.mxu1 %v14262_v59 }
 0xccb   :  { %14308 = vmatprep.subr.bf16.mxu0 %v14269_v37  ;;  %14349 = vmatprep.subr.bf16.mxu1 %v14271_v2 }
 0xcce   :  { %14309 = vmatpush1.bf16.msra.mxu0 %v14268_v38  ;;  %14350 = vmatpush1.bf16.msra.mxu1 %v14270_v8 }
 0xccf   :  { %14310 = vmatprep.subr.bf16.mxu0 %v14277_v9  ;;  %14351 = vmatprep.subr.bf16.mxu1 %v14279_v61 }
 0xcd0   :  { %v13460_v45 = vpop.f32.mrb[144].mxu0  ;;  %v13501_v51 = vpop.f32.mrb[92].mxu1 }
 0xcd1   :  { %v21338_v22 = vadd.f32 %v13460_v45, %v21303_v15  ;;  %v21341_v13 = vadd.f32 %v13501_v51, %v21306_v34  ;;  %v13462_v57 = vpop.f32.mrb[145].mxu0  ;;  %v13503_v5 = vpop.f32.mrb[93].mxu1  ;;  %v14284_v15 = vld [vmem:[#allocation2 + $0x1980] sm:$0xff]  ;;  %v14293_v34 = vld [vmem:[#allocation2 + $0x19c8] sm:$0xff]  ;;  %v14290_v45 = vld [vmem:[#allocation2 + $0x19b0] sm:$0xff] }
 0xcd2   :  { %v21344_v58 = vadd.f32 %v13462_v57, %v21309_v36  ;;  %v21347_v21 = vadd.f32 %v13503_v5, %v21312_v42  ;;  %v13464_v4 = vpop.f32.mrb[146].mxu0  ;;  %v13505_v14 = vpop.f32.mrb[94].mxu1  ;;  %14311 = vmatpush1.bf16.msra.mxu0 %v14276_v54  ;;  %14352 = vmatpush1.bf16.msra.mxu1 %v14278_v6  ;;  %v14292_v36 = vld [vmem:[#allocation2 + $0x19c0] sm:$0xff]  ;;  %v14241_v42 = vld [vmem:[#allocation2 + $0x1828] sm:$0xff]  ;;  %v14299_v51 = vld [vmem:[#allocation2 + $0x19f8] sm:$0xff] }
 0xcd3   :  { %v13465_v3 = vpop.f32.mrb[147].mxu0  ;;  %v13506_v30 = vpop.f32.mrb[95].mxu1  ;;  %14312 = vmatprep.subr.bf16.mxu0 %v14285_v63  ;;  %14353 = vmatprep.subr.bf16.mxu1 %v14287_v23  ;;  %v14298_v63 = vld [vmem:[#allocation2 + $0x19f0] sm:$0xff]  ;;  %v14476_v23 = vld [vmem:[#allocation2 + $0x1a18] sm:$0xff]  ;;  %v14473_v57 = vld [vmem:[#allocation2 + $0x1a00] sm:$0xff] }
 0xcd4   :  { %v14475_v5 = vld [vmem:[#allocation2 + $0x1a10] sm:$0xff]  ;;  %v14482_v4 = vld [vmem:[#allocation2 + $0x1a48] sm:$0xff]  ;;  %v14484_v14 = vld [vmem:[#allocation2 + $0x1a58] sm:$0xff] }
 0xcd5   :  { %v14481_v3 = vld [vmem:[#allocation2 + $0x1a40] sm:$0xff]  ;;  %v14483_v30 = vld [vmem:[#allocation2 + $0x1a50] sm:$0xff] }
 0xcd6   :  { %14313 = vmatpush1.bf16.msra.mxu0 %v14284_v15  ;;  %14354 = vmatpush1.bf16.msra.mxu1 %v14286_v60  ;;  %v14490_v15 = vld [vmem:[#allocation2 + $0x1a88] sm:$0xff]  ;;  %v14492_v60 = vld [vmem:[#allocation2 + $0x1a98] sm:$0xff] }
 0xcd7   :  { %14314 = vmatprep.subr.bf16.mxu0 %v14293_v34  ;;  %14355 = vmatprep.subr.bf16.mxu1 %v14295_v12  ;;  %v14489_v34 = vld [vmem:[#allocation2 + $0x1a80] sm:$0xff]  ;;  %v14491_v12 = vld [vmem:[#allocation2 + $0x1a90] sm:$0xff] }
 0xcda   :  { %14315 = vmatpush1.bf16.msra.mxu0 %v14292_v36  ;;  %14356 = vmatpush1.bf16.msra.mxu1 %v14294_v7  ;;  %v14498_v36 = vld [vmem:[#allocation2 + $0x1ac8] sm:$0xff]  ;;  %v14500_v7 = vld [vmem:[#allocation2 + $0x1ad8] sm:$0xff] }
 0xcdb   :  { %14382 = vmatprep.subr.bf16.mxu0 %v14241_v42  ;;  %14423 = vmatprep.subr.bf16.mxu1 %v14243_v43  ;;  %v14497_v42 = vld [vmem:[#allocation2 + $0x1ac0] sm:$0xff]  ;;  %v14499_v43 = vld [vmem:[#allocation2 + $0x1ad0] sm:$0xff] }
 0xcdd   :  { %14333 = vmatmul.mubr.bf16.vlgmr.msra.gmra.mrb[172].mxu0 %v21351_v47  ;;  %14374 = vmatmul.mubr.bf16.vlgmr.msra.gmra.mrb[120].mxu1 %v21351_v47 }
 0xcde   :  { %14383 = vmatpush1.bf16.msra.mxu0 %v14240_v18  ;;  %14424 = vmatpush1.bf16.msra.mxu1 %v14242_v27  ;;  %v14506_v18 = vld [vmem:[#allocation2 + $0x1b08] sm:$0xff]  ;;  %v14508_v27 = vld [vmem:[#allocation2 + $0x1b18] sm:$0xff] }
 0xcdf   :  { %14384 = vmatprep.subr.bf16.mxu0 %v14249_v26  ;;  %14425 = vmatprep.subr.bf16.mxu1 %v14251_v29  ;;  %v14505_v26 = vld [vmem:[#allocation2 + $0x1b00] sm:$0xff]  ;;  %v14507_v29 = vld [vmem:[#allocation2 + $0x1b10] sm:$0xff] }
 0xce0   :  { %14414 = vmatprep.mubr.bf16.mxu0 %v18018_v25  ;;  %14455 = vmatprep.mubr.bf16.mxu1 %v18018_v25 }
 0xce2   :  { %14385 = vmatpush1.bf16.msra.mxu0 %v14248_v10  ;;  %14426 = vmatpush1.bf16.msra.mxu1 %v14250_v32  ;;  %v14514_v10 = vld [vmem:[#allocation2 + $0x1b48] sm:$0xff]  ;;  %v14516_v32 = vld [vmem:[#allocation2 + $0x1b58] sm:$0xff] }
 0xce3   :  { %14386 = vmatprep.subr.bf16.mxu0 %v14257_v24  ;;  %14427 = vmatprep.subr.bf16.mxu1 %v14259_v50  ;;  %v14513_v24 = vld [vmem:[#allocation2 + $0x1b40] sm:$0xff]  ;;  %v14515_v50 = vld [vmem:[#allocation2 + $0x1b50] sm:$0xff] }
 0xce6   :  { %14387 = vmatpush1.bf16.msra.mxu0 %v14256_v53  ;;  %14428 = vmatpush1.bf16.msra.mxu1 %v14258_v11 }
 0xce7   :  { %14388 = vmatprep.subr.bf16.mxu0 %v14265_v55  ;;  %14429 = vmatprep.subr.bf16.mxu1 %v14267_v31  ;;  %v14522_v55 = vld [vmem:[#allocation2 + $0x1b88] sm:$0xff]  ;;  %v14524_v31 = vld [vmem:[#allocation2 + $0x1b98] sm:$0xff] }
 0xcea   :  { %14389 = vmatpush1.bf16.msra.mxu0 %v14264_v40  ;;  %14430 = vmatpush1.bf16.msra.mxu1 %v14266_v44 }
 0xceb   :  { %14390 = vmatprep.subr.bf16.mxu0 %v14273_v39  ;;  %14431 = vmatprep.subr.bf16.mxu1 %v14275_v16 }
 0xcee   :  { %14391 = vmatpush1.bf16.msra.mxu0 %v14272_v1  ;;  %14432 = vmatpush1.bf16.msra.mxu1 %v14274_v48 }
 0xcef   :  { %14392 = vmatprep.subr.bf16.mxu0 %v14281_v46  ;;  %14433 = vmatprep.subr.bf16.mxu1 %v14283_v62 }
 0xcf0   :  { %v13618_v49 = vpop.f32.mrb[148].mxu0  ;;  %v13659_v17 = vpop.f32.mrb[96].mxu1 }
 0xcf1   :  { %v21358_v33 = vadd.f32 %v13618_v49, %v21322_v35  ;;  %v21361_v59 = vadd.f32 %v13659_v17, %v21325_v0  ;;  %v13620_v37 = vpop.f32.mrb[149].mxu0  ;;  %v13661_v2 = vpop.f32.mrb[97].mxu1  ;;  %v14288_v35 = vld [vmem:[#allocation2 + $0x19a0] sm:$0xff]  ;;  %v14297_v0 = vld [vmem:[#allocation2 + $0x19e8] sm:$0xff]  ;;  %v14523_v49 = vld [vmem:[#allocation2 + $0x1b90] sm:$0xff] }
 0xcf2   :  { %v21364_v38 = vadd.f32 %v13620_v37, %v21328_v20  ;;  %v21367_v8 = vadd.f32 %v13661_v2, %v21331_v19  ;;  %v13622_v9 = vpop.f32.mrb[150].mxu0  ;;  %v13663_v61 = vpop.f32.mrb[98].mxu1  ;;  %14393 = vmatpush1.bf16.msra.mxu0 %v14280_v28  ;;  %14434 = vmatpush1.bf16.msra.mxu1 %v14282_v52  ;;  %v14296_v20 = vld [vmem:[#allocation2 + $0x19e0] sm:$0xff]  ;;  %v14474_v19 = vld [vmem:[#allocation2 + $0x1a08] sm:$0xff]  ;;  %v14532_v17 = vld [vmem:[#allocation2 + $0x1bd8] sm:$0xff]  ;;  %v21386_v37 = vrot.slane %v21351_v47, 1 }
 0xcf3   :  { %v13623_v54 = vpop.f32.mrb[151].mxu0  ;;  %v13664_v6 = vpop.f32.mrb[99].mxu1  ;;  %14394 = vmatprep.subr.bf16.mxu0 %v14289_v41  ;;  %14435 = vmatprep.subr.bf16.mxu1 %v14291_v56  ;;  %v14531_v41 = vld [vmem:[#allocation2 + $0x1bd0] sm:$0xff]  ;;  %v14480_v56 = vld [vmem:[#allocation2 + $0x1a38] sm:$0xff]  ;;  %v14477_v2 = vld [vmem:[#allocation2 + $0x1a20] sm:$0xff] }
 0xcf4   :  { %v14479_v9 = vld [vmem:[#allocation2 + $0x1a30] sm:$0xff]  ;;  %v14486_v61 = vld [vmem:[#allocation2 + $0x1a68] sm:$0xff]  ;;  %v14488_v54 = vld [vmem:[#allocation2 + $0x1a78] sm:$0xff] }
 0xcf5   :  { %v14485_v6 = vld [vmem:[#allocation2 + $0x1a60] sm:$0xff] }
 0xcf6   :  { %14395 = vmatpush1.bf16.msra.mxu0 %v14288_v35  ;;  %14436 = vmatpush1.bf16.msra.mxu1 %v14290_v45  ;;  %v14487_v35 = vld [vmem:[#allocation2 + $0x1a70] sm:$0xff]  ;;  %v14494_v45 = vld [vmem:[#allocation2 + $0x1aa8] sm:$0xff] }
 0xcf7   :  { %14396 = vmatprep.subr.bf16.mxu0 %v14297_v0  ;;  %14437 = vmatprep.subr.bf16.mxu1 %v14299_v51  ;;  %v14496_v0 = vld [vmem:[#allocation2 + $0x1ab8] sm:$0xff]  ;;  %v14493_v51 = vld [vmem:[#allocation2 + $0x1aa0] sm:$0xff] }
 0xcfa   :  { %14397 = vmatpush1.bf16.msra.mxu0 %v14296_v20  ;;  %14438 = vmatpush1.bf16.msra.mxu1 %v14298_v63  ;;  %v14495_v20 = vld [vmem:[#allocation2 + $0x1ab0] sm:$0xff]  ;;  %v14502_v63 = vld [vmem:[#allocation2 + $0x1ae8] sm:$0xff] }
 0xcfb   :  { %14540 = vmatprep.subr.bf16.mxu0 %v14474_v19  ;;  %14581 = vmatprep.subr.bf16.mxu1 %v14476_v23  ;;  %v14504_v19 = vld [vmem:[#allocation2 + $0x1af8] sm:$0xff]  ;;  %v14501_v23 = vld [vmem:[#allocation2 + $0x1ae0] sm:$0xff] }
 0xcfd   :  { %14415 = vmatmul.mubr.bf16.vlgmr.msra.gmra.mrb[176].mxu0 %v21351_v47  ;;  %14456 = vmatmul.mubr.bf16.vlgmr.msra.gmra.mrb[124].mxu1 %v21351_v47 }
 0xcfe   :  { %14541 = vmatpush1.bf16.msra.mxu0 %v14473_v57  ;;  %14582 = vmatpush1.bf16.msra.mxu1 %v14475_v5  ;;  %v14503_v57 = vld [vmem:[#allocation2 + $0x1af0] sm:$0xff]  ;;  %v14510_v5 = vld [vmem:[#allocation2 + $0x1b28] sm:$0xff] }
 0xcff   :  { %14542 = vmatprep.subr.bf16.mxu0 %v14482_v4  ;;  %14583 = vmatprep.subr.bf16.mxu1 %v14484_v14  ;;  %v14512_v4 = vld [vmem:[#allocation2 + $0x1b38] sm:$0xff]  ;;  %v14509_v14 = vld [vmem:[#allocation2 + $0x1b20] sm:$0xff] }
 0xd00   :  { %14572 = vmatprep.mubr.bf16.mxu0 %v18018_v25  ;;  %14613 = vmatprep.mubr.bf16.mxu1 %v18018_v25 }
 0xd02   :  { %14543 = vmatpush1.bf16.msra.mxu0 %v14481_v3  ;;  %14584 = vmatpush1.bf16.msra.mxu1 %v14483_v30  ;;  %v14511_v3 = vld [vmem:[#allocation2 + $0x1b30] sm:$0xff]  ;;  %v14518_v30 = vld [vmem:[#allocation2 + $0x1b68] sm:$0xff] }
 0xd03   :  { %14544 = vmatprep.subr.bf16.mxu0 %v14490_v15  ;;  %14585 = vmatprep.subr.bf16.mxu1 %v14492_v60  ;;  %v14520_v15 = vld [vmem:[#allocation2 + $0x1b78] sm:$0xff]  ;;  %v14517_v60 = vld [vmem:[#allocation2 + $0x1b60] sm:$0xff] }
 0xd06   :  { %14545 = vmatpush1.bf16.msra.mxu0 %v14489_v34  ;;  %14586 = vmatpush1.bf16.msra.mxu1 %v14491_v12  ;;  %v14519_v34 = vld [vmem:[#allocation2 + $0x1b70] sm:$0xff] }
 0xd07   :  { %14546 = vmatprep.subr.bf16.mxu0 %v14498_v36  ;;  %14587 = vmatprep.subr.bf16.mxu1 %v14500_v7  ;;  %v14526_v7 = vld [vmem:[#allocation2 + $0x1ba8] sm:$0xff] }
 0xd0a   :  { %14547 = vmatpush1.bf16.msra.mxu0 %v14497_v42  ;;  %14588 = vmatpush1.bf16.msra.mxu1 %v14499_v43  ;;  %v14528_v42 = vld [vmem:[#allocation2 + $0x1bb8] sm:$0xff] }
 0xd0b   :  { %14548 = vmatprep.subr.bf16.mxu0 %v14506_v18  ;;  %14589 = vmatprep.subr.bf16.mxu1 %v14508_v27 }
 0xd0e   :  { %14549 = vmatpush1.bf16.msra.mxu0 %v14505_v26  ;;  %14590 = vmatpush1.bf16.msra.mxu1 %v14507_v29 }
 0xd0f   :  { %14550 = vmatprep.subr.bf16.mxu0 %v14514_v10  ;;  %14591 = vmatprep.subr.bf16.mxu1 %v14516_v32 }
 0xd10   :  { %v13700_v53 = vpop.f32.mrb[152].mxu0  ;;  %v13741_v11 = vpop.f32.mrb[100].mxu1 }
 0xd11   :  { %v21374_v40 = vadd.f32 %v13700_v53, %v21338_v22  ;;  %v21377_v44 = vadd.f32 %v13741_v11, %v21341_v13  ;;  %v13702_v39 = vpop.f32.mrb[153].mxu0  ;;  %v13743_v16 = vpop.f32.mrb[101].mxu1  ;;  %v14521_v22 = vld [vmem:[#allocation2 + $0x1b80] sm:$0xff]  ;;  %v14530_v13 = vld [vmem:[#allocation2 + $0x1bc8] sm:$0xff]  ;;  %v14527_v11 = vld [vmem:[#allocation2 + $0x1bb0] sm:$0xff] }
 0xd12   :  { %v21380_v1 = vadd.f32 %v13702_v39, %v21344_v58  ;;  %v21383_v48 = vadd.f32 %v13743_v16, %v21347_v21  ;;  %v13704_v46 = vpop.f32.mrb[154].mxu0  ;;  %v13745_v62 = vpop.f32.mrb[102].mxu1  ;;  %14551 = vmatpush1.bf16.msra.mxu0 %v14513_v24  ;;  %14592 = vmatpush1.bf16.msra.mxu1 %v14515_v50  ;;  %v14529_v58 = vld [vmem:[#allocation2 + $0x1bc0] sm:$0xff]  ;;  %v14478_v21 = vld [vmem:[#allocation2 + $0x1a28] sm:$0xff]  ;;  %v14716_v39 = vld [vmem:[#allocation2 + $0x1c18] sm:$0xff] }
 0xd13   :  { %v13705_v28 = vpop.f32.mrb[155].mxu0  ;;  %v13746_v52 = vpop.f32.mrb[103].mxu1  ;;  %14552 = vmatprep.subr.bf16.mxu0 %v14522_v55  ;;  %14593 = vmatprep.subr.bf16.mxu1 %v14524_v31  ;;  %v14536_v55 = vld [vmem:[#allocation2 + $0x1bf8] sm:$0xff]  ;;  %v14535_v31 = vld [vmem:[#allocation2 + $0x1bf0] sm:$0xff]  ;;  %v14713_v16 = vld [vmem:[#allocation2 + $0x1c00] sm:$0xff] }
 0xd14   :  { %v14715_v46 = vld [vmem:[#allocation2 + $0x1c10] sm:$0xff]  ;;  %v14722_v62 = vld [vmem:[#allocation2 + $0x1c48] sm:$0xff]  ;;  %v14724_v28 = vld [vmem:[#allocation2 + $0x1c58] sm:$0xff] }
 0xd15   :  { %v14721_v52 = vld [vmem:[#allocation2 + $0x1c40] sm:$0xff] }
 0xd16   :  { %14553 = vmatpush1.bf16.msra.mxu0 %v14521_v22  ;;  %14594 = vmatpush1.bf16.msra.mxu1 %v14523_v49  ;;  %v14723_v22 = vld [vmem:[#allocation2 + $0x1c50] sm:$0xff]  ;;  %v14730_v49 = vld [vmem:[#allocation2 + $0x1c88] sm:$0xff] }
 0xd17   :  { %14554 = vmatprep.subr.bf16.mxu0 %v14530_v13  ;;  %14595 = vmatprep.subr.bf16.mxu1 %v14532_v17  ;;  %v14732_v13 = vld [vmem:[#allocation2 + $0x1c98] sm:$0xff]  ;;  %v14729_v17 = vld [vmem:[#allocation2 + $0x1c80] sm:$0xff] }
 0xd1a   :  { %14555 = vmatpush1.bf16.msra.mxu0 %v14529_v58  ;;  %14596 = vmatpush1.bf16.msra.mxu1 %v14531_v41  ;;  %v14731_v58 = vld [vmem:[#allocation2 + $0x1c90] sm:$0xff]  ;;  %v14738_v41 = vld [vmem:[#allocation2 + $0x1cc8] sm:$0xff] }
 0xd1b   :  { %14622 = vmatprep.subr.bf16.mxu0 %v14478_v21  ;;  %14663 = vmatprep.subr.bf16.mxu1 %v14480_v56  ;;  %v14740_v21 = vld [vmem:[#allocation2 + $0x1cd8] sm:$0xff]  ;;  %v14737_v56 = vld [vmem:[#allocation2 + $0x1cc0] sm:$0xff] }
 0xd1d   :  { %14573 = vmatmul.mubr.bf16.vlgmr.msra.gmra.mrb[180].mxu0 %v21386_v37  ;;  %14614 = vmatmul.mubr.bf16.vlgmr.msra.gmra.mrb[128].mxu1 %v21386_v37 }
 0xd1e   :  { %14623 = vmatpush1.bf16.msra.mxu0 %v14477_v2  ;;  %14664 = vmatpush1.bf16.msra.mxu1 %v14479_v9  ;;  %v14746_v2 = vld [vmem:[#allocation2 + $0x1d08] sm:$0xff]  ;;  %v14748_v9 = vld [vmem:[#allocation2 + $0x1d18] sm:$0xff] }
 0xd1f   :  { %14624 = vmatprep.subr.bf16.mxu0 %v14486_v61  ;;  %14665 = vmatprep.subr.bf16.mxu1 %v14488_v54  ;;  %v14745_v61 = vld [vmem:[#allocation2 + $0x1d00] sm:$0xff]  ;;  %v14747_v54 = vld [vmem:[#allocation2 + $0x1d10] sm:$0xff] }
 0xd20   :  { %14654 = vmatprep.mubr.bf16.mxu0 %v18018_v25  ;;  %14695 = vmatprep.mubr.bf16.mxu1 %v18018_v25 }
 0xd22   :  { %14625 = vmatpush1.bf16.msra.mxu0 %v14485_v6  ;;  %14666 = vmatpush1.bf16.msra.mxu1 %v14487_v35  ;;  %v14754_v6 = vld [vmem:[#allocation2 + $0x1d48] sm:$0xff]  ;;  %v14756_v35 = vld [vmem:[#allocation2 + $0x1d58] sm:$0xff] }
 0xd23   :  { %14626 = vmatprep.subr.bf16.mxu0 %v14494_v45  ;;  %14667 = vmatprep.subr.bf16.mxu1 %v14496_v0  ;;  %v14753_v45 = vld [vmem:[#allocation2 + $0x1d40] sm:$0xff]  ;;  %v14755_v0 = vld [vmem:[#allocation2 + $0x1d50] sm:$0xff] }
 0xd26   :  { %14627 = vmatpush1.bf16.msra.mxu0 %v14493_v51  ;;  %14668 = vmatpush1.bf16.msra.mxu1 %v14495_v20 }
 0xd27   :  { %14628 = vmatprep.subr.bf16.mxu0 %v14502_v63  ;;  %14669 = vmatprep.subr.bf16.mxu1 %v14504_v19  ;;  %v14762_v63 = vld [vmem:[#allocation2 + $0x1d88] sm:$0xff]  ;;  %v14764_v19 = vld [vmem:[#allocation2 + $0x1d98] sm:$0xff] }
 0xd2a   :  { %14629 = vmatpush1.bf16.msra.mxu0 %v14501_v23  ;;  %14670 = vmatpush1.bf16.msra.mxu1 %v14503_v57 }
 0xd2b   :  { %14630 = vmatprep.subr.bf16.mxu0 %v14510_v5  ;;  %14671 = vmatprep.subr.bf16.mxu1 %v14512_v4 }
 0xd2e   :  { %14631 = vmatpush1.bf16.msra.mxu0 %v14509_v14  ;;  %14672 = vmatpush1.bf16.msra.mxu1 %v14511_v3 }
 0xd2f   :  { %14632 = vmatprep.subr.bf16.mxu0 %v14518_v30  ;;  %14673 = vmatprep.subr.bf16.mxu1 %v14520_v15 }
 0xd30   :  { %v13857_v12 = vpop.f32.mrb[156].mxu0  ;;  %v13898_v36 = vpop.f32.mrb[104].mxu1 }
 0xd31   :  { %v21393_v43 = vadd.f32 %v13857_v12, %v21358_v33  ;;  %v21396_v18 = vadd.f32 %v13898_v36, %v21361_v59  ;;  %v13859_v27 = vpop.f32.mrb[157].mxu0  ;;  %v13900_v26 = vpop.f32.mrb[105].mxu1  ;;  %v14525_v33 = vld [vmem:[#allocation2 + $0x1ba0] sm:$0xff]  ;;  %v14534_v59 = vld [vmem:[#allocation2 + $0x1be8] sm:$0xff]  ;;  %v14763_v12 = vld [vmem:[#allocation2 + $0x1d90] sm:$0xff] }
 0xd32   :  { %v21399_v29 = vadd.f32 %v13859_v27, %v21364_v38  ;;  %v21402_v10 = vadd.f32 %v13900_v26, %v21367_v8  ;;  %v13861_v32 = vpop.f32.mrb[158].mxu0  ;;  %v13902_v24 = vpop.f32.mrb[106].mxu1  ;;  %14633 = vmatpush1.bf16.msra.mxu0 %v14517_v60  ;;  %14674 = vmatpush1.bf16.msra.mxu1 %v14519_v34  ;;  %v14533_v38 = vld [vmem:[#allocation2 + $0x1be0] sm:$0xff]  ;;  %v14714_v8 = vld [vmem:[#allocation2 + $0x1c08] sm:$0xff]  ;;  %v14772_v36 = vld [vmem:[#allocation2 + $0x1dd8] sm:$0xff]  ;;  %v21421_v27 = vrot.slane %v21351_v47, 2 }
 0xd33   :  { %v13862_v50 = vpop.f32.mrb[159].mxu0  ;;  %v13903_v53 = vpop.f32.mrb[107].mxu1  ;;  %14634 = vmatprep.subr.bf16.mxu0 %v14526_v7  ;;  %14675 = vmatprep.subr.bf16.mxu1 %v14528_v42  ;;  %v14771_v7 = vld [vmem:[#allocation2 + $0x1dd0] sm:$0xff]  ;;  %v14720_v42 = vld [vmem:[#allocation2 + $0x1c38] sm:$0xff]  ;;  %v14717_v26 = vld [vmem:[#allocation2 + $0x1c20] sm:$0xff] }
 0xd34   :  { %v14719_v32 = vld [vmem:[#allocation2 + $0x1c30] sm:$0xff]  ;;  %v14726_v24 = vld [vmem:[#allocation2 + $0x1c68] sm:$0xff]  ;;  %v14728_v50 = vld [vmem:[#allocation2 + $0x1c78] sm:$0xff] }
 0xd35   :  { %v14725_v53 = vld [vmem:[#allocation2 + $0x1c60] sm:$0xff] }
 0xd36   :  { %14635 = vmatpush1.bf16.msra.mxu0 %v14525_v33  ;;  %14676 = vmatpush1.bf16.msra.mxu1 %v14527_v11  ;;  %v14727_v33 = vld [vmem:[#allocation2 + $0x1c70] sm:$0xff]  ;;  %v14734_v11 = vld [vmem:[#allocation2 + $0x1ca8] sm:$0xff] }
 0xd37   :  { %14636 = vmatprep.subr.bf16.mxu0 %v14534_v59  ;;  %14677 = vmatprep.subr.bf16.mxu1 %v14536_v55  ;;  %v14736_v59 = vld [vmem:[#allocation2 + $0x1cb8] sm:$0xff]  ;;  %v14733_v55 = vld [vmem:[#allocation2 + $0x1ca0] sm:$0xff] }
 0xd3a   :  { %14637 = vmatpush1.bf16.msra.mxu0 %v14533_v38  ;;  %14678 = vmatpush1.bf16.msra.mxu1 %v14535_v31  ;;  %v14735_v38 = vld [vmem:[#allocation2 + $0x1cb0] sm:$0xff]  ;;  %v14742_v31 = vld [vmem:[#allocation2 + $0x1ce8] sm:$0xff] }
 0xd3b   :  { %14779 = vmatprep.subr.bf16.mxu0 %v14714_v8  ;;  %14820 = vmatprep.subr.bf16.mxu1 %v14716_v39  ;;  %v14744_v8 = vld [vmem:[#allocation2 + $0x1cf8] sm:$0xff]  ;;  %v14741_v39 = vld [vmem:[#allocation2 + $0x1ce0] sm:$0xff] }
 0xd3d   :  { %14655 = vmatmul.mubr.bf16.vlgmr.msra.gmra.mrb[184].mxu0 %v21386_v37  ;;  %14696 = vmatmul.mubr.bf16.vlgmr.msra.gmra.mrb[132].mxu1 %v21386_v37  ;;  %v14739_v37 = vld [vmem:[#allocation2 + $0x1cd0] sm:$0xff] }
 0xd3e   :  { %14780 = vmatpush1.bf16.msra.mxu0 %v14713_v16  ;;  %14821 = vmatpush1.bf16.msra.mxu1 %v14715_v46  ;;  %v14743_v16 = vld [vmem:[#allocation2 + $0x1cf0] sm:$0xff]  ;;  %v14750_v46 = vld [vmem:[#allocation2 + $0x1d28] sm:$0xff] }
 0xd3f   :  { %14781 = vmatprep.subr.bf16.mxu0 %v14722_v62  ;;  %14822 = vmatprep.subr.bf16.mxu1 %v14724_v28  ;;  %v14752_v62 = vld [vmem:[#allocation2 + $0x1d38] sm:$0xff]  ;;  %v14749_v28 = vld [vmem:[#allocation2 + $0x1d20] sm:$0xff] }
 0xd40   :  { %14811 = vmatprep.mubr.bf16.mxu0 %v18018_v25  ;;  %14852 = vmatprep.mubr.bf16.mxu1 %v18018_v25 }
 0xd42   :  { %14782 = vmatpush1.bf16.msra.mxu0 %v14721_v52  ;;  %14823 = vmatpush1.bf16.msra.mxu1 %v14723_v22  ;;  %v14751_v52 = vld [vmem:[#allocation2 + $0x1d30] sm:$0xff]  ;;  %v14758_v22 = vld [vmem:[#allocation2 + $0x1d68] sm:$0xff] }
 0xd43   :  { %14783 = vmatprep.subr.bf16.mxu0 %v14730_v49  ;;  %14824 = vmatprep.subr.bf16.mxu1 %v14732_v13  ;;  %v14760_v49 = vld [vmem:[#allocation2 + $0x1d78] sm:$0xff]  ;;  %v14757_v13 = vld [vmem:[#allocation2 + $0x1d60] sm:$0xff] }
 0xd46   :  { %14784 = vmatpush1.bf16.msra.mxu0 %v14729_v17  ;;  %14825 = vmatpush1.bf16.msra.mxu1 %v14731_v58  ;;  %v14759_v17 = vld [vmem:[#allocation2 + $0x1d70] sm:$0xff] }
 0xd47   :  { %14785 = vmatprep.subr.bf16.mxu0 %v14738_v41  ;;  %14826 = vmatprep.subr.bf16.mxu1 %v14740_v21  ;;  %v14766_v21 = vld [vmem:[#allocation2 + $0x1da8] sm:$0xff] }
 0xd4a   :  { %14786 = vmatpush1.bf16.msra.mxu0 %v14737_v56  ;;  %14827 = vmatpush1.bf16.msra.mxu1 %v14739_v37  ;;  %v14768_v56 = vld [vmem:[#allocation2 + $0x1db8] sm:$0xff] }
 0xd4b   :  { %14787 = vmatprep.subr.bf16.mxu0 %v14746_v2  ;;  %14828 = vmatprep.subr.bf16.mxu1 %v14748_v9 }
 0xd4e   :  { %14788 = vmatpush1.bf16.msra.mxu0 %v14745_v61  ;;  %14829 = vmatpush1.bf16.msra.mxu1 %v14747_v54 }
 0xd4f   :  { %14789 = vmatprep.subr.bf16.mxu0 %v14754_v6  ;;  %14830 = vmatprep.subr.bf16.mxu1 %v14756_v35 }
 0xd50   :  { %v13939_v51 = vpop.f32.mrb[160].mxu0  ;;  %v13980_v20 = vpop.f32.mrb[108].mxu1 }
 0xd51   :  { %v21409_v23 = vadd.f32 %v13939_v51, %v21374_v40  ;;  %v21412_v57 = vadd.f32 %v13980_v20, %v21377_v44  ;;  %v13941_v5 = vpop.f32.mrb[161].mxu0  ;;  %v13982_v4 = vpop.f32.mrb[109].mxu1  ;;  %v14761_v40 = vld [vmem:[#allocation2 + $0x1d80] sm:$0xff]  ;;  %v14770_v44 = vld [vmem:[#allocation2 + $0x1dc8] sm:$0xff]  ;;  %v14767_v20 = vld [vmem:[#allocation2 + $0x1db0] sm:$0xff] }
 0xd52   :  { %v21415_v14 = vadd.f32 %v13941_v5, %v21380_v1  ;;  %v21418_v3 = vadd.f32 %v13982_v4, %v21383_v48  ;;  %v13943_v30 = vpop.f32.mrb[162].mxu0  ;;  %v13984_v15 = vpop.f32.mrb[110].mxu1  ;;  %14790 = vmatpush1.bf16.msra.mxu0 %v14753_v45  ;;  %14831 = vmatpush1.bf16.msra.mxu1 %v14755_v0  ;;  %v14769_v1 = vld [vmem:[#allocation2 + $0x1dc0] sm:$0xff]  ;;  %v14718_v48 = vld [vmem:[#allocation2 + $0x1c28] sm:$0xff]  ;;  %v14955_v5 = vld [vmem:[#allocation2 + $0x1e18] sm:$0xff] }
 0xd53   :  { %v13944_v60 = vpop.f32.mrb[163].mxu0  ;;  %v13985_v34 = vpop.f32.mrb[111].mxu1  ;;  %14791 = vmatprep.subr.bf16.mxu0 %v14762_v63  ;;  %14832 = vmatprep.subr.bf16.mxu1 %v14764_v19  ;;  %v14776_v63 = vld [vmem:[#allocation2 + $0x1df8] sm:$0xff]  ;;  %v14775_v19 = vld [vmem:[#allocation2 + $0x1df0] sm:$0xff]  ;;  %v14952_v4 = vld [vmem:[#allocation2 + $0x1e00] sm:$0xff] }
 0xd54   :  { %v14954_v30 = vld [vmem:[#allocation2 + $0x1e10] sm:$0xff]  ;;  %v14961_v15 = vld [vmem:[#allocation2 + $0x1e48] sm:$0xff]  ;;  %v14963_v60 = vld [vmem:[#allocation2 + $0x1e58] sm:$0xff] }
 0xd55   :  { %v14960_v34 = vld [vmem:[#allocation2 + $0x1e40] sm:$0xff] }
 0xd56   :  { %14792 = vmatpush1.bf16.msra.mxu0 %v14761_v40  ;;  %14833 = vmatpush1.bf16.msra.mxu1 %v14763_v12  ;;  %v14962_v40 = vld [vmem:[#allocation2 + $0x1e50] sm:$0xff]  ;;  %v14969_v12 = vld [vmem:[#allocation2 + $0x1e88] sm:$0xff] }
 0xd57   :  { %14793 = vmatprep.subr.bf16.mxu0 %v14770_v44  ;;  %14834 = vmatprep.subr.bf16.mxu1 %v14772_v36  ;;  %v14971_v44 = vld [vmem:[#allocation2 + $0x1e98] sm:$0xff]  ;;  %v14968_v36 = vld [vmem:[#allocation2 + $0x1e80] sm:$0xff] }
 0xd5a   :  { %14794 = vmatpush1.bf16.msra.mxu0 %v14769_v1  ;;  %14835 = vmatpush1.bf16.msra.mxu1 %v14771_v7  ;;  %v14970_v1 = vld [vmem:[#allocation2 + $0x1e90] sm:$0xff]  ;;  %v14977_v7 = vld [vmem:[#allocation2 + $0x1ec8] sm:$0xff] }
 0xd5b   :  { %14861 = vmatprep.subr.bf16.mxu0 %v14718_v48  ;;  %14902 = vmatprep.subr.bf16.mxu1 %v14720_v42  ;;  %v14979_v48 = vld [vmem:[#allocation2 + $0x1ed8] sm:$0xff]  ;;  %v14976_v42 = vld [vmem:[#allocation2 + $0x1ec0] sm:$0xff] }
 0xd5d   :  { %14812 = vmatmul.mubr.bf16.vlgmr.msra.gmra.mrb[188].mxu0 %v21421_v27  ;;  %14853 = vmatmul.mubr.bf16.vlgmr.msra.gmra.mrb[136].mxu1 %v21421_v27 }
 0xd5e   :  { %14862 = vmatpush1.bf16.msra.mxu0 %v14717_v26  ;;  %14903 = vmatpush1.bf16.msra.mxu1 %v14719_v32  ;;  %v14985_v26 = vld [vmem:[#allocation2 + $0x1f08] sm:$0xff]  ;;  %v14987_v32 = vld [vmem:[#allocation2 + $0x1f18] sm:$0xff] }
 0xd5f   :  { %14863 = vmatprep.subr.bf16.mxu0 %v14726_v24  ;;  %14904 = vmatprep.subr.bf16.mxu1 %v14728_v50  ;;  %v14984_v24 = vld [vmem:[#allocation2 + $0x1f00] sm:$0xff]  ;;  %v14986_v50 = vld [vmem:[#allocation2 + $0x1f10] sm:$0xff] }
 0xd60   :  { %14893 = vmatprep.mubr.bf16.mxu0 %v18018_v25  ;;  %14934 = vmatprep.mubr.bf16.mxu1 %v18018_v25 }
 0xd62   :  { %14864 = vmatpush1.bf16.msra.mxu0 %v14725_v53  ;;  %14905 = vmatpush1.bf16.msra.mxu1 %v14727_v33  ;;  %v14993_v53 = vld [vmem:[#allocation2 + $0x1f48] sm:$0xff]  ;;  %v14995_v33 = vld [vmem:[#allocation2 + $0x1f58] sm:$0xff] }
 0xd63   :  { %14865 = vmatprep.subr.bf16.mxu0 %v14734_v11  ;;  %14906 = vmatprep.subr.bf16.mxu1 %v14736_v59  ;;  %v14992_v11 = vld [vmem:[#allocation2 + $0x1f40] sm:$0xff]  ;;  %v14994_v59 = vld [vmem:[#allocation2 + $0x1f50] sm:$0xff] }
 0xd66   :  { %14866 = vmatpush1.bf16.msra.mxu0 %v14733_v55  ;;  %14907 = vmatpush1.bf16.msra.mxu1 %v14735_v38 }
 0xd67   :  { %14867 = vmatprep.subr.bf16.mxu0 %v14742_v31  ;;  %14908 = vmatprep.subr.bf16.mxu1 %v14744_v8  ;;  %v15001_v31 = vld [vmem:[#allocation2 + $0x1f88] sm:$0xff]  ;;  %v15003_v8 = vld [vmem:[#allocation2 + $0x1f98] sm:$0xff] }
 0xd6a   :  { %14868 = vmatpush1.bf16.msra.mxu0 %v14741_v39  ;;  %14909 = vmatpush1.bf16.msra.mxu1 %v14743_v16 }
 0xd6b   :  { %14869 = vmatprep.subr.bf16.mxu0 %v14750_v46  ;;  %14910 = vmatprep.subr.bf16.mxu1 %v14752_v62 }
 0xd6e   :  { %14870 = vmatpush1.bf16.msra.mxu0 %v14749_v28  ;;  %14911 = vmatpush1.bf16.msra.mxu1 %v14751_v52 }
 0xd6f   :  { %14871 = vmatprep.subr.bf16.mxu0 %v14758_v22  ;;  %14912 = vmatprep.subr.bf16.mxu1 %v14760_v49 }
 0xd70   :  { %v14096_v58 = vpop.f32.mrb[164].mxu0  ;;  %v14137_v41 = vpop.f32.mrb[112].mxu1 }
 0xd71   :  { %v21428_v37 = vadd.f32 %v14096_v58, %v21393_v43  ;;  %v21431_v2 = vadd.f32 %v14137_v41, %v21396_v18  ;;  %v14098_v9 = vpop.f32.mrb[165].mxu0  ;;  %v14139_v61 = vpop.f32.mrb[113].mxu1  ;;  %v14765_v43 = vld [vmem:[#allocation2 + $0x1da0] sm:$0xff]  ;;  %v14774_v18 = vld [vmem:[#allocation2 + $0x1de8] sm:$0xff]  ;;  %v15002_v58 = vld [vmem:[#allocation2 + $0x1f90] sm:$0xff] }
 0xd72   :  { %v21434_v54 = vadd.f32 %v14098_v9, %v21399_v29  ;;  %v21437_v6 = vadd.f32 %v14139_v61, %v21402_v10  ;;  %v14100_v35 = vpop.f32.mrb[166].mxu0  ;;  %v14141_v45 = vpop.f32.mrb[114].mxu1  ;;  %14872 = vmatpush1.bf16.msra.mxu0 %v14757_v13  ;;  %14913 = vmatpush1.bf16.msra.mxu1 %v14759_v17  ;;  %v14773_v29 = vld [vmem:[#allocation2 + $0x1de0] sm:$0xff]  ;;  %v14953_v10 = vld [vmem:[#allocation2 + $0x1e08] sm:$0xff]  ;;  %v15011_v41 = vld [vmem:[#allocation2 + $0x1fd8] sm:$0xff]  ;;  %v21456_v9 = vrot.slane %v21351_v47, 3 }
 0xd73   :  { %v14101_v0 = vpop.f32.mrb[167].mxu0  ;;  %v14142_v51 = vpop.f32.mrb[115].mxu1  ;;  %14873 = vmatprep.subr.bf16.mxu0 %v14766_v21  ;;  %14914 = vmatprep.subr.bf16.mxu1 %v14768_v56  ;;  %v15010_v21 = vld [vmem:[#allocation2 + $0x1fd0] sm:$0xff]  ;;  %v14959_v56 = vld [vmem:[#allocation2 + $0x1e38] sm:$0xff]  ;;  %v14956_v61 = vld [vmem:[#allocation2 + $0x1e20] sm:$0xff] }
 0xd74   :  { %v14958_v35 = vld [vmem:[#allocation2 + $0x1e30] sm:$0xff]  ;;  %v14965_v45 = vld [vmem:[#allocation2 + $0x1e68] sm:$0xff]  ;;  %v14967_v0 = vld [vmem:[#allocation2 + $0x1e78] sm:$0xff] }
 0xd75   :  { %v14964_v51 = vld [vmem:[#allocation2 + $0x1e60] sm:$0xff]  ;;  %v14973_v47 = vld [vmem:[#allocation2 + $0x1ea8] sm:$0xff] }
 0xd76   :  { %14874 = vmatpush1.bf16.msra.mxu0 %v14765_v43  ;;  %14915 = vmatpush1.bf16.msra.mxu1 %v14767_v20  ;;  %v14966_v43 = vld [vmem:[#allocation2 + $0x1e70] sm:$0xff]  ;;  %v14975_v20 = vld [vmem:[#allocation2 + $0x1eb8] sm:$0xff] }
 0xd77   :  { %14875 = vmatprep.subr.bf16.mxu0 %v14774_v18  ;;  %14916 = vmatprep.subr.bf16.mxu1 %v14776_v63  ;;  %v14972_v18 = vld [vmem:[#allocation2 + $0x1ea0] sm:$0xff]  ;;  %v14974_v63 = vld [vmem:[#allocation2 + $0x1eb0] sm:$0xff] }
 0xd7a   :  { %14876 = vmatpush1.bf16.msra.mxu0 %v14773_v29  ;;  %14917 = vmatpush1.bf16.msra.mxu1 %v14775_v19  ;;  %v14981_v29 = vld [vmem:[#allocation2 + $0x1ee8] sm:$0xff]  ;;  %v14983_v19 = vld [vmem:[#allocation2 + $0x1ef8] sm:$0xff] }
 0xd7b   :  { %15018 = vmatprep.subr.bf16.mxu0 %v14953_v10  ;;  %15059 = vmatprep.subr.bf16.mxu1 %v14955_v5  ;;  %v14980_v10 = vld [vmem:[#allocation2 + $0x1ee0] sm:$0xff]  ;;  %v14982_v5 = vld [vmem:[#allocation2 + $0x1ef0] sm:$0xff] }
 0xd7d   :  { %14894 = vmatmul.mubr.bf16.vlgmr.msra.gmra.mrb[192].mxu0 %v21421_v27  ;;  %14935 = vmatmul.mubr.bf16.vlgmr.msra.gmra.mrb[140].mxu1 %v21421_v27  ;;  %v14978_v27 = vld [vmem:[#allocation2 + $0x1ed0] sm:$0xff] }
 0xd7e   :  { %15019 = vmatpush1.bf16.msra.mxu0 %v14952_v4  ;;  %15060 = vmatpush1.bf16.msra.mxu1 %v14954_v30  ;;  %v14989_v4 = vld [vmem:[#allocation2 + $0x1f28] sm:$0xff]  ;;  %v14991_v30 = vld [vmem:[#allocation2 + $0x1f38] sm:$0xff] }
 0xd7f   :  { %15020 = vmatprep.subr.bf16.mxu0 %v14961_v15  ;;  %15061 = vmatprep.subr.bf16.mxu1 %v14963_v60  ;;  %v14990_v15 = vld [vmem:[#allocation2 + $0x1f30] sm:$0xff]  ;;  %v14997_v60 = vld [vmem:[#allocation2 + $0x1f68] sm:$0xff] }
 0xd80   :  { %15050 = vmatprep.mubr.bf16.mxu0 %v18018_v25  ;;  %15091 = vmatprep.mubr.bf16.mxu1 %v18018_v25 }
 0xd82   :  { %15021 = vmatpush1.bf16.msra.mxu0 %v14960_v34  ;;  %15062 = vmatpush1.bf16.msra.mxu1 %v14962_v40  ;;  %v14999_v34 = vld [vmem:[#allocation2 + $0x1f78] sm:$0xff]  ;;  %v14996_v40 = vld [vmem:[#allocation2 + $0x1f60] sm:$0xff] }
 0xd83   :  { %15022 = vmatprep.subr.bf16.mxu0 %v14969_v12  ;;  %15063 = vmatprep.subr.bf16.mxu1 %v14971_v44  ;;  %v14998_v12 = vld [vmem:[#allocation2 + $0x1f70] sm:$0xff] }
 0xd86   :  { %15023 = vmatpush1.bf16.msra.mxu0 %v14968_v36  ;;  %15064 = vmatpush1.bf16.msra.mxu1 %v14970_v1  ;;  %v15005_v1 = vld [vmem:[#allocation2 + $0x1fa8] sm:$0xff] }
 0xd87   :  { %15024 = vmatprep.subr.bf16.mxu0 %v14977_v7  ;;  %15065 = vmatprep.subr.bf16.mxu1 %v14979_v48  ;;  %v15007_v7 = vld [vmem:[#allocation2 + $0x1fb8] sm:$0xff] }
 0xd8a   :  { %15025 = vmatpush1.bf16.msra.mxu0 %v14976_v42  ;;  %15066 = vmatpush1.bf16.msra.mxu1 %v14978_v27 }
 0xd8b   :  { %15026 = vmatprep.subr.bf16.mxu0 %v14985_v26  ;;  %15067 = vmatprep.subr.bf16.mxu1 %v14987_v32 }
 0xd8e   :  { %15027 = vmatpush1.bf16.msra.mxu0 %v14984_v24  ;;  %15068 = vmatpush1.bf16.msra.mxu1 %v14986_v50 }
 0xd8f   :  { %15028 = vmatprep.subr.bf16.mxu0 %v14993_v53  ;;  %15069 = vmatprep.subr.bf16.mxu1 %v14995_v33 }
 0xd90   :  { %v14178_v55 = vpop.f32.mrb[168].mxu0  ;;  %v14219_v38 = vpop.f32.mrb[116].mxu1 }
 0xd91   :  { %v21444_v39 = vadd.f32 %v14178_v55, %v21409_v23  ;;  %v21447_v16 = vadd.f32 %v14219_v38, %v21412_v57  ;;  %v14180_v46 = vpop.f32.mrb[169].mxu0  ;;  %v14221_v62 = vpop.f32.mrb[117].mxu1  ;;  %v15000_v23 = vld [vmem:[#allocation2 + $0x1f80] sm:$0xff]  ;;  %v15009_v57 = vld [vmem:[#allocation2 + $0x1fc8] sm:$0xff]  ;;  %v15006_v55 = vld [vmem:[#allocation2 + $0x1fb0] sm:$0xff] }
 0xd92   :  { %v21450_v28 = vadd.f32 %v14180_v46, %v21415_v14  ;;  %v21453_v52 = vadd.f32 %v14221_v62, %v21418_v3  ;;  %v14182_v22 = vpop.f32.mrb[170].mxu0  ;;  %v14223_v49 = vpop.f32.mrb[118].mxu1  ;;  %15029 = vmatpush1.bf16.msra.mxu0 %v14992_v11  ;;  %15070 = vmatpush1.bf16.msra.mxu1 %v14994_v59  ;;  %v15008_v14 = vld [vmem:[#allocation2 + $0x1fc0] sm:$0xff]  ;;  %v14957_v3 = vld [vmem:[#allocation2 + $0x1e28] sm:$0xff] }
 0xd93   :  { %v14183_v13 = vpop.f32.mrb[171].mxu0  ;;  %v14224_v17 = vpop.f32.mrb[119].mxu1  ;;  %15030 = vmatprep.subr.bf16.mxu0 %v15001_v31  ;;  %15071 = vmatprep.subr.bf16.mxu1 %v15003_v8  ;;  %v15004_v59 = vld [vmem:[#allocation2 + $0x1fa0] sm:$0xff]  ;;  %v15013_v38 = vld [vmem:[#allocation2 + $0x1fe8] sm:$0xff] }
 0xd96   :  { %15031 = vmatpush1.bf16.msra.mxu0 %v15000_v23  ;;  %15072 = vmatpush1.bf16.msra.mxu1 %v15002_v58 }
 0xd97   :  { %15032 = vmatprep.subr.bf16.mxu0 %v15009_v57  ;;  %15073 = vmatprep.subr.bf16.mxu1 %v15011_v41 }
 0xd9a   :  { %15033 = vmatpush1.bf16.msra.mxu0 %v15008_v14  ;;  %15074 = vmatpush1.bf16.msra.mxu1 %v15010_v21 }
 0xd9b   :  { %15100 = vmatprep.subr.bf16.mxu0 %v14957_v3  ;;  %15141 = vmatprep.subr.bf16.mxu1 %v14959_v56 }
 0xd9d   :  { %15051 = vmatmul.mubr.bf16.vlgmr.msra.gmra.mrb[196].mxu0 %v21456_v9  ;;  %15092 = vmatmul.mubr.bf16.vlgmr.msra.gmra.mrb[144].mxu1 %v21456_v9 }
 0xd9e   :  { %15101 = vmatpush1.bf16.msra.mxu0 %v14956_v61  ;;  %15142 = vmatpush1.bf16.msra.mxu1 %v14958_v35 }
 0xd9f   :  { %15102 = vmatprep.subr.bf16.mxu0 %v14965_v45  ;;  %15143 = vmatprep.subr.bf16.mxu1 %v14967_v0 }
 0xda0   :  { %15132 = vmatprep.mubr.bf16.mxu0 %v18018_v25  ;;  %15173 = vmatprep.mubr.bf16.mxu1 %v18018_v25  ;;  %v14988_v25 = vld [vmem:[#allocation2 + $0x1f20] sm:$0xff] }
 0xda2   :  { %15103 = vmatpush1.bf16.msra.mxu0 %v14964_v51  ;;  %15144 = vmatpush1.bf16.msra.mxu1 %v14966_v43 }
 0xda3   :  { %15104 = vmatprep.subr.bf16.mxu0 %v14973_v47  ;;  %15145 = vmatprep.subr.bf16.mxu1 %v14975_v20 }
 0xda6   :  { %15105 = vmatpush1.bf16.msra.mxu0 %v14972_v18  ;;  %15146 = vmatpush1.bf16.msra.mxu1 %v14974_v63 }
 0xda7   :  { %15106 = vmatprep.subr.bf16.mxu0 %v14981_v29  ;;  %15147 = vmatprep.subr.bf16.mxu1 %v14983_v19 }
 0xdaa   :  { %15107 = vmatpush1.bf16.msra.mxu0 %v14980_v10  ;;  %15148 = vmatpush1.bf16.msra.mxu1 %v14982_v5 }
 0xdab   :  { %15108 = vmatprep.subr.bf16.mxu0 %v14989_v4  ;;  %15149 = vmatprep.subr.bf16.mxu1 %v14991_v30  ;;  %v17900_v4 = vld [vmem:[%s21873_s12 + $0x40] sm:$0xff]  }
 0xdac   :  { %v17901_v30 = vld [vmem:[%s21873_s12 + $0xc0] sm:$0xff]  }
 0xdae   :  { %15109 = vmatpush1.bf16.msra.mxu0 %v14988_v25  ;;  %15150 = vmatpush1.bf16.msra.mxu1 %v14990_v15  ;;  %v17902_v25 = vld [vmem:[%s21873_s12] sm:$0xff]  }
 0xdaf   :  { %15110 = vmatprep.subr.bf16.mxu0 %v14997_v60  ;;  %15151 = vmatprep.subr.bf16.mxu1 %v14999_v34  ;;  %v17903_v15 = vld [vmem:[%s21873_s12 + $0x80] sm:$0xff]   ;;  %v17904_v60 = vld [vmem:[%s21873_s12 + $0x48] sm:$0xff]  }
 0xdb0   :  { %v14334_v44 = vpop.f32.mrb[172].mxu0  ;;  %v14375_v36 = vpop.f32.mrb[120].mxu1  ;;  %v17905_v34 = vld [vmem:[%s21873_s12 + $0xc8] sm:$0xff]  }
 0xdb1   :  { %v14464_v48 = vadd.f32 %v14334_v44, %v21428_v37  ;;  %v14466_v42 = vadd.f32 %v14375_v36, %v21431_v2  ;;  %v14336_v27 = vpop.f32.mrb[173].mxu0  ;;  %v14377_v26 = vpop.f32.mrb[121].mxu1  ;;  %v15015_v37 = vld [vmem:[#allocation2 + $0x1ff8] sm:$0xff]  ;;  %v15012_v2 = vld [vmem:[#allocation2 + $0x1fe0] sm:$0xff]  ;;  %v17908_v44 = vld [vmem:[%s21873_s12 + $0x50] sm:$0xff]  }
 0xdb2   :  { %v14465_v32 = vadd.f32 %v14336_v27, %v21434_v54  ;;  %v14467_v24 = vadd.f32 %v14377_v26, %v21437_v6  ;;  %v14338_v50 = vpop.f32.mrb[174].mxu0  ;;  %v14379_v53 = vpop.f32.mrb[122].mxu1  ;;  %15111 = vmatpush1.bf16.msra.mxu0 %v14996_v40  ;;  %15152 = vmatpush1.bf16.msra.mxu1 %v14998_v12  ;;  %v15014_v54 = vld [vmem:[#allocation2 + $0x1ff0] sm:$0xff]  ;;  %v17906_v40 = vld [vmem:[%s21873_s12 + $0x8] sm:$0xff]   ;;  %v17914_v27 = vld [vmem:[%s21873_s12 + $0x18] sm:$0xff]  }
 0xdb3   :  { %v14339_v33 = vpop.f32.mrb[175].mxu0  ;;  %v14380_v11 = vpop.f32.mrb[123].mxu1  ;;  %15112 = vmatprep.subr.bf16.mxu0 %v15005_v1  ;;  %15153 = vmatprep.subr.bf16.mxu1 %v15007_v7  ;;  %v17907_v12 = vld [vmem:[%s21873_s12 + $0x88] sm:$0xff]   ;;  %v17909_v36 = vld [vmem:[%s21873_s12 + $0xd0] sm:$0xff]   ;;  %v17915_v26 = vld [vmem:[%s21873_s12 + $0x98] sm:$0xff]  }
 0xdb4   :  { %v17910_v1 = vld [vmem:[%s21873_s12 + $0x10] sm:$0xff]   ;;  %v17918_v50 = vld [vmem:[%s21873_s12 + $0x20] sm:$0xff]   ;;  %v17920_v33 = vld [vmem:[%s21873_s12 + $0x68] sm:$0xff]  }
 0xdb5   :  { %v17911_v7 = vld [vmem:[%s21873_s12 + $0x90] sm:$0xff]   ;;  %v17919_v53 = vld [vmem:[%s21873_s12 + $0xa0] sm:$0xff]   ;;  %v17921_v11 = vld [vmem:[%s21873_s12 + $0xe8] sm:$0xff]  }
 0xdb6   :  { %15113 = vmatpush1.bf16.msra.mxu0 %v15004_v59  ;;  %15154 = vmatpush1.bf16.msra.mxu1 %v15006_v55  ;;  %v17922_v59 = vld [vmem:[%s21873_s12 + $0x28] sm:$0xff]  }
 0xdb7   :  { %15114 = vmatprep.subr.bf16.mxu0 %v15013_v38  ;;  %15155 = vmatprep.subr.bf16.mxu1 %v15015_v37  ;;  %v17923_v55 = vld [vmem:[%s21873_s12 + $0xa8] sm:$0xff]   ;;  %v17924_v38 = vld [vmem:[%s21873_s12 + $0x70] sm:$0xff]  }
 0xdb8   :  { %v17925_v37 = vld [vmem:[%s21873_s12 + $0xf0] sm:$0xff]  }
 0xdba   :  { %15115 = vmatpush1.bf16.msra.mxu0 %v15012_v2  ;;  %15156 = vmatpush1.bf16.msra.mxu1 %v15014_v54  ;;  %v17926_v2 = vld [vmem:[%s21873_s12 + $0x30] sm:$0xff]  }
 0xdbb   :  { %17069 = vmatprep.subr.bf16.mxu0 %v17900_v4  ;;  %17091 = vmatprep.subr.bf16.mxu1 %v17901_v30  ;;  %v17927_v54 = vld [vmem:[%s21873_s12 + $0xb0] sm:$0xff]  }
 0xdbd   :  { %15133 = vmatmul.mubr.bf16.vlgmr.msra.gmra.mrb[200].mxu0 %v21456_v9  ;;  %15174 = vmatmul.mubr.bf16.vlgmr.msra.gmra.mrb[148].mxu1 %v21456_v9 }
 0xdbe   :  { %17070 = vmatpush3.bf16.msra.mxu0 %v17902_v25  ;;  %17092 = vmatpush3.bf16.msra.mxu1 %v17903_v15 }
 0xdbf   :  { %17071 = vmatprep.subr.bf16.mxu0 %v17904_v60  ;;  %17093 = vmatprep.subr.bf16.mxu1 %v17905_v34 }
 0xdc2   :  { %17072 = vmatpush3.bf16.msra.mxu0 %v17906_v40  ;;  %17094 = vmatpush3.bf16.msra.mxu1 %v17907_v12 }
 0xdc3   :  { %17073 = vmatprep.subr.bf16.mxu0 %v17908_v44  ;;  %17095 = vmatprep.subr.bf16.mxu1 %v17909_v36 }
 0xdc6   :  { %17074 = vmatpush3.bf16.msra.mxu0 %v17910_v1  ;;  %17096 = vmatpush3.bf16.msra.mxu1 %v17911_v7 }
 0xdd0   :  { %v14416_v6 = vpop.f32.mrb[176].mxu0  ;;  %v14457_v31 = vpop.f32.mrb[124].mxu1 }
 0xdd1   :  { %v14468_v8 = vadd.f32 %v14416_v6, %v21444_v39  ;;  %v14470_v46 = vadd.f32 %v14457_v31, %v21447_v16  ;;  %v14418_v62 = vpop.f32.mrb[177].mxu0  ;;  %v14459_v22 = vpop.f32.mrb[125].mxu1  ;;  %v17928_v6 = vld [vmem:[%s21873_s12 + $0x78] sm:$0xff]  }
 0xdd2   :  { %v14469_v49 = vadd.f32 %v14418_v62, %v21450_v28  ;;  %v14471_v13 = vadd.f32 %v14459_v22, %v21453_v52  ;;  %v14420_v17 = vpop.f32.mrb[178].mxu0  ;;  %v14461_v23 = vpop.f32.mrb[126].mxu1  ;;  %v17929_v31 = vld [vmem:[%s21873_s12 + $0xf8] sm:$0xff]  }
 0xdd3   :  { %v14421_v58 = vpop.f32.mrb[179].mxu0  ;;  %v14462_v57 = vpop.f32.mrb[127].mxu1  ;;  %v17930_v62 = vld [vmem:[%s21873_s12 + $0x38] sm:$0xff]  }
 0xdd4   :  { %v17931_v22 = vld [vmem:[%s21873_s12 + $0xb8] sm:$0xff]  }
 0xdf0   :  { %v14574_v41 = vpop.f32.mrb[180].mxu0  ;;  %v14615_v14 = vpop.f32.mrb[128].mxu1 }
 0xdf1   :  { %v21472_v21 = vadd.f32 %v14574_v41, %v14464_v48  ;;  %v21474_v3 = vadd.f32 %v14615_v14, %v14466_v42  ;;  %v14576_v56 = vpop.f32.mrb[181].mxu0  ;;  %v14617_v39 = vpop.f32.mrb[129].mxu1  ;;  %v17912_v48 = vld [vmem:[%s21873_s12 + $0x58] sm:$0xff]  }
 0xdf2   :  { %v21476_v9 = vadd.f32 %v14576_v56, %v14465_v32  ;;  %v21478_v16 = vadd.f32 %v14617_v39, %v14467_v24  ;;  %v14578_v61 = vpop.f32.mrb[182].mxu0  ;;  %v14619_v28 = vpop.f32.mrb[130].mxu1  ;;  %v17913_v42 = vld [vmem:[%s21873_s12 + $0xd8] sm:$0xff]   ;;  %17075 = vmatprep.subr.bf16.mxu0 %v17912_v48  ;;  %v17916_v32 = vld [vmem:[%s21873_s12 + $0x60] sm:$0xff]  }
 0xdf3   :  { %v14579_v35 = vpop.f32.mrb[183].mxu0  ;;  %v14620_v52 = vpop.f32.mrb[131].mxu1  ;;  %17097 = vmatprep.subr.bf16.mxu1 %v17913_v42  ;;  %17076 = vmatpush3.bf16.msra.mxu0 %v17914_v27  ;;  %v17917_v24 = vld [vmem:[%s21873_s12 + $0xe0] sm:$0xff]  }
 0xdf4   :  { %17098 = vmatpush3.bf16.msra.mxu1 %v17915_v26  ;;  %17077 = vmatprep.subr.bf16.mxu0 %v17916_v32 }
 0xdf5   :  { %17099 = vmatprep.subr.bf16.mxu1 %v17917_v24 }
 0xdf7   :  { %17078 = vmatpush3.bf16.msra.mxu0 %v17918_v50 }
 0xdf8   :  { %17100 = vmatpush3.bf16.msra.mxu1 %v17919_v53  ;;  %17079 = vmatprep.subr.bf16.mxu0 %v17920_v33 }
 0xdf9   :  { %17101 = vmatprep.subr.bf16.mxu1 %v17921_v11 }
 0xdfb   :  { %17080 = vmatpush3.bf16.msra.mxu0 %v17922_v59 }
 0xdfc   :  { %17102 = vmatpush3.bf16.msra.mxu1 %v17923_v55  ;;  %17081 = vmatprep.subr.bf16.mxu0 %v17924_v38 }
 0xdfd   :  { %17103 = vmatprep.subr.bf16.mxu1 %v17925_v37 }
 0xdff   :  { %17082 = vmatpush3.bf16.msra.mxu0 %v17926_v2 }
 0xe00   :  { %17104 = vmatpush3.bf16.msra.mxu1 %v17927_v54  ;;  %17083 = vmatprep.subr.bf16.mxu0 %v17928_v6 }
 0xe01   :  { %17105 = vmatprep.subr.bf16.mxu1 %v17929_v31 }
 0xe03   :  { %17084 = vmatpush3.bf16.msra.mxu0 %v17930_v62 }
 0xe04   :  { %17106 = vmatpush3.bf16.msra.mxu1 %v17931_v22 }
 0xe10   :  { %v14656_v45 = vpop.f32.mrb[184].mxu0  ;;  %v14697_v0 = vpop.f32.mrb[132].mxu1 }
 0xe11   :  { %v21480_v51 = vadd.f32 %v14656_v45, %v14468_v8  ;;  %v21482_v43 = vadd.f32 %v14697_v0, %v14470_v46  ;;  %v14658_v47 = vpop.f32.mrb[185].mxu0  ;;  %v14699_v20 = vpop.f32.mrb[133].mxu1 }
 0xe12   :  { %v21484_v18 = vadd.f32 %v14658_v47, %v14469_v49  ;;  %v21486_v63 = vadd.f32 %v14699_v20, %v14471_v13  ;;  %v14660_v29 = vpop.f32.mrb[186].mxu0  ;;  %v14701_v19 = vpop.f32.mrb[134].mxu1 }
 0xe13   :  { %v14661_v10 = vpop.f32.mrb[187].mxu0  ;;  %v14702_v5 = vpop.f32.mrb[135].mxu1 }
 0xe14   :  { %v15192_v10 = vlaneseq }
 0xe16   :  { %v21606_v5 = vshrl.u32 %v15192_v10, 7 }
 0xe18   :  { %v21623_v4 = vsub.s32 3, %v21606_v5 }
 0xe30   :  { %v14813_v8 = vpop.f32.mrb[188].mxu0  ;;  %v14854_v46 = vpop.f32.mrb[136].mxu1 }
 0xe31   :  { %v14943_v49 = vadd.f32 %v14813_v8, %v21472_v21  ;;  %v14945_v13 = vadd.f32 %v14854_v46, %v21474_v3  ;;  %v14815_v17 = vpop.f32.mrb[189].mxu0  ;;  %v14856_v23 = vpop.f32.mrb[137].mxu1  ;;  %v17932_v21 = vld [vmem:[%s21873_s12 + $0x140] sm:$0xff]  }
 0xe32   :  { %v14944_v58 = vadd.f32 %v14815_v17, %v21476_v9  ;;  %v14946_v57 = vadd.f32 %v14856_v23, %v21478_v16  ;;  %v14817_v41 = vpop.f32.mrb[190].mxu0  ;;  %v14858_v14 = vpop.f32.mrb[138].mxu1  ;;  %v17933_v3 = vld [vmem:[%s21873_s12 + $0x1c0] sm:$0xff]   ;;  %17113 = vmatprep.subr.bf16.mxu0 %v17932_v21 }
 0xe33   :  { %v14818_v56 = vpop.f32.mrb[191].mxu0  ;;  %v14859_v39 = vpop.f32.mrb[139].mxu1  ;;  %17135 = vmatprep.subr.bf16.mxu1 %v17933_v3 }
 0xe50   :  { %v14895_v61 = vpop.f32.mrb[192].mxu0  ;;  %v14936_v9 = vpop.f32.mrb[140].mxu1 }
 0xe51   :  { %v21595_v16 = vadd.f32 %v14895_v61, %v21480_v51  ;;  %v21598_v28 = vadd.f32 %v14936_v9, %v21482_v43  ;;  %v14897_v35 = vpop.f32.mrb[193].mxu0  ;;  %v14938_v52 = vpop.f32.mrb[141].mxu1  ;;  %v21609_v51 = vsub.s32 0, %v21606_v5  ;;  %v21612_v43 = vsub.s32 2, %v21606_v5 }
 0xe52   :  { %v21601_v45 = vadd.f32 %v14897_v35, %v21484_v18  ;;  %v21604_v0 = vadd.f32 %v14938_v52, %v21486_v63  ;;  %v14899_v47 = vpop.f32.mrb[194].mxu0  ;;  %v14940_v20 = vpop.f32.mrb[142].mxu1  ;;  %v21617_v18 = vld [vmem:[%s21870_s9] sm:$0xff]  ;;  %v21620_v63 = vsub.s32 1, %v21606_v5 }
 0xe53   :  { %v14900_v29 = vpop.f32.mrb[195].mxu0  ;;  %v14941_v19 = vpop.f32.mrb[143].mxu1  ;;  %v15195_v30 = vrot.slane %v21617_v18, %v21609_v51  ;;  %v15203_v25 = vrot.slane %v21617_v18, %v21612_v43  ;;  %v15207_v40 = vrot.slane %v21617_v18, %v21623_v4 }
 0xe54   :  { %v15199_v34 = vrot.slane %v21617_v18, %v21620_v63 }
 0xe70   :  { %v15052_v15 = vpop.f32.mrb[196].mxu0  ;;  %v15093_v60 = vpop.f32.mrb[144].mxu1 }
 0xe71   :  { %v15182_v12 = vadd.f32 %v15052_v15, %v14943_v49  ;;  %v15184_v44 = vadd.f32 %v15093_v60, %v14945_v13  ;;  %v15054_v36 = vpop.f32.mrb[197].mxu0  ;;  %v15095_v1 = vpop.f32.mrb[145].mxu1 }
 0xe72   :  { %v15183_v7 = vadd.f32 %v15054_v36, %v14944_v58  ;;  %v15185_v48 = vadd.f32 %v15095_v1, %v14946_v57  ;;  %v15056_v42 = vpop.f32.mrb[198].mxu0  ;;  %v15097_v27 = vpop.f32.mrb[146].mxu1 }
 0xe73   :  { %v15232_v26 = vadd.f32 %v15195_v30, %v15182_v12  ;;  %v15234_v32 = vadd.f32 %v15203_v25, %v15184_v44  ;;  %v15057_v24 = vpop.f32.mrb[199].mxu0  ;;  %v15098_v50 = vpop.f32.mrb[147].mxu1 }
 0xe74   :  { %v15233_v53 = vadd.f32 %v15199_v34, %v15183_v7  ;;  %v15235_v33 = vadd.f32 %v15207_v40, %v15185_v48  ;;  %v21658_v24 = vsub.s32 4, %v21606_v5  ;;  %v21661_v50 = vsub.s32 6, %v21606_v5 }
 0xe75   :  { %v15241_v11 = vsel %vm15240_vm5, %v15232_v26, 0.0  ;;  %v15255_v59 = vsel %vm15240_vm5, %v15234_v32, 0.0 }
 0xe76   :  { %v15242_v55 = vrot.slane %v15241_v11, 4  ;;  %v15256_v38 = vrot.slane %v15255_v59, 4  ;;  %v15248_v37 = vsel %vm15240_vm5, %v15233_v53, 0.0  ;;  %v15262_v2 = vsel %vm15240_vm5, %v15235_v33, 0.0 }
 0xe77   :  { %v15249_v54 = vrot.slane %v15248_v37, 4  ;;  %v15263_v6 = vrot.slane %v15262_v2, 4 }
 0xe78   :  { %v15243_v31 = vadd.f32 %v15242_v55, %v15241_v11  ;;  %v15257_v8 = vadd.f32 %v15256_v38, %v15255_v59  ;;  %v21664_v11 = vsub.s32 5, %v21606_v5  ;;  %v21667_v59 = vsub.s32 7, %v21606_v5 }
 0xe79   :  { %v15250_v46 = vadd.f32 %v15249_v54, %v15248_v37  ;;  %v15264_v62 = vadd.f32 %v15263_v6, %v15262_v2 }
 0xe7a   :  { %v15244_v22 = vrot.slane %v15243_v31, 2  ;;  %v15258_v49 = vrot.slane %v15257_v8, 2  ;;  %v15215_v5 = vrot.slane %v21617_v18, %v21664_v11 }
 0xe7b   :  { %v15251_v13 = vrot.slane %v15250_v46, 2  ;;  %v15265_v17 = vrot.slane %v15264_v62, 2 }
 0xe7c   :  { %v15245_v23 = vadd.f32 %v15244_v22, %v15243_v31  ;;  %v15259_v58 = vadd.f32 %v15258_v49, %v15257_v8  ;;  %v15211_v31 = vrot.slane %v21617_v18, %v21658_v24  ;;  %v15219_v8 = vrot.slane %v21617_v18, %v21661_v50 }
 0xe7d   :  { %v15252_v57 = vadd.f32 %v15251_v13, %v15250_v46  ;;  %v15266_v41 = vadd.f32 %v15265_v17, %v15264_v62  ;;  %v15223_v13 = vrot.slane %v21617_v18, %v21667_v59 }
 0xe7e   :  { %v15246_v14 = vrot.slane %v15245_v23, 1  ;;  %v15260_v56 = vrot.slane %v15259_v58, 1 }
 0xe7f   :  { %v15253_v39 = vrot.slane %v15252_v57, 1  ;;  %v15267_v21 = vrot.slane %v15266_v41, 1 }
 0xe80   :  { %v15247_v3 = vadd.f32 %v15246_v14, %v15245_v23  ;;  %v15261_v61 = vadd.f32 %v15260_v56, %v15259_v58 }
 0xe81   :  { %v15254_v9 = vadd.f32 %v15253_v39, %v15252_v57  ;;  %v15268_v35 = vadd.f32 %v15267_v21, %v15266_v41 }
 0xe82   :  { %v15298_v52 = vmul.f32 0.5, %v15247_v3  ;;  %v15300_v47 = vmul.f32 0.5, %v15261_v61 }
 0xe83   :  { %v15299_v20 = vmul.f32 0.5, %v15254_v9  ;;  %v15301_v29 = vmul.f32 0.5, %v15268_v35 }
 0xe84   :  { %v21637_v19 = vsub.f32 %v15232_v26, %v15298_v52  ;;  %v21639_v10 = vsub.f32 %v15234_v32, %v15300_v47 }
 0xe85   :  { %v21641_v30 = vsub.f32 %v15233_v53, %v15299_v20  ;;  %v21643_v25 = vsub.f32 %v15235_v33, %v15301_v29 }
 0xe86   :  { %v15314_v15 = vmul.f32 %v21637_v19, %v21637_v19  ;;  %v15316_v60 = vmul.f32 %v21639_v10, %v21639_v10 }
 0xe87   :  { %v15315_v34 = vmul.f32 %v21641_v30, %v21641_v30  ;;  %v15317_v40 = vmul.f32 %v21643_v25, %v21643_v25 }
 0xe88   :  { %v15322_v12 = vsel %vm15240_vm5, %v15314_v15, 0.0  ;;  %v15336_v44 = vsel %vm15240_vm5, %v15316_v60, 0.0 }
 0xe89   :  { %v15323_v36 = vrot.slane %v15322_v12, 4  ;;  %v15337_v1 = vrot.slane %v15336_v44, 4  ;;  %v15329_v7 = vsel %vm15240_vm5, %v15315_v34, 0.0  ;;  %v15343_v48 = vsel %vm15240_vm5, %v15317_v40, 0.0 }
 0xe8a   :  { %v15330_v42 = vrot.slane %v15329_v7, 4  ;;  %v15344_v27 = vrot.slane %v15343_v48, 4 }
 0xe8b   :  { %v15324_v26 = vadd.f32 %v15323_v36, %v15322_v12  ;;  %v15338_v32 = vadd.f32 %v15337_v1, %v15336_v44 }
 0xe8c   :  { %v15331_v53 = vadd.f32 %v15330_v42, %v15329_v7  ;;  %v15345_v33 = vadd.f32 %v15344_v27, %v15343_v48 }
 0xe8d   :  { %v15325_v55 = vrot.slane %v15324_v26, 2  ;;  %v15339_v38 = vrot.slane %v15338_v32, 2 }
 0xe8e   :  { %v15332_v37 = vrot.slane %v15331_v53, 2  ;;  %v15346_v2 = vrot.slane %v15345_v33, 2 }
 0xe8f   :  { %v15326_v54 = vadd.f32 %v15325_v55, %v15324_v26  ;;  %v15340_v6 = vadd.f32 %v15339_v38, %v15338_v32 }
 0xe90   :  { %v15333_v46 = vadd.f32 %v15332_v37, %v15331_v53  ;;  %v15347_v62 = vadd.f32 %v15346_v2, %v15345_v33  ;;  %v15134_v22 = vpop.f32.mrb[200].mxu0  ;;  %v15175_v49 = vpop.f32.mrb[148].mxu1 }
 0xe91   :  { %v15327_v17 = vrot.slane %v15326_v54, 1  ;;  %v15341_v23 = vrot.slane %v15340_v6, 1  ;;  %v15186_v58 = vadd.f32 %v15134_v22, %v21595_v16  ;;  %v15188_v57 = vadd.f32 %v15175_v49, %v21598_v28  ;;  %v15136_v41 = vpop.f32.mrb[201].mxu0  ;;  %v15177_v14 = vpop.f32.mrb[149].mxu1  ;;  %v21694_v22 = vld [vmem:[%s21871_s10] sm:$0xff] }
 0xe92   :  { %v15334_v56 = vrot.slane %v15333_v46, 1  ;;  %v15348_v39 = vrot.slane %v15347_v62, 1  ;;  %v15187_v21 = vadd.f32 %v15136_v41, %v21601_v45  ;;  %v15189_v3 = vadd.f32 %v15177_v14, %v21604_v0  ;;  %v15138_v61 = vpop.f32.mrb[202].mxu0  ;;  %v15179_v9 = vpop.f32.mrb[150].mxu1 }
 0xe93   :  { %v15328_v35 = vadd.f32 %v15327_v17, %v15326_v54  ;;  %v15342_v52 = vadd.f32 %v15341_v23, %v15340_v6  ;;  %v15236_v47 = vadd.f32 %v15211_v31, %v15186_v58  ;;  %v15238_v18 = vadd.f32 %v15219_v8, %v15188_v57  ;;  %v15139_v20 = vpop.f32.mrb[203].mxu0  ;;  %v15180_v29 = vpop.f32.mrb[151].mxu1 }
 0xe94   :  { %v15335_v15 = vadd.f32 %v15334_v56, %v15333_v46  ;;  %v15349_v16 = vadd.f32 %v15348_v39, %v15347_v62  ;;  %v21681_v60 = vadd.f32 %v15215_v5, %v15187_v21  ;;  %v21683_v28 = vadd.f32 %v15223_v13, %v15189_v3  ;;  %v21699_v13 = vld [vmem:[%s21872_s11] sm:$0xff] }
 0xe95   :  { %v15378_v34 = vmul.f32 0.5, %v15328_v35  ;;  %v15380_v40 = vmul.f32 0.5, %v15342_v52  ;;  %v15269_v45 = vsel %vm15240_vm5, %v15236_v47, 0.0  ;;  %v15283_v0 = vsel %vm15240_vm5, %v15238_v18, 0.0 }
 0xe96   :  { %v15379_v12 = vmul.f32 0.5, %v15335_v15  ;;  %v15381_v44 = vmul.f32 0.5, %v15349_v16  ;;  %v15270_v36 = vrot.slane %v15269_v45, 4  ;;  %v15284_v1 = vrot.slane %v15283_v0, 4 }
 0xe97   :  { %v15387_v7 = vadd.f32 1e-05, %v15378_v34  ;;  %v15389_v48 = vadd.f32 1e-05, %v15380_v40  ;;  %v15276_v42 = vsel %vm15240_vm5, %v21681_v60, 0.0  ;;  %v15290_v27 = vsel %vm15240_vm5, %v21683_v28, 0.0 }
 0xe98   :  { %v15388_v26 = vadd.f32 1e-05, %v15379_v12  ;;  %v15390_v32 = vadd.f32 1e-05, %v15381_v44  ;;  %v15271_v53 = vadd.f32 %v15270_v36, %v15269_v45  ;;  %v15285_v33 = vadd.f32 %v15284_v1, %v15283_v0 }
 0xe99   :  { %17964 = vrsqrt.f32 %v15387_v7  ;;  %v15277_v55 = vrot.slane %v15276_v42, 4  ;;  %v15291_v38 = vrot.slane %v15290_v27, 4  ;;  %v15415_v41 = vrot.slane %v21694_v22, %v21609_v51 }
 0xe9a   :  { %17966 = vrsqrt.f32 %v15389_v48  ;;  %v15272_v37 = vrot.slane %v15271_v53, 2  ;;  %v15286_v2 = vrot.slane %v15285_v33, 2  ;;  %v15423_v14 = vrot.slane %v21694_v22, %v21612_v43 }
 0xe9b   :  { %17968 = vrsqrt.f32 %v15388_v26  ;;  %v15278_v54 = vadd.f32 %v15277_v55, %v15276_v42  ;;  %v15292_v6 = vadd.f32 %v15291_v38, %v15290_v27  ;;  %v15465_v21 = vrot.slane %v21699_v13, %v21609_v51 }
 0xe9c   :  { %17970 = vrsqrt.f32 %v15390_v32  ;;  %v15273_v31 = vadd.f32 %v15272_v37, %v15271_v53  ;;  %v15287_v8 = vadd.f32 %v15286_v2, %v15285_v33  ;;  %v15419_v3 = vrot.slane %v21694_v22, %v21620_v63 }
 0xe9d   :  { %v15279_v46 = vrot.slane %v15278_v54, 2  ;;  %v15293_v62 = vrot.slane %v15292_v6, 2  ;;  %v15473_v52 = vrot.slane %v21699_v13, %v21612_v43  ;;  %v15427_v20 = vrot.slane %v21694_v22, %v21623_v4 }
 0xe9e   :  { %v15274_v49 = vrot.slane %v15273_v31, 1  ;;  %v15288_v5 = vrot.slane %v15287_v8, 1  ;;  %v15469_v45 = vrot.slane %v21699_v13, %v21620_v63  ;;  %v15477_v36 = vrot.slane %v21699_v13, %v21623_v4 }
 0xe9f   :  { %v15280_v17 = vadd.f32 %v15279_v46, %v15278_v54  ;;  %v15294_v23 = vadd.f32 %v15293_v62, %v15292_v6 }
 0xea0   :  { %v15275_v58 = vadd.f32 %v15274_v49, %v15273_v31  ;;  %v15289_v57 = vadd.f32 %v15288_v5, %v15287_v8 }
 0xea1   :  { %v15281_v56 = vrot.slane %v15280_v17, 1  ;;  %v15295_v39 = vrot.slane %v15294_v23, 1 }
 0xea2   :  { %v15302_v61 = vmul.f32 0.5, %v15275_v58  ;;  %v15304_v9 = vmul.f32 0.5, %v15289_v57 }
 0xea3   :  { %v17965_v35 = vpop.eup %17964  ;;  %v15282_v29 = vadd.f32 %v15281_v56, %v15280_v17  ;;  %v15296_v15 = vadd.f32 %v15295_v39, %v15294_v23 }
 0xea4   :  { %v17967_v16 = vpop.eup %17966  ;;  %v15403_v34 = vmul.f32 %v17965_v35, %v21637_v19  ;;  %v21714_v40 = vsub.f32 %v15236_v47, %v15302_v61  ;;  %v21716_v51 = vsub.f32 %v15238_v18, %v15304_v9  ;;  %v17934_v61 = vld [vmem:[%s21873_s12 + $0x100] sm:$0xff]  }
 0xea5   :  { %v17969_v0 = vpop.eup %17968  ;;  %v15405_v12 = vmul.f32 %v17967_v16, %v21639_v10  ;;  %v15303_v44 = vmul.f32 0.5, %v15282_v29  ;;  %v15305_v43 = vmul.f32 0.5, %v15296_v15  ;;  %v17936_v29 = vld [vmem:[%s21873_s12 + $0x148] sm:$0xff]  }
 0xea6   :  { %v17971_v1 = vpop.eup %17970  ;;  %v15452_v7 = vmul.f32 %v15415_v41, %v15403_v34  ;;  %v15404_v48 = vmul.f32 %v17969_v0, %v21641_v30  ;;  %v15318_v19 = vmul.f32 %v21714_v40, %v21714_v40  ;;  %v15320_v47 = vmul.f32 %v21716_v51, %v21716_v51 }
 0xea7   :  { %v15454_v18 = vmul.f32 %v15423_v14, %v15405_v12  ;;  %v15406_v63 = vmul.f32 %v17971_v1, %v21643_v25  ;;  %v21730_v10 = vsub.f32 %v21681_v60, %v15303_v44  ;;  %v21733_v42 = vsub.f32 %v21683_v28, %v15305_v43  ;;  %v17938_v43 = vld [vmem:[%s21873_s12 + $0x108] sm:$0xff]  }
 0xea8   :  { %v15502_v4 = vadd.f32 %v15465_v21, %v15452_v7  ;;  %v15453_v27 = vmul.f32 %v15419_v3, %v15404_v48  ;;  %v15350_v26 = vsel %vm15240_vm5, %v15318_v19, 0.0  ;;  %v15364_v30 = vsel %vm15240_vm5, %v15320_v47, 0.0  ;;  %v17935_v19 = vld [vmem:[%s21873_s12 + $0x180] sm:$0xff]   ;;  %v17940_v47 = vld [vmem:[%s21873_s12 + $0x150] sm:$0xff]  }
 0xea9   :  { %v15504_v32 = vadd.f32 %v15473_v52, %v15454_v18  ;;  %v15455_v53 = vmul.f32 %v15427_v20, %v15406_v63  ;;  %v15351_v33 = vrot.slane %v15350_v26, 4  ;;  %v15365_v55 = vrot.slane %v15364_v30, 4  ;;  %v17937_v63 = vld [vmem:[%s21873_s12 + $0x1c8] sm:$0xff]  }
 0xeaa   :  { %v15319_v38 = vmul.f32 %v21730_v10, %v21730_v10  ;;  %v15321_v25 = vmul.f32 %v21733_v42, %v21733_v42  ;;  %v15503_v60 = vadd.f32 %v15469_v45, %v15453_v27  ;;  %vm15510_vm6 = vcmp.gt.f32.partialorder %v15502_v4, 0.0 }
 0xeab   :  { %v15352_v28 = vadd.f32 %v15351_v33, %v15350_v26  ;;  %v15366_v37 = vadd.f32 %v15365_v55, %v15364_v30  ;;  %v15505_v2 = vadd.f32 %v15477_v36, %v15455_v53  ;;  %v15518_v54 = vmul.f32 0.2, %v15502_v4  ;;  %v17939_v55 = vld [vmem:[%s21873_s12 + $0x188] sm:$0xff]  }
 0xeac   :  { %v15357_v6 = vsel %vm15240_vm5, %v15319_v38, 0.0  ;;  %v15371_v31 = vsel %vm15240_vm5, %v15321_v25, 0.0  ;;  %vm15511_vm7 = vcmp.gt.f32.partialorder %v15503_v60, 0.0  ;;  %v15519_v8 = vmul.f32 0.2, %v15503_v60  ;;  %v17944_v38 = vld [vmem:[%s21873_s12 + $0x158] sm:$0xff]  }
 0xead   :  { %v15353_v46 = vrot.slane %v15352_v28, 2  ;;  %v15367_v62 = vrot.slane %v15366_v37, 2  ;;  %v15358_v49 = vrot.slane %v15357_v6, 4  ;;  %v15372_v5 = vrot.slane %v15371_v31, 4  ;;  %v17941_v25 = vld [vmem:[%s21873_s12 + $0x1d0] sm:$0xff]  }
 0xeae   :  { %v15527_v17 = vsel %vm15511_vm7, %v15503_v60, %v15519_v8  ;;  %vm15513_vm8 = vcmp.gt.f32.partialorder %v15505_v2, 0.0  ;;  %v15521_v23 = vmul.f32 0.2, %v15505_v2  ;;  %v15526_v58 = vsel %vm15510_vm6, %v15502_v4, %v15518_v54  ;;  %v17948_v54 = vld [vmem:[%s21873_s12 + $0x160] sm:$0xff]   ;;  %v17947_v8 = vld [vmem:[%s21873_s12 + $0x198] sm:$0xff]  }
 0xeaf   :  { %v15354_v57 = vadd.f32 %v15353_v46, %v15352_v28  ;;  %v15368_v41 = vadd.f32 %v15367_v62, %v15366_v37  ;;  %v15359_v14 = vadd.f32 %v15358_v49, %v15357_v6  ;;  %v15373_v56 = vadd.f32 %v15372_v5, %v15371_v31  ;;  %v17946_v37 = vld [vmem:[%s21873_s12 + $0x118] sm:$0xff]   ;;  %v17950_v31 = vld [vmem:[%s21873_s12 + $0x120] sm:$0xff]   ;;  %v17952_v46 = vld [vmem:[%s21873_s12 + $0x168] sm:$0xff]  }
 0xeb0   :  { %v15535_v39 = vpack.c.bf16 %v15527_v17, %v15527_v17  ;;  %v15529_v21 = vsel %vm15513_vm8, %v15505_v2, %v15521_v23  ;;  %v15534_v3 = vpack.c.bf16 %v15526_v58, %v15526_v58  ;;  %vm15512_vm9 = vcmp.gt.f32.partialorder %v15504_v32, 0.0  ;;  %v17943_v2 = vld [vmem:[%s21873_s12 + $0x190] sm:$0xff]   ;;  %v17945_v6 = vld [vmem:[%s21873_s12 + $0x1d8] sm:$0xff]   ;;  %v17949_v49 = vld [vmem:[%s21873_s12 + $0x1e0] sm:$0xff]  }
 0xeb1   :  { %v15355_v9 = vrot.slane %v15354_v57, 1  ;;  %v15369_v35 = vrot.slane %v15368_v41, 1  ;;  %v15360_v52 = vrot.slane %v15359_v14, 2  ;;  %v15374_v20 = vrot.slane %v15373_v56, 2 }
 0xeb2   :  { %16093 = vmatprep.mubr.bf16.mxu0 %v15535_v39  ;;  %v15537_v15 = vpack.c.bf16 %v15529_v21, %v15529_v21  ;;  %v15520_v16 = vmul.f32 0.2, %v15504_v32  ;;  %v15431_v62 = vrot.slane %v21694_v22, %v21658_v24  ;;  %v15439_v17 = vrot.slane %v21694_v22, %v21661_v50  ;;  %v17953_v21 = vld [vmem:[%s21873_s12 + $0x1e8] sm:$0xff]  }
 0xeb3   :  { %v15356_v34 = vadd.f32 %v15355_v9, %v15354_v57  ;;  %v15370_v45 = vadd.f32 %v15369_v35, %v15368_v41  ;;  %v15361_v0 = vadd.f32 %v15360_v52, %v15359_v14  ;;  %v15375_v12 = vadd.f32 %v15374_v20, %v15373_v56  ;;  %16094 = vmatmul.mubr.bf16.vlgmr.msra.gmra.mrb[204].mxu0 %v15534_v3  ;;  %v17954_v41 = vld [vmem:[%s21873_s12 + $0x128] sm:$0xff]   ;;  %v17951_v56 = vld [vmem:[%s21873_s12 + $0x1a0] sm:$0xff]  }
 0xeb4   :  { %16133 = vmatprep.mubr.bf16.mxu1 %v15537_v15  ;;  %v15528_v44 = vsel %vm15512_vm9, %v15504_v32, %v15520_v16  ;;  %17114 = vmatpush3.bf16.msra.mxu0 %v17934_v61  ;;  %v17942_v32 = vld [vmem:[%s21873_s12 + $0x110] sm:$0xff]   ;;  %v15481_v57 = vrot.slane %v21699_v13, %v21658_v24  ;;  %v15435_v24 = vrot.slane %v21694_v22, %v21664_v11 }
 0xeb5   :  { %v15382_v36 = vmul.f32 0.5, %v15356_v34  ;;  %v15384_v1 = vmul.f32 0.5, %v15370_v45  ;;  %v15362_v7 = vrot.slane %v15361_v0, 1  ;;  %v15376_v48 = vrot.slane %v15375_v12, 1  ;;  %17115 = vmatprep.subr.bf16.mxu0 %v17936_v29  ;;  %v17958_v29 = vld [vmem:[%s21873_s12 + $0x130] sm:$0xff]  }
 0xeb6   :  { %v15536_v18 = vpack.c.bf16 %v15528_v44, %v15528_v44  ;;  %v15489_v61 = vrot.slane %v21699_v13, %v21661_v50  ;;  %v15443_v9 = vrot.slane %v21694_v22, %v21667_v59  ;;  %v15485_v15 = vrot.slane %v21699_v13, %v21664_v11  ;;  %v17955_v50 = vld [vmem:[%s21873_s12 + $0x1a8] sm:$0xff]   ;;  %v17960_v22 = vld [vmem:[%s21873_s12 + $0x178] sm:$0xff]   ;;  %v17957_v11 = vld [vmem:[%s21873_s12 + $0x1f0] sm:$0xff]  }
 0xeb7   :  { %v15391_v4 = vadd.f32 1e-05, %v15382_v36  ;;  %v15393_v27 = vadd.f32 1e-05, %v15384_v1  ;;  %v15363_v26 = vadd.f32 %v15362_v7, %v15361_v0  ;;  %v15377_v30 = vadd.f32 %v15376_v48, %v15375_v12  ;;  %v17962_v12 = vld [vmem:[%s21873_s12 + $0x138] sm:$0xff]  }
 0xeb8   :  { %16134 = vmatmul.mubr.bf16.vlgmr.msra.gmra.mrb[152].mxu1 %v15536_v18  ;;  %17116 = vmatpush3.bf16.msra.mxu0 %v17938_v43  ;;  %v17961_v43 = vld [vmem:[%s21873_s12 + $0x1f8] sm:$0xff]  }
 0xeb9   :  { %17972 = vrsqrt.f32 %v15391_v4  ;;  %v15383_v53 = vmul.f32 0.5, %v15363_v26  ;;  %v15385_v33 = vmul.f32 0.5, %v15377_v30  ;;  %17136 = vmatpush3.bf16.msra.mxu1 %v17935_v19  ;;  %17117 = vmatprep.subr.bf16.mxu0 %v17940_v47  ;;  %v17963_v47 = vld [vmem:[%s21873_s12 + $0x1b8] sm:$0xff]  }
 0xeba   :  { %17974 = vrsqrt.f32 %v15393_v27  ;;  %17137 = vmatprep.subr.bf16.mxu1 %v17937_v63 }
 0xebb   :  { %v15392_v60 = vadd.f32 1e-05, %v15383_v53  ;;  %v15394_v28 = vadd.f32 1e-05, %v15385_v33  ;;  %v16682_v33 = vld [vmem:[%s21874_s13] ss:$0 sm:$0xff] }
 0xebc   :  { %17118 = vmatpush3.bf16.msra.mxu0 %v17942_v32 }
 0xebd   :  { %17976 = vrsqrt.f32 %v15392_v60  ;;  %17138 = vmatpush3.bf16.msra.mxu1 %v17939_v55  ;;  %17119 = vmatprep.subr.bf16.mxu0 %v17944_v38 }
 0xebe   :  { %17978 = vrsqrt.f32 %v15394_v28  ;;  %17139 = vmatprep.subr.bf16.mxu1 %v17941_v25 }
 0xec0   :  { %17120 = vmatpush3.bf16.msra.mxu0 %v17946_v37 }
 0xec1   :  { %17140 = vmatpush3.bf16.msra.mxu1 %v17943_v2  ;;  %17121 = vmatprep.subr.bf16.mxu0 %v17948_v54 }
 0xec2   :  { %17141 = vmatprep.subr.bf16.mxu1 %v17945_v6 }
 0xec3   :  { %v17973_v5 = vpop.eup %17972 }
 0xec4   :  { %v17975_v23 = vpop.eup %17974  ;;  %v15407_v58 = vmul.f32 %v17973_v5, %v21714_v40  ;;  %17122 = vmatpush3.bf16.msra.mxu0 %v17950_v31  ;;  %v17956_v40 = vld [vmem:[%s21873_s12 + $0x170] sm:$0xff]  }
 0xec5   :  { %v15409_v14 = vmul.f32 %v17975_v23, %v21716_v51  ;;  %17142 = vmatpush3.bf16.msra.mxu1 %v17947_v8  ;;  %17123 = vmatprep.subr.bf16.mxu0 %v17952_v46 }
 0xec6   :  { %v15456_v39 = vmul.f32 %v15431_v62, %v15407_v58  ;;  %17143 = vmatprep.subr.bf16.mxu1 %v17949_v49 }
 0xec7   :  { %v17977_v51 = vpop.eup %17976  ;;  %v15458_v3 = vmul.f32 %v15439_v17, %v15409_v14 }
 0xec8   :  { %v17979_v35 = vpop.eup %17978  ;;  %v15506_v52 = vadd.f32 %v15481_v57, %v15456_v39  ;;  %v15408_v20 = vmul.f32 %v17977_v51, %v21730_v10  ;;  %17124 = vmatpush3.bf16.msra.mxu0 %v17954_v41  ;;  %v15493_v10 = vrot.slane %v21699_v13, %v21667_v59  ;;  %v17959_v59 = vld [vmem:[%s21873_s12 + $0x1b0] sm:$0xff]  }
 0xec9   :  { %v15410_v16 = vmul.f32 %v17979_v35, %v21733_v42  ;;  %17144 = vmatpush3.bf16.msra.mxu1 %v17951_v56  ;;  %17125 = vmatprep.subr.bf16.mxu0 %v17956_v40  ;;  %v15508_v42 = vadd.f32 %v15489_v61, %v15458_v3 }
 0xeca   :  { %v15457_v34 = vmul.f32 %v15435_v24, %v15408_v20  ;;  %17145 = vmatprep.subr.bf16.mxu1 %v17953_v21  ;;  %v15522_v0 = vmul.f32 0.2, %v15506_v52  ;;  %vm15514_vm10 = vcmp.gt.f32.partialorder %v15506_v52, 0.0 }
 0xecb   :  { %v15459_v45 = vmul.f32 %v15443_v9, %v15410_v16  ;;  %v15524_v48 = vmul.f32 0.2, %v15508_v42  ;;  %vm15516_vm13 = vcmp.gt.f32.partialorder %v15508_v42, 0.0 }
 0xecc   :  { %17126 = vmatpush3.bf16.msra.mxu0 %v17958_v29  ;;  %v15507_v44 = vadd.f32 %v15485_v15, %v15457_v34  ;;  %v15530_v7 = vsel %vm15514_vm10, %v15506_v52, %v15522_v0 }
 0xecd   :  { %17146 = vmatpush3.bf16.msra.mxu1 %v17955_v50  ;;  %17127 = vmatprep.subr.bf16.mxu0 %v17960_v22  ;;  %v15509_v13 = vadd.f32 %v15493_v10, %v15459_v45  ;;  %v15538_v27 = vpack.c.bf16 %v15530_v7, %v15530_v7  ;;  %v15532_v26 = vsel %vm15516_vm13, %v15508_v42, %v15524_v48 }
 0xece   :  { %17147 = vmatprep.subr.bf16.mxu1 %v17957_v11  ;;  %vm15515_vm11 = vcmp.gt.f32.partialorder %v15507_v44, 0.0  ;;  %v15523_v36 = vmul.f32 0.2, %v15507_v44  ;;  %v15540_v30 = vpack.c.bf16 %v15532_v26, %v15532_v26 }
 0xecf   :  { %vm15517_vm12 = vcmp.gt.f32.partialorder %v15509_v13, 0.0  ;;  %v15525_v1 = vmul.f32 0.2, %v15509_v13 }
 0xed0   :  { %17128 = vmatpush3.bf16.msra.mxu0 %v17962_v12  ;;  %v15531_v19 = vsel %vm15515_vm11, %v15507_v44, %v15523_v36 }
 0xed1   :  { %17148 = vmatpush3.bf16.msra.mxu1 %v17959_v59  ;;  %v15539_v18 = vpack.c.bf16 %v15531_v19, %v15531_v19  ;;  %v15533_v63 = vsel %vm15517_vm12, %v15509_v13, %v15525_v1 }
 0xed2   :  { %17149 = vmatprep.subr.bf16.mxu1 %v17961_v43  ;;  %v15541_v4 = vpack.c.bf16 %v15533_v63, %v15533_v63 }
 0xed3   :  { %16173 = vmatprep.mubr.bf16.mxu0 %v15539_v18 }
 0xed4   :  { %16213 = vmatprep.mubr.bf16.mxu1 %v15541_v4  ;;  %16174 = vmatmul.mubr.bf16.vlgmr.msra.gmra.mrb[208].mxu0 %v15538_v27 }
 0xed5   :  { %17150 = vmatpush3.bf16.msra.mxu1 %v17963_v47 }
 0xed8   :  { %16214 = vmatmul.mubr.bf16.vlgmr.msra.gmra.mrb[156].mxu1 %v15540_v30 }
 0xf86   :  { %v17085_v32 = vpop.f32.mrb[204].mxu0 }
 0xf87   :  { %v17086_v53 = vpop.f32.mrb[205].mxu0 }
 0xf88   :  { %v17087_v55 = vadd.f32 %v17086_v53, %v17085_v32  ;;  %v17088_v38 = vpop.f32.mrb[206].mxu0 }
 0xf89   :  { %v17089_v25 = vpop.f32.mrb[207].mxu0 }
 0xf8a   :  { %v16096_v28 = vadd.f32 %v17087_v55, %v16682_v33 }
 0xf8b   :  { %v17107_v60 = vpop.f32.mrb[152].mxu1 }
 0xf8c   :  { %v17108_v37 = vpop.f32.mrb[153].mxu1 }
 0xf8d   :  { %v17109_v2 = vadd.f32 %v17108_v37, %v17107_v60  ;;  %v17110_v54 = vpop.f32.mrb[154].mxu1 }
 0xf8e   :  { %v17111_v6 = vpop.f32.mrb[155].mxu1 }
 0xf8f   :  { %v16136_v31 = vadd.f32 %v17109_v2, %v16096_v28 }
 0xfa7   :  { %v17129_v8 = vpop.f32.mrb[208].mxu0 }
 0xfa8   :  { %v17130_v46 = vpop.f32.mrb[209].mxu0 }
 0xfa9   :  { %v17131_v62 = vadd.f32 %v17130_v46, %v17129_v8  ;;  %v17132_v49 = vpop.f32.mrb[210].mxu0 }
 0xfaa   :  { %v17133_v5 = vpop.f32.mrb[211].mxu0 }
 0xfab   :  { %v17151_v17 = vpop.f32.mrb[156].mxu1  ;;  %v16176_v23 = vadd.f32 %v17131_v62, %v16136_v31 }
 0xfac   :  { %v17152_v58 = vpop.f32.mrb[157].mxu1 }
 0xfad   :  { %v17153_v57 = vadd.f32 %v17152_v58, %v17151_v17  ;;  %v17154_v41 = vpop.f32.mrb[158].mxu1 }
 0xfae   :  { %v17155_v14 = vpop.f32.mrb[159].mxu1 }
 0xfaf   :  { %v16216_v56 = vadd.f32 %v17153_v57, %v16176_v23 }
 0xfb1   :  { %v16747_v40 = vmul.f32 -1.442695, %v16216_v56 }
 0xfb3   :  { %17980 = vpow2.f32 %v16747_v40 }
 0xfbd   :  { %v17981_v39 = vpop.eup %17980 }
 0xfbe   :  { %v16224_v24 = vadd.f32 1.0, %v17981_v39 }
 0xfc0   :  { %17982 = vrcp.f32 %v16224_v24 }
 0xfca   :  { %v17983_v21 = vpop.eup %17982 }
 0xfcb   :  { %16227 = vst [vmem:[%s21875_s14] sm:$0x3] %v17983_v21 }
 0xfcc   :  { %16232 = vsyncmov [#allocation3] }
 0xfcf   :  { %s16233_s3 = vpop.sfrf %16232 }
 0xfd0   :  { %p16748_p2 = scmp.ne.s32.totalorder %s16233_s3, 0 }
 0xfd2   :  { %16237 = shalt.err (%p16748_p2)  }

</bundles_post_ra>
